<compile_context>
chip_gen: v5e
topology: v5e:2x2
jax: 0.10.0
libtpu: 0.0.40
codegen_flags: <defaults>
</compile_context>

<pallas_src>
import functools

import jax
import jax.numpy as jnp
from jax.experimental import pallas as pl
from jax.experimental.pallas import tpu as pltpu

EPS_BN = 1e-5
EPS_REVIN = 1e-5

# MXU-operand / inter-kernel activation dtype (f32 accumulation everywhere).
# Set to jnp.float32 for an exact-f32 reference path.
MM_DTYPE = jnp.bfloat16


def _vmem_capacity():
    cap = 128 * 1024 * 1024
    try:
        cap = int(getattr(pltpu.get_tpu_info(), "vmem_capacity_bytes", cap))
    except Exception:
        pass
    return cap


_VMEM_CAP = _vmem_capacity()
# Leave ~25% headroom for double-buffered BlockSpec inputs (v7x only has 64 MiB).
VMEM_LIMIT = (_VMEM_CAP * 3) // 4
# Bigger row tiles on 128 MiB parts (v5e/v6e); smaller on v7x (64 MiB).
ROW_TILE = 2048 if _VMEM_CAP >= (100 * 1024 * 1024) else 1024


def _cparams(*sem):
    return pltpu.CompilerParams(dimension_semantics=sem,
                                vmem_limit_bytes=VMEM_LIMIT)


def _divisor_tile(M, unit, target):
    """Largest row tile that is a multiple of `unit`, divides M and is <= target
    (falls back to `unit`, or M itself when M <= target).  `unit` is either a
    multiple of 8 or equal to M, so the TPU (8,128) block rule always holds and
    no row padding / output slicing is ever needed."""
    assert M % unit == 0
    if M <= target:
        return M
    n = M // unit
    best, f = 1, 1
    while f * f <= n:
        if n % f == 0:
            for d in (f, n // f):
                if d * unit <= target and d > best:
                    best = d
        f += 1
    return best * unit


# ----------------------------- in-kernel math helpers -----------------------------

def _erf(x):
    # Abramowitz & Stegun 7.1.26 rational approximation, |err| <= 1.5e-7.
    a1, a2, a3, a4, a5 = (0.254829592, -0.284496736, 1.421413741,
                          -1.453152027, 1.061405429)
    p = 0.3275911
    ax = jnp.abs(x)
    t = 1.0 / (1.0 + p * ax)
    poly = ((((a5 * t + a4) * t + a3) * t + a2) * t + a1) * t
    y = 1.0 - poly * jnp.exp(-ax * ax)
    return jnp.where(x >= 0, y, -y)


def _gelu(x):
    # Exact-erf GELU (matches torch.nn.GELU()).  The FFN kernel is MXU/DMA bound
    # at these shapes so the ~10 VALU ops + 1 EUP exp are hidden filler.
    return 0.5 * x * (1.0 + _erf(x * 0.7071067811865476))


def _bn_scale_shift(stats, count, gamma, beta):
    """Fold BatchNorm1d (training-mode batch stats) into per-feature scale/shift."""
    mean = stats[0] / count
    var = jnp.maximum(stats[1] / count - mean * mean, 0.0)
    scale = gamma * jax.lax.rsqrt(var + EPS_BN)
    shift = beta - mean * scale
    return scale.reshape(1, -1), shift.reshape(1, -1)


# ----------------------------- RevIN norm -----------------------------

def _revin_norm_kernel(x_ref, w_ref, b_ref, y_ref, m_ref, s_ref):
    x = x_ref[...]                                     # [rows, seq] (lane = time)
    mean = jnp.mean(x, axis=-1, keepdims=True)
    var = jnp.mean((x - mean) ** 2, axis=-1, keepdims=True)   # unbiased=False
    std = jnp.sqrt(var + EPS_REVIN)
    y_ref[...] = ((x - mean) / std * w_ref[...] + b_ref[...]).astype(y_ref.dtype)
    m_ref[...] = mean.astype(m_ref.dtype)
    s_ref[...] = std.astype(s_ref.dtype)


def revin_norm_pallas(x, w_rows, b_rows, *, unit):
    M, S = x.shape
    tm = _divisor_tile(M, unit, ROW_TILE)
    y, m, s = pl.pallas_call(
        _revin_norm_kernel,
        out_shape=(jax.ShapeDtypeStruct((M, S), MM_DTYPE),
                   jax.ShapeDtypeStruct((M, 1), jnp.float32),
                   jax.ShapeDtypeStruct((M, 1), jnp.float32)),
        grid=(M // tm,),
        in_specs=[pl.BlockSpec((tm, S), lambda i: (i, 0)),
                  pl.BlockSpec((tm, 1), lambda i: (i, 0)),
                  pl.BlockSpec((tm, 1), lambda i: (i, 0))],
        out_specs=(pl.BlockSpec((tm, S), lambda i: (i, 0)),
                   pl.BlockSpec((tm, 1), lambda i: (i, 0)),
                   pl.BlockSpec((tm, 1), lambda i: (i, 0))),
        compiler_params=_cparams("parallel"),
    )(x, w_rows, b_rows)
    return y, m, s


# ----------------------------- patch embedding -----------------------------

def _patch_embed_kernel(x_ref, w_ref, b_ref, pos_ref, o_ref, *, groups):
    acc = jnp.dot(x_ref[...], w_ref[...], preferred_element_type=jnp.float32)
    # positional encoding broadcast in-kernel (single [P, D] block, no HBM slab)
    pos = jnp.tile(pos_ref[...], (groups, 1))
    o_ref[...] = (acc + b_ref[...] + pos).astype(o_ref.dtype)


def patch_embed_pallas(patches2d, w, b, w_pos, patch_num, *, unit):
    M, patch_len = patches2d.shape
    D = w.shape[1]
    tm = _divisor_tile(M, unit, ROW_TILE)
    kern = functools.partial(_patch_embed_kernel, groups=tm // patch_num)
    return pl.pallas_call(
        kern,
        out_shape=jax.ShapeDtypeStruct((M, D), MM_DTYPE),
        grid=(M // tm,),
        in_specs=[pl.BlockSpec((tm, patch_len), lambda i: (i, 0)),
                  pl.BlockSpec((patch_len, D), lambda i: (0, 0)),
                  pl.BlockSpec((1, D), lambda i: (0, 0)),
                  pl.BlockSpec((patch_num, D), lambda i: (0, 0))],
        out_specs=pl.BlockSpec((tm, D), lambda i: (i, 0)),
        compiler_params=_cparams("parallel"),
    )(patches2d, w, b.reshape(1, D), w_pos)


# ----------------------------- attention sub-layer (fused) -----------------------------

def _attn_layer_kernel(*refs, n_heads, gb, dm, att_scale, has_prev,
                       need_scores, need_mask, bv_valid):
    it = iter(refs)
    src_ref = next(it)
    prev_ref = next(it) if has_prev else None
    bnsc_ref = next(it)
    bnsh_ref = next(it)
    wqkv_ref = next(it)
    bqkv_ref = next(it)
    wo_ref = next(it)
    bo_ref = next(it)
    y_ref = next(it)
    sc_ref = next(it) if need_scores else None
    st_ref = next(it)
    ctx_sc = next(it)

    i = pl.program_id(0)
    dh = dm // n_heads
    bn_sc = bnsc_ref[...]
    bn_sh = bnsh_ref[...]
    wqkv = wqkv_ref[...]
    bqkv = bqkv_ref[...]
    wo = wo_ref[...]
    bo = bo_ref[...]

    ssum = jnp.zeros((1, dm), jnp.float32)
    ssq = jnp.zeros((1, dm), jnp.float32)
    for g in range(gb):                       # static unroll over the batch group
        # BatchNorm prologue of the previous sub-layer (identity on layer 0).
        x = src_ref[g].astype(jnp.float32) * bn_sc + bn_sh
        # Fused Q|K|V projection ([L, D] @ [D, 3D], MXU, f32 accumulate).
        qkv = jnp.dot(x.astype(MM_DTYPE), wqkv,
                      preferred_element_type=jnp.float32) + bqkv
        qkv = qkv.astype(MM_DTYPE)
        for h in range(n_heads):
            lo = h * dh
            q = qkv[:, lo:lo + dh]
            k = qkv[:, dm + lo:dm + lo + dh]
            v = qkv[:, 2 * dm + lo:2 * dm + lo + dh]
            s = jnp.einsum("qc,kc->qk", q, k,
                           preferred_element_type=jnp.float32) * att_scale
            if has_prev:                      # residual attention (pre-softmax)
                s = s + prev_ref[g, h].astype(jnp.float32)
            if need_scores:
                sc_ref[g, h] = s.astype(MM_DTYPE)
            m = jnp.max(s, axis=-1, keepdims=True)
            e = jnp.exp(s - m)
            p = e * pl.reciprocal(jnp.sum(e, axis=-1, keepdims=True), approx=True)
            ctx = jnp.dot(p.astype(MM_DTYPE), v,
                          preferred_element_type=jnp.float32)
            # write the head slice straight into the ctx scratch (no concatenate)
            ctx_sc[:, lo:lo + dh] = ctx.astype(MM_DTYPE)
        # to_out projection + residual add (post-norm transformer block)
        y = x + jnp.dot(ctx_sc[...], wo, preferred_element_type=jnp.float32) + bo
        if need_mask:
            y = jnp.where(i * gb + g < bv_valid, y, 0.0)
        y_ref[g] = y.astype(y_ref.dtype)
        ssum = ssum + jnp.sum(y, axis=0, keepdims=True)
        ssq = ssq + jnp.sum(y * y, axis=0, keepdims=True)
    # per-block partial BatchNorm statistics (reduced in the wrapper)
    st_ref[0] = jnp.concatenate([ssum, ssq], axis=0)


def attn_layer_pallas(src3, prev, bn_scale, bn_shift, wqkv, bqkv, wo, bo, *,
                      n_heads, gb, bv_valid, need_scores):
    Bp, L, D = src3.shape
    nblk = Bp // gb
    dh = D // n_heads
    has_prev = prev is not None
    kern = functools.partial(
        _attn_layer_kernel, n_heads=n_heads, gb=gb, dm=D,
        att_scale=float(dh) ** -0.5, has_prev=has_prev,
        need_scores=need_scores, need_mask=(Bp != bv_valid), bv_valid=bv_valid)

    in_specs = [pl.BlockSpec((gb, L, D), lambda i: (i, 0, 0))]
    args = [src3]
    if has_prev:
        in_specs.append(pl.BlockSpec((gb, n_heads, L, L),
                                     lambda i: (i, 0, 0, 0)))
        args.append(prev)
    in_specs += [pl.BlockSpec((1, D), lambda i: (0, 0)),
                 pl.BlockSpec((1, D), lambda i: (0, 0)),
                 pl.BlockSpec((D, 3 * D), lambda i: (0, 0)),
                 pl.BlockSpec((1, 3 * D), lambda i: (0, 0)),
                 pl.BlockSpec((D, D), lambda i: (0, 0)),
                 pl.BlockSpec((1, D), lambda i: (0, 0))]
    args += [bn_scale, bn_shift, wqkv, bqkv.reshape(1, 3 * D), wo,
             bo.reshape(1, D)]

    out_shape = [jax.ShapeDtypeStruct((Bp, L, D), MM_DTYPE)]
    out_specs = [pl.BlockSpec((gb, L, D), lambda i: (i, 0, 0))]
    if need_scores:
        out_shape.append(jax.ShapeDtypeStruct((Bp, n_heads, L, L), MM_DTYPE))
        out_specs.append(pl.BlockSpec((gb, n_heads, L, L),
                                      lambda i: (i, 0, 0, 0)))
    out_shape.append(jax.ShapeDtypeStruct((nblk, 2, D), jnp.float32))
    out_specs.append(pl.BlockSpec((1, 2, D), lambda i: (i, 0, 0)))

    outs = pl.pallas_call(
        kern,
        out_shape=tuple(out_shape),
        grid=(nblk,),
        in_specs=in_specs,
        out_specs=tuple(out_specs),
        scratch_shapes=[pltpu.VMEM((L, D), MM_DTYPE)],
        compiler_params=_cparams("parallel"),
    )(*args)
    if need_scores:
        y, scores, st = outs
    else:
        (y, st), scores = outs, None
    return y, scores, st.sum(axis=0)


# ----------------------------- FFN sub-layer (fused) -----------------------------

def _ffn_layer_kernel(y1_ref, bnsc_ref, bnsh_ref, w1_ref, b1_ref, w2_ref,
                      b2_ref, y2_ref, st_ref, *, need_mask, valid_rows):
    # BatchNorm prologue (normalise of the attention sub-layer output).
    x = y1_ref[...].astype(jnp.float32) * bnsc_ref[...] + bnsh_ref[...]
    h = jnp.dot(x.astype(MM_DTYPE), w1_ref[...],
                preferred_element_type=jnp.float32) + b1_ref[...]
    h = _gelu(h)
    y = x + jnp.dot(h.astype(MM_DTYPE), w2_ref[...],
                    preferred_element_type=jnp.float32) + b2_ref[...]
    if need_mask:
        tm = y.shape[0]
        rows = (jax.lax.broadcasted_iota(jnp.int32, (tm, 1), 0)
                + pl.program_id(0) * tm)
        y = jnp.where(rows < valid_rows, y, 0.0)
    y2_ref[...] = y.astype(y2_ref.dtype)
    st_ref[0] = jnp.concatenate([jnp.sum(y, axis=0, keepdims=True),
                                 jnp.sum(y * y, axis=0, keepdims=True)], axis=0)


def ffn_layer_pallas(y1, bn_scale, bn_shift, w1, b1, w2, b2, *, unit,
                     valid_rows):
    M, D = y1.shape
    F = w1.shape[1]
    tm = _divisor_tile(M, unit, ROW_TILE)
    nblk = M // tm
    kern = functools.partial(_ffn_layer_kernel, need_mask=(valid_rows != M),
                             valid_rows=valid_rows)
    y2, st = pl.pallas_call(
        kern,
        out_shape=(jax.ShapeDtypeStruct((M, D), MM_DTYPE),
                   jax.ShapeDtypeStruct((nblk, 2, D), jnp.float32)),
        grid=(nblk,),
        in_specs=[pl.BlockSpec((tm, D), lambda i: (i, 0)),
                  pl.BlockSpec((1, D), lambda i: (0, 0)),
                  pl.BlockSpec((1, D), lambda i: (0, 0)),
                  pl.BlockSpec((D, F), lambda i: (0, 0)),
                  pl.BlockSpec((1, F), lambda i: (0, 0)),
                  pl.BlockSpec((F, D), lambda i: (0, 0)),
                  pl.BlockSpec((1, D), lambda i: (0, 0))],
        out_specs=(pl.BlockSpec((tm, D), lambda i: (i, 0)),
                   pl.BlockSpec((1, 2, D), lambda i: (i, 0, 0))),
        compiler_params=_cparams("parallel"),
    )(y1, bn_scale, bn_shift, w1, b1.reshape(1, F), w2, b2.reshape(1, D))
    return y2, st.sum(axis=0)


# ----------------------------- FlattenHead (fused BN + RevIN denorm) -----------------------------

def _head_kernel(x_ref, bnsc_ref, bnsh_ref, w_ref, b_ref, m_ref, s_ref,
                 rw_ref, rb_ref, o_ref):
    # final BatchNorm normalise, flattened-feature layout (scale tiled per patch)
    x = x_ref[...].astype(jnp.float32) * bnsc_ref[...] + bnsh_ref[...]
    y = jnp.dot(x.astype(MM_DTYPE), w_ref[...],
                preferred_element_type=jnp.float32) + b_ref[...]
    # RevIN denorm epilogue
    y = (y - rb_ref[...]) / (rw_ref[...] + EPS_REVIN * EPS_REVIN)
    y = y * s_ref[...] + m_ref[...]
    o_ref[...] = y.astype(o_ref.dtype)


def head_pallas(x, bn_scale_nf, bn_shift_nf, w, b, mean, std, rw_rows, rb_rows,
                *, unit):
    M, nf = x.shape
    tw = w.shape[1]
    row_target = max(8, min(ROW_TILE,
                            (8 * 1024 * 1024) // max(nf * x.dtype.itemsize, 1)))
    tm = _divisor_tile(M, unit, row_target)
    return pl.pallas_call(
        _head_kernel,
        out_shape=jax.ShapeDtypeStruct((M, tw), jnp.float32),
        grid=(M // tm,),
        in_specs=[pl.BlockSpec((tm, nf), lambda i: (i, 0)),
                  pl.BlockSpec((1, nf), lambda i: (0, 0)),
                  pl.BlockSpec((1, nf), lambda i: (0, 0)),
                  pl.BlockSpec((nf, tw), lambda i: (0, 0)),
                  pl.BlockSpec((1, tw), lambda i: (0, 0)),
                  pl.BlockSpec((tm, 1), lambda i: (i, 0)),
                  pl.BlockSpec((tm, 1), lambda i: (i, 0)),
                  pl.BlockSpec((tm, 1), lambda i: (i, 0)),
                  pl.BlockSpec((tm, 1), lambda i: (i, 0))],
        out_specs=pl.BlockSpec((tm, tw), lambda i: (i, 0)),
        compiler_params=_cparams("parallel"),
    )(x, bn_scale_nf, bn_shift_nf, w, b.reshape(1, tw), mean, std,
      rw_rows, rb_rows)


# ----------------------------- model glue -----------------------------

def patchtst_forward(z, params, cfg):
    """z: [batch, seq_len, n_vars] -> [batch, n_vars, target_window]."""
    bs, seq, nvars = z.shape
    patch_len, stride = cfg["patch_len"], cfg["stride"]
    P, D = cfg["patch_num"], cfg["d_model"]
    n_heads, tw = cfg["n_heads"], cfg["target_window"]
    n_layers = len(params["layers"])
    BV = bs * nvars

    blk = max(8, (cfg.get("batch_block", 8) // 8) * 8)
    if BV <= blk:
        GB, Bp = BV, BV
    else:
        GB = blk
        Bp = -(-BV // GB) * GB

    # RevIN 'norm' on a lane-dense [B*C, S] layout (time on the lane axis).
    x = jnp.transpose(z, (0, 2, 1)).reshape(BV, seq)
    rw_rows = jnp.tile(params["revin_w"], (bs,)).reshape(BV, 1)
    rb_rows = jnp.tile(params["revin_b"], (bs,)).reshape(BV, 1)
    if Bp != BV:                  # pad channel rows once; kernels mask BN stats
        pad = Bp - BV
        x = jnp.pad(x, ((0, pad), (0, 0)))
        rw_rows = jnp.pad(rw_rows, ((0, pad), (0, 0)), constant_values=1.0)
        rb_rows = jnp.pad(rb_rows, ((0, pad), (0, 0)))
    xn, mean, std = revin_norm_pallas(x, rw_rows, rb_rows, unit=GB)

    # ReplicationPad1d((0, stride)) + unfold -> [Bp*P, patch_len]
    xpad = jnp.concatenate([xn, jnp.repeat(xn[:, -1:], stride, axis=1)], axis=1)
    idx = jnp.arange(P)[:, None] * stride + jnp.arange(patch_len)[None, :]
    patches2d = xpad[:, idx].reshape(Bp * P, patch_len)

    # W_P patch embedding + positional encoding (fused); dropout p=0 -> identity.
    src2d = patch_embed_pallas(patches2d, params["W_P_w"], params["W_P_b"],
                               params["W_pos"], P, unit=GB * P)
    src3 = src2d.reshape(Bp, P, D)

    # TSTEncoder: per layer one attention kernel + one FFN kernel.
    # BatchNorm uses training-mode batch statistics (nn.Module default); the
    # [d_model]-sized finalisation is plain XLA between kernels and the
    # normalise is fused into the next kernel's prologue.
    count = float(BV * P)
    bn_scale = jnp.ones((1, D), jnp.float32)     # layer-0 prologue = identity
    bn_shift = jnp.zeros((1, D), jnp.float32)
    prev = None
    for li, lp in enumerate(params["layers"]):
        y1, scores, st1 = attn_layer_pallas(
            src3, prev, bn_scale, bn_shift, lp["Wqkv"], lp["bqkv"],
            lp["Wo"], lp["bo"], n_heads=n_heads, gb=GB, bv_valid=BV,
            need_scores=(li + 1 < n_layers))
        sc1, sh1 = _bn_scale_shift(st1, count, lp["bn1_g"], lp["bn1_b"])
        y2, st2 = ffn_layer_pallas(y1.reshape(Bp * P, D), sc1, sh1,
                                   lp["W1"], lp["b1"], lp["W2"], lp["b2"],
                                   unit=GB * P, valid_rows=BV * P)
        bn_scale, bn_shift = _bn_scale_shift(st2, count, lp["bn2_g"],
                                             lp["bn2_b"])
        src3 = y2.reshape(Bp, P, D)
        prev = scores

    # FlattenHead (individual=False) with final BatchNorm + RevIN denorm fused.
    flat = src3.reshape(Bp, P * D)
    scale_nf = jnp.tile(bn_scale.reshape(-1), (P,)).reshape(1, P * D)
    shift_nf = jnp.tile(bn_shift.reshape(-1), (P,)).reshape(1, P * D)
    y = head_pallas(flat, scale_nf, shift_nf, params["head_w"],
                    params["head_b"], mean, std, rw_rows, rb_rows, unit=GB)
    if Bp != BV:
        y = y[:BV]
    return y.reshape(bs, nvars, tw)


# ----------------------------- parameter init -----------------------------

def init_params(key, cfg):
    d_model, d_ff, n_heads = cfg["d_model"], cfg["d_ff"], cfg["n_heads"]
    patch_len, patch_num, c_in = cfg["patch_len"], cfg["patch_num"], cfg["c_in"]
    tw, n_layers = cfg["target_window"], cfg["n_layers"]

    def lin(k, fan_in, fan_out):
        kw, kb = jax.random.split(k)
        w = jax.random.normal(kw, (fan_in, fan_out), jnp.float32) * 0.02
        b = jax.random.normal(kb, (fan_out,), jnp.float32) * 0.02
        # resident matmul weights pre-cast ONCE to the MXU dtype; biases stay f32
        return w.astype(MM_DTYPE), b

    keys = jax.random.split(key, 4 + n_layers)
    params = {"revin_w": jnp.ones((c_in,), jnp.float32),
              "revin_b": jnp.zeros((c_in,), jnp.float32)}
    params["W_P_w"], params["W_P_b"] = lin(keys[0], patch_len, d_model)
    # pe='zeros', learn_pe=True  ->  uniform(-0.02, 0.02) init
    params["W_pos"] = jax.random.uniform(keys[1], (patch_num, d_model),
                                         jnp.float32, -0.02, 0.02)
    params["head_w"], params["head_b"] = lin(keys[2], d_model * patch_num, tw)

    layers = []
    for li in range(n_layers):
        lk = jax.random.split(keys[4 + li], 4)
        lp = {}
        lp["Wqkv"], lp["bqkv"] = lin(lk[0], d_model, 3 * d_model)   # fused Q|K|V
        lp["Wo"], lp["bo"] = lin(lk[1], d_model, d_model)
        lp["W1"], lp["b1"] = lin(lk[2], d_model, d_ff)
        lp["W2"], lp["b2"] = lin(lk[3], d_ff, d_model)
        lp["bn1_g"] = jnp.ones((d_model,), jnp.float32)
        lp["bn1_b"] = jnp.zeros((d_model,), jnp.float32)
        lp["bn2_g"] = jnp.ones((d_model,), jnp.float32)
        lp["bn2_b"] = jnp.zeros((d_model,), jnp.float32)
        layers.append(lp)
    params["layers"] = layers
    return params


# ----------------------------- main -----------------------------

if __name__ == "__main__":
    cfg = dict(bs=2, c_in=3, context_window=16, target_window=8,
               patch_len=4, stride=4, n_layers=2,
               d_model=32, n_heads=4, d_ff=64, batch_block=8)
    # patch_num = (context_window - patch_len)//stride + 1  (+1 for padding_patch='end')
    cfg["patch_num"] = ((cfg["context_window"] - cfg["patch_len"])
                        // cfg["stride"] + 1 + 1)

    key = jax.random.PRNGKey(0)
    kz, kp = jax.random.split(key)
    z = jax.random.normal(kz, (cfg["bs"], cfg["context_window"], cfg["c_in"]),
                          jnp.float32)
    params = init_params(kp, cfg)

    fwd = jax.jit(functools.partial(patchtst_forward, cfg=cfg))
    out = jax.block_until_ready(fwd(z, params))
    assert out.shape == (cfg["bs"], cfg["c_in"], cfg["target_window"])
    assert bool(jnp.all(jnp.isfinite(out)))
    print("KERNEL_OK")
</pallas_src>

<mosaic_0001>
module attributes {stable_mosaic.version = 11 : i64} {
  func.func @_revin_norm_kernel(%arg0: i32, %arg1: memref<6x16xf32, #tpu.memory_space<vmem>>, %arg2: memref<6x1xf32, #tpu.memory_space<vmem>>, %arg3: memref<6x1xf32, #tpu.memory_space<vmem>>, %arg4: memref<6x16xbf16, #tpu.memory_space<vmem>>, %arg5: memref<6x1xf32, #tpu.memory_space<vmem>>, %arg6: memref<6x1xf32, #tpu.memory_space<vmem>>) attributes {dimension_semantics = [#tpu.dimension_semantics<parallel>], iteration_bounds = array<i64: 1>, scalar_prefetch = 0 : i64, scratch_operands = 0 : i64, tpu.core_type = #tpu.core_type<tc>, window_params = [{transform_indices = @transform_0, window_bounds = array<i64: 6, 16>}, {transform_indices = @transform_1, window_bounds = array<i64: 6, 1>}, {transform_indices = @transform_2, window_bounds = array<i64: 6, 1>}, {transform_indices = @transform_3, window_bounds = array<i64: 6, 16>}, {transform_indices = @transform_4, window_bounds = array<i64: 6, 1>}, {transform_indices = @transform_5, window_bounds = array<i64: 6, 1>}]} {
    %c0 = arith.constant 0 : index
    %c0_0 = arith.constant 0 : index
    %0 = vector.load %arg1[%c0, %c0_0] : memref<6x16xf32, #tpu.memory_space<vmem>>, vector<6x16xf32>
    %cst = arith.constant dense<0.000000e+00> : vector<6xf32>
    %1 = vector.multi_reduction <add>, %0, %cst [1] : vector<6x16xf32> to vector<6xf32>
    %2 = vector.shape_cast %1 : vector<6xf32> to vector<6x1xf32>
    %cst_1 = arith.constant 1.600000e+01 : f32
    %3 = vector.broadcast %cst_1 : f32 to vector<6x1xf32>
    %4 = arith.divf %2, %3 : vector<6x1xf32>
    %5 = vector.broadcast %4 : vector<6x1xf32> to vector<6x16xf32>
    %6 = arith.subf %0, %5 : vector<6x16xf32>
    %7 = arith.mulf %6, %6 : vector<6x16xf32>
    %cst_2 = arith.constant dense<0.000000e+00> : vector<6xf32>
    %8 = vector.multi_reduction <add>, %7, %cst_2 [1] : vector<6x16xf32> to vector<6xf32>
    %9 = vector.shape_cast %8 : vector<6xf32> to vector<6x1xf32>
    %cst_3 = arith.constant 1.600000e+01 : f32
    %10 = vector.broadcast %cst_3 : f32 to vector<6x1xf32>
    %11 = arith.divf %9, %10 : vector<6x1xf32>
    %cst_4 = arith.constant 9.99999974E-6 : f32
    %12 = vector.broadcast %cst_4 : f32 to vector<6x1xf32>
    %13 = arith.addf %11, %12 : vector<6x1xf32>
    %14 = math.sqrt %13 : vector<6x1xf32>
    %15 = vector.broadcast %4 : vector<6x1xf32> to vector<6x16xf32>
    %16 = arith.subf %0, %15 : vector<6x16xf32>
    %17 = vector.broadcast %14 : vector<6x1xf32> to vector<6x16xf32>
    %18 = arith.divf %16, %17 : vector<6x16xf32>
    %c0_5 = arith.constant 0 : index
    %c0_6 = arith.constant 0 : index
    %19 = vector.load %arg2[%c0_5, %c0_6] : memref<6x1xf32, #tpu.memory_space<vmem>>, vector<6x1xf32>
    %20 = vector.broadcast %19 : vector<6x1xf32> to vector<6x16xf32>
    %21 = arith.mulf %18, %20 : vector<6x16xf32>
    %c0_7 = arith.constant 0 : index
    %c0_8 = arith.constant 0 : index
    %22 = vector.load %arg3[%c0_7, %c0_8] : memref<6x1xf32, #tpu.memory_space<vmem>>, vector<6x1xf32>
    %23 = vector.broadcast %22 : vector<6x1xf32> to vector<6x16xf32>
    %24 = arith.addf %21, %23 : vector<6x16xf32>
    %25 = arith.truncf %24 : vector<6x16xf32> to vector<6x16xbf16>
    %c0_9 = arith.constant 0 : index
    %c0_10 = arith.constant 0 : index
    %26 = vector.load %arg4[%c0_9, %c0_10] : memref<6x16xbf16, #tpu.memory_space<vmem>>, vector<6x16xbf16>
    tpu.vector_store %arg4[%c0_9, %c0_10], %25 {strides = array<i32>} : memref<6x16xbf16, #tpu.memory_space<vmem>>, vector<6x16xbf16>,
    %c0_11 = arith.constant 0 : index
    %c0_12 = arith.constant 0 : index
    %27 = vector.load %arg5[%c0_11, %c0_12] : memref<6x1xf32, #tpu.memory_space<vmem>>, vector<6x1xf32>
    tpu.vector_store %arg5[%c0_11, %c0_12], %4 {strides = array<i32>} : memref<6x1xf32, #tpu.memory_space<vmem>>, vector<6x1xf32>,
    %c0_13 = arith.constant 0 : index
    %c0_14 = arith.constant 0 : index
    %28 = vector.load %arg6[%c0_13, %c0_14] : memref<6x1xf32, #tpu.memory_space<vmem>>, vector<6x1xf32>
    tpu.vector_store %arg6[%c0_13, %c0_14], %14 {strides = array<i32>} : memref<6x1xf32, #tpu.memory_space<vmem>>, vector<6x1xf32>,
    return
  }
  func.func @transform_0(%arg0: i32) -> (i32, i32) {
    %c0_i32 = arith.constant 0 : i32
    %c0_i32_0 = arith.constant 0 : i32
    return %arg0, %c0_i32 : i32, i32
  }
  func.func @transform_1(%arg0: i32) -> (i32, i32) {
    %c0_i32 = arith.constant 0 : i32
    %c0_i32_0 = arith.constant 0 : i32
    return %arg0, %c0_i32 : i32, i32
  }
  func.func @transform_2(%arg0: i32) -> (i32, i32) {
    %c0_i32 = arith.constant 0 : i32
    %c0_i32_0 = arith.constant 0 : i32
    return %arg0, %c0_i32 : i32, i32
  }
  func.func @transform_3(%arg0: i32) -> (i32, i32) {
    %c0_i32 = arith.constant 0 : i32
    %c0_i32_0 = arith.constant 0 : i32
    return %arg0, %c0_i32 : i32, i32
  }
  func.func @transform_4(%arg0: i32) -> (i32, i32) {
    %c0_i32 = arith.constant 0 : i32
    %c0_i32_0 = arith.constant 0 : i32
    return %arg0, %c0_i32 : i32, i32
  }
  func.func @transform_5(%arg0: i32) -> (i32, i32) {
    %c0_i32 = arith.constant 0 : i32
    %c0_i32_0 = arith.constant 0 : i32
    return %arg0, %c0_i32 : i32, i32
  }
}

module attributes {stable_mosaic.version = 11 : i64} {
  func.func @_patch_embed_kernel(%arg0: i32, %arg1: memref<30x4xbf16, #tpu.memory_space<vmem>>, %arg2: memref<4x32xbf16, #tpu.memory_space<vmem>>, %arg3: memref<1x32xf32, #tpu.memory_space<vmem>>, %arg4: memref<5x32xf32, #tpu.memory_space<vmem>>, %arg5: memref<30x32xbf16, #tpu.memory_space<vmem>>) attributes {dimension_semantics = [#tpu.dimension_semantics<parallel>], iteration_bounds = array<i64: 1>, scalar_prefetch = 0 : i64, scratch_operands = 0 : i64, tpu.core_type = #tpu.core_type<tc>, window_params = [{transform_indices = @transform_0, window_bounds = array<i64: 30, 4>}, {pipeline_mode = #tpu.pipeline_mode<synchronous>, transform_indices = @transform_1, window_bounds = array<i64: 4, 32>}, {pipeline_mode = #tpu.pipeline_mode<synchronous>, transform_indices = @transform_2, window_bounds = array<i64: 1, 32>}, {pipeline_mode = #tpu.pipeline_mode<synchronous>, transform_indices = @transform_3, window_bounds = array<i64: 5, 32>}, {transform_indices = @transform_4, window_bounds = array<i64: 30, 32>}]} {
    %c0 = arith.constant 0 : index
    %c0_0 = arith.constant 0 : index
    %0 = vector.load %arg1[%c0, %c0_0] : memref<30x4xbf16, #tpu.memory_space<vmem>>, vector<30x4xbf16>
    %c0_1 = arith.constant 0 : index
    %c0_2 = arith.constant 0 : index
    %1 = vector.load %arg2[%c0_1, %c0_2] : memref<4x32xbf16, #tpu.memory_space<vmem>>, vector<4x32xbf16>
    %cst = arith.constant dense<0.000000e+00> : vector<30x32xf32>
    %2 = tpu.matmul %0, %1, %cst {dimension_numbers = #tpu.dot_dimension_numbers<[1], [0], [0], [1], [0, 0, 1, 1], [], []>} : vector<30x4xbf16>, vector<4x32xbf16>, vector<30x32xf32> -> vector<30x32xf32>
    %c0_3 = arith.constant 0 : index
    %c0_4 = arith.constant 0 : index
    %3 = vector.load %arg4[%c0_3, %c0_4] : memref<5x32xf32, #tpu.memory_space<vmem>>, vector<5x32xf32>
    %4 = tpu.concatenate %3, %3, %3, %3, %3, %3 in 0 : vector<5x32xf32>, vector<5x32xf32>, vector<5x32xf32>, vector<5x32xf32>, vector<5x32xf32>, vector<5x32xf32> -> vector<30x32xf32>
    %c0_5 = arith.constant 0 : index
    %c0_6 = arith.constant 0 : index
    %5 = vector.load %arg3[%c0_5, %c0_6] : memref<1x32xf32, #tpu.memory_space<vmem>>, vector<1x32xf32>
    %6 = vector.broadcast %5 : vector<1x32xf32> to vector<30x32xf32>
    %7 = arith.addf %2, %6 : vector<30x32xf32>
    %8 = arith.addf %7, %4 : vector<30x32xf32>
    %9 = arith.truncf %8 : vector<30x32xf32> to vector<30x32xbf16>
    %c0_7 = arith.constant 0 : index
    %c0_8 = arith.constant 0 : index
    %10 = vector.load %arg5[%c0_7, %c0_8] : memref<30x32xbf16, #tpu.memory_space<vmem>>, vector<30x32xbf16>
    tpu.vector_store %arg5[%c0_7, %c0_8], %9 {strides = array<i32>} : memref<30x32xbf16, #tpu.memory_space<vmem>>, vector<30x32xbf16>,
    return
  }
  func.func @transform_0(%arg0: i32) -> (i32, i32) {
    %c0_i32 = arith.constant 0 : i32
    %c0_i32_0 = arith.constant 0 : i32
    return %arg0, %c0_i32 : i32, i32
  }
  func.func @transform_1(%arg0: i32) -> (i32, i32) {
    %c0_i32 = arith.constant 0 : i32
    %c0_i32_0 = arith.constant 0 : i32
    %c0_i32_1 = arith.constant 0 : i32
    return %c0_i32, %c0_i32_0 : i32, i32
  }
  func.func @transform_2(%arg0: i32) -> (i32, i32) {
    %c0_i32 = arith.constant 0 : i32
    %c0_i32_0 = arith.constant 0 : i32
    %c0_i32_1 = arith.constant 0 : i32
    return %c0_i32, %c0_i32_0 : i32, i32
  }
  func.func @transform_3(%arg0: i32) -> (i32, i32) {
    %c0_i32 = arith.constant 0 : i32
    %c0_i32_0 = arith.constant 0 : i32
    %c0_i32_1 = arith.constant 0 : i32
    return %c0_i32, %c0_i32_0 : i32, i32
  }
  func.func @transform_4(%arg0: i32) -> (i32, i32) {
    %c0_i32 = arith.constant 0 : i32
    %c0_i32_0 = arith.constant 0 : i32
    return %arg0, %c0_i32 : i32, i32
  }
}

module attributes {stable_mosaic.version = 11 : i64} {
  func.func @_attn_layer_kernel(%arg0: i32, %arg1: memref<6x5x32xbf16, #tpu.memory_space<vmem>>, %arg2: memref<1x32xf32, #tpu.memory_space<vmem>>, %arg3: memref<1x32xf32, #tpu.memory_space<vmem>>, %arg4: memref<32x96xbf16, #tpu.memory_space<vmem>>, %arg5: memref<1x96xf32, #tpu.memory_space<vmem>>, %arg6: memref<32x32xbf16, #tpu.memory_space<vmem>>, %arg7: memref<1x32xf32, #tpu.memory_space<vmem>>, %arg8: memref<6x5x32xbf16, #tpu.memory_space<vmem>>, %arg9: memref<6x4x5x5xbf16, #tpu.memory_space<vmem>>, %arg10: memref<1x2x32xf32, #tpu.memory_space<vmem>>, %arg11: memref<5x32xbf16, #tpu.memory_space<vmem>>) attributes {dimension_semantics = [#tpu.dimension_semantics<parallel>], iteration_bounds = array<i64: 1>, scalar_prefetch = 0 : i64, scratch_operands = 1 : i64, tpu.core_type = #tpu.core_type<tc>, window_params = [{transform_indices = @transform_0, window_bounds = array<i64: 6, 5, 32>}, {pipeline_mode = #tpu.pipeline_mode<synchronous>, transform_indices = @transform_1, window_bounds = array<i64: 1, 32>}, {pipeline_mode = #tpu.pipeline_mode<synchronous>, transform_indices = @transform_2, window_bounds = array<i64: 1, 32>}, {pipeline_mode = #tpu.pipeline_mode<synchronous>, transform_indices = @transform_3, window_bounds = array<i64: 32, 96>}, {pipeline_mode = #tpu.pipeline_mode<synchronous>, transform_indices = @transform_4, window_bounds = array<i64: 1, 96>}, {pipeline_mode = #tpu.pipeline_mode<synchronous>, transform_indices = @transform_5, window_bounds = array<i64: 32, 32>}, {pipeline_mode = #tpu.pipeline_mode<synchronous>, transform_indices = @transform_6, window_bounds = array<i64: 1, 32>}, {transform_indices = @transform_7, window_bounds = array<i64: 6, 5, 32>}, {transform_indices = @transform_8, window_bounds = array<i64: 6, 4, 5, 5>}, {transform_indices = @transform_9, window_bounds = array<i64: 1, 2, 32>}]} {
    %c0 = arith.constant 0 : index
    %c0_0 = arith.constant 0 : index
    %0 = vector.load %arg2[%c0, %c0_0] : memref<1x32xf32, #tpu.memory_space<vmem>>, vector<1x32xf32>
    %c0_1 = arith.constant 0 : index
    %c0_2 = arith.constant 0 : index
    %1 = vector.load %arg3[%c0_1, %c0_2] : memref<1x32xf32, #tpu.memory_space<vmem>>, vector<1x32xf32>
    %c0_3 = arith.constant 0 : index
    %c0_4 = arith.constant 0 : index
    %2 = vector.load %arg4[%c0_3, %c0_4] : memref<32x96xbf16, #tpu.memory_space<vmem>>, vector<32x96xbf16>
    %c0_5 = arith.constant 0 : index
    %c0_6 = arith.constant 0 : index
    %3 = vector.load %arg5[%c0_5, %c0_6] : memref<1x96xf32, #tpu.memory_space<vmem>>, vector<1x96xf32>
    %c0_7 = arith.constant 0 : index
    %c0_8 = arith.constant 0 : index
    %4 = vector.load %arg6[%c0_7, %c0_8] : memref<32x32xbf16, #tpu.memory_space<vmem>>, vector<32x32xbf16>
    %c0_9 = arith.constant 0 : index
    %c0_10 = arith.constant 0 : index
    %5 = vector.load %arg7[%c0_9, %c0_10] : memref<1x32xf32, #tpu.memory_space<vmem>>, vector<1x32xf32>
    %cst = arith.constant 0.000000e+00 : f32
    %6 = vector.broadcast %cst : f32 to vector<1x32xf32>
    %cst_11 = arith.constant 0.000000e+00 : f32
    %7 = vector.broadcast %cst_11 : f32 to vector<1x32xf32>
    %c0_12 = arith.constant 0 : index
    %c0_13 = arith.constant 0 : index
    %c0_14 = arith.constant 0 : index
    %8 = vector.load %arg1[%c0_12, %c0_13, %c0_14] : memref<6x5x32xbf16, #tpu.memory_space<vmem>>, vector<1x5x32xbf16>
    %9 = vector.shape_cast %8 : vector<1x5x32xbf16> to vector<5x32xbf16>
    %10 = arith.extf %9 : vector<5x32xbf16> to vector<5x32xf32>
    %11 = vector.broadcast %0 : vector<1x32xf32> to vector<5x32xf32>
    %12 = arith.mulf %10, %11 : vector<5x32xf32>
    %13 = vector.broadcast %1 : vector<1x32xf32> to vector<5x32xf32>
    %14 = arith.addf %12, %13 : vector<5x32xf32>
    %15 = arith.truncf %14 : vector<5x32xf32> to vector<5x32xbf16>
    %cst_15 = arith.constant dense<0.000000e+00> : vector<5x96xf32>
    %16 = tpu.matmul %15, %2, %cst_15 {dimension_numbers = #tpu.dot_dimension_numbers<[1], [0], [0], [1], [0, 0, 1, 1], [], []>} : vector<5x32xbf16>, vector<32x96xbf16>, vector<5x96xf32> -> vector<5x96xf32>
    %17 = vector.broadcast %3 : vector<1x96xf32> to vector<5x96xf32>
    %18 = arith.addf %16, %17 : vector<5x96xf32>
    %19 = arith.truncf %18 : vector<5x96xf32> to vector<5x96xbf16>
    %20 = vector.extract_strided_slice %19 {offsets = [0, 0], sizes = [5, 8], strides = [1, 1]} : vector<5x96xbf16> to vector<5x8xbf16>
    %21 = vector.extract_strided_slice %19 {offsets = [0, 32], sizes = [5, 8], strides = [1, 1]} : vector<5x96xbf16> to vector<5x8xbf16>
    %22 = vector.extract_strided_slice %19 {offsets = [0, 64], sizes = [5, 8], strides = [1, 1]} : vector<5x96xbf16> to vector<5x8xbf16>
    "tpu.trace_start"() <{level = 10 : i32, message = "qc,kc->qk"}> : () -> ()
    %cst_16 = arith.constant dense<0.000000e+00> : vector<5x5xf32>
    %23 = tpu.matmul %20, %21, %cst_16 {dimension_numbers = #tpu.dot_dimension_numbers<[1], [1], [0], [0], [0, 0, 1, 0], [], []>} : vector<5x8xbf16>, vector<5x8xbf16>, vector<5x5xf32> -> vector<5x5xf32>
    "tpu.trace_stop"() : () -> ()
    %cst_17 = arith.constant 0.353553385 : f32
    %24 = vector.broadcast %cst_17 : f32 to vector<5x5xf32>
    %25 = arith.mulf %23, %24 : vector<5x5xf32>
    %26 = arith.truncf %25 : vector<5x5xf32> to vector<5x5xbf16>
    %c0_18 = arith.constant 0 : index
    %c0_19 = arith.constant 0 : index
    %c0_20 = arith.constant 0 : index
    %c0_21 = arith.constant 0 : index
    %27 = vector.load %arg9[%c0_18, %c0_19, %c0_20, %c0_21] : memref<6x4x5x5xbf16, #tpu.memory_space<vmem>>, vector<1x1x5x5xbf16>
    %28 = vector.shape_cast %27 : vector<1x1x5x5xbf16> to vector<5x5xbf16>
    %29 = vector.shape_cast %26 : vector<5x5xbf16> to vector<1x1x5x5xbf16>
    tpu.vector_store %arg9[%c0_18, %c0_19, %c0_20, %c0_21], %29 {strides = array<i32>} : memref<6x4x5x5xbf16, #tpu.memory_space<vmem>>, vector<1x1x5x5xbf16>,
    %cst_22 = arith.constant dense<0xFF800000> : vector<5xf32>
    %30 = vector.multi_reduction <maximumf>, %25, %cst_22 [1] : vector<5x5xf32> to vector<5xf32>
    %31 = vector.shape_cast %30 : vector<5xf32> to vector<5x1xf32>
    %32 = vector.broadcast %31 : vector<5x1xf32> to vector<5x5xf32>
    %33 = arith.subf %25, %32 : vector<5x5xf32>
    %34 = math.exp %33 : vector<5x5xf32>
    %cst_23 = arith.constant dense<0.000000e+00> : vector<5xf32>
    %35 = vector.multi_reduction <add>, %34, %cst_23 [1] : vector<5x5xf32> to vector<5xf32>
    %36 = vector.shape_cast %35 : vector<5xf32> to vector<5x1xf32>
    %37 = tpu.reciprocal %36 {approx = true} : vector<5x1xf32> -> vector<5x1xf32>
    %38 = vector.broadcast %37 : vector<5x1xf32> to vector<5x5xf32>
    %39 = arith.mulf %34, %38 : vector<5x5xf32>
    %40 = arith.truncf %39 : vector<5x5xf32> to vector<5x5xbf16>
    %cst_24 = arith.constant dense<0.000000e+00> : vector<5x8xf32>
    %41 = tpu.matmul %40, %22, %cst_24 {dimension_numbers = #tpu.dot_dimension_numbers<[1], [0], [0], [1], [0, 0, 1, 1], [], []>} : vector<5x5xbf16>, vector<5x8xbf16>, vector<5x8xf32> -> vector<5x8xf32>
    %42 = arith.truncf %41 : vector<5x8xf32> to vector<5x8xbf16>
    %c0_25 = arith.constant 0 : index
    %c0_26 = arith.constant 0 : index
    %43 = vector.load %arg11[%c0_25, %c0_26] : memref<5x32xbf16, #tpu.memory_space<vmem>>, vector<5x8xbf16>
    tpu.vector_store %arg11[%c0_25, %c0_26], %42 {strides = array<i32>} : memref<5x32xbf16, #tpu.memory_space<vmem>>, vector<5x8xbf16>,
    %44 = vector.extract_strided_slice %19 {offsets = [0, 8], sizes = [5, 8], strides = [1, 1]} : vector<5x96xbf16> to vector<5x8xbf16>
    %45 = vector.extract_strided_slice %19 {offsets = [0, 40], sizes = [5, 8], strides = [1, 1]} : vector<5x96xbf16> to vector<5x8xbf16>
    %46 = vector.extract_strided_slice %19 {offsets = [0, 72], sizes = [5, 8], strides = [1, 1]} : vector<5x96xbf16> to vector<5x8xbf16>
    "tpu.trace_start"() <{level = 10 : i32, message = "qc,kc->qk"}> : () -> ()
    %cst_27 = arith.constant dense<0.000000e+00> : vector<5x5xf32>
    %47 = tpu.matmul %44, %45, %cst_27 {dimension_numbers = #tpu.dot_dimension_numbers<[1], [1], [0], [0], [0, 0, 1, 0], [], []>} : vector<5x8xbf16>, vector<5x8xbf16>, vector<5x5xf32> -> vector<5x5xf32>
    "tpu.trace_stop"() : () -> ()
    %cst_28 = arith.constant 0.353553385 : f32
    %48 = vector.broadcast %cst_28 : f32 to vector<5x5xf32>
    %49 = arith.mulf %47, %48 : vector<5x5xf32>
    %50 = arith.truncf %49 : vector<5x5xf32> to vector<5x5xbf16>
    %c0_29 = arith.constant 0 : index
    %c1 = arith.constant 1 : index
    %c0_30 = arith.constant 0 : index
    %c0_31 = arith.constant 0 : index
    %51 = vector.load %arg9[%c0_29, %c1, %c0_30, %c0_31] : memref<6x4x5x5xbf16, #tpu.memory_space<vmem>>, vector<1x1x5x5xbf16>
    %52 = vector.shape_cast %51 : vector<1x1x5x5xbf16> to vector<5x5xbf16>
    %53 = vector.shape_cast %50 : vector<5x5xbf16> to vector<1x1x5x5xbf16>
    tpu.vector_store %arg9[%c0_29, %c1, %c0_30, %c0_31], %53 {strides = array<i32>} : memref<6x4x5x5xbf16, #tpu.memory_space<vmem>>, vector<1x1x5x5xbf16>,
    %cst_32 = arith.constant dense<0xFF800000> : vector<5xf32>
    %54 = vector.multi_reduction <maximumf>, %49, %cst_32 [1] : vector<5x5xf32> to vector<5xf32>
    %55 = vector.shape_cast %54 : vector<5xf32> to vector<5x1xf32>
    %56 = vector.broadcast %55 : vector<5x1xf32> to vector<5x5xf32>
    %57 = arith.subf %49, %56 : vector<5x5xf32>
    %58 = math.exp %57 : vector<5x5xf32>
    %cst_33 = arith.constant dense<0.000000e+00> : vector<5xf32>
    %59 = vector.multi_reduction <add>, %58, %cst_33 [1] : vector<5x5xf32> to vector<5xf32>
    %60 = vector.shape_cast %59 : vector<5xf32> to vector<5x1xf32>
    %61 = tpu.reciprocal %60 {approx = true} : vector<5x1xf32> -> vector<5x1xf32>
    %62 = vector.broadcast %61 : vector<5x1xf32> to vector<5x5xf32>
    %63 = arith.mulf %58, %62 : vector<5x5xf32>
    %64 = arith.truncf %63 : vector<5x5xf32> to vector<5x5xbf16>
    %cst_34 = arith.constant dense<0.000000e+00> : vector<5x8xf32>
    %65 = tpu.matmul %64, %46, %cst_34 {dimension_numbers = #tpu.dot_dimension_numbers<[1], [0], [0], [1], [0, 0, 1, 1], [], []>} : vector<5x5xbf16>, vector<5x8xbf16>, vector<5x8xf32> -> vector<5x8xf32>
    %66 = arith.truncf %65 : vector<5x8xf32> to vector<5x8xbf16>
    %c0_35 = arith.constant 0 : index
    %c8 = arith.constant 8 : index
    %67 = vector.load %arg11[%c0_35, %c8] : memref<5x32xbf16, #tpu.memory_space<vmem>>, vector<5x8xbf16>
    tpu.vector_store %arg11[%c0_35, %c8], %66 {strides = array<i32>} : memref<5x32xbf16, #tpu.memory_space<vmem>>, vector<5x8xbf16>,
    %68 = vector.extract_strided_slice %19 {offsets = [0, 16], sizes = [5, 8], strides = [1, 1]} : vector<5x96xbf16> to vector<5x8xbf16>
    %69 = vector.extract_strided_slice %19 {offsets = [0, 48], sizes = [5, 8], strides = [1, 1]} : vector<5x96xbf16> to vector<5x8xbf16>
    %70 = vector.extract_strided_slice %19 {offsets = [0, 80], sizes = [5, 8], strides = [1, 1]} : vector<5x96xbf16> to vector<5x8xbf16>
    "tpu.trace_start"() <{level = 10 : i32, message = "qc,kc->qk"}> : () -> ()
    %cst_36 = arith.constant dense<0.000000e+00> : vector<5x5xf32>
    %71 = tpu.matmul %68, %69, %cst_36 {dimension_numbers = #tpu.dot_dimension_numbers<[1], [1], [0], [0], [0, 0, 1, 0], [], []>} : vector<5x8xbf16>, vector<5x8xbf16>, vector<5x5xf32> -> vector<5x5xf32>
    "tpu.trace_stop"() : () -> ()
    %cst_37 = arith.constant 0.353553385 : f32
    %72 = vector.broadcast %cst_37 : f32 to vector<5x5xf32>
    %73 = arith.mulf %71, %72 : vector<5x5xf32>
    %74 = arith.truncf %73 : vector<5x5xf32> to vector<5x5xbf16>
    %c0_38 = arith.constant 0 : index
    %c2 = arith.constant 2 : index
    %c0_39 = arith.constant 0 : index
    %c0_40 = arith.constant 0 : index
    %75 = vector.load %arg9[%c0_38, %c2, %c0_39, %c0_40] : memref<6x4x5x5xbf16, #tpu.memory_space<vmem>>, vector<1x1x5x5xbf16>
    %76 = vector.shape_cast %75 : vector<1x1x5x5xbf16> to vector<5x5xbf16>
    %77 = vector.shape_cast %74 : vector<5x5xbf16> to vector<1x1x5x5xbf16>
    tpu.vector_store %arg9[%c0_38, %c2, %c0_39, %c0_40], %77 {strides = array<i32>} : memref<6x4x5x5xbf16, #tpu.memory_space<vmem>>, vector<1x1x5x5xbf16>,
    %cst_41 = arith.constant dense<0xFF800000> : vector<5xf32>
    %78 = vector.multi_reduction <maximumf>, %73, %cst_41 [1] : vector<5x5xf32> to vector<5xf32>
    %79 = vector.shape_cast %78 : vector<5xf32> to vector<5x1xf32>
    %80 = vector.broadcast %79 : vector<5x1xf32> to vector<5x5xf32>
    %81 = arith.subf %73, %80 : vector<5x5xf32>
    %82 = math.exp %81 : vector<5x5xf32>
    %cst_42 = arith.constant dense<0.000000e+00> : vector<5xf32>
    %83 = vector.multi_reduction <add>, %82, %cst_42 [1] : vector<5x5xf32> to vector<5xf32>
    %84 = vector.shape_cast %83 : vector<5xf32> to vector<5x1xf32>
    %85 = tpu.reciprocal %84 {approx = true} : vector<5x1xf32> -> vector<5x1xf32>
    %86 = vector.broadcast %85 : vector<5x1xf32> to vector<5x5xf32>
    %87 = arith.mulf %82, %86 : vector<5x5xf32>
    %88 = arith.truncf %87 : vector<5x5xf32> to vector<5x5xbf16>
    %cst_43 = arith.constant dense<0.000000e+00> : vector<5x8xf32>
    %89 = tpu.matmul %88, %70, %cst_43 {dimension_numbers = #tpu.dot_dimension_numbers<[1], [0], [0], [1], [0, 0, 1, 1], [], []>} : vector<5x5xbf16>, vector<5x8xbf16>, vector<5x8xf32> -> vector<5x8xf32>
    %90 = arith.truncf %89 : vector<5x8xf32> to vector<5x8xbf16>
    %c0_44 = arith.constant 0 : index
    %c16 = arith.constant 16 : index
    %91 = vector.load %arg11[%c0_44, %c16] : memref<5x32xbf16, #tpu.memory_space<vmem>>, vector<5x8xbf16>
    tpu.vector_store %arg11[%c0_44, %c16], %90 {strides = array<i32>} : memref<5x32xbf16, #tpu.memory_space<vmem>>, vector<5x8xbf16>,
    %92 = vector.extract_strided_slice %19 {offsets = [0, 24], sizes = [5, 8], strides = [1, 1]} : vector<5x96xbf16> to vector<5x8xbf16>
    %93 = vector.extract_strided_slice %19 {offsets = [0, 56], sizes = [5, 8], strides = [1, 1]} : vector<5x96xbf16> to vector<5x8xbf16>
    %94 = vector.extract_strided_slice %19 {offsets = [0, 88], sizes = [5, 8], strides = [1, 1]} : vector<5x96xbf16> to vector<5x8xbf16>
    "tpu.trace_start"() <{level = 10 : i32, message = "qc,kc->qk"}> : () -> ()
    %cst_45 = arith.constant dense<0.000000e+00> : vector<5x5xf32>
    %95 = tpu.matmul %92, %93, %cst_45 {dimension_numbers = #tpu.dot_dimension_numbers<[1], [1], [0], [0], [0, 0, 1, 0], [], []>} : vector<5x8xbf16>, vector<5x8xbf16>, vector<5x5xf32> -> vector<5x5xf32>
    "tpu.trace_stop"() : () -> ()
    %cst_46 = arith.constant 0.353553385 : f32
    %96 = vector.broadcast %cst_46 : f32 to vector<5x5xf32>
    %97 = arith.mulf %95, %96 : vector<5x5xf32>
    %98 = arith.truncf %97 : vector<5x5xf32> to vector<5x5xbf16>
    %c0_47 = arith.constant 0 : index
    %c3 = arith.constant 3 : index
    %c0_48 = arith.constant 0 : index
    %c0_49 = arith.constant 0 : index
    %99 = vector.load %arg9[%c0_47, %c3, %c0_48, %c0_49] : memref<6x4x5x5xbf16, #tpu.memory_space<vmem>>, vector<1x1x5x5xbf16>
    %100 = vector.shape_cast %99 : vector<1x1x5x5xbf16> to vector<5x5xbf16>
    %101 = vector.shape_cast %98 : vector<5x5xbf16> to vector<1x1x5x5xbf16>
    tpu.vector_store %arg9[%c0_47, %c3, %c0_48, %c0_49], %101 {strides = array<i32>} : memref<6x4x5x5xbf16, #tpu.memory_space<vmem>>, vector<1x1x5x5xbf16>,
    %cst_50 = arith.constant dense<0xFF800000> : vector<5xf32>
    %102 = vector.multi_reduction <maximumf>, %97, %cst_50 [1] : vector<5x5xf32> to vector<5xf32>
    %103 = vector.shape_cast %102 : vector<5xf32> to vector<5x1xf32>
    %104 = vector.broadcast %103 : vector<5x1xf32> to vector<5x5xf32>
    %105 = arith.subf %97, %104 : vector<5x5xf32>
    %106 = math.exp %105 : vector<5x5xf32>
    %cst_51 = arith.constant dense<0.000000e+00> : vector<5xf32>
    %107 = vector.multi_reduction <add>, %106, %cst_51 [1] : vector<5x5xf32> to vector<5xf32>
    %108 = vector.shape_cast %107 : vector<5xf32> to vector<5x1xf32>
    %109 = tpu.reciprocal %108 {approx = true} : vector<5x1xf32> -> vector<5x1xf32>
    %110 = vector.broadcast %109 : vector<5x1xf32> to vector<5x5xf32>
    %111 = arith.mulf %106, %110 : vector<5x5xf32>
    %112 = arith.truncf %111 : vector<5x5xf32> to vector<5x5xbf16>
    %cst_52 = arith.constant dense<0.000000e+00> : vector<5x8xf32>
    %113 = tpu.matmul %112, %94, %cst_52 {dimension_numbers = #tpu.dot_dimension_numbers<[1], [0], [0], [1], [0, 0, 1, 1], [], []>} : vector<5x5xbf16>, vector<5x8xbf16>, vector<5x8xf32> -> vector<5x8xf32>
    %114 = arith.truncf %113 : vector<5x8xf32> to vector<5x8xbf16>
    %c0_53 = arith.constant 0 : index
    %c24 = arith.constant 24 : index
    %115 = vector.load %arg11[%c0_53, %c24] : memref<5x32xbf16, #tpu.memory_space<vmem>>, vector<5x8xbf16>
    tpu.vector_store %arg11[%c0_53, %c24], %114 {strides = array<i32>} : memref<5x32xbf16, #tpu.memory_space<vmem>>, vector<5x8xbf16>,
    %c0_54 = arith.constant 0 : index
    %c0_55 = arith.constant 0 : index
    %116 = vector.load %arg11[%c0_54, %c0_55] : memref<5x32xbf16, #tpu.memory_space<vmem>>, vector<5x32xbf16>
    %cst_56 = arith.constant dense<0.000000e+00> : vector<5x32xf32>
    %117 = tpu.matmul %116, %4, %cst_56 {dimension_numbers = #tpu.dot_dimension_numbers<[1], [0], [0], [1], [0, 0, 1, 1], [], []>} : vector<5x32xbf16>, vector<32x32xbf16>, vector<5x32xf32> -> vector<5x32xf32>
    %118 = arith.addf %14, %117 : vector<5x32xf32>
    %119 = vector.broadcast %5 : vector<1x32xf32> to vector<5x32xf32>
    %120 = arith.addf %118, %119 : vector<5x32xf32>
    %121 = arith.truncf %120 : vector<5x32xf32> to vector<5x32xbf16>
    %c0_57 = arith.constant 0 : index
    %c0_58 = arith.constant 0 : index
    %c0_59 = arith.constant 0 : index
    %122 = vector.load %arg8[%c0_57, %c0_58, %c0_59] : memref<6x5x32xbf16, #tpu.memory_space<vmem>>, vector<1x5x32xbf16>
    %123 = vector.shape_cast %122 : vector<1x5x32xbf16> to vector<5x32xbf16>
    %124 = vector.shape_cast %121 : vector<5x32xbf16> to vector<1x5x32xbf16>
    tpu.vector_store %arg8[%c0_57, %c0_58, %c0_59], %124 {strides = array<i32>} : memref<6x5x32xbf16, #tpu.memory_space<vmem>>, vector<1x5x32xbf16>,
    %cst_60 = arith.constant dense<0.000000e+00> : vector<32xf32>
    %125 = vector.multi_reduction <add>, %120, %cst_60 [0] : vector<5x32xf32> to vector<32xf32>
    %126 = vector.shape_cast %125 : vector<32xf32> to vector<1x32xf32>
    %127 = arith.addf %6, %126 : vector<1x32xf32>
    %128 = arith.mulf %120, %120 : vector<5x32xf32>
    %cst_61 = arith.constant dense<0.000000e+00> : vector<32xf32>
    %129 = vector.multi_reduction <add>, %128, %cst_61 [0] : vector<5x32xf32> to vector<32xf32>
    %130 = vector.shape_cast %129 : vector<32xf32> to vector<1x32xf32>
    %131 = arith.addf %7, %130 : vector<1x32xf32>
    %c1_62 = arith.constant 1 : index
    %c0_63 = arith.constant 0 : index
    %c0_64 = arith.constant 0 : index
    %132 = vector.load %arg1[%c1_62, %c0_63, %c0_64] : memref<6x5x32xbf16, #tpu.memory_space<vmem>>, vector<1x5x32xbf16>
    %133 = vector.shape_cast %132 : vector<1x5x32xbf16> to vector<5x32xbf16>
    %134 = arith.extf %133 : vector<5x32xbf16> to vector<5x32xf32>
    %135 = vector.broadcast %0 : vector<1x32xf32> to vector<5x32xf32>
    %136 = arith.mulf %134, %135 : vector<5x32xf32>
    %137 = vector.broadcast %1 : vector<1x32xf32> to vector<5x32xf32>
    %138 = arith.addf %136, %137 : vector<5x32xf32>
    %139 = arith.truncf %138 : vector<5x32xf32> to vector<5x32xbf16>
    %cst_65 = arith.constant dense<0.000000e+00> : vector<5x96xf32>
    %140 = tpu.matmul %139, %2, %cst_65 {dimension_numbers = #tpu.dot_dimension_numbers<[1], [0], [0], [1], [0, 0, 1, 1], [], []>} : vector<5x32xbf16>, vector<32x96xbf16>, vector<5x96xf32> -> vector<5x96xf32>
    %141 = vector.broadcast %3 : vector<1x96xf32> to vector<5x96xf32>
    %142 = arith.addf %140, %141 : vector<5x96xf32>
    %143 = arith.truncf %142 : vector<5x96xf32> to vector<5x96xbf16>
    %144 = vector.extract_strided_slice %143 {offsets = [0, 0], sizes = [5, 8], strides = [1, 1]} : vector<5x96xbf16> to vector<5x8xbf16>
    %145 = vector.extract_strided_slice %143 {offsets = [0, 32], sizes = [5, 8], strides = [1, 1]} : vector<5x96xbf16> to vector<5x8xbf16>
    %146 = vector.extract_strided_slice %143 {offsets = [0, 64], sizes = [5, 8], strides = [1, 1]} : vector<5x96xbf16> to vector<5x8xbf16>
    "tpu.trace_start"() <{level = 10 : i32, message = "qc,kc->qk"}> : () -> ()
    %cst_66 = arith.constant dense<0.000000e+00> : vector<5x5xf32>
    %147 = tpu.matmul %144, %145, %cst_66 {dimension_numbers = #tpu.dot_dimension_numbers<[1], [1], [0], [0], [0, 0, 1, 0], [], []>} : vector<5x8xbf16>, vector<5x8xbf16>, vector<5x5xf32> -> vector<5x5xf32>
    "tpu.trace_stop"() : () -> ()
    %cst_67 = arith.constant 0.353553385 : f32
    %148 = vector.broadcast %cst_67 : f32 to vector<5x5xf32>
    %149 = arith.mulf %147, %148 : vector<5x5xf32>
    %150 = arith.truncf %149 : vector<5x5xf32> to vector<5x5xbf16>
    %c1_68 = arith.constant 1 : index
    %c0_69 = arith.constant 0 : index
    %c0_70 = arith.constant 0 : index
    %c0_71 = arith.constant 0 : index
    %151 = vector.load %arg9[%c1_68, %c0_69, %c0_70, %c0_71] : memref<6x4x5x5xbf16, #tpu.memory_space<vmem>>, vector<1x1x5x5xbf16>
    %152 = vector.shape_cast %151 : vector<1x1x5x5xbf16> to vector<5x5xbf16>
    %153 = vector.shape_cast %150 : vector<5x5xbf16> to vector<1x1x5x5xbf16>
    tpu.vector_store %arg9[%c1_68, %c0_69, %c0_70, %c0_71], %153 {strides = array<i32>} : memref<6x4x5x5xbf16, #tpu.memory_space<vmem>>, vector<1x1x5x5xbf16>,
    %cst_72 = arith.constant dense<0xFF800000> : vector<5xf32>
    %154 = vector.multi_reduction <maximumf>, %149, %cst_72 [1] : vector<5x5xf32> to vector<5xf32>
    %155 = vector.shape_cast %154 : vector<5xf32> to vector<5x1xf32>
    %156 = vector.broadcast %155 : vector<5x1xf32> to vector<5x5xf32>
    %157 = arith.subf %149, %156 : vector<5x5xf32>
    %158 = math.exp %157 : vector<5x5xf32>
    %cst_73 = arith.constant dense<0.000000e+00> : vector<5xf32>
    %159 = vector.multi_reduction <add>, %158, %cst_73 [1] : vector<5x5xf32> to vector<5xf32>
    %160 = vector.shape_cast %159 : vector<5xf32> to vector<5x1xf32>
    %161 = tpu.reciprocal %160 {approx = true} : vector<5x1xf32> -> vector<5x1xf32>
    %162 = vector.broadcast %161 : vector<5x1xf32> to vector<5x5xf32>
    %163 = arith.mulf %158, %162 : vector<5x5xf32>
    %164 = arith.truncf %163 : vector<5x5xf32> to vector<5x5xbf16>
    %cst_74 = arith.constant dense<0.000000e+00> : vector<5x8xf32>
    %165 = tpu.matmul %164, %146, %cst_74 {dimension_numbers = #tpu.dot_dimension_numbers<[1], [0], [0], [1], [0, 0, 1, 1], [], []>} : vector<5x5xbf16>, vector<5x8xbf16>, vector<5x8xf32> -> vector<5x8xf32>
    %166 = arith.truncf %165 : vector<5x8xf32> to vector<5x8xbf16>
    %c0_75 = arith.constant 0 : index
    %c0_76 = arith.constant 0 : index
    %167 = vector.load %arg11[%c0_75, %c0_76] : memref<5x32xbf16, #tpu.memory_space<vmem>>, vector<5x8xbf16>
    tpu.vector_store %arg11[%c0_75, %c0_76], %166 {strides = array<i32>} : memref<5x32xbf16, #tpu.memory_space<vmem>>, vector<5x8xbf16>,
    %168 = vector.extract_strided_slice %143 {offsets = [0, 8], sizes = [5, 8], strides = [1, 1]} : vector<5x96xbf16> to vector<5x8xbf16>
    %169 = vector.extract_strided_slice %143 {offsets = [0, 40], sizes = [5, 8], strides = [1, 1]} : vector<5x96xbf16> to vector<5x8xbf16>
    %170 = vector.extract_strided_slice %143 {offsets = [0, 72], sizes = [5, 8], strides = [1, 1]} : vector<5x96xbf16> to vector<5x8xbf16>
    "tpu.trace_start"() <{level = 10 : i32, message = "qc,kc->qk"}> : () -> ()
    %cst_77 = arith.constant dense<0.000000e+00> : vector<5x5xf32>
    %171 = tpu.matmul %168, %169, %cst_77 {dimension_numbers = #tpu.dot_dimension_numbers<[1], [1], [0], [0], [0, 0, 1, 0], [], []>} : vector<5x8xbf16>, vector<5x8xbf16>, vector<5x5xf32> -> vector<5x5xf32>
    "tpu.trace_stop"() : () -> ()
    %cst_78 = arith.constant 0.353553385 : f32
    %172 = vector.broadcast %cst_78 : f32 to vector<5x5xf32>
    %173 = arith.mulf %171, %172 : vector<5x5xf32>
    %174 = arith.truncf %173 : vector<5x5xf32> to vector<5x5xbf16>
    %c1_79 = arith.constant 1 : index
    %c1_80 = arith.constant 1 : index
    %c0_81 = arith.constant 0 : index
    %c0_82 = arith.constant 0 : index
    %175 = vector.load %arg9[%c1_79, %c1_80, %c0_81, %c0_82] : memref<6x4x5x5xbf16, #tpu.memory_space<vmem>>, vector<1x1x5x5xbf16>
    %176 = vector.shape_cast %175 : vector<1x1x5x5xbf16> to vector<5x5xbf16>
    %177 = vector.shape_cast %174 : vector<5x5xbf16> to vector<1x1x5x5xbf16>
    tpu.vector_store %arg9[%c1_79, %c1_80, %c0_81, %c0_82], %177 {strides = array<i32>} : memref<6x4x5x5xbf16, #tpu.memory_space<vmem>>, vector<1x1x5x5xbf16>,
    %cst_83 = arith.constant dense<0xFF800000> : vector<5xf32>
    %178 = vector.multi_reduction <maximumf>, %173, %cst_83 [1] : vector<5x5xf32> to vector<5xf32>
    %179 = vector.shape_cast %178 : vector<5xf32> to vector<5x1xf32>
    %180 = vector.broadcast %179 : vector<5x1xf32> to vector<5x5xf32>
    %181 = arith.subf %173, %180 : vector<5x5xf32>
    %182 = math.exp %181 : vector<5x5xf32>
    %cst_84 = arith.constant dense<0.000000e+00> : vector<5xf32>
    %183 = vector.multi_reduction <add>, %182, %cst_84 [1] : vector<5x5xf32> to vector<5xf32>
    %184 = vector.shape_cast %183 : vector<5xf32> to vector<5x1xf32>
    %185 = tpu.reciprocal %184 {approx = true} : vector<5x1xf32> -> vector<5x1xf32>
    %186 = vector.broadcast %185 : vector<5x1xf32> to vector<5x5xf32>
    %187 = arith.mulf %182, %186 : vector<5x5xf32>
    %188 = arith.truncf %187 : vector<5x5xf32> to vector<5x5xbf16>
    %cst_85 = arith.constant dense<0.000000e+00> : vector<5x8xf32>
    %189 = tpu.matmul %188, %170, %cst_85 {dimension_numbers = #tpu.dot_dimension_numbers<[1], [0], [0], [1], [0, 0, 1, 1], [], []>} : vector<5x5xbf16>, vector<5x8xbf16>, vector<5x8xf32> -> vector<5x8xf32>
    %190 = arith.truncf %189 : vector<5x8xf32> to vector<5x8xbf16>
    %c0_86 = arith.constant 0 : index
    %c8_87 = arith.constant 8 : index
    %191 = vector.load %arg11[%c0_86, %c8_87] : memref<5x32xbf16, #tpu.memory_space<vmem>>, vector<5x8xbf16>
    tpu.vector_store %arg11[%c0_86, %c8_87], %190 {strides = array<i32>} : memref<5x32xbf16, #tpu.memory_space<vmem>>, vector<5x8xbf16>,
    %192 = vector.extract_strided_slice %143 {offsets = [0, 16], sizes = [5, 8], strides = [1, 1]} : vector<5x96xbf16> to vector<5x8xbf16>
    %193 = vector.extract_strided_slice %143 {offsets = [0, 48], sizes = [5, 8], strides = [1, 1]} : vector<5x96xbf16> to vector<5x8xbf16>
    %194 = vector.extract_strided_slice %143 {offsets = [0, 80], sizes = [5, 8], strides = [1, 1]} : vector<5x96xbf16> to vector<5x8xbf16>
    "tpu.trace_start"() <{level = 10 : i32, message = "qc,kc->qk"}> : () -> ()
    %cst_88 = arith.constant dense<0.000000e+00> : vector<5x5xf32>
    %195 = tpu.matmul %192, %193, %cst_88 {dimension_numbers = #tpu.dot_dimension_numbers<[1], [1], [0], [0], [0, 0, 1, 0], [], []>} : vector<5x8xbf16>, vector<5x8xbf16>, vector<5x5xf32> -> vector<5x5xf32>
    "tpu.trace_stop"() : () -> ()
    %cst_89 = arith.constant 0.353553385 : f32
    %196 = vector.broadcast %cst_89 : f32 to vector<5x5xf32>
    %197 = arith.mulf %195, %196 : vector<5x5xf32>
    %198 = arith.truncf %197 : vector<5x5xf32> to vector<5x5xbf16>
    %c1_90 = arith.constant 1 : index
    %c2_91 = arith.constant 2 : index
    %c0_92 = arith.constant 0 : index
    %c0_93 = arith.constant 0 : index
    %199 = vector.load %arg9[%c1_90, %c2_91, %c0_92, %c0_93] : memref<6x4x5x5xbf16, #tpu.memory_space<vmem>>, vector<1x1x5x5xbf16>
    %200 = vector.shape_cast %199 : vector<1x1x5x5xbf16> to vector<5x5xbf16>
    %201 = vector.shape_cast %198 : vector<5x5xbf16> to vector<1x1x5x5xbf16>
    tpu.vector_store %arg9[%c1_90, %c2_91, %c0_92, %c0_93], %201 {strides = array<i32>} : memref<6x4x5x5xbf16, #tpu.memory_space<vmem>>, vector<1x1x5x5xbf16>,
    %cst_94 = arith.constant dense<0xFF800000> : vector<5xf32>
    %202 = vector.multi_reduction <maximumf>, %197, %cst_94 [1] : vector<5x5xf32> to vector<5xf32>
    %203 = vector.shape_cast %202 : vector<5xf32> to vector<5x1xf32>
    %204 = vector.broadcast %203 : vector<5x1xf32> to vector<5x5xf32>
    %205 = arith.subf %197, %204 : vector<5x5xf32>
    %206 = math.exp %205 : vector<5x5xf32>
    %cst_95 = arith.constant dense<0.000000e+00> : vector<5xf32>
    %207 = vector.multi_reduction <add>, %206, %cst_95 [1] : vector<5x5xf32> to vector<5xf32>
    %208 = vector.shape_cast %207 : vector<5xf32> to vector<5x1xf32>
    %209 = tpu.reciprocal %208 {approx = true} : vector<5x1xf32> -> vector<5x1xf32>
    %210 = vector.broadcast %209 : vector<5x1xf32> to vector<5x5xf32>
    %211 = arith.mulf %206, %210 : vector<5x5xf32>
    %212 = arith.truncf %211 : vector<5x5xf32> to vector<5x5xbf16>
    %cst_96 = arith.constant dense<0.000000e+00> : vector<5x8xf32>
    %213 = tpu.matmul %212, %194, %cst_96 {dimension_numbers = #tpu.dot_dimension_numbers<[1], [0], [0], [1], [0, 0, 1, 1], [], []>} : vector<5x5xbf16>, vector<5x8xbf16>, vector<5x8xf32> -> vector<5x8xf32>
    %214 = arith.truncf %213 : vector<5x8xf32> to vector<5x8xbf16>
    %c0_97 = arith.constant 0 : index
    %c16_98 = arith.constant 16 : index
    %215 = vector.load %arg11[%c0_97, %c16_98] : memref<5x32xbf16, #tpu.memory_space<vmem>>, vector<5x8xbf16>
    tpu.vector_store %arg11[%c0_97, %c16_98], %214 {strides = array<i32>} : memref<5x32xbf16, #tpu.memory_space<vmem>>, vector<5x8xbf16>,
    %216 = vector.extract_strided_slice %143 {offsets = [0, 24], sizes = [5, 8], strides = [1, 1]} : vector<5x96xbf16> to vector<5x8xbf16>
    %217 = vector.extract_strided_slice %143 {offsets = [0, 56], sizes = [5, 8], strides = [1, 1]} : vector<5x96xbf16> to vector<5x8xbf16>
    %218 = vector.extract_strided_slice %143 {offsets = [0, 88], sizes = [5, 8], strides = [1, 1]} : vector<5x96xbf16> to vector<5x8xbf16>
    "tpu.trace_start"() <{level = 10 : i32, message = "qc,kc->qk"}> : () -> ()
    %cst_99 = arith.constant dense<0.000000e+00> : vector<5x5xf32>
    %219 = tpu.matmul %216, %217, %cst_99 {dimension_numbers = #tpu.dot_dimension_numbers<[1], [1], [0], [0], [0, 0, 1, 0], [], []>} : vector<5x8xbf16>, vector<5x8xbf16>, vector<5x5xf32> -> vector<5x5xf32>
    "tpu.trace_stop"() : () -> ()
    %cst_100 = arith.constant 0.353553385 : f32
    %220 = vector.broadcast %cst_100 : f32 to vector<5x5xf32>
    %221 = arith.mulf %219, %220 : vector<5x5xf32>
    %222 = arith.truncf %221 : vector<5x5xf32> to vector<5x5xbf16>
    %c1_101 = arith.constant 1 : index
    %c3_102 = arith.constant 3 : index
    %c0_103 = arith.constant 0 : index
    %c0_104 = arith.constant 0 : index
    %223 = vector.load %arg9[%c1_101, %c3_102, %c0_103, %c0_104] : memref<6x4x5x5xbf16, #tpu.memory_space<vmem>>, vector<1x1x5x5xbf16>
    %224 = vector.shape_cast %223 : vector<1x1x5x5xbf16> to vector<5x5xbf16>
    %225 = vector.shape_cast %222 : vector<5x5xbf16> to vector<1x1x5x5xbf16>
    tpu.vector_store %arg9[%c1_101, %c3_102, %c0_103, %c0_104], %225 {strides = array<i32>} : memref<6x4x5x5xbf16, #tpu.memory_space<vmem>>, vector<1x1x5x5xbf16>,
    %cst_105 = arith.constant dense<0xFF800000> : vector<5xf32>
    %226 = vector.multi_reduction <maximumf>, %221, %cst_105 [1] : vector<5x5xf32> to vector<5xf32>
    %227 = vector.shape_cast %226 : vector<5xf32> to vector<5x1xf32>
    %228 = vector.broadcast %227 : vector<5x1xf32> to vector<5x5xf32>
    %229 = arith.subf %221, %228 : vector<5x5xf32>
    %230 = math.exp %229 : vector<5x5xf32>
    %cst_106 = arith.constant dense<0.000000e+00> : vector<5xf32>
    %231 = vector.multi_reduction <add>, %230, %cst_106 [1] : vector<5x5xf32> to vector<5xf32>
    %232 = vector.shape_cast %231 : vector<5xf32> to vector<5x1xf32>
    %233 = tpu.reciprocal %232 {approx = true} : vector<5x1xf32> -> vector<5x1xf32>
    %234 = vector.broadcast %233 : vector<5x1xf32> to vector<5x5xf32>
    %235 = arith.mulf %230, %234 : vector<5x5xf32>
    %236 = arith.truncf %235 : vector<5x5xf32> to vector<5x5xbf16>
    %cst_107 = arith.constant dense<0.000000e+00> : vector<5x8xf32>
    %237 = tpu.matmul %236, %218, %cst_107 {dimension_numbers = #tpu.dot_dimension_numbers<[1], [0], [0], [1], [0, 0, 1, 1], [], []>} : vector<5x5xbf16>, vector<5x8xbf16>, vector<5x8xf32> -> vector<5x8xf32>
    %238 = arith.truncf %237 : vector<5x8xf32> to vector<5x8xbf16>
    %c0_108 = arith.constant 0 : index
    %c24_109 = arith.constant 24 : index
    %239 = vector.load %arg11[%c0_108, %c24_109] : memref<5x32xbf16, #tpu.memory_space<vmem>>, vector<5x8xbf16>
    tpu.vector_store %arg11[%c0_108, %c24_109], %238 {strides = array<i32>} : memref<5x32xbf16, #tpu.memory_space<vmem>>, vector<5x8xbf16>,
    %c0_110 = arith.constant 0 : index
    %c0_111 = arith.constant 0 : index
    %240 = vector.load %arg11[%c0_110, %c0_111] : memref<5x32xbf16, #tpu.memory_space<vmem>>, vector<5x32xbf16>
    %cst_112 = arith.constant dense<0.000000e+00> : vector<5x32xf32>
    %241 = tpu.matmul %240, %4, %cst_112 {dimension_numbers = #tpu.dot_dimension_numbers<[1], [0], [0], [1], [0, 0, 1, 1], [], []>} : vector<5x32xbf16>, vector<32x32xbf16>, vector<5x32xf32> -> vector<5x32xf32>
    %242 = arith.addf %138, %241 : vector<5x32xf32>
    %243 = vector.broadcast %5 : vector<1x32xf32> to vector<5x32xf32>
    %244 = arith.addf %242, %243 : vector<5x32xf32>
    %245 = arith.truncf %244 : vector<5x32xf32> to vector<5x32xbf16>
    %c1_113 = arith.constant 1 : index
    %c0_114 = arith.constant 0 : index
    %c0_115 = arith.constant 0 : index
    %246 = vector.load %arg8[%c1_113, %c0_114, %c0_115] : memref<6x5x32xbf16, #tpu.memory_space<vmem>>, vector<1x5x32xbf16>
    %247 = vector.shape_cast %246 : vector<1x5x32xbf16> to vector<5x32xbf16>
    %248 = vector.shape_cast %245 : vector<5x32xbf16> to vector<1x5x32xbf16>
    tpu.vector_store %arg8[%c1_113, %c0_114, %c0_115], %248 {strides = array<i32>} : memref<6x5x32xbf16, #tpu.memory_space<vmem>>, vector<1x5x32xbf16>,
    %cst_116 = arith.constant dense<0.000000e+00> : vector<32xf32>
    %249 = vector.multi_reduction <add>, %244, %cst_116 [0] : vector<5x32xf32> to vector<32xf32>
    %250 = vector.shape_cast %249 : vector<32xf32> to vector<1x32xf32>
    %251 = arith.addf %127, %250 : vector<1x32xf32>
    %252 = arith.mulf %244, %244 : vector<5x32xf32>
    %cst_117 = arith.constant dense<0.000000e+00> : vector<32xf32>
    %253 = vector.multi_reduction <add>, %252, %cst_117 [0] : vector<5x32xf32> to vector<32xf32>
    %254 = vector.shape_cast %253 : vector<32xf32> to vector<1x32xf32>
    %255 = arith.addf %131, %254 : vector<1x32xf32>
    %c2_118 = arith.constant 2 : index
    %c0_119 = arith.constant 0 : index
    %c0_120 = arith.constant 0 : index
    %256 = vector.load %arg1[%c2_118, %c0_119, %c0_120] : memref<6x5x32xbf16, #tpu.memory_space<vmem>>, vector<1x5x32xbf16>
    %257 = vector.shape_cast %256 : vector<1x5x32xbf16> to vector<5x32xbf16>
    %258 = arith.extf %257 : vector<5x32xbf16> to vector<5x32xf32>
    %259 = vector.broadcast %0 : vector<1x32xf32> to vector<5x32xf32>
    %260 = arith.mulf %258, %259 : vector<5x32xf32>
    %261 = vector.broadcast %1 : vector<1x32xf32> to vector<5x32xf32>
    %262 = arith.addf %260, %261 : vector<5x32xf32>
    %263 = arith.truncf %262 : vector<5x32xf32> to vector<5x32xbf16>
    %cst_121 = arith.constant dense<0.000000e+00> : vector<5x96xf32>
    %264 = tpu.matmul %263, %2, %cst_121 {dimension_numbers = #tpu.dot_dimension_numbers<[1], [0], [0], [1], [0, 0, 1, 1], [], []>} : vector<5x32xbf16>, vector<32x96xbf16>, vector<5x96xf32> -> vector<5x96xf32>
    %265 = vector.broadcast %3 : vector<1x96xf32> to vector<5x96xf32>
    %266 = arith.addf %264, %265 : vector<5x96xf32>
    %267 = arith.truncf %266 : vector<5x96xf32> to vector<5x96xbf16>
    %268 = vector.extract_strided_slice %267 {offsets = [0, 0], sizes = [5, 8], strides = [1, 1]} : vector<5x96xbf16> to vector<5x8xbf16>
    %269 = vector.extract_strided_slice %267 {offsets = [0, 32], sizes = [5, 8], strides = [1, 1]} : vector<5x96xbf16> to vector<5x8xbf16>
    %270 = vector.extract_strided_slice %267 {offsets = [0, 64], sizes = [5, 8], strides = [1, 1]} : vector<5x96xbf16> to vector<5x8xbf16>
    "tpu.trace_start"() <{level = 10 : i32, message = "qc,kc->qk"}> : () -> ()
    %cst_122 = arith.constant dense<0.000000e+00> : vector<5x5xf32>
    %271 = tpu.matmul %268, %269, %cst_122 {dimension_numbers = #tpu.dot_dimension_numbers<[1], [1], [0], [0], [0, 0, 1, 0], [], []>} : vector<5x8xbf16>, vector<5x8xbf16>, vector<5x5xf32> -> vector<5x5xf32>
    "tpu.trace_stop"() : () -> ()
    %cst_123 = arith.constant 0.353553385 : f32
    %272 = vector.broadcast %cst_123 : f32 to vector<5x5xf32>
    %273 = arith.mulf %271, %272 : vector<5x5xf32>
    %274 = arith.truncf %273 : vector<5x5xf32> to vector<5x5xbf16>
    %c2_124 = arith.constant 2 : index
    %c0_125 = arith.constant 0 : index
    %c0_126 = arith.constant 0 : index
    %c0_127 = arith.constant 0 : index
    %275 = vector.load %arg9[%c2_124, %c0_125, %c0_126, %c0_127] : memref<6x4x5x5xbf16, #tpu.memory_space<vmem>>, vector<1x1x5x5xbf16>
    %276 = vector.shape_cast %275 : vector<1x1x5x5xbf16> to vector<5x5xbf16>
    %277 = vector.shape_cast %274 : vector<5x5xbf16> to vector<1x1x5x5xbf16>
    tpu.vector_store %arg9[%c2_124, %c0_125, %c0_126, %c0_127], %277 {strides = array<i32>} : memref<6x4x5x5xbf16, #tpu.memory_space<vmem>>, vector<1x1x5x5xbf16>,
    %cst_128 = arith.constant dense<0xFF800000> : vector<5xf32>
    %278 = vector.multi_reduction <maximumf>, %273, %cst_128 [1] : vector<5x5xf32> to vector<5xf32>
    %279 = vector.shape_cast %278 : vector<5xf32> to vector<5x1xf32>
    %280 = vector.broadcast %279 : vector<5x1xf32> to vector<5x5xf32>
    %281 = arith.subf %273, %280 : vector<5x5xf32>
    %282 = math.exp %281 : vector<5x5xf32>
    %cst_129 = arith.constant dense<0.000000e+00> : vector<5xf32>
    %283 = vector.multi_reduction <add>, %282, %cst_129 [1] : vector<5x5xf32> to vector<5xf32>
    %284 = vector.shape_cast %283 : vector<5xf32> to vector<5x1xf32>
    %285 = tpu.reciprocal %284 {approx = true} : vector<5x1xf32> -> vector<5x1xf32>
    %286 = vector.broadcast %285 : vector<5x1xf32> to vector<5x5xf32>
    %287 = arith.mulf %282, %286 : vector<5x5xf32>
    %288 = arith.truncf %287 : vector<5x5xf32> to vector<5x5xbf16>
    %cst_130 = arith.constant dense<0.000000e+00> : vector<5x8xf32>
    %289 = tpu.matmul %288, %270, %cst_130 {dimension_numbers = #tpu.dot_dimension_numbers<[1], [0], [0], [1], [0, 0, 1, 1], [], []>} : vector<5x5xbf16>, vector<5x8xbf16>, vector<5x8xf32> -> vector<5x8xf32>
    %290 = arith.truncf %289 : vector<5x8xf32> to vector<5x8xbf16>
    %c0_131 = arith.constant 0 : index
    %c0_132 = arith.constant 0 : index
    %291 = vector.load %arg11[%c0_131, %c0_132] : memref<5x32xbf16, #tpu.memory_space<vmem>>, vector<5x8xbf16>
    tpu.vector_store %arg11[%c0_131, %c0_132], %290 {strides = array<i32>} : memref<5x32xbf16, #tpu.memory_space<vmem>>, vector<5x8xbf16>,
    %292 = vector.extract_strided_slice %267 {offsets = [0, 8], sizes = [5, 8], strides = [1, 1]} : vector<5x96xbf16> to vector<5x8xbf16>
    %293 = vector.extract_strided_slice %267 {offsets = [0, 40], sizes = [5, 8], strides = [1, 1]} : vector<5x96xbf16> to vector<5x8xbf16>
    %294 = vector.extract_strided_slice %267 {offsets = [0, 72], sizes = [5, 8], strides = [1, 1]} : vector<5x96xbf16> to vector<5x8xbf16>
    "tpu.trace_start"() <{level = 10 : i32, message = "qc,kc->qk"}> : () -> ()
    %cst_133 = arith.constant dense<0.000000e+00> : vector<5x5xf32>
    %295 = tpu.matmul %292, %293, %cst_133 {dimension_numbers = #tpu.dot_dimension_numbers<[1], [1], [0], [0], [0, 0, 1, 0], [], []>} : vector<5x8xbf16>, vector<5x8xbf16>, vector<5x5xf32> -> vector<5x5xf32>
    "tpu.trace_stop"() : () -> ()
    %cst_134 = arith.constant 0.353553385 : f32
    %296 = vector.broadcast %cst_134 : f32 to vector<5x5xf32>
    %297 = arith.mulf %295, %296 : vector<5x5xf32>
    %298 = arith.truncf %297 : vector<5x5xf32> to vector<5x5xbf16>
    %c2_135 = arith.constant 2 : index
    %c1_136 = arith.constant 1 : index
    %c0_137 = arith.constant 0 : index
    %c0_138 = arith.constant 0 : index
    %299 = vector.load %arg9[%c2_135, %c1_136, %c0_137, %c0_138] : memref<6x4x5x5xbf16, #tpu.memory_space<vmem>>, vector<1x1x5x5xbf16>
    %300 = vector.shape_cast %299 : vector<1x1x5x5xbf16> to vector<5x5xbf16>
    %301 = vector.shape_cast %298 : vector<5x5xbf16> to vector<1x1x5x5xbf16>
    tpu.vector_store %arg9[%c2_135, %c1_136, %c0_137, %c0_138], %301 {strides = array<i32>} : memref<6x4x5x5xbf16, #tpu.memory_space<vmem>>, vector<1x1x5x5xbf16>,
    %cst_139 = arith.constant dense<0xFF800000> : vector<5xf32>
    %302 = vector.multi_reduction <maximumf>, %297, %cst_139 [1] : vector<5x5xf32> to vector<5xf32>
    %303 = vector.shape_cast %302 : vector<5xf32> to vector<5x1xf32>
    %304 = vector.broadcast %303 : vector<5x1xf32> to vector<5x5xf32>
    %305 = arith.subf %297, %304 : vector<5x5xf32>
    %306 = math.exp %305 : vector<5x5xf32>
    %cst_140 = arith.constant dense<0.000000e+00> : vector<5xf32>
    %307 = vector.multi_reduction <add>, %306, %cst_140 [1] : vector<5x5xf32> to vector<5xf32>
    %308 = vector.shape_cast %307 : vector<5xf32> to vector<5x1xf32>
    %309 = tpu.reciprocal %308 {approx = true} : vector<5x1xf32> -> vector<5x1xf32>
    %310 = vector.broadcast %309 : vector<5x1xf32> to vector<5x5xf32>
    %311 = arith.mulf %306, %310 : vector<5x5xf32>
    %312 = arith.truncf %311 : vector<5x5xf32> to vector<5x5xbf16>
    %cst_141 = arith.constant dense<0.000000e+00> : vector<5x8xf32>
    %313 = tpu.matmul %312, %294, %cst_141 {dimension_numbers = #tpu.dot_dimension_numbers<[1], [0], [0], [1], [0, 0, 1, 1], [], []>} : vector<5x5xbf16>, vector<5x8xbf16>, vector<5x8xf32> -> vector<5x8xf32>
    %314 = arith.truncf %313 : vector<5x8xf32> to vector<5x8xbf16>
    %c0_142 = arith.constant 0 : index
    %c8_143 = arith.constant 8 : index
    %315 = vector.load %arg11[%c0_142, %c8_143] : memref<5x32xbf16, #tpu.memory_space<vmem>>, vector<5x8xbf16>
    tpu.vector_store %arg11[%c0_142, %c8_143], %314 {strides = array<i32>} : memref<5x32xbf16, #tpu.memory_space<vmem>>, vector<5x8xbf16>,
    %316 = vector.extract_strided_slice %267 {offsets = [0, 16], sizes = [5, 8], strides = [1, 1]} : vector<5x96xbf16> to vector<5x8xbf16>
    %317 = vector.extract_strided_slice %267 {offsets = [0, 48], sizes = [5, 8], strides = [1, 1]} : vector<5x96xbf16> to vector<5x8xbf16>
    %318 = vector.extract_strided_slice %267 {offsets = [0, 80], sizes = [5, 8], strides = [1, 1]} : vector<5x96xbf16> to vector<5x8xbf16>
    "tpu.trace_start"() <{level = 10 : i32, message = "qc,kc->qk"}> : () -> ()
    %cst_144 = arith.constant dense<0.000000e+00> : vector<5x5xf32>
    %319 = tpu.matmul %316, %317, %cst_144 {dimension_numbers = #tpu.dot_dimension_numbers<[1], [1], [0], [0], [0, 0, 1, 0], [], []>} : vector<5x8xbf16>, vector<5x8xbf16>, vector<5x5xf32> -> vector<5x5xf32>
    "tpu.trace_stop"() : () -> ()
    %cst_145 = arith.constant 0.353553385 : f32
    %320 = vector.broadcast %cst_145 : f32 to vector<5x5xf32>
    %321 = arith.mulf %319, %320 : vector<5x5xf32>
    %322 = arith.truncf %321 : vector<5x5xf32> to vector<5x5xbf16>
    %c2_146 = arith.constant 2 : index
    %c2_147 = arith.constant 2 : index
    %c0_148 = arith.constant 0 : index
    %c0_149 = arith.constant 0 : index
    %323 = vector.load %arg9[%c2_146, %c2_147, %c0_148, %c0_149] : memref<6x4x5x5xbf16, #tpu.memory_space<vmem>>, vector<1x1x5x5xbf16>
    %324 = vector.shape_cast %323 : vector<1x1x5x5xbf16> to vector<5x5xbf16>
    %325 = vector.shape_cast %322 : vector<5x5xbf16> to vector<1x1x5x5xbf16>
    tpu.vector_store %arg9[%c2_146, %c2_147, %c0_148, %c0_149], %325 {strides = array<i32>} : memref<6x4x5x5xbf16, #tpu.memory_space<vmem>>, vector<1x1x5x5xbf16>,
    %cst_150 = arith.constant dense<0xFF800000> : vector<5xf32>
    %326 = vector.multi_reduction <maximumf>, %321, %cst_150 [1] : vector<5x5xf32> to vector<5xf32>
    %327 = vector.shape_cast %326 : vector<5xf32> to vector<5x1xf32>
    %328 = vector.broadcast %327 : vector<5x1xf32> to vector<5x5xf32>
    %329 = arith.subf %321, %328 : vector<5x5xf32>
    %330 = math.exp %329 : vector<5x5xf32>
    %cst_151 = arith.constant dense<0.000000e+00> : vector<5xf32>
    %331 = vector.multi_reduction <add>, %330, %cst_151 [1] : vector<5x5xf32> to vector<5xf32>
    %332 = vector.shape_cast %331 : vector<5xf32> to vector<5x1xf32>
    %333 = tpu.reciprocal %332 {approx = true} : vector<5x1xf32> -> vector<5x1xf32>
    %334 = vector.broadcast %333 : vector<5x1xf32> to vector<5x5xf32>
    %335 = arith.mulf %330, %334 : vector<5x5xf32>
    %336 = arith.truncf %335 : vector<5x5xf32> to vector<5x5xbf16>
    %cst_152 = arith.constant dense<0.000000e+00> : vector<5x8xf32>
    %337 = tpu.matmul %336, %318, %cst_152 {dimension_numbers = #tpu.dot_dimension_numbers<[1], [0], [0], [1], [0, 0, 1, 1], [], []>} : vector<5x5xbf16>, vector<5x8xbf16>, vector<5x8xf32> -> vector<5x8xf32>
    %338 = arith.truncf %337 : vector<5x8xf32> to vector<5x8xbf16>
    %c0_153 = arith.constant 0 : index
    %c16_154 = arith.constant 16 : index
    %339 = vector.load %arg11[%c0_153, %c16_154] : memref<5x32xbf16, #tpu.memory_space<vmem>>, vector<5x8xbf16>
    tpu.vector_store %arg11[%c0_153, %c16_154], %338 {strides = array<i32>} : memref<5x32xbf16, #tpu.memory_space<vmem>>, vector<5x8xbf16>,
    %340 = vector.extract_strided_slice %267 {offsets = [0, 24], sizes = [5, 8], strides = [1, 1]} : vector<5x96xbf16> to vector<5x8xbf16>
    %341 = vector.extract_strided_slice %267 {offsets = [0, 56], sizes = [5, 8], strides = [1, 1]} : vector<5x96xbf16> to vector<5x8xbf16>
    %342 = vector.extract_strided_slice %267 {offsets = [0, 88], sizes = [5, 8], strides = [1, 1]} : vector<5x96xbf16> to vector<5x8xbf16>
    "tpu.trace_start"() <{level = 10 : i32, message = "qc,kc->qk"}> : () -> ()
    %cst_155 = arith.constant dense<0.000000e+00> : vector<5x5xf32>
    %343 = tpu.matmul %340, %341, %cst_155 {dimension_numbers = #tpu.dot_dimension_numbers<[1], [1], [0], [0], [0, 0, 1, 0], [], []>} : vector<5x8xbf16>, vector<5x8xbf16>, vector<5x5xf32> -> vector<5x5xf32>
    "tpu.trace_stop"() : () -> ()
    %cst_156 = arith.constant 0.353553385 : f32
    %344 = vector.broadcast %cst_156 : f32 to vector<5x5xf32>
    %345 = arith.mulf %343, %344 : vector<5x5xf32>
    %346 = arith.truncf %345 : vector<5x5xf32> to vector<5x5xbf16>
    %c2_157 = arith.constant 2 : index
    %c3_158 = arith.constant 3 : index
    %c0_159 = arith.constant 0 : index
    %c0_160 = arith.constant 0 : index
    %347 = vector.load %arg9[%c2_157, %c3_158, %c0_159, %c0_160] : memref<6x4x5x5xbf16, #tpu.memory_space<vmem>>, vector<1x1x5x5xbf16>
    %348 = vector.shape_cast %347 : vector<1x1x5x5xbf16> to vector<5x5xbf16>
    %349 = vector.shape_cast %346 : vector<5x5xbf16> to vector<1x1x5x5xbf16>
    tpu.vector_store %arg9[%c2_157, %c3_158, %c0_159, %c0_160], %349 {strides = array<i32>} : memref<6x4x5x5xbf16, #tpu.memory_space<vmem>>, vector<1x1x5x5xbf16>,
    %cst_161 = arith.constant dense<0xFF800000> : vector<5xf32>
    %350 = vector.multi_reduction <maximumf>, %345, %cst_161 [1] : vector<5x5xf32> to vector<5xf32>
    %351 = vector.shape_cast %350 : vector<5xf32> to vector<5x1xf32>
    %352 = vector.broadcast %351 : vector<5x1xf32> to vector<5x5xf32>
    %353 = arith.subf %345, %352 : vector<5x5xf32>
    %354 = math.exp %353 : vector<5x5xf32>
    %cst_162 = arith.constant dense<0.000000e+00> : vector<5xf32>
    %355 = vector.multi_reduction <add>, %354, %cst_162 [1] : vector<5x5xf32> to vector<5xf32>
    %356 = vector.shape_cast %355 : vector<5xf32> to vector<5x1xf32>
    %357 = tpu.reciprocal %356 {approx = true} : vector<5x1xf32> -> vector<5x1xf32>
    %358 = vector.broadcast %357 : vector<5x1xf32> to vector<5x5xf32>
    %359 = arith.mulf %354, %358 : vector<5x5xf32>
    %360 = arith.truncf %359 : vector<5x5xf32> to vector<5x5xbf16>
    %cst_163 = arith.constant dense<0.000000e+00> : vector<5x8xf32>
    %361 = tpu.matmul %360, %342, %cst_163 {dimension_numbers = #tpu.dot_dimension_numbers<[1], [0], [0], [1], [0, 0, 1, 1], [], []>} : vector<5x5xbf16>, vector<5x8xbf16>, vector<5x8xf32> -> vector<5x8xf32>
    %362 = arith.truncf %361 : vector<5x8xf32> to vector<5x8xbf16>
    %c0_164 = arith.constant 0 : index
    %c24_165 = arith.constant 24 : index
    %363 = vector.load %arg11[%c0_164, %c24_165] : memref<5x32xbf16, #tpu.memory_space<vmem>>, vector<5x8xbf16>
    tpu.vector_store %arg11[%c0_164, %c24_165], %362 {strides = array<i32>} : memref<5x32xbf16, #tpu.memory_space<vmem>>, vector<5x8xbf16>,
    %c0_166 = arith.constant 0 : index
    %c0_167 = arith.constant 0 : index
    %364 = vector.load %arg11[%c0_166, %c0_167] : memref<5x32xbf16, #tpu.memory_space<vmem>>, vector<5x32xbf16>
    %cst_168 = arith.constant dense<0.000000e+00> : vector<5x32xf32>
    %365 = tpu.matmul %364, %4, %cst_168 {dimension_numbers = #tpu.dot_dimension_numbers<[1], [0], [0], [1], [0, 0, 1, 1], [], []>} : vector<5x32xbf16>, vector<32x32xbf16>, vector<5x32xf32> -> vector<5x32xf32>
    %366 = arith.addf %262, %365 : vector<5x32xf32>
    %367 = vector.broadcast %5 : vector<1x32xf32> to vector<5x32xf32>
    %368 = arith.addf %366, %367 : vector<5x32xf32>
    %369 = arith.truncf %368 : vector<5x32xf32> to vector<5x32xbf16>
    %c2_169 = arith.constant 2 : index
    %c0_170 = arith.constant 0 : index
    %c0_171 = arith.constant 0 : index
    %370 = vector.load %arg8[%c2_169, %c0_170, %c0_171] : memref<6x5x32xbf16, #tpu.memory_space<vmem>>, vector<1x5x32xbf16>
    %371 = vector.shape_cast %370 : vector<1x5x32xbf16> to vector<5x32xbf16>
    %372 = vector.shape_cast %369 : vector<5x32xbf16> to vector<1x5x32xbf16>
    tpu.vector_store %arg8[%c2_169, %c0_170, %c0_171], %372 {strides = array<i32>} : memref<6x5x32xbf16, #tpu.memory_space<vmem>>, vector<1x5x32xbf16>,
    %cst_172 = arith.constant dense<0.000000e+00> : vector<32xf32>
    %373 = vector.multi_reduction <add>, %368, %cst_172 [0] : vector<5x32xf32> to vector<32xf32>
    %374 = vector.shape_cast %373 : vector<32xf32> to vector<1x32xf32>
    %375 = arith.addf %251, %374 : vector<1x32xf32>
    %376 = arith.mulf %368, %368 : vector<5x32xf32>
    %cst_173 = arith.constant dense<0.000000e+00> : vector<32xf32>
    %377 = vector.multi_reduction <add>, %376, %cst_173 [0] : vector<5x32xf32> to vector<32xf32>
    %378 = vector.shape_cast %377 : vector<32xf32> to vector<1x32xf32>
    %379 = arith.addf %255, %378 : vector<1x32xf32>
    %c3_174 = arith.constant 3 : index
    %c0_175 = arith.constant 0 : index
    %c0_176 = arith.constant 0 : index
    %380 = vector.load %arg1[%c3_174, %c0_175, %c0_176] : memref<6x5x32xbf16, #tpu.memory_space<vmem>>, vector<1x5x32xbf16>
    %381 = vector.shape_cast %380 : vector<1x5x32xbf16> to vector<5x32xbf16>
    %382 = arith.extf %381 : vector<5x32xbf16> to vector<5x32xf32>
    %383 = vector.broadcast %0 : vector<1x32xf32> to vector<5x32xf32>
    %384 = arith.mulf %382, %383 : vector<5x32xf32>
    %385 = vector.broadcast %1 : vector<1x32xf32> to vector<5x32xf32>
    %386 = arith.addf %384, %385 : vector<5x32xf32>
    %387 = arith.truncf %386 : vector<5x32xf32> to vector<5x32xbf16>
    %cst_177 = arith.constant dense<0.000000e+00> : vector<5x96xf32>
    %388 = tpu.matmul %387, %2, %cst_177 {dimension_numbers = #tpu.dot_dimension_numbers<[1], [0], [0], [1], [0, 0, 1, 1], [], []>} : vector<5x32xbf16>, vector<32x96xbf16>, vector<5x96xf32> -> vector<5x96xf32>
    %389 = vector.broadcast %3 : vector<1x96xf32> to vector<5x96xf32>
    %390 = arith.addf %388, %389 : vector<5x96xf32>
    %391 = arith.truncf %390 : vector<5x96xf32> to vector<5x96xbf16>
    %392 = vector.extract_strided_slice %391 {offsets = [0, 0], sizes = [5, 8], strides = [1, 1]} : vector<5x96xbf16> to vector<5x8xbf16>
    %393 = vector.extract_strided_slice %391 {offsets = [0, 32], sizes = [5, 8], strides = [1, 1]} : vector<5x96xbf16> to vector<5x8xbf16>
    %394 = vector.extract_strided_slice %391 {offsets = [0, 64], sizes = [5, 8], strides = [1, 1]} : vector<5x96xbf16> to vector<5x8xbf16>
    "tpu.trace_start"() <{level = 10 : i32, message = "qc,kc->qk"}> : () -> ()
    %cst_178 = arith.constant dense<0.000000e+00> : vector<5x5xf32>
    %395 = tpu.matmul %392, %393, %cst_178 {dimension_numbers = #tpu.dot_dimension_numbers<[1], [1], [0], [0], [0, 0, 1, 0], [], []>} : vector<5x8xbf16>, vector<5x8xbf16>, vector<5x5xf32> -> vector<5x5xf32>
    "tpu.trace_stop"() : () -> ()
    %cst_179 = arith.constant 0.353553385 : f32
    %396 = vector.broadcast %cst_179 : f32 to vector<5x5xf32>
    %397 = arith.mulf %395, %396 : vector<5x5xf32>
    %398 = arith.truncf %397 : vector<5x5xf32> to vector<5x5xbf16>
    %c3_180 = arith.constant 3 : index
    %c0_181 = arith.constant 0 : index
    %c0_182 = arith.constant 0 : index
    %c0_183 = arith.constant 0 : index
    %399 = vector.load %arg9[%c3_180, %c0_181, %c0_182, %c0_183] : memref<6x4x5x5xbf16, #tpu.memory_space<vmem>>, vector<1x1x5x5xbf16>
    %400 = vector.shape_cast %399 : vector<1x1x5x5xbf16> to vector<5x5xbf16>
    %401 = vector.shape_cast %398 : vector<5x5xbf16> to vector<1x1x5x5xbf16>
    tpu.vector_store %arg9[%c3_180, %c0_181, %c0_182, %c0_183], %401 {strides = array<i32>} : memref<6x4x5x5xbf16, #tpu.memory_space<vmem>>, vector<1x1x5x5xbf16>,
    %cst_184 = arith.constant dense<0xFF800000> : vector<5xf32>
    %402 = vector.multi_reduction <maximumf>, %397, %cst_184 [1] : vector<5x5xf32> to vector<5xf32>
    %403 = vector.shape_cast %402 : vector<5xf32> to vector<5x1xf32>
    %404 = vector.broadcast %403 : vector<5x1xf32> to vector<5x5xf32>
    %405 = arith.subf %397, %404 : vector<5x5xf32>
    %406 = math.exp %405 : vector<5x5xf32>
    %cst_185 = arith.constant dense<0.000000e+00> : vector<5xf32>
    %407 = vector.multi_reduction <add>, %406, %cst_185 [1] : vector<5x5xf32> to vector<5xf32>
    %408 = vector.shape_cast %407 : vector<5xf32> to vector<5x1xf32>
    %409 = tpu.reciprocal %408 {approx = true} : vector<5x1xf32> -> vector<5x1xf32>
    %410 = vector.broadcast %409 : vector<5x1xf32> to vector<5x5xf32>
    %411 = arith.mulf %406, %410 : vector<5x5xf32>
    %412 = arith.truncf %411 : vector<5x5xf32> to vector<5x5xbf16>
    %cst_186 = arith.constant dense<0.000000e+00> : vector<5x8xf32>
    %413 = tpu.matmul %412, %394, %cst_186 {dimension_numbers = #tpu.dot_dimension_numbers<[1], [0], [0], [1], [0, 0, 1, 1], [], []>} : vector<5x5xbf16>, vector<5x8xbf16>, vector<5x8xf32> -> vector<5x8xf32>
    %414 = arith.truncf %413 : vector<5x8xf32> to vector<5x8xbf16>
    %c0_187 = arith.constant 0 : index
    %c0_188 = arith.constant 0 : index
    %415 = vector.load %arg11[%c0_187, %c0_188] : memref<5x32xbf16, #tpu.memory_space<vmem>>, vector<5x8xbf16>
    tpu.vector_store %arg11[%c0_187, %c0_188], %414 {strides = array<i32>} : memref<5x32xbf16, #tpu.memory_space<vmem>>, vector<5x8xbf16>,
    %416 = vector.extract_strided_slice %391 {offsets = [0, 8], sizes = [5, 8], strides = [1, 1]} : vector<5x96xbf16> to vector<5x8xbf16>
    %417 = vector.extract_strided_slice %391 {offsets = [0, 40], sizes = [5, 8], strides = [1, 1]} : vector<5x96xbf16> to vector<5x8xbf16>
    %418 = vector.extract_strided_slice %391 {offsets = [0, 72], sizes = [5, 8], strides = [1, 1]} : vector<5x96xbf16> to vector<5x8xbf16>
    "tpu.trace_start"() <{level = 10 : i32, message = "qc,kc->qk"}> : () -> ()
    %cst_189 = arith.constant dense<0.000000e+00> : vector<5x5xf32>
    %419 = tpu.matmul %416, %417, %cst_189 {dimension_numbers = #tpu.dot_dimension_numbers<[1], [1], [0], [0], [0, 0, 1, 0], [], []>} : vector<5x8xbf16>, vector<5x8xbf16>, vector<5x5xf32> -> vector<5x5xf32>
    "tpu.trace_stop"() : () -> ()
    %cst_190 = arith.constant 0.353553385 : f32
    %420 = vector.broadcast %cst_190 : f32 to vector<5x5xf32>
    %421 = arith.mulf %419, %420 : vector<5x5xf32>
    %422 = arith.truncf %421 : vector<5x5xf32> to vector<5x5xbf16>
    %c3_191 = arith.constant 3 : index
    %c1_192 = arith.constant 1 : index
    %c0_193 = arith.constant 0 : index
    %c0_194 = arith.constant 0 : index
    %423 = vector.load %arg9[%c3_191, %c1_192, %c0_193, %c0_194] : memref<6x4x5x5xbf16, #tpu.memory_space<vmem>>, vector<1x1x5x5xbf16>
    %424 = vector.shape_cast %423 : vector<1x1x5x5xbf16> to vector<5x5xbf16>
    %425 = vector.shape_cast %422 : vector<5x5xbf16> to vector<1x1x5x5xbf16>
    tpu.vector_store %arg9[%c3_191, %c1_192, %c0_193, %c0_194], %425 {strides = array<i32>} : memref<6x4x5x5xbf16, #tpu.memory_space<vmem>>, vector<1x1x5x5xbf16>,
    %cst_195 = arith.constant dense<0xFF800000> : vector<5xf32>
    %426 = vector.multi_reduction <maximumf>, %421, %cst_195 [1] : vector<5x5xf32> to vector<5xf32>
    %427 = vector.shape_cast %426 : vector<5xf32> to vector<5x1xf32>
    %428 = vector.broadcast %427 : vector<5x1xf32> to vector<5x5xf32>
    %429 = arith.subf %421, %428 : vector<5x5xf32>
    %430 = math.exp %429 : vector<5x5xf32>
    %cst_196 = arith.constant dense<0.000000e+00> : vector<5xf32>
    %431 = vector.multi_reduction <add>, %430, %cst_196 [1] : vector<5x5xf32> to vector<5xf32>
    %432 = vector.shape_cast %431 : vector<5xf32> to vector<5x1xf32>
    %433 = tpu.reciprocal %432 {approx = true} : vector<5x1xf32> -> vector<5x1xf32>
    %434 = vector.broadcast %433 : vector<5x1xf32> to vector<5x5xf32>
    %435 = arith.mulf %430, %434 : vector<5x5xf32>
    %436 = arith.truncf %435 : vector<5x5xf32> to vector<5x5xbf16>
    %cst_197 = arith.constant dense<0.000000e+00> : vector<5x8xf32>
    %437 = tpu.matmul %436, %418, %cst_197 {dimension_numbers = #tpu.dot_dimension_numbers<[1], [0], [0], [1], [0, 0, 1, 1], [], []>} : vector<5x5xbf16>, vector<5x8xbf16>, vector<5x8xf32> -> vector<5x8xf32>
    %438 = arith.truncf %437 : vector<5x8xf32> to vector<5x8xbf16>
    %c0_198 = arith.constant 0 : index
    %c8_199 = arith.constant 8 : index
    %439 = vector.load %arg11[%c0_198, %c8_199] : memref<5x32xbf16, #tpu.memory_space<vmem>>, vector<5x8xbf16>
    tpu.vector_store %arg11[%c0_198, %c8_199], %438 {strides = array<i32>} : memref<5x32xbf16, #tpu.memory_space<vmem>>, vector<5x8xbf16>,
    %440 = vector.extract_strided_slice %391 {offsets = [0, 16], sizes = [5, 8], strides = [1, 1]} : vector<5x96xbf16> to vector<5x8xbf16>
    %441 = vector.extract_strided_slice %391 {offsets = [0, 48], sizes = [5, 8], strides = [1, 1]} : vector<5x96xbf16> to vector<5x8xbf16>
    %442 = vector.extract_strided_slice %391 {offsets = [0, 80], sizes = [5, 8], strides = [1, 1]} : vector<5x96xbf16> to vector<5x8xbf16>
    "tpu.trace_start"() <{level = 10 : i32, message = "qc,kc->qk"}> : () -> ()
    %cst_200 = arith.constant dense<0.000000e+00> : vector<5x5xf32>
    %443 = tpu.matmul %440, %441, %cst_200 {dimension_numbers = #tpu.dot_dimension_numbers<[1], [1], [0], [0], [0, 0, 1, 0], [], []>} : vector<5x8xbf16>, vector<5x8xbf16>, vector<5x5xf32> -> vector<5x5xf32>
    "tpu.trace_stop"() : () -> ()
    %cst_201 = arith.constant 0.353553385 : f32
    %444 = vector.broadcast %cst_201 : f32 to vector<5x5xf32>
    %445 = arith.mulf %443, %444 : vector<5x5xf32>
    %446 = arith.truncf %445 : vector<5x5xf32> to vector<5x5xbf16>
    %c3_202 = arith.constant 3 : index
    %c2_203 = arith.constant 2 : index
    %c0_204 = arith.constant 0 : index
    %c0_205 = arith.constant 0 : index
    %447 = vector.load %arg9[%c3_202, %c2_203, %c0_204, %c0_205] : memref<6x4x5x5xbf16, #tpu.memory_space<vmem>>, vector<1x1x5x5xbf16>
    %448 = vector.shape_cast %447 : vector<1x1x5x5xbf16> to vector<5x5xbf16>
    %449 = vector.shape_cast %446 : vector<5x5xbf16> to vector<1x1x5x5xbf16>
    tpu.vector_store %arg9[%c3_202, %c2_203, %c0_204, %c0_205], %449 {strides = array<i32>} : memref<6x4x5x5xbf16, #tpu.memory_space<vmem>>, vector<1x1x5x5xbf16>,
    %cst_206 = arith.constant dense<0xFF800000> : vector<5xf32>
    %450 = vector.multi_reduction <maximumf>, %445, %cst_206 [1] : vector<5x5xf32> to vector<5xf32>
    %451 = vector.shape_cast %450 : vector<5xf32> to vector<5x1xf32>
    %452 = vector.broadcast %451 : vector<5x1xf32> to vector<5x5xf32>
    %453 = arith.subf %445, %452 : vector<5x5xf32>
    %454 = math.exp %453 : vector<5x5xf32>
    %cst_207 = arith.constant dense<0.000000e+00> : vector<5xf32>
    %455 = vector.multi_reduction <add>, %454, %cst_207 [1] : vector<5x5xf32> to vector<5xf32>
    %456 = vector.shape_cast %455 : vector<5xf32> to vector<5x1xf32>
    %457 = tpu.reciprocal %456 {approx = true} : vector<5x1xf32> -> vector<5x1xf32>
    %458 = vector.broadcast %457 : vector<5x1xf32> to vector<5x5xf32>
    %459 = arith.mulf %454, %458 : vector<5x5xf32>
    %460 = arith.truncf %459 : vector<5x5xf32> to vector<5x5xbf16>
    %cst_208 = arith.constant dense<0.000000e+00> : vector<5x8xf32>
    %461 = tpu.matmul %460, %442, %cst_208 {dimension_numbers = #tpu.dot_dimension_numbers<[1], [0], [0], [1], [0, 0, 1, 1], [], []>} : vector<5x5xbf16>, vector<5x8xbf16>, vector<5x8xf32> -> vector<5x8xf32>
    %462 = arith.truncf %461 : vector<5x8xf32> to vector<5x8xbf16>
    %c0_209 = arith.constant 0 : index
    %c16_210 = arith.constant 16 : index
    %463 = vector.load %arg11[%c0_209, %c16_210] : memref<5x32xbf16, #tpu.memory_space<vmem>>, vector<5x8xbf16>
    tpu.vector_store %arg11[%c0_209, %c16_210], %462 {strides = array<i32>} : memref<5x32xbf16, #tpu.memory_space<vmem>>, vector<5x8xbf16>,
    %464 = vector.extract_strided_slice %391 {offsets = [0, 24], sizes = [5, 8], strides = [1, 1]} : vector<5x96xbf16> to vector<5x8xbf16>
    %465 = vector.extract_strided_slice %391 {offsets = [0, 56], sizes = [5, 8], strides = [1, 1]} : vector<5x96xbf16> to vector<5x8xbf16>
    %466 = vector.extract_strided_slice %391 {offsets = [0, 88], sizes = [5, 8], strides = [1, 1]} : vector<5x96xbf16> to vector<5x8xbf16>
    "tpu.trace_start"() <{level = 10 : i32, message = "qc,kc->qk"}> : () -> ()
    %cst_211 = arith.constant dense<0.000000e+00> : vector<5x5xf32>
    %467 = tpu.matmul %464, %465, %cst_211 {dimension_numbers = #tpu.dot_dimension_numbers<[1], [1], [0], [0], [0, 0, 1, 0], [], []>} : vector<5x8xbf16>, vector<5x8xbf16>, vector<5x5xf32> -> vector<5x5xf32>
    "tpu.trace_stop"() : () -> ()
    %cst_212 = arith.constant 0.353553385 : f32
    %468 = vector.broadcast %cst_212 : f32 to vector<5x5xf32>
    %469 = arith.mulf %467, %468 : vector<5x5xf32>
    %470 = arith.truncf %469 : vector<5x5xf32> to vector<5x5xbf16>
    %c3_213 = arith.constant 3 : index
    %c3_214 = arith.constant 3 : index
    %c0_215 = arith.constant 0 : index
    %c0_216 = arith.constant 0 : index
    %471 = vector.load %arg9[%c3_213, %c3_214, %c0_215, %c0_216] : memref<6x4x5x5xbf16, #tpu.memory_space<vmem>>, vector<1x1x5x5xbf16>
    %472 = vector.shape_cast %471 : vector<1x1x5x5xbf16> to vector<5x5xbf16>
    %473 = vector.shape_cast %470 : vector<5x5xbf16> to vector<1x1x5x5xbf16>
    tpu.vector_store %arg9[%c3_213, %c3_214, %c0_215, %c0_216], %473 {strides = array<i32>} : memref<6x4x5x5xbf16, #tpu.memory_space<vmem>>, vector<1x1x5x5xbf16>,
    %cst_217 = arith.constant dense<0xFF800000> : vector<5xf32>
    %474 = vector.multi_reduction <maximumf>, %469, %cst_217 [1] : vector<5x5xf32> to vector<5xf32>
    %475 = vector.shape_cast %474 : vector<5xf32> to vector<5x1xf32>
    %476 = vector.broadcast %475 : vector<5x1xf32> to vector<5x5xf32>
    %477 = arith.subf %469, %476 : vector<5x5xf32>
    %478 = math.exp %477 : vector<5x5xf32>
    %cst_218 = arith.constant dense<0.000000e+00> : vector<5xf32>
    %479 = vector.multi_reduction <add>, %478, %cst_218 [1] : vector<5x5xf32> to vector<5xf32>
    %480 = vector.shape_cast %479 : vector<5xf32> to vector<5x1xf32>
    %481 = tpu.reciprocal %480 {approx = true} : vector<5x1xf32> -> vector<5x1xf32>
    %482 = vector.broadcast %481 : vector<5x1xf32> to vector<5x5xf32>
    %483 = arith.mulf %478, %482 : vector<5x5xf32>
    %484 = arith.truncf %483 : vector<5x5xf32> to vector<5x5xbf16>
    %cst_219 = arith.constant dense<0.000000e+00> : vector<5x8xf32>
    %485 = tpu.matmul %484, %466, %cst_219 {dimension_numbers = #tpu.dot_dimension_numbers<[1], [0], [0], [1], [0, 0, 1, 1], [], []>} : vector<5x5xbf16>, vector<5x8xbf16>, vector<5x8xf32> -> vector<5x8xf32>
    %486 = arith.truncf %485 : vector<5x8xf32> to vector<5x8xbf16>
    %c0_220 = arith.constant 0 : index
    %c24_221 = arith.constant 24 : index
    %487 = vector.load %arg11[%c0_220, %c24_221] : memref<5x32xbf16, #tpu.memory_space<vmem>>, vector<5x8xbf16>
    tpu.vector_store %arg11[%c0_220, %c24_221], %486 {strides = array<i32>} : memref<5x32xbf16, #tpu.memory_space<vmem>>, vector<5x8xbf16>,
    %c0_222 = arith.constant 0 : index
    %c0_223 = arith.constant 0 : index
    %488 = vector.load %arg11[%c0_222, %c0_223] : memref<5x32xbf16, #tpu.memory_space<vmem>>, vector<5x32xbf16>
    %cst_224 = arith.constant dense<0.000000e+00> : vector<5x32xf32>
    %489 = tpu.matmul %488, %4, %cst_224 {dimension_numbers = #tpu.dot_dimension_numbers<[1], [0], [0], [1], [0, 0, 1, 1], [], []>} : vector<5x32xbf16>, vector<32x32xbf16>, vector<5x32xf32> -> vector<5x32xf32>
    %490 = arith.addf %386, %489 : vector<5x32xf32>
    %491 = vector.broadcast %5 : vector<1x32xf32> to vector<5x32xf32>
    %492 = arith.addf %490, %491 : vector<5x32xf32>
    %493 = arith.truncf %492 : vector<5x32xf32> to vector<5x32xbf16>
    %c3_225 = arith.constant 3 : index
    %c0_226 = arith.constant 0 : index
    %c0_227 = arith.constant 0 : index
    %494 = vector.load %arg8[%c3_225, %c0_226, %c0_227] : memref<6x5x32xbf16, #tpu.memory_space<vmem>>, vector<1x5x32xbf16>
    %495 = vector.shape_cast %494 : vector<1x5x32xbf16> to vector<5x32xbf16>
    %496 = vector.shape_cast %493 : vector<5x32xbf16> to vector<1x5x32xbf16>
    tpu.vector_store %arg8[%c3_225, %c0_226, %c0_227], %496 {strides = array<i32>} : memref<6x5x32xbf16, #tpu.memory_space<vmem>>, vector<1x5x32xbf16>,
    %cst_228 = arith.constant dense<0.000000e+00> : vector<32xf32>
    %497 = vector.multi_reduction <add>, %492, %cst_228 [0] : vector<5x32xf32> to vector<32xf32>
    %498 = vector.shape_cast %497 : vector<32xf32> to vector<1x32xf32>
    %499 = arith.addf %375, %498 : vector<1x32xf32>
    %500 = arith.mulf %492, %492 : vector<5x32xf32>
    %cst_229 = arith.constant dense<0.000000e+00> : vector<32xf32>
    %501 = vector.multi_reduction <add>, %500, %cst_229 [0] : vector<5x32xf32> to vector<32xf32>
    %502 = vector.shape_cast %501 : vector<32xf32> to vector<1x32xf32>
    %503 = arith.addf %379, %502 : vector<1x32xf32>
    %c4 = arith.constant 4 : index
    %c0_230 = arith.constant 0 : index
    %c0_231 = arith.constant 0 : index
    %504 = vector.load %arg1[%c4, %c0_230, %c0_231] : memref<6x5x32xbf16, #tpu.memory_space<vmem>>, vector<1x5x32xbf16>
    %505 = vector.shape_cast %504 : vector<1x5x32xbf16> to vector<5x32xbf16>
    %506 = arith.extf %505 : vector<5x32xbf16> to vector<5x32xf32>
    %507 = vector.broadcast %0 : vector<1x32xf32> to vector<5x32xf32>
    %508 = arith.mulf %506, %507 : vector<5x32xf32>
    %509 = vector.broadcast %1 : vector<1x32xf32> to vector<5x32xf32>
    %510 = arith.addf %508, %509 : vector<5x32xf32>
    %511 = arith.truncf %510 : vector<5x32xf32> to vector<5x32xbf16>
    %cst_232 = arith.constant dense<0.000000e+00> : vector<5x96xf32>
    %512 = tpu.matmul %511, %2, %cst_232 {dimension_numbers = #tpu.dot_dimension_numbers<[1], [0], [0], [1], [0, 0, 1, 1], [], []>} : vector<5x32xbf16>, vector<32x96xbf16>, vector<5x96xf32> -> vector<5x96xf32>
    %513 = vector.broadcast %3 : vector<1x96xf32> to vector<5x96xf32>
    %514 = arith.addf %512, %513 : vector<5x96xf32>
    %515 = arith.truncf %514 : vector<5x96xf32> to vector<5x96xbf16>
    %516 = vector.extract_strided_slice %515 {offsets = [0, 0], sizes = [5, 8], strides = [1, 1]} : vector<5x96xbf16> to vector<5x8xbf16>
    %517 = vector.extract_strided_slice %515 {offsets = [0, 32], sizes = [5, 8], strides = [1, 1]} : vector<5x96xbf16> to vector<5x8xbf16>
    %518 = vector.extract_strided_slice %515 {offsets = [0, 64], sizes = [5, 8], strides = [1, 1]} : vector<5x96xbf16> to vector<5x8xbf16>
    "tpu.trace_start"() <{level = 10 : i32, message = "qc,kc->qk"}> : () -> ()
    %cst_233 = arith.constant dense<0.000000e+00> : vector<5x5xf32>
    %519 = tpu.matmul %516, %517, %cst_233 {dimension_numbers = #tpu.dot_dimension_numbers<[1], [1], [0], [0], [0, 0, 1, 0], [], []>} : vector<5x8xbf16>, vector<5x8xbf16>, vector<5x5xf32> -> vector<5x5xf32>
    "tpu.trace_stop"() : () -> ()
    %cst_234 = arith.constant 0.353553385 : f32
    %520 = vector.broadcast %cst_234 : f32 to vector<5x5xf32>
    %521 = arith.mulf %519, %520 : vector<5x5xf32>
    %522 = arith.truncf %521 : vector<5x5xf32> to vector<5x5xbf16>
    %c4_235 = arith.constant 4 : index
    %c0_236 = arith.constant 0 : index
    %c0_237 = arith.constant 0 : index
    %c0_238 = arith.constant 0 : index
    %523 = vector.load %arg9[%c4_235, %c0_236, %c0_237, %c0_238] : memref<6x4x5x5xbf16, #tpu.memory_space<vmem>>, vector<1x1x5x5xbf16>
    %524 = vector.shape_cast %523 : vector<1x1x5x5xbf16> to vector<5x5xbf16>
    %525 = vector.shape_cast %522 : vector<5x5xbf16> to vector<1x1x5x5xbf16>
    tpu.vector_store %arg9[%c4_235, %c0_236, %c0_237, %c0_238], %525 {strides = array<i32>} : memref<6x4x5x5xbf16, #tpu.memory_space<vmem>>, vector<1x1x5x5xbf16>,
    %cst_239 = arith.constant dense<0xFF800000> : vector<5xf32>
    %526 = vector.multi_reduction <maximumf>, %521, %cst_239 [1] : vector<5x5xf32> to vector<5xf32>
    %527 = vector.shape_cast %526 : vector<5xf32> to vector<5x1xf32>
    %528 = vector.broadcast %527 : vector<5x1xf32> to vector<5x5xf32>
    %529 = arith.subf %521, %528 : vector<5x5xf32>
    %530 = math.exp %529 : vector<5x5xf32>
    %cst_240 = arith.constant dense<0.000000e+00> : vector<5xf32>
    %531 = vector.multi_reduction <add>, %530, %cst_240 [1] : vector<5x5xf32> to vector<5xf32>
    %532 = vector.shape_cast %531 : vector<5xf32> to vector<5x1xf32>
    %533 = tpu.reciprocal %532 {approx = true} : vector<5x1xf32> -> vector<5x1xf32>
    %534 = vector.broadcast %533 : vector<5x1xf32> to vector<5x5xf32>
    %535 = arith.mulf %530, %534 : vector<5x5xf32>
    %536 = arith.truncf %535 : vector<5x5xf32> to vector<5x5xbf16>
    %cst_241 = arith.constant dense<0.000000e+00> : vector<5x8xf32>
    %537 = tpu.matmul %536, %518, %cst_241 {dimension_numbers = #tpu.dot_dimension_numbers<[1], [0], [0], [1], [0, 0, 1, 1], [], []>} : vector<5x5xbf16>, vector<5x8xbf16>, vector<5x8xf32> -> vector<5x8xf32>
    %538 = arith.truncf %537 : vector<5x8xf32> to vector<5x8xbf16>
    %c0_242 = arith.constant 0 : index
    %c0_243 = arith.constant 0 : index
    %539 = vector.load %arg11[%c0_242, %c0_243] : memref<5x32xbf16, #tpu.memory_space<vmem>>, vector<5x8xbf16>
    tpu.vector_store %arg11[%c0_242, %c0_243], %538 {strides = array<i32>} : memref<5x32xbf16, #tpu.memory_space<vmem>>, vector<5x8xbf16>,
    %540 = vector.extract_strided_slice %515 {offsets = [0, 8], sizes = [5, 8], strides = [1, 1]} : vector<5x96xbf16> to vector<5x8xbf16>
    %541 = vector.extract_strided_slice %515 {offsets = [0, 40], sizes = [5, 8], strides = [1, 1]} : vector<5x96xbf16> to vector<5x8xbf16>
    %542 = vector.extract_strided_slice %515 {offsets = [0, 72], sizes = [5, 8], strides = [1, 1]} : vector<5x96xbf16> to vector<5x8xbf16>
    "tpu.trace_start"() <{level = 10 : i32, message = "qc,kc->qk"}> : () -> ()
    %cst_244 = arith.constant dense<0.000000e+00> : vector<5x5xf32>
    %543 = tpu.matmul %540, %541, %cst_244 {dimension_numbers = #tpu.dot_dimension_numbers<[1], [1], [0], [0], [0, 0, 1, 0], [], []>} : vector<5x8xbf16>, vector<5x8xbf16>, vector<5x5xf32> -> vector<5x5xf32>
    "tpu.trace_stop"() : () -> ()
    %cst_245 = arith.constant 0.353553385 : f32
    %544 = vector.broadcast %cst_245 : f32 to vector<5x5xf32>
    %545 = arith.mulf %543, %544 : vector<5x5xf32>
    %546 = arith.truncf %545 : vector<5x5xf32> to vector<5x5xbf16>
    %c4_246 = arith.constant 4 : index
    %c1_247 = arith.constant 1 : index
    %c0_248 = arith.constant 0 : index
    %c0_249 = arith.constant 0 : index
    %547 = vector.load %arg9[%c4_246, %c1_247, %c0_248, %c0_249] : memref<6x4x5x5xbf16, #tpu.memory_space<vmem>>, vector<1x1x5x5xbf16>
    %548 = vector.shape_cast %547 : vector<1x1x5x5xbf16> to vector<5x5xbf16>
    %549 = vector.shape_cast %546 : vector<5x5xbf16> to vector<1x1x5x5xbf16>
    tpu.vector_store %arg9[%c4_246, %c1_247, %c0_248, %c0_249], %549 {strides = array<i32>} : memref<6x4x5x5xbf16, #tpu.memory_space<vmem>>, vector<1x1x5x5xbf16>,
    %cst_250 = arith.constant dense<0xFF800000> : vector<5xf32>
    %550 = vector.multi_reduction <maximumf>, %545, %cst_250 [1] : vector<5x5xf32> to vector<5xf32>
    %551 = vector.shape_cast %550 : vector<5xf32> to vector<5x1xf32>
    %552 = vector.broadcast %551 : vector<5x1xf32> to vector<5x5xf32>
    %553 = arith.subf %545, %552 : vector<5x5xf32>
    %554 = math.exp %553 : vector<5x5xf32>
    %cst_251 = arith.constant dense<0.000000e+00> : vector<5xf32>
    %555 = vector.multi_reduction <add>, %554, %cst_251 [1] : vector<5x5xf32> to vector<5xf32>
    %556 = vector.shape_cast %555 : vector<5xf32> to vector<5x1xf32>
    %557 = tpu.reciprocal %556 {approx = true} : vector<5x1xf32> -> vector<5x1xf32>
    %558 = vector.broadcast %557 : vector<5x1xf32> to vector<5x5xf32>
    %559 = arith.mulf %554, %558 : vector<5x5xf32>
    %560 = arith.truncf %559 : vector<5x5xf32> to vector<5x5xbf16>
    %cst_252 = arith.constant dense<0.000000e+00> : vector<5x8xf32>
    %561 = tpu.matmul %560, %542, %cst_252 {dimension_numbers = #tpu.dot_dimension_numbers<[1], [0], [0], [1], [0, 0, 1, 1], [], []>} : vector<5x5xbf16>, vector<5x8xbf16>, vector<5x8xf32> -> vector<5x8xf32>
    %562 = arith.truncf %561 : vector<5x8xf32> to vector<5x8xbf16>
    %c0_253 = arith.constant 0 : index
    %c8_254 = arith.constant 8 : index
    %563 = vector.load %arg11[%c0_253, %c8_254] : memref<5x32xbf16, #tpu.memory_space<vmem>>, vector<5x8xbf16>
    tpu.vector_store %arg11[%c0_253, %c8_254], %562 {strides = array<i32>} : memref<5x32xbf16, #tpu.memory_space<vmem>>, vector<5x8xbf16>,
    %564 = vector.extract_strided_slice %515 {offsets = [0, 16], sizes = [5, 8], strides = [1, 1]} : vector<5x96xbf16> to vector<5x8xbf16>
    %565 = vector.extract_strided_slice %515 {offsets = [0, 48], sizes = [5, 8], strides = [1, 1]} : vector<5x96xbf16> to vector<5x8xbf16>
    %566 = vector.extract_strided_slice %515 {offsets = [0, 80], sizes = [5, 8], strides = [1, 1]} : vector<5x96xbf16> to vector<5x8xbf16>
    "tpu.trace_start"() <{level = 10 : i32, message = "qc,kc->qk"}> : () -> ()
    %cst_255 = arith.constant dense<0.000000e+00> : vector<5x5xf32>
    %567 = tpu.matmul %564, %565, %cst_255 {dimension_numbers = #tpu.dot_dimension_numbers<[1], [1], [0], [0], [0, 0, 1, 0], [], []>} : vector<5x8xbf16>, vector<5x8xbf16>, vector<5x5xf32> -> vector<5x5xf32>
    "tpu.trace_stop"() : () -> ()
    %cst_256 = arith.constant 0.353553385 : f32
    %568 = vector.broadcast %cst_256 : f32 to vector<5x5xf32>
    %569 = arith.mulf %567, %568 : vector<5x5xf32>
    %570 = arith.truncf %569 : vector<5x5xf32> to vector<5x5xbf16>
    %c4_257 = arith.constant 4 : index
    %c2_258 = arith.constant 2 : index
    %c0_259 = arith.constant 0 : index
    %c0_260 = arith.constant 0 : index
    %571 = vector.load %arg9[%c4_257, %c2_258, %c0_259, %c0_260] : memref<6x4x5x5xbf16, #tpu.memory_space<vmem>>, vector<1x1x5x5xbf16>
    %572 = vector.shape_cast %571 : vector<1x1x5x5xbf16> to vector<5x5xbf16>
    %573 = vector.shape_cast %570 : vector<5x5xbf16> to vector<1x1x5x5xbf16>
    tpu.vector_store %arg9[%c4_257, %c2_258, %c0_259, %c0_260], %573 {strides = array<i32>} : memref<6x4x5x5xbf16, #tpu.memory_space<vmem>>, vector<1x1x5x5xbf16>,
    %cst_261 = arith.constant dense<0xFF800000> : vector<5xf32>
    %574 = vector.multi_reduction <maximumf>, %569, %cst_261 [1] : vector<5x5xf32> to vector<5xf32>
    %575 = vector.shape_cast %574 : vector<5xf32> to vector<5x1xf32>
    %576 = vector.broadcast %575 : vector<5x1xf32> to vector<5x5xf32>
    %577 = arith.subf %569, %576 : vector<5x5xf32>
    %578 = math.exp %577 : vector<5x5xf32>
    %cst_262 = arith.constant dense<0.000000e+00> : vector<5xf32>
    %579 = vector.multi_reduction <add>, %578, %cst_262 [1] : vector<5x5xf32> to vector<5xf32>
    %580 = vector.shape_cast %579 : vector<5xf32> to vector<5x1xf32>
    %581 = tpu.reciprocal %580 {approx = true} : vector<5x1xf32> -> vector<5x1xf32>
    %582 = vector.broadcast %581 : vector<5x1xf32> to vector<5x5xf32>
    %583 = arith.mulf %578, %582 : vector<5x5xf32>
    %584 = arith.truncf %583 : vector<5x5xf32> to vector<5x5xbf16>
    %cst_263 = arith.constant dense<0.000000e+00> : vector<5x8xf32>
    %585 = tpu.matmul %584, %566, %cst_263 {dimension_numbers = #tpu.dot_dimension_numbers<[1], [0], [0], [1], [0, 0, 1, 1], [], []>} : vector<5x5xbf16>, vector<5x8xbf16>, vector<5x8xf32> -> vector<5x8xf32>
    %586 = arith.truncf %585 : vector<5x8xf32> to vector<5x8xbf16>
    %c0_264 = arith.constant 0 : index
    %c16_265 = arith.constant 16 : index
    %587 = vector.load %arg11[%c0_264, %c16_265] : memref<5x32xbf16, #tpu.memory_space<vmem>>, vector<5x8xbf16>
    tpu.vector_store %arg11[%c0_264, %c16_265], %586 {strides = array<i32>} : memref<5x32xbf16, #tpu.memory_space<vmem>>, vector<5x8xbf16>,
    %588 = vector.extract_strided_slice %515 {offsets = [0, 24], sizes = [5, 8], strides = [1, 1]} : vector<5x96xbf16> to vector<5x8xbf16>
    %589 = vector.extract_strided_slice %515 {offsets = [0, 56], sizes = [5, 8], strides = [1, 1]} : vector<5x96xbf16> to vector<5x8xbf16>
    %590 = vector.extract_strided_slice %515 {offsets = [0, 88], sizes = [5, 8], strides = [1, 1]} : vector<5x96xbf16> to vector<5x8xbf16>
    "tpu.trace_start"() <{level = 10 : i32, message = "qc,kc->qk"}> : () -> ()
    %cst_266 = arith.constant dense<0.000000e+00> : vector<5x5xf32>
    %591 = tpu.matmul %588, %589, %cst_266 {dimension_numbers = #tpu.dot_dimension_numbers<[1], [1], [0], [0], [0, 0, 1, 0], [], []>} : vector<5x8xbf16>, vector<5x8xbf16>, vector<5x5xf32> -> vector<5x5xf32>
    "tpu.trace_stop"() : () -> ()
    %cst_267 = arith.constant 0.353553385 : f32
    %592 = vector.broadcast %cst_267 : f32 to vector<5x5xf32>
    %593 = arith.mulf %591, %592 : vector<5x5xf32>
    %594 = arith.truncf %593 : vector<5x5xf32> to vector<5x5xbf16>
    %c4_268 = arith.constant 4 : index
    %c3_269 = arith.constant 3 : index
    %c0_270 = arith.constant 0 : index
    %c0_271 = arith.constant 0 : index
    %595 = vector.load %arg9[%c4_268, %c3_269, %c0_270, %c0_271] : memref<6x4x5x5xbf16, #tpu.memory_space<vmem>>, vector<1x1x5x5xbf16>
    %596 = vector.shape_cast %595 : vector<1x1x5x5xbf16> to vector<5x5xbf16>
    %597 = vector.shape_cast %594 : vector<5x5xbf16> to vector<1x1x5x5xbf16>
    tpu.vector_store %arg9[%c4_268, %c3_269, %c0_270, %c0_271], %597 {strides = array<i32>} : memref<6x4x5x5xbf16, #tpu.memory_space<vmem>>, vector<1x1x5x5xbf16>,
    %cst_272 = arith.constant dense<0xFF800000> : vector<5xf32>
    %598 = vector.multi_reduction <maximumf>, %593, %cst_272 [1] : vector<5x5xf32> to vector<5xf32>
    %599 = vector.shape_cast %598 : vector<5xf32> to vector<5x1xf32>
    %600 = vector.broadcast %599 : vector<5x1xf32> to vector<5x5xf32>
    %601 = arith.subf %593, %600 : vector<5x5xf32>
    %602 = math.exp %601 : vector<5x5xf32>
    %cst_273 = arith.constant dense<0.000000e+00> : vector<5xf32>
    %603 = vector.multi_reduction <add>, %602, %cst_273 [1] : vector<5x5xf32> to vector<5xf32>
    %604 = vector.shape_cast %603 : vector<5xf32> to vector<5x1xf32>
    %605 = tpu.reciprocal %604 {approx = true} : vector<5x1xf32> -> vector<5x1xf32>
    %606 = vector.broadcast %605 : vector<5x1xf32> to vector<5x5xf32>
    %607 = arith.mulf %602, %606 : vector<5x5xf32>
    %608 = arith.truncf %607 : vector<5x5xf32> to vector<5x5xbf16>
    %cst_274 = arith.constant dense<0.000000e+00> : vector<5x8xf32>
    %609 = tpu.matmul %608, %590, %cst_274 {dimension_numbers = #tpu.dot_dimension_numbers<[1], [0], [0], [1], [0, 0, 1, 1], [], []>} : vector<5x5xbf16>, vector<5x8xbf16>, vector<5x8xf32> -> vector<5x8xf32>
    %610 = arith.truncf %609 : vector<5x8xf32> to vector<5x8xbf16>
    %c0_275 = arith.constant 0 : index
    %c24_276 = arith.constant 24 : index
    %611 = vector.load %arg11[%c0_275, %c24_276] : memref<5x32xbf16, #tpu.memory_space<vmem>>, vector<5x8xbf16>
    tpu.vector_store %arg11[%c0_275, %c24_276], %610 {strides = array<i32>} : memref<5x32xbf16, #tpu.memory_space<vmem>>, vector<5x8xbf16>,
    %c0_277 = arith.constant 0 : index
    %c0_278 = arith.constant 0 : index
    %612 = vector.load %arg11[%c0_277, %c0_278] : memref<5x32xbf16, #tpu.memory_space<vmem>>, vector<5x32xbf16>
    %cst_279 = arith.constant dense<0.000000e+00> : vector<5x32xf32>
    %613 = tpu.matmul %612, %4, %cst_279 {dimension_numbers = #tpu.dot_dimension_numbers<[1], [0], [0], [1], [0, 0, 1, 1], [], []>} : vector<5x32xbf16>, vector<32x32xbf16>, vector<5x32xf32> -> vector<5x32xf32>
    %614 = arith.addf %510, %613 : vector<5x32xf32>
    %615 = vector.broadcast %5 : vector<1x32xf32> to vector<5x32xf32>
    %616 = arith.addf %614, %615 : vector<5x32xf32>
    %617 = arith.truncf %616 : vector<5x32xf32> to vector<5x32xbf16>
    %c4_280 = arith.constant 4 : index
    %c0_281 = arith.constant 0 : index
    %c0_282 = arith.constant 0 : index
    %618 = vector.load %arg8[%c4_280, %c0_281, %c0_282] : memref<6x5x32xbf16, #tpu.memory_space<vmem>>, vector<1x5x32xbf16>
    %619 = vector.shape_cast %618 : vector<1x5x32xbf16> to vector<5x32xbf16>
    %620 = vector.shape_cast %617 : vector<5x32xbf16> to vector<1x5x32xbf16>
    tpu.vector_store %arg8[%c4_280, %c0_281, %c0_282], %620 {strides = array<i32>} : memref<6x5x32xbf16, #tpu.memory_space<vmem>>, vector<1x5x32xbf16>,
    %cst_283 = arith.constant dense<0.000000e+00> : vector<32xf32>
    %621 = vector.multi_reduction <add>, %616, %cst_283 [0] : vector<5x32xf32> to vector<32xf32>
    %622 = vector.shape_cast %621 : vector<32xf32> to vector<1x32xf32>
    %623 = arith.addf %499, %622 : vector<1x32xf32>
    %624 = arith.mulf %616, %616 : vector<5x32xf32>
    %cst_284 = arith.constant dense<0.000000e+00> : vector<32xf32>
    %625 = vector.multi_reduction <add>, %624, %cst_284 [0] : vector<5x32xf32> to vector<32xf32>
    %626 = vector.shape_cast %625 : vector<32xf32> to vector<1x32xf32>
    %627 = arith.addf %503, %626 : vector<1x32xf32>
    %c5 = arith.constant 5 : index
    %c0_285 = arith.constant 0 : index
    %c0_286 = arith.constant 0 : index
    %628 = vector.load %arg1[%c5, %c0_285, %c0_286] : memref<6x5x32xbf16, #tpu.memory_space<vmem>>, vector<1x5x32xbf16>
    %629 = vector.shape_cast %628 : vector<1x5x32xbf16> to vector<5x32xbf16>
    %630 = arith.extf %629 : vector<5x32xbf16> to vector<5x32xf32>
    %631 = vector.broadcast %0 : vector<1x32xf32> to vector<5x32xf32>
    %632 = arith.mulf %630, %631 : vector<5x32xf32>
    %633 = vector.broadcast %1 : vector<1x32xf32> to vector<5x32xf32>
    %634 = arith.addf %632, %633 : vector<5x32xf32>
    %635 = arith.truncf %634 : vector<5x32xf32> to vector<5x32xbf16>
    %cst_287 = arith.constant dense<0.000000e+00> : vector<5x96xf32>
    %636 = tpu.matmul %635, %2, %cst_287 {dimension_numbers = #tpu.dot_dimension_numbers<[1], [0], [0], [1], [0, 0, 1, 1], [], []>} : vector<5x32xbf16>, vector<32x96xbf16>, vector<5x96xf32> -> vector<5x96xf32>
    %637 = vector.broadcast %3 : vector<1x96xf32> to vector<5x96xf32>
    %638 = arith.addf %636, %637 : vector<5x96xf32>
    %639 = arith.truncf %638 : vector<5x96xf32> to vector<5x96xbf16>
    %640 = vector.extract_strided_slice %639 {offsets = [0, 0], sizes = [5, 8], strides = [1, 1]} : vector<5x96xbf16> to vector<5x8xbf16>
    %641 = vector.extract_strided_slice %639 {offsets = [0, 32], sizes = [5, 8], strides = [1, 1]} : vector<5x96xbf16> to vector<5x8xbf16>
    %642 = vector.extract_strided_slice %639 {offsets = [0, 64], sizes = [5, 8], strides = [1, 1]} : vector<5x96xbf16> to vector<5x8xbf16>
    "tpu.trace_start"() <{level = 10 : i32, message = "qc,kc->qk"}> : () -> ()
    %cst_288 = arith.constant dense<0.000000e+00> : vector<5x5xf32>
    %643 = tpu.matmul %640, %641, %cst_288 {dimension_numbers = #tpu.dot_dimension_numbers<[1], [1], [0], [0], [0, 0, 1, 0], [], []>} : vector<5x8xbf16>, vector<5x8xbf16>, vector<5x5xf32> -> vector<5x5xf32>
    "tpu.trace_stop"() : () -> ()
    %cst_289 = arith.constant 0.353553385 : f32
    %644 = vector.broadcast %cst_289 : f32 to vector<5x5xf32>
    %645 = arith.mulf %643, %644 : vector<5x5xf32>
    %646 = arith.truncf %645 : vector<5x5xf32> to vector<5x5xbf16>
    %c5_290 = arith.constant 5 : index
    %c0_291 = arith.constant 0 : index
    %c0_292 = arith.constant 0 : index
    %c0_293 = arith.constant 0 : index
    %647 = vector.load %arg9[%c5_290, %c0_291, %c0_292, %c0_293] : memref<6x4x5x5xbf16, #tpu.memory_space<vmem>>, vector<1x1x5x5xbf16>
    %648 = vector.shape_cast %647 : vector<1x1x5x5xbf16> to vector<5x5xbf16>
    %649 = vector.shape_cast %646 : vector<5x5xbf16> to vector<1x1x5x5xbf16>
    tpu.vector_store %arg9[%c5_290, %c0_291, %c0_292, %c0_293], %649 {strides = array<i32>} : memref<6x4x5x5xbf16, #tpu.memory_space<vmem>>, vector<1x1x5x5xbf16>,
    %cst_294 = arith.constant dense<0xFF800000> : vector<5xf32>
    %650 = vector.multi_reduction <maximumf>, %645, %cst_294 [1] : vector<5x5xf32> to vector<5xf32>
    %651 = vector.shape_cast %650 : vector<5xf32> to vector<5x1xf32>
    %652 = vector.broadcast %651 : vector<5x1xf32> to vector<5x5xf32>
    %653 = arith.subf %645, %652 : vector<5x5xf32>
    %654 = math.exp %653 : vector<5x5xf32>
    %cst_295 = arith.constant dense<0.000000e+00> : vector<5xf32>
    %655 = vector.multi_reduction <add>, %654, %cst_295 [1] : vector<5x5xf32> to vector<5xf32>
    %656 = vector.shape_cast %655 : vector<5xf32> to vector<5x1xf32>
    %657 = tpu.reciprocal %656 {approx = true} : vector<5x1xf32> -> vector<5x1xf32>
    %658 = vector.broadcast %657 : vector<5x1xf32> to vector<5x5xf32>
    %659 = arith.mulf %654, %658 : vector<5x5xf32>
    %660 = arith.truncf %659 : vector<5x5xf32> to vector<5x5xbf16>
    %cst_296 = arith.constant dense<0.000000e+00> : vector<5x8xf32>
    %661 = tpu.matmul %660, %642, %cst_296 {dimension_numbers = #tpu.dot_dimension_numbers<[1], [0], [0], [1], [0, 0, 1, 1], [], []>} : vector<5x5xbf16>, vector<5x8xbf16>, vector<5x8xf32> -> vector<5x8xf32>
    %662 = arith.truncf %661 : vector<5x8xf32> to vector<5x8xbf16>
    %c0_297 = arith.constant 0 : index
    %c0_298 = arith.constant 0 : index
    %663 = vector.load %arg11[%c0_297, %c0_298] : memref<5x32xbf16, #tpu.memory_space<vmem>>, vector<5x8xbf16>
    tpu.vector_store %arg11[%c0_297, %c0_298], %662 {strides = array<i32>} : memref<5x32xbf16, #tpu.memory_space<vmem>>, vector<5x8xbf16>,
    %664 = vector.extract_strided_slice %639 {offsets = [0, 8], sizes = [5, 8], strides = [1, 1]} : vector<5x96xbf16> to vector<5x8xbf16>
    %665 = vector.extract_strided_slice %639 {offsets = [0, 40], sizes = [5, 8], strides = [1, 1]} : vector<5x96xbf16> to vector<5x8xbf16>
    %666 = vector.extract_strided_slice %639 {offsets = [0, 72], sizes = [5, 8], strides = [1, 1]} : vector<5x96xbf16> to vector<5x8xbf16>
    "tpu.trace_start"() <{level = 10 : i32, message = "qc,kc->qk"}> : () -> ()
    %cst_299 = arith.constant dense<0.000000e+00> : vector<5x5xf32>
    %667 = tpu.matmul %664, %665, %cst_299 {dimension_numbers = #tpu.dot_dimension_numbers<[1], [1], [0], [0], [0, 0, 1, 0], [], []>} : vector<5x8xbf16>, vector<5x8xbf16>, vector<5x5xf32> -> vector<5x5xf32>
    "tpu.trace_stop"() : () -> ()
    %cst_300 = arith.constant 0.353553385 : f32
    %668 = vector.broadcast %cst_300 : f32 to vector<5x5xf32>
    %669 = arith.mulf %667, %668 : vector<5x5xf32>
    %670 = arith.truncf %669 : vector<5x5xf32> to vector<5x5xbf16>
    %c5_301 = arith.constant 5 : index
    %c1_302 = arith.constant 1 : index
    %c0_303 = arith.constant 0 : index
    %c0_304 = arith.constant 0 : index
    %671 = vector.load %arg9[%c5_301, %c1_302, %c0_303, %c0_304] : memref<6x4x5x5xbf16, #tpu.memory_space<vmem>>, vector<1x1x5x5xbf16>
    %672 = vector.shape_cast %671 : vector<1x1x5x5xbf16> to vector<5x5xbf16>
    %673 = vector.shape_cast %670 : vector<5x5xbf16> to vector<1x1x5x5xbf16>
    tpu.vector_store %arg9[%c5_301, %c1_302, %c0_303, %c0_304], %673 {strides = array<i32>} : memref<6x4x5x5xbf16, #tpu.memory_space<vmem>>, vector<1x1x5x5xbf16>,
    %cst_305 = arith.constant dense<0xFF800000> : vector<5xf32>
    %674 = vector.multi_reduction <maximumf>, %669, %cst_305 [1] : vector<5x5xf32> to vector<5xf32>
    %675 = vector.shape_cast %674 : vector<5xf32> to vector<5x1xf32>
    %676 = vector.broadcast %675 : vector<5x1xf32> to vector<5x5xf32>
    %677 = arith.subf %669, %676 : vector<5x5xf32>
    %678 = math.exp %677 : vector<5x5xf32>
    %cst_306 = arith.constant dense<0.000000e+00> : vector<5xf32>
    %679 = vector.multi_reduction <add>, %678, %cst_306 [1] : vector<5x5xf32> to vector<5xf32>
    %680 = vector.shape_cast %679 : vector<5xf32> to vector<5x1xf32>
    %681 = tpu.reciprocal %680 {approx = true} : vector<5x1xf32> -> vector<5x1xf32>
    %682 = vector.broadcast %681 : vector<5x1xf32> to vector<5x5xf32>
    %683 = arith.mulf %678, %682 : vector<5x5xf32>
    %684 = arith.truncf %683 : vector<5x5xf32> to vector<5x5xbf16>
    %cst_307 = arith.constant dense<0.000000e+00> : vector<5x8xf32>
    %685 = tpu.matmul %684, %666, %cst_307 {dimension_numbers = #tpu.dot_dimension_numbers<[1], [0], [0], [1], [0, 0, 1, 1], [], []>} : vector<5x5xbf16>, vector<5x8xbf16>, vector<5x8xf32> -> vector<5x8xf32>
    %686 = arith.truncf %685 : vector<5x8xf32> to vector<5x8xbf16>
    %c0_308 = arith.constant 0 : index
    %c8_309 = arith.constant 8 : index
    %687 = vector.load %arg11[%c0_308, %c8_309] : memref<5x32xbf16, #tpu.memory_space<vmem>>, vector<5x8xbf16>
    tpu.vector_store %arg11[%c0_308, %c8_309], %686 {strides = array<i32>} : memref<5x32xbf16, #tpu.memory_space<vmem>>, vector<5x8xbf16>,
    %688 = vector.extract_strided_slice %639 {offsets = [0, 16], sizes = [5, 8], strides = [1, 1]} : vector<5x96xbf16> to vector<5x8xbf16>
    %689 = vector.extract_strided_slice %639 {offsets = [0, 48], sizes = [5, 8], strides = [1, 1]} : vector<5x96xbf16> to vector<5x8xbf16>
    %690 = vector.extract_strided_slice %639 {offsets = [0, 80], sizes = [5, 8], strides = [1, 1]} : vector<5x96xbf16> to vector<5x8xbf16>
    "tpu.trace_start"() <{level = 10 : i32, message = "qc,kc->qk"}> : () -> ()
    %cst_310 = arith.constant dense<0.000000e+00> : vector<5x5xf32>
    %691 = tpu.matmul %688, %689, %cst_310 {dimension_numbers = #tpu.dot_dimension_numbers<[1], [1], [0], [0], [0, 0, 1, 0], [], []>} : vector<5x8xbf16>, vector<5x8xbf16>, vector<5x5xf32> -> vector<5x5xf32>
    "tpu.trace_stop"() : () -> ()
    %cst_311 = arith.constant 0.353553385 : f32
    %692 = vector.broadcast %cst_311 : f32 to vector<5x5xf32>
    %693 = arith.mulf %691, %692 : vector<5x5xf32>
    %694 = arith.truncf %693 : vector<5x5xf32> to vector<5x5xbf16>
    %c5_312 = arith.constant 5 : index
    %c2_313 = arith.constant 2 : index
    %c0_314 = arith.constant 0 : index
    %c0_315 = arith.constant 0 : index
    %695 = vector.load %arg9[%c5_312, %c2_313, %c0_314, %c0_315] : memref<6x4x5x5xbf16, #tpu.memory_space<vmem>>, vector<1x1x5x5xbf16>
    %696 = vector.shape_cast %695 : vector<1x1x5x5xbf16> to vector<5x5xbf16>
    %697 = vector.shape_cast %694 : vector<5x5xbf16> to vector<1x1x5x5xbf16>
    tpu.vector_store %arg9[%c5_312, %c2_313, %c0_314, %c0_315], %697 {strides = array<i32>} : memref<6x4x5x5xbf16, #tpu.memory_space<vmem>>, vector<1x1x5x5xbf16>,
    %cst_316 = arith.constant dense<0xFF800000> : vector<5xf32>
    %698 = vector.multi_reduction <maximumf>, %693, %cst_316 [1] : vector<5x5xf32> to vector<5xf32>
    %699 = vector.shape_cast %698 : vector<5xf32> to vector<5x1xf32>
    %700 = vector.broadcast %699 : vector<5x1xf32> to vector<5x5xf32>
    %701 = arith.subf %693, %700 : vector<5x5xf32>
    %702 = math.exp %701 : vector<5x5xf32>
    %cst_317 = arith.constant dense<0.000000e+00> : vector<5xf32>
    %703 = vector.multi_reduction <add>, %702, %cst_317 [1] : vector<5x5xf32> to vector<5xf32>
    %704 = vector.shape_cast %703 : vector<5xf32> to vector<5x1xf32>
    %705 = tpu.reciprocal %704 {approx = true} : vector<5x1xf32> -> vector<5x1xf32>
    %706 = vector.broadcast %705 : vector<5x1xf32> to vector<5x5xf32>
    %707 = arith.mulf %702, %706 : vector<5x5xf32>
    %708 = arith.truncf %707 : vector<5x5xf32> to vector<5x5xbf16>
    %cst_318 = arith.constant dense<0.000000e+00> : vector<5x8xf32>
    %709 = tpu.matmul %708, %690, %cst_318 {dimension_numbers = #tpu.dot_dimension_numbers<[1], [0], [0], [1], [0, 0, 1, 1], [], []>} : vector<5x5xbf16>, vector<5x8xbf16>, vector<5x8xf32> -> vector<5x8xf32>
    %710 = arith.truncf %709 : vector<5x8xf32> to vector<5x8xbf16>
    %c0_319 = arith.constant 0 : index
    %c16_320 = arith.constant 16 : index
    %711 = vector.load %arg11[%c0_319, %c16_320] : memref<5x32xbf16, #tpu.memory_space<vmem>>, vector<5x8xbf16>
    tpu.vector_store %arg11[%c0_319, %c16_320], %710 {strides = array<i32>} : memref<5x32xbf16, #tpu.memory_space<vmem>>, vector<5x8xbf16>,
    %712 = vector.extract_strided_slice %639 {offsets = [0, 24], sizes = [5, 8], strides = [1, 1]} : vector<5x96xbf16> to vector<5x8xbf16>
    %713 = vector.extract_strided_slice %639 {offsets = [0, 56], sizes = [5, 8], strides = [1, 1]} : vector<5x96xbf16> to vector<5x8xbf16>
    %714 = vector.extract_strided_slice %639 {offsets = [0, 88], sizes = [5, 8], strides = [1, 1]} : vector<5x96xbf16> to vector<5x8xbf16>
    "tpu.trace_start"() <{level = 10 : i32, message = "qc,kc->qk"}> : () -> ()
    %cst_321 = arith.constant dense<0.000000e+00> : vector<5x5xf32>
    %715 = tpu.matmul %712, %713, %cst_321 {dimension_numbers = #tpu.dot_dimension_numbers<[1], [1], [0], [0], [0, 0, 1, 0], [], []>} : vector<5x8xbf16>, vector<5x8xbf16>, vector<5x5xf32> -> vector<5x5xf32>
    "tpu.trace_stop"() : () -> ()
    %cst_322 = arith.constant 0.353553385 : f32
    %716 = vector.broadcast %cst_322 : f32 to vector<5x5xf32>
    %717 = arith.mulf %715, %716 : vector<5x5xf32>
    %718 = arith.truncf %717 : vector<5x5xf32> to vector<5x5xbf16>
    %c5_323 = arith.constant 5 : index
    %c3_324 = arith.constant 3 : index
    %c0_325 = arith.constant 0 : index
    %c0_326 = arith.constant 0 : index
    %719 = vector.load %arg9[%c5_323, %c3_324, %c0_325, %c0_326] : memref<6x4x5x5xbf16, #tpu.memory_space<vmem>>, vector<1x1x5x5xbf16>
    %720 = vector.shape_cast %719 : vector<1x1x5x5xbf16> to vector<5x5xbf16>
    %721 = vector.shape_cast %718 : vector<5x5xbf16> to vector<1x1x5x5xbf16>
    tpu.vector_store %arg9[%c5_323, %c3_324, %c0_325, %c0_326], %721 {strides = array<i32>} : memref<6x4x5x5xbf16, #tpu.memory_space<vmem>>, vector<1x1x5x5xbf16>,
    %cst_327 = arith.constant dense<0xFF800000> : vector<5xf32>
    %722 = vector.multi_reduction <maximumf>, %717, %cst_327 [1] : vector<5x5xf32> to vector<5xf32>
    %723 = vector.shape_cast %722 : vector<5xf32> to vector<5x1xf32>
    %724 = vector.broadcast %723 : vector<5x1xf32> to vector<5x5xf32>
    %725 = arith.subf %717, %724 : vector<5x5xf32>
    %726 = math.exp %725 : vector<5x5xf32>
    %cst_328 = arith.constant dense<0.000000e+00> : vector<5xf32>
    %727 = vector.multi_reduction <add>, %726, %cst_328 [1] : vector<5x5xf32> to vector<5xf32>
    %728 = vector.shape_cast %727 : vector<5xf32> to vector<5x1xf32>
    %729 = tpu.reciprocal %728 {approx = true} : vector<5x1xf32> -> vector<5x1xf32>
    %730 = vector.broadcast %729 : vector<5x1xf32> to vector<5x5xf32>
    %731 = arith.mulf %726, %730 : vector<5x5xf32>
    %732 = arith.truncf %731 : vector<5x5xf32> to vector<5x5xbf16>
    %cst_329 = arith.constant dense<0.000000e+00> : vector<5x8xf32>
    %733 = tpu.matmul %732, %714, %cst_329 {dimension_numbers = #tpu.dot_dimension_numbers<[1], [0], [0], [1], [0, 0, 1, 1], [], []>} : vector<5x5xbf16>, vector<5x8xbf16>, vector<5x8xf32> -> vector<5x8xf32>
    %734 = arith.truncf %733 : vector<5x8xf32> to vector<5x8xbf16>
    %c0_330 = arith.constant 0 : index
    %c24_331 = arith.constant 24 : index
    %735 = vector.load %arg11[%c0_330, %c24_331] : memref<5x32xbf16, #tpu.memory_space<vmem>>, vector<5x8xbf16>
    tpu.vector_store %arg11[%c0_330, %c24_331], %734 {strides = array<i32>} : memref<5x32xbf16, #tpu.memory_space<vmem>>, vector<5x8xbf16>,
    %c0_332 = arith.constant 0 : index
    %c0_333 = arith.constant 0 : index
    %736 = vector.load %arg11[%c0_332, %c0_333] : memref<5x32xbf16, #tpu.memory_space<vmem>>, vector<5x32xbf16>
    %cst_334 = arith.constant dense<0.000000e+00> : vector<5x32xf32>
    %737 = tpu.matmul %736, %4, %cst_334 {dimension_numbers = #tpu.dot_dimension_numbers<[1], [0], [0], [1], [0, 0, 1, 1], [], []>} : vector<5x32xbf16>, vector<32x32xbf16>, vector<5x32xf32> -> vector<5x32xf32>
    %738 = arith.addf %634, %737 : vector<5x32xf32>
    %739 = vector.broadcast %5 : vector<1x32xf32> to vector<5x32xf32>
    %740 = arith.addf %738, %739 : vector<5x32xf32>
    %741 = arith.truncf %740 : vector<5x32xf32> to vector<5x32xbf16>
    %c5_335 = arith.constant 5 : index
    %c0_336 = arith.constant 0 : index
    %c0_337 = arith.constant 0 : index
    %742 = vector.load %arg8[%c5_335, %c0_336, %c0_337] : memref<6x5x32xbf16, #tpu.memory_space<vmem>>, vector<1x5x32xbf16>
    %743 = vector.shape_cast %742 : vector<1x5x32xbf16> to vector<5x32xbf16>
    %744 = vector.shape_cast %741 : vector<5x32xbf16> to vector<1x5x32xbf16>
    tpu.vector_store %arg8[%c5_335, %c0_336, %c0_337], %744 {strides = array<i32>} : memref<6x5x32xbf16, #tpu.memory_space<vmem>>, vector<1x5x32xbf16>,
    %cst_338 = arith.constant dense<0.000000e+00> : vector<32xf32>
    %745 = vector.multi_reduction <add>, %740, %cst_338 [0] : vector<5x32xf32> to vector<32xf32>
    %746 = vector.shape_cast %745 : vector<32xf32> to vector<1x32xf32>
    %747 = arith.addf %623, %746 : vector<1x32xf32>
    %748 = arith.mulf %740, %740 : vector<5x32xf32>
    %cst_339 = arith.constant dense<0.000000e+00> : vector<32xf32>
    %749 = vector.multi_reduction <add>, %748, %cst_339 [0] : vector<5x32xf32> to vector<32xf32>
    %750 = vector.shape_cast %749 : vector<32xf32> to vector<1x32xf32>
    %751 = arith.addf %627, %750 : vector<1x32xf32>
    %752 = tpu.concatenate %747, %751 in 0 : vector<1x32xf32>, vector<1x32xf32> -> vector<2x32xf32>
    %c0_340 = arith.constant 0 : index
    %c0_341 = arith.constant 0 : index
    %c0_342 = arith.constant 0 : index
    %753 = vector.load %arg10[%c0_340, %c0_341, %c0_342] : memref<1x2x32xf32, #tpu.memory_space<vmem>>, vector<1x2x32xf32>
    %754 = vector.shape_cast %753 : vector<1x2x32xf32> to vector<2x32xf32>
    %755 = vector.shape_cast %752 : vector<2x32xf32> to vector<1x2x32xf32>
    tpu.vector_store %arg10[%c0_340, %c0_341, %c0_342], %755 {strides = array<i32>} : memref<1x2x32xf32, #tpu.memory_space<vmem>>, vector<1x2x32xf32>,
    return
  }
  func.func @transform_0(%arg0: i32) -> (i32, i32, i32) {
    %c0_i32 = arith.constant 0 : i32
    %c0_i32_0 = arith.constant 0 : i32
    %c0_i32_1 = arith.constant 0 : i32
    return %arg0, %c0_i32, %c0_i32_0 : i32, i32, i32
  }
  func.func @transform_1(%arg0: i32) -> (i32, i32) {
    %c0_i32 = arith.constant 0 : i32
    %c0_i32_0 = arith.constant 0 : i32
    %c0_i32_1 = arith.constant 0 : i32
    return %c0_i32, %c0_i32_0 : i32, i32
  }
  func.func @transform_2(%arg0: i32) -> (i32, i32) {
    %c0_i32 = arith.constant 0 : i32
    %c0_i32_0 = arith.constant 0 : i32
    %c0_i32_1 = arith.constant 0 : i32
    return %c0_i32, %c0_i32_0 : i32, i32
  }
  func.func @transform_3(%arg0: i32) -> (i32, i32) {
    %c0_i32 = arith.constant 0 : i32
    %c0_i32_0 = arith.constant 0 : i32
    %c0_i32_1 = arith.constant 0 : i32
    return %c0_i32, %c0_i32_0 : i32, i32
  }
  func.func @transform_4(%arg0: i32) -> (i32, i32) {
    %c0_i32 = arith.constant 0 : i32
    %c0_i32_0 = arith.constant 0 : i32
    %c0_i32_1 = arith.constant 0 : i32
    return %c0_i32, %c0_i32_0 : i32, i32
  }
  func.func @transform_5(%arg0: i32) -> (i32, i32) {
    %c0_i32 = arith.constant 0 : i32
    %c0_i32_0 = arith.constant 0 : i32
    %c0_i32_1 = arith.constant 0 : i32
    return %c0_i32, %c0_i32_0 : i32, i32
  }
  func.func @transform_6(%arg0: i32) -> (i32, i32) {
    %c0_i32 = arith.constant 0 : i32
    %c0_i32_0 = arith.constant 0 : i32
    %c0_i32_1 = arith.constant 0 : i32
    return %c0_i32, %c0_i32_0 : i32, i32
  }
  func.func @transform_7(%arg0: i32) -> (i32, i32, i32) {
    %c0_i32 = arith.constant 0 : i32
    %c0_i32_0 = arith.constant 0 : i32
    %c0_i32_1 = arith.constant 0 : i32
    return %arg0, %c0_i32, %c0_i32_0 : i32, i32, i32
  }
  func.func @transform_8(%arg0: i32) -> (i32, i32, i32, i32) {
    %c0_i32 = arith.constant 0 : i32
    %c0_i32_0 = arith.constant 0 : i32
    %c0_i32_1 = arith.constant 0 : i32
    %c0_i32_2 = arith.constant 0 : i32
    return %arg0, %c0_i32, %c0_i32_0, %c0_i32_1 : i32, i32, i32, i32
  }
  func.func @transform_9(%arg0: i32) -> (i32, i32, i32) {
    %c0_i32 = arith.constant 0 : i32
    %c0_i32_0 = arith.constant 0 : i32
    %c0_i32_1 = arith.constant 0 : i32
    return %arg0, %c0_i32, %c0_i32_0 : i32, i32, i32
  }
}

module attributes {stable_mosaic.version = 11 : i64} {
  func.func @_ffn_layer_kernel(%arg0: i32, %arg1: memref<30x32xbf16, #tpu.memory_space<vmem>>, %arg2: memref<1x32xf32, #tpu.memory_space<vmem>>, %arg3: memref<1x32xf32, #tpu.memory_space<vmem>>, %arg4: memref<32x64xbf16, #tpu.memory_space<vmem>>, %arg5: memref<1x64xf32, #tpu.memory_space<vmem>>, %arg6: memref<64x32xbf16, #tpu.memory_space<vmem>>, %arg7: memref<1x32xf32, #tpu.memory_space<vmem>>, %arg8: memref<30x32xbf16, #tpu.memory_space<vmem>>, %arg9: memref<1x2x32xf32, #tpu.memory_space<vmem>>) attributes {dimension_semantics = [#tpu.dimension_semantics<parallel>], iteration_bounds = array<i64: 1>, scalar_prefetch = 0 : i64, scratch_operands = 0 : i64, tpu.core_type = #tpu.core_type<tc>, window_params = [{transform_indices = @transform_0, window_bounds = array<i64: 30, 32>}, {pipeline_mode = #tpu.pipeline_mode<synchronous>, transform_indices = @transform_1, window_bounds = array<i64: 1, 32>}, {pipeline_mode = #tpu.pipeline_mode<synchronous>, transform_indices = @transform_2, window_bounds = array<i64: 1, 32>}, {pipeline_mode = #tpu.pipeline_mode<synchronous>, transform_indices = @transform_3, window_bounds = array<i64: 32, 64>}, {pipeline_mode = #tpu.pipeline_mode<synchronous>, transform_indices = @transform_4, window_bounds = array<i64: 1, 64>}, {pipeline_mode = #tpu.pipeline_mode<synchronous>, transform_indices = @transform_5, window_bounds = array<i64: 64, 32>}, {pipeline_mode = #tpu.pipeline_mode<synchronous>, transform_indices = @transform_6, window_bounds = array<i64: 1, 32>}, {transform_indices = @transform_7, window_bounds = array<i64: 30, 32>}, {transform_indices = @transform_8, window_bounds = array<i64: 1, 2, 32>}]} {
    %c0 = arith.constant 0 : index
    %c0_0 = arith.constant 0 : index
    %0 = vector.load %arg1[%c0, %c0_0] : memref<30x32xbf16, #tpu.memory_space<vmem>>, vector<30x32xbf16>
    %1 = arith.extf %0 : vector<30x32xbf16> to vector<30x32xf32>
    %c0_1 = arith.constant 0 : index
    %c0_2 = arith.constant 0 : index
    %2 = vector.load %arg2[%c0_1, %c0_2] : memref<1x32xf32, #tpu.memory_space<vmem>>, vector<1x32xf32>
    %3 = vector.broadcast %2 : vector<1x32xf32> to vector<30x32xf32>
    %4 = arith.mulf %1, %3 : vector<30x32xf32>
    %c0_3 = arith.constant 0 : index
    %c0_4 = arith.constant 0 : index
    %5 = vector.load %arg3[%c0_3, %c0_4] : memref<1x32xf32, #tpu.memory_space<vmem>>, vector<1x32xf32>
    %6 = vector.broadcast %5 : vector<1x32xf32> to vector<30x32xf32>
    %7 = arith.addf %4, %6 : vector<30x32xf32>
    %8 = arith.truncf %7 : vector<30x32xf32> to vector<30x32xbf16>
    %c0_5 = arith.constant 0 : index
    %c0_6 = arith.constant 0 : index
    %9 = vector.load %arg4[%c0_5, %c0_6] : memref<32x64xbf16, #tpu.memory_space<vmem>>, vector<32x64xbf16>
    %cst = arith.constant dense<0.000000e+00> : vector<30x64xf32>
    %10 = tpu.matmul %8, %9, %cst {dimension_numbers = #tpu.dot_dimension_numbers<[1], [0], [0], [1], [0, 0, 1, 1], [], []>} : vector<30x32xbf16>, vector<32x64xbf16>, vector<30x64xf32> -> vector<30x64xf32>
    %c0_7 = arith.constant 0 : index
    %c0_8 = arith.constant 0 : index
    %11 = vector.load %arg5[%c0_7, %c0_8] : memref<1x64xf32, #tpu.memory_space<vmem>>, vector<1x64xf32>
    %12 = vector.broadcast %11 : vector<1x64xf32> to vector<30x64xf32>
    %13 = arith.addf %10, %12 : vector<30x64xf32>
    %cst_9 = arith.constant 5.000000e-01 : f32
    %14 = vector.broadcast %cst_9 : f32 to vector<30x64xf32>
    %15 = arith.mulf %14, %13 : vector<30x64xf32>
    %cst_10 = arith.constant 0.707106769 : f32
    %16 = vector.broadcast %cst_10 : f32 to vector<30x64xf32>
    %17 = arith.mulf %13, %16 : vector<30x64xf32>
    %18 = math.absf %17 : vector<30x64xf32>
    %cst_11 = arith.constant 0.327591091 : f32
    %19 = vector.broadcast %cst_11 : f32 to vector<30x64xf32>
    %20 = arith.mulf %19, %18 : vector<30x64xf32>
    %cst_12 = arith.constant 1.000000e+00 : f32
    %21 = vector.broadcast %cst_12 : f32 to vector<30x64xf32>
    %22 = arith.addf %21, %20 : vector<30x64xf32>
    %cst_13 = arith.constant 1.000000e+00 : f32
    %23 = vector.broadcast %cst_13 : f32 to vector<30x64xf32>
    %24 = arith.divf %23, %22 : vector<30x64xf32>
    %cst_14 = arith.constant 1.06140542 : f32
    %25 = vector.broadcast %cst_14 : f32 to vector<30x64xf32>
    %26 = arith.mulf %25, %24 : vector<30x64xf32>
    %cst_15 = arith.constant -1.45315206 : f32
    %27 = vector.broadcast %cst_15 : f32 to vector<30x64xf32>
    %28 = arith.addf %26, %27 : vector<30x64xf32>
    %29 = arith.mulf %28, %24 : vector<30x64xf32>
    %cst_16 = arith.constant 1.42141378 : f32
    %30 = vector.broadcast %cst_16 : f32 to vector<30x64xf32>
    %31 = arith.addf %29, %30 : vector<30x64xf32>
    %32 = arith.mulf %31, %24 : vector<30x64xf32>
    %cst_17 = arith.constant -0.284496725 : f32
    %33 = vector.broadcast %cst_17 : f32 to vector<30x64xf32>
    %34 = arith.addf %32, %33 : vector<30x64xf32>
    %35 = arith.mulf %34, %24 : vector<30x64xf32>
    %cst_18 = arith.constant 0.254829586 : f32
    %36 = vector.broadcast %cst_18 : f32 to vector<30x64xf32>
    %37 = arith.addf %35, %36 : vector<30x64xf32>
    %38 = arith.mulf %37, %24 : vector<30x64xf32>
    %cst_19 = arith.constant 0.000000e+00 : f32
    %39 = vector.broadcast %cst_19 : f32 to vector<30x64xf32>
    %40 = arith.subf %39, %18 : vector<30x64xf32>
    %41 = arith.mulf %40, %18 : vector<30x64xf32>
    %42 = math.exp %41 : vector<30x64xf32>
    %43 = arith.mulf %38, %42 : vector<30x64xf32>
    %cst_20 = arith.constant 1.000000e+00 : f32
    %44 = vector.broadcast %cst_20 : f32 to vector<30x64xf32>
    %45 = arith.subf %44, %43 : vector<30x64xf32>
    %cst_21 = arith.constant 0.000000e+00 : f32
    %46 = vector.broadcast %cst_21 : f32 to vector<30x64xf32>
    %47 = arith.cmpf oge, %17, %46 : vector<30x64xf32>
    %cst_22 = arith.constant 0.000000e+00 : f32
    %48 = vector.broadcast %cst_22 : f32 to vector<30x64xf32>
    %49 = arith.subf %48, %45 : vector<30x64xf32>
    %50 = arith.select %47, %45, %49 : vector<30x64xi1>, vector<30x64xf32>
    %cst_23 = arith.constant 1.000000e+00 : f32
    %51 = vector.broadcast %cst_23 : f32 to vector<30x64xf32>
    %52 = arith.addf %51, %50 : vector<30x64xf32>
    %53 = arith.mulf %15, %52 : vector<30x64xf32>
    %54 = arith.truncf %53 : vector<30x64xf32> to vector<30x64xbf16>
    %c0_24 = arith.constant 0 : index
    %c0_25 = arith.constant 0 : index
    %55 = vector.load %arg6[%c0_24, %c0_25] : memref<64x32xbf16, #tpu.memory_space<vmem>>, vector<64x32xbf16>
    %cst_26 = arith.constant dense<0.000000e+00> : vector<30x32xf32>
    %56 = tpu.matmul %54, %55, %cst_26 {dimension_numbers = #tpu.dot_dimension_numbers<[1], [0], [0], [1], [0, 0, 1, 1], [], []>} : vector<30x64xbf16>, vector<64x32xbf16>, vector<30x32xf32> -> vector<30x32xf32>
    %57 = arith.addf %7, %56 : vector<30x32xf32>
    %c0_27 = arith.constant 0 : index
    %c0_28 = arith.constant 0 : index
    %58 = vector.load %arg7[%c0_27, %c0_28] : memref<1x32xf32, #tpu.memory_space<vmem>>, vector<1x32xf32>
    %59 = vector.broadcast %58 : vector<1x32xf32> to vector<30x32xf32>
    %60 = arith.addf %57, %59 : vector<30x32xf32>
    %61 = arith.truncf %60 : vector<30x32xf32> to vector<30x32xbf16>
    %c0_29 = arith.constant 0 : index
    %c0_30 = arith.constant 0 : index
    %62 = vector.load %arg8[%c0_29, %c0_30] : memref<30x32xbf16, #tpu.memory_space<vmem>>, vector<30x32xbf16>
    tpu.vector_store %arg8[%c0_29, %c0_30], %61 {strides = array<i32>} : memref<30x32xbf16, #tpu.memory_space<vmem>>, vector<30x32xbf16>,
    %cst_31 = arith.constant dense<0.000000e+00> : vector<32xf32>
    %63 = vector.multi_reduction <add>, %60, %cst_31 [0] : vector<30x32xf32> to vector<32xf32>
    %64 = vector.shape_cast %63 : vector<32xf32> to vector<1x32xf32>
    %65 = arith.mulf %60, %60 : vector<30x32xf32>
    %cst_32 = arith.constant dense<0.000000e+00> : vector<32xf32>
    %66 = vector.multi_reduction <add>, %65, %cst_32 [0] : vector<30x32xf32> to vector<32xf32>
    %67 = vector.shape_cast %66 : vector<32xf32> to vector<1x32xf32>
    %68 = tpu.concatenate %64, %67 in 0 : vector<1x32xf32>, vector<1x32xf32> -> vector<2x32xf32>
    %c0_33 = arith.constant 0 : index
    %c0_34 = arith.constant 0 : index
    %c0_35 = arith.constant 0 : index
    %69 = vector.load %arg9[%c0_33, %c0_34, %c0_35] : memref<1x2x32xf32, #tpu.memory_space<vmem>>, vector<1x2x32xf32>
    %70 = vector.shape_cast %69 : vector<1x2x32xf32> to vector<2x32xf32>
    %71 = vector.shape_cast %68 : vector<2x32xf32> to vector<1x2x32xf32>
    tpu.vector_store %arg9[%c0_33, %c0_34, %c0_35], %71 {strides = array<i32>} : memref<1x2x32xf32, #tpu.memory_space<vmem>>, vector<1x2x32xf32>,
    return
  }
  func.func @transform_0(%arg0: i32) -> (i32, i32) {
    %c0_i32 = arith.constant 0 : i32
    %c0_i32_0 = arith.constant 0 : i32
    return %arg0, %c0_i32 : i32, i32
  }
  func.func @transform_1(%arg0: i32) -> (i32, i32) {
    %c0_i32 = arith.constant 0 : i32
    %c0_i32_0 = arith.constant 0 : i32
    %c0_i32_1 = arith.constant 0 : i32
    return %c0_i32, %c0_i32_0 : i32, i32
  }
  func.func @transform_2(%arg0: i32) -> (i32, i32) {
    %c0_i32 = arith.constant 0 : i32
    %c0_i32_0 = arith.constant 0 : i32
    %c0_i32_1 = arith.constant 0 : i32
    return %c0_i32, %c0_i32_0 : i32, i32
  }
  func.func @transform_3(%arg0: i32) -> (i32, i32) {
    %c0_i32 = arith.constant 0 : i32
    %c0_i32_0 = arith.constant 0 : i32
    %c0_i32_1 = arith.constant 0 : i32
    return %c0_i32, %c0_i32_0 : i32, i32
  }
  func.func @transform_4(%arg0: i32) -> (i32, i32) {
    %c0_i32 = arith.constant 0 : i32
    %c0_i32_0 = arith.constant 0 : i32
    %c0_i32_1 = arith.constant 0 : i32
    return %c0_i32, %c0_i32_0 : i32, i32
  }
  func.func @transform_5(%arg0: i32) -> (i32, i32) {
    %c0_i32 = arith.constant 0 : i32
    %c0_i32_0 = arith.constant 0 : i32
    %c0_i32_1 = arith.constant 0 : i32
    return %c0_i32, %c0_i32_0 : i32, i32
  }
  func.func @transform_6(%arg0: i32) -> (i32, i32) {
    %c0_i32 = arith.constant 0 : i32
    %c0_i32_0 = arith.constant 0 : i32
    %c0_i32_1 = arith.constant 0 : i32
    return %c0_i32, %c0_i32_0 : i32, i32
  }
  func.func @transform_7(%arg0: i32) -> (i32, i32) {
    %c0_i32 = arith.constant 0 : i32
    %c0_i32_0 = arith.constant 0 : i32
    return %arg0, %c0_i32 : i32, i32
  }
  func.func @transform_8(%arg0: i32) -> (i32, i32, i32) {
    %c0_i32 = arith.constant 0 : i32
    %c0_i32_0 = arith.constant 0 : i32
    %c0_i32_1 = arith.constant 0 : i32
    return %arg0, %c0_i32, %c0_i32_0 : i32, i32, i32
  }
}

module attributes {stable_mosaic.version = 11 : i64} {
  func.func @_attn_layer_kernel(%arg0: i32, %arg1: memref<6x5x32xbf16, #tpu.memory_space<vmem>>, %arg2: memref<6x4x5x5xbf16, #tpu.memory_space<vmem>>, %arg3: memref<1x32xf32, #tpu.memory_space<vmem>>, %arg4: memref<1x32xf32, #tpu.memory_space<vmem>>, %arg5: memref<32x96xbf16, #tpu.memory_space<vmem>>, %arg6: memref<1x96xf32, #tpu.memory_space<vmem>>, %arg7: memref<32x32xbf16, #tpu.memory_space<vmem>>, %arg8: memref<1x32xf32, #tpu.memory_space<vmem>>, %arg9: memref<6x5x32xbf16, #tpu.memory_space<vmem>>, %arg10: memref<1x2x32xf32, #tpu.memory_space<vmem>>, %arg11: memref<5x32xbf16, #tpu.memory_space<vmem>>) attributes {dimension_semantics = [#tpu.dimension_semantics<parallel>], iteration_bounds = array<i64: 1>, scalar_prefetch = 0 : i64, scratch_operands = 1 : i64, tpu.core_type = #tpu.core_type<tc>, window_params = [{transform_indices = @transform_0, window_bounds = array<i64: 6, 5, 32>}, {transform_indices = @transform_1, window_bounds = array<i64: 6, 4, 5, 5>}, {pipeline_mode = #tpu.pipeline_mode<synchronous>, transform_indices = @transform_2, window_bounds = array<i64: 1, 32>}, {pipeline_mode = #tpu.pipeline_mode<synchronous>, transform_indices = @transform_3, window_bounds = array<i64: 1, 32>}, {pipeline_mode = #tpu.pipeline_mode<synchronous>, transform_indices = @transform_4, window_bounds = array<i64: 32, 96>}, {pipeline_mode = #tpu.pipeline_mode<synchronous>, transform_indices = @transform_5, window_bounds = array<i64: 1, 96>}, {pipeline_mode = #tpu.pipeline_mode<synchronous>, transform_indices = @transform_6, window_bounds = array<i64: 32, 32>}, {pipeline_mode = #tpu.pipeline_mode<synchronous>, transform_indices = @transform_7, window_bounds = array<i64: 1, 32>}, {transform_indices = @transform_8, window_bounds = array<i64: 6, 5, 32>}, {transform_indices = @transform_9, window_bounds = array<i64: 1, 2, 32>}]} {
    %c0 = arith.constant 0 : index
    %c0_0 = arith.constant 0 : index
    %0 = vector.load %arg3[%c0, %c0_0] : memref<1x32xf32, #tpu.memory_space<vmem>>, vector<1x32xf32>
    %c0_1 = arith.constant 0 : index
    %c0_2 = arith.constant 0 : index
    %1 = vector.load %arg4[%c0_1, %c0_2] : memref<1x32xf32, #tpu.memory_space<vmem>>, vector<1x32xf32>
    %c0_3 = arith.constant 0 : index
    %c0_4 = arith.constant 0 : index
    %2 = vector.load %arg5[%c0_3, %c0_4] : memref<32x96xbf16, #tpu.memory_space<vmem>>, vector<32x96xbf16>
    %c0_5 = arith.constant 0 : index
    %c0_6 = arith.constant 0 : index
    %3 = vector.load %arg6[%c0_5, %c0_6] : memref<1x96xf32, #tpu.memory_space<vmem>>, vector<1x96xf32>
    %c0_7 = arith.constant 0 : index
    %c0_8 = arith.constant 0 : index
    %4 = vector.load %arg7[%c0_7, %c0_8] : memref<32x32xbf16, #tpu.memory_space<vmem>>, vector<32x32xbf16>
    %c0_9 = arith.constant 0 : index
    %c0_10 = arith.constant 0 : index
    %5 = vector.load %arg8[%c0_9, %c0_10] : memref<1x32xf32, #tpu.memory_space<vmem>>, vector<1x32xf32>
    %cst = arith.constant 0.000000e+00 : f32
    %6 = vector.broadcast %cst : f32 to vector<1x32xf32>
    %cst_11 = arith.constant 0.000000e+00 : f32
    %7 = vector.broadcast %cst_11 : f32 to vector<1x32xf32>
    %c0_12 = arith.constant 0 : index
    %c0_13 = arith.constant 0 : index
    %c0_14 = arith.constant 0 : index
    %8 = vector.load %arg1[%c0_12, %c0_13, %c0_14] : memref<6x5x32xbf16, #tpu.memory_space<vmem>>, vector<1x5x32xbf16>
    %9 = vector.shape_cast %8 : vector<1x5x32xbf16> to vector<5x32xbf16>
    %10 = arith.extf %9 : vector<5x32xbf16> to vector<5x32xf32>
    %11 = vector.broadcast %0 : vector<1x32xf32> to vector<5x32xf32>
    %12 = arith.mulf %10, %11 : vector<5x32xf32>
    %13 = vector.broadcast %1 : vector<1x32xf32> to vector<5x32xf32>
    %14 = arith.addf %12, %13 : vector<5x32xf32>
    %15 = arith.truncf %14 : vector<5x32xf32> to vector<5x32xbf16>
    %cst_15 = arith.constant dense<0.000000e+00> : vector<5x96xf32>
    %16 = tpu.matmul %15, %2, %cst_15 {dimension_numbers = #tpu.dot_dimension_numbers<[1], [0], [0], [1], [0, 0, 1, 1], [], []>} : vector<5x32xbf16>, vector<32x96xbf16>, vector<5x96xf32> -> vector<5x96xf32>
    %17 = vector.broadcast %3 : vector<1x96xf32> to vector<5x96xf32>
    %18 = arith.addf %16, %17 : vector<5x96xf32>
    %19 = arith.truncf %18 : vector<5x96xf32> to vector<5x96xbf16>
    %20 = vector.extract_strided_slice %19 {offsets = [0, 0], sizes = [5, 8], strides = [1, 1]} : vector<5x96xbf16> to vector<5x8xbf16>
    %21 = vector.extract_strided_slice %19 {offsets = [0, 32], sizes = [5, 8], strides = [1, 1]} : vector<5x96xbf16> to vector<5x8xbf16>
    %22 = vector.extract_strided_slice %19 {offsets = [0, 64], sizes = [5, 8], strides = [1, 1]} : vector<5x96xbf16> to vector<5x8xbf16>
    "tpu.trace_start"() <{level = 10 : i32, message = "qc,kc->qk"}> : () -> ()
    %cst_16 = arith.constant dense<0.000000e+00> : vector<5x5xf32>
    %23 = tpu.matmul %20, %21, %cst_16 {dimension_numbers = #tpu.dot_dimension_numbers<[1], [1], [0], [0], [0, 0, 1, 0], [], []>} : vector<5x8xbf16>, vector<5x8xbf16>, vector<5x5xf32> -> vector<5x5xf32>
    "tpu.trace_stop"() : () -> ()
    %cst_17 = arith.constant 0.353553385 : f32
    %24 = vector.broadcast %cst_17 : f32 to vector<5x5xf32>
    %25 = arith.mulf %23, %24 : vector<5x5xf32>
    %c0_18 = arith.constant 0 : index
    %c0_19 = arith.constant 0 : index
    %c0_20 = arith.constant 0 : index
    %c0_21 = arith.constant 0 : index
    %26 = vector.load %arg2[%c0_18, %c0_19, %c0_20, %c0_21] : memref<6x4x5x5xbf16, #tpu.memory_space<vmem>>, vector<1x1x5x5xbf16>
    %27 = vector.shape_cast %26 : vector<1x1x5x5xbf16> to vector<5x5xbf16>
    %28 = arith.extf %27 : vector<5x5xbf16> to vector<5x5xf32>
    %29 = arith.addf %25, %28 : vector<5x5xf32>
    %cst_22 = arith.constant dense<0xFF800000> : vector<5xf32>
    %30 = vector.multi_reduction <maximumf>, %29, %cst_22 [1] : vector<5x5xf32> to vector<5xf32>
    %31 = vector.shape_cast %30 : vector<5xf32> to vector<5x1xf32>
    %32 = vector.broadcast %31 : vector<5x1xf32> to vector<5x5xf32>
    %33 = arith.subf %29, %32 : vector<5x5xf32>
    %34 = math.exp %33 : vector<5x5xf32>
    %cst_23 = arith.constant dense<0.000000e+00> : vector<5xf32>
    %35 = vector.multi_reduction <add>, %34, %cst_23 [1] : vector<5x5xf32> to vector<5xf32>
    %36 = vector.shape_cast %35 : vector<5xf32> to vector<5x1xf32>
    %37 = tpu.reciprocal %36 {approx = true} : vector<5x1xf32> -> vector<5x1xf32>
    %38 = vector.broadcast %37 : vector<5x1xf32> to vector<5x5xf32>
    %39 = arith.mulf %34, %38 : vector<5x5xf32>
    %40 = arith.truncf %39 : vector<5x5xf32> to vector<5x5xbf16>
    %cst_24 = arith.constant dense<0.000000e+00> : vector<5x8xf32>
    %41 = tpu.matmul %40, %22, %cst_24 {dimension_numbers = #tpu.dot_dimension_numbers<[1], [0], [0], [1], [0, 0, 1, 1], [], []>} : vector<5x5xbf16>, vector<5x8xbf16>, vector<5x8xf32> -> vector<5x8xf32>
    %42 = arith.truncf %41 : vector<5x8xf32> to vector<5x8xbf16>
    %c0_25 = arith.constant 0 : index
    %c0_26 = arith.constant 0 : index
    %43 = vector.load %arg11[%c0_25, %c0_26] : memref<5x32xbf16, #tpu.memory_space<vmem>>, vector<5x8xbf16>
    tpu.vector_store %arg11[%c0_25, %c0_26], %42 {strides = array<i32>} : memref<5x32xbf16, #tpu.memory_space<vmem>>, vector<5x8xbf16>,
    %44 = vector.extract_strided_slice %19 {offsets = [0, 8], sizes = [5, 8], strides = [1, 1]} : vector<5x96xbf16> to vector<5x8xbf16>
    %45 = vector.extract_strided_slice %19 {offsets = [0, 40], sizes = [5, 8], strides = [1, 1]} : vector<5x96xbf16> to vector<5x8xbf16>
    %46 = vector.extract_strided_slice %19 {offsets = [0, 72], sizes = [5, 8], strides = [1, 1]} : vector<5x96xbf16> to vector<5x8xbf16>
    "tpu.trace_start"() <{level = 10 : i32, message = "qc,kc->qk"}> : () -> ()
    %cst_27 = arith.constant dense<0.000000e+00> : vector<5x5xf32>
    %47 = tpu.matmul %44, %45, %cst_27 {dimension_numbers = #tpu.dot_dimension_numbers<[1], [1], [0], [0], [0, 0, 1, 0], [], []>} : vector<5x8xbf16>, vector<5x8xbf16>, vector<5x5xf32> -> vector<5x5xf32>
    "tpu.trace_stop"() : () -> ()
    %cst_28 = arith.constant 0.353553385 : f32
    %48 = vector.broadcast %cst_28 : f32 to vector<5x5xf32>
    %49 = arith.mulf %47, %48 : vector<5x5xf32>
    %c0_29 = arith.constant 0 : index
    %c1 = arith.constant 1 : index
    %c0_30 = arith.constant 0 : index
    %c0_31 = arith.constant 0 : index
    %50 = vector.load %arg2[%c0_29, %c1, %c0_30, %c0_31] : memref<6x4x5x5xbf16, #tpu.memory_space<vmem>>, vector<1x1x5x5xbf16>
    %51 = vector.shape_cast %50 : vector<1x1x5x5xbf16> to vector<5x5xbf16>
    %52 = arith.extf %51 : vector<5x5xbf16> to vector<5x5xf32>
    %53 = arith.addf %49, %52 : vector<5x5xf32>
    %cst_32 = arith.constant dense<0xFF800000> : vector<5xf32>
    %54 = vector.multi_reduction <maximumf>, %53, %cst_32 [1] : vector<5x5xf32> to vector<5xf32>
    %55 = vector.shape_cast %54 : vector<5xf32> to vector<5x1xf32>
    %56 = vector.broadcast %55 : vector<5x1xf32> to vector<5x5xf32>
    %57 = arith.subf %53, %56 : vector<5x5xf32>
    %58 = math.exp %57 : vector<5x5xf32>
    %cst_33 = arith.constant dense<0.000000e+00> : vector<5xf32>
    %59 = vector.multi_reduction <add>, %58, %cst_33 [1] : vector<5x5xf32> to vector<5xf32>
    %60 = vector.shape_cast %59 : vector<5xf32> to vector<5x1xf32>
    %61 = tpu.reciprocal %60 {approx = true} : vector<5x1xf32> -> vector<5x1xf32>
    %62 = vector.broadcast %61 : vector<5x1xf32> to vector<5x5xf32>
    %63 = arith.mulf %58, %62 : vector<5x5xf32>
    %64 = arith.truncf %63 : vector<5x5xf32> to vector<5x5xbf16>
    %cst_34 = arith.constant dense<0.000000e+00> : vector<5x8xf32>
    %65 = tpu.matmul %64, %46, %cst_34 {dimension_numbers = #tpu.dot_dimension_numbers<[1], [0], [0], [1], [0, 0, 1, 1], [], []>} : vector<5x5xbf16>, vector<5x8xbf16>, vector<5x8xf32> -> vector<5x8xf32>
    %66 = arith.truncf %65 : vector<5x8xf32> to vector<5x8xbf16>
    %c0_35 = arith.constant 0 : index
    %c8 = arith.constant 8 : index
    %67 = vector.load %arg11[%c0_35, %c8] : memref<5x32xbf16, #tpu.memory_space<vmem>>, vector<5x8xbf16>
    tpu.vector_store %arg11[%c0_35, %c8], %66 {strides = array<i32>} : memref<5x32xbf16, #tpu.memory_space<vmem>>, vector<5x8xbf16>,
    %68 = vector.extract_strided_slice %19 {offsets = [0, 16], sizes = [5, 8], strides = [1, 1]} : vector<5x96xbf16> to vector<5x8xbf16>
    %69 = vector.extract_strided_slice %19 {offsets = [0, 48], sizes = [5, 8], strides = [1, 1]} : vector<5x96xbf16> to vector<5x8xbf16>
    %70 = vector.extract_strided_slice %19 {offsets = [0, 80], sizes = [5, 8], strides = [1, 1]} : vector<5x96xbf16> to vector<5x8xbf16>
    "tpu.trace_start"() <{level = 10 : i32, message = "qc,kc->qk"}> : () -> ()
    %cst_36 = arith.constant dense<0.000000e+00> : vector<5x5xf32>
    %71 = tpu.matmul %68, %69, %cst_36 {dimension_numbers = #tpu.dot_dimension_numbers<[1], [1], [0], [0], [0, 0, 1, 0], [], []>} : vector<5x8xbf16>, vector<5x8xbf16>, vector<5x5xf32> -> vector<5x5xf32>
    "tpu.trace_stop"() : () -> ()
    %cst_37 = arith.constant 0.353553385 : f32
    %72 = vector.broadcast %cst_37 : f32 to vector<5x5xf32>
    %73 = arith.mulf %71, %72 : vector<5x5xf32>
    %c0_38 = arith.constant 0 : index
    %c2 = arith.constant 2 : index
    %c0_39 = arith.constant 0 : index
    %c0_40 = arith.constant 0 : index
    %74 = vector.load %arg2[%c0_38, %c2, %c0_39, %c0_40] : memref<6x4x5x5xbf16, #tpu.memory_space<vmem>>, vector<1x1x5x5xbf16>
    %75 = vector.shape_cast %74 : vector<1x1x5x5xbf16> to vector<5x5xbf16>
    %76 = arith.extf %75 : vector<5x5xbf16> to vector<5x5xf32>
    %77 = arith.addf %73, %76 : vector<5x5xf32>
    %cst_41 = arith.constant dense<0xFF800000> : vector<5xf32>
    %78 = vector.multi_reduction <maximumf>, %77, %cst_41 [1] : vector<5x5xf32> to vector<5xf32>
    %79 = vector.shape_cast %78 : vector<5xf32> to vector<5x1xf32>
    %80 = vector.broadcast %79 : vector<5x1xf32> to vector<5x5xf32>
    %81 = arith.subf %77, %80 : vector<5x5xf32>
    %82 = math.exp %81 : vector<5x5xf32>
    %cst_42 = arith.constant dense<0.000000e+00> : vector<5xf32>
    %83 = vector.multi_reduction <add>, %82, %cst_42 [1] : vector<5x5xf32> to vector<5xf32>
    %84 = vector.shape_cast %83 : vector<5xf32> to vector<5x1xf32>
    %85 = tpu.reciprocal %84 {approx = true} : vector<5x1xf32> -> vector<5x1xf32>
    %86 = vector.broadcast %85 : vector<5x1xf32> to vector<5x5xf32>
    %87 = arith.mulf %82, %86 : vector<5x5xf32>
    %88 = arith.truncf %87 : vector<5x5xf32> to vector<5x5xbf16>
    %cst_43 = arith.constant dense<0.000000e+00> : vector<5x8xf32>
    %89 = tpu.matmul %88, %70, %cst_43 {dimension_numbers = #tpu.dot_dimension_numbers<[1], [0], [0], [1], [0, 0, 1, 1], [], []>} : vector<5x5xbf16>, vector<5x8xbf16>, vector<5x8xf32> -> vector<5x8xf32>
    %90 = arith.truncf %89 : vector<5x8xf32> to vector<5x8xbf16>
    %c0_44 = arith.constant 0 : index
    %c16 = arith.constant 16 : index
    %91 = vector.load %arg11[%c0_44, %c16] : memref<5x32xbf16, #tpu.memory_space<vmem>>, vector<5x8xbf16>
    tpu.vector_store %arg11[%c0_44, %c16], %90 {strides = array<i32>} : memref<5x32xbf16, #tpu.memory_space<vmem>>, vector<5x8xbf16>,
    %92 = vector.extract_strided_slice %19 {offsets = [0, 24], sizes = [5, 8], strides = [1, 1]} : vector<5x96xbf16> to vector<5x8xbf16>
    %93 = vector.extract_strided_slice %19 {offsets = [0, 56], sizes = [5, 8], strides = [1, 1]} : vector<5x96xbf16> to vector<5x8xbf16>
    %94 = vector.extract_strided_slice %19 {offsets = [0, 88], sizes = [5, 8], strides = [1, 1]} : vector<5x96xbf16> to vector<5x8xbf16>
    "tpu.trace_start"() <{level = 10 : i32, message = "qc,kc->qk"}> : () -> ()
    %cst_45 = arith.constant dense<0.000000e+00> : vector<5x5xf32>
    %95 = tpu.matmul %92, %93, %cst_45 {dimension_numbers = #tpu.dot_dimension_numbers<[1], [1], [0], [0], [0, 0, 1, 0], [], []>} : vector<5x8xbf16>, vector<5x8xbf16>, vector<5x5xf32> -> vector<5x5xf32>
    "tpu.trace_stop"() : () -> ()
    %cst_46 = arith.constant 0.353553385 : f32
    %96 = vector.broadcast %cst_46 : f32 to vector<5x5xf32>
    %97 = arith.mulf %95, %96 : vector<5x5xf32>
    %c0_47 = arith.constant 0 : index
    %c3 = arith.constant 3 : index
    %c0_48 = arith.constant 0 : index
    %c0_49 = arith.constant 0 : index
    %98 = vector.load %arg2[%c0_47, %c3, %c0_48, %c0_49] : memref<6x4x5x5xbf16, #tpu.memory_space<vmem>>, vector<1x1x5x5xbf16>
    %99 = vector.shape_cast %98 : vector<1x1x5x5xbf16> to vector<5x5xbf16>
    %100 = arith.extf %99 : vector<5x5xbf16> to vector<5x5xf32>
    %101 = arith.addf %97, %100 : vector<5x5xf32>
    %cst_50 = arith.constant dense<0xFF800000> : vector<5xf32>
    %102 = vector.multi_reduction <maximumf>, %101, %cst_50 [1] : vector<5x5xf32> to vector<5xf32>
    %103 = vector.shape_cast %102 : vector<5xf32> to vector<5x1xf32>
    %104 = vector.broadcast %103 : vector<5x1xf32> to vector<5x5xf32>
    %105 = arith.subf %101, %104 : vector<5x5xf32>
    %106 = math.exp %105 : vector<5x5xf32>
    %cst_51 = arith.constant dense<0.000000e+00> : vector<5xf32>
    %107 = vector.multi_reduction <add>, %106, %cst_51 [1] : vector<5x5xf32> to vector<5xf32>
    %108 = vector.shape_cast %107 : vector<5xf32> to vector<5x1xf32>
    %109 = tpu.reciprocal %108 {approx = true} : vector<5x1xf32> -> vector<5x1xf32>
    %110 = vector.broadcast %109 : vector<5x1xf32> to vector<5x5xf32>
    %111 = arith.mulf %106, %110 : vector<5x5xf32>
    %112 = arith.truncf %111 : vector<5x5xf32> to vector<5x5xbf16>
    %cst_52 = arith.constant dense<0.000000e+00> : vector<5x8xf32>
    %113 = tpu.matmul %112, %94, %cst_52 {dimension_numbers = #tpu.dot_dimension_numbers<[1], [0], [0], [1], [0, 0, 1, 1], [], []>} : vector<5x5xbf16>, vector<5x8xbf16>, vector<5x8xf32> -> vector<5x8xf32>
    %114 = arith.truncf %113 : vector<5x8xf32> to vector<5x8xbf16>
    %c0_53 = arith.constant 0 : index
    %c24 = arith.constant 24 : index
    %115 = vector.load %arg11[%c0_53, %c24] : memref<5x32xbf16, #tpu.memory_space<vmem>>, vector<5x8xbf16>
    tpu.vector_store %arg11[%c0_53, %c24], %114 {strides = array<i32>} : memref<5x32xbf16, #tpu.memory_space<vmem>>, vector<5x8xbf16>,
    %c0_54 = arith.constant 0 : index
    %c0_55 = arith.constant 0 : index
    %116 = vector.load %arg11[%c0_54, %c0_55] : memref<5x32xbf16, #tpu.memory_space<vmem>>, vector<5x32xbf16>
    %cst_56 = arith.constant dense<0.000000e+00> : vector<5x32xf32>
    %117 = tpu.matmul %116, %4, %cst_56 {dimension_numbers = #tpu.dot_dimension_numbers<[1], [0], [0], [1], [0, 0, 1, 1], [], []>} : vector<5x32xbf16>, vector<32x32xbf16>, vector<5x32xf32> -> vector<5x32xf32>
    %118 = arith.addf %14, %117 : vector<5x32xf32>
    %119 = vector.broadcast %5 : vector<1x32xf32> to vector<5x32xf32>
    %120 = arith.addf %118, %119 : vector<5x32xf32>
    %121 = arith.truncf %120 : vector<5x32xf32> to vector<5x32xbf16>
    %c0_57 = arith.constant 0 : index
    %c0_58 = arith.constant 0 : index
    %c0_59 = arith.constant 0 : index
    %122 = vector.load %arg9[%c0_57, %c0_58, %c0_59] : memref<6x5x32xbf16, #tpu.memory_space<vmem>>, vector<1x5x32xbf16>
    %123 = vector.shape_cast %122 : vector<1x5x32xbf16> to vector<5x32xbf16>
    %124 = vector.shape_cast %121 : vector<5x32xbf16> to vector<1x5x32xbf16>
    tpu.vector_store %arg9[%c0_57, %c0_58, %c0_59], %124 {strides = array<i32>} : memref<6x5x32xbf16, #tpu.memory_space<vmem>>, vector<1x5x32xbf16>,
    %cst_60 = arith.constant dense<0.000000e+00> : vector<32xf32>
    %125 = vector.multi_reduction <add>, %120, %cst_60 [0] : vector<5x32xf32> to vector<32xf32>
    %126 = vector.shape_cast %125 : vector<32xf32> to vector<1x32xf32>
    %127 = arith.addf %6, %126 : vector<1x32xf32>
    %128 = arith.mulf %120, %120 : vector<5x32xf32>
    %cst_61 = arith.constant dense<0.000000e+00> : vector<32xf32>
    %129 = vector.multi_reduction <add>, %128, %cst_61 [0] : vector<5x32xf32> to vector<32xf32>
    %130 = vector.shape_cast %129 : vector<32xf32> to vector<1x32xf32>
    %131 = arith.addf %7, %130 : vector<1x32xf32>
    %c1_62 = arith.constant 1 : index
    %c0_63 = arith.constant 0 : index
    %c0_64 = arith.constant 0 : index
    %132 = vector.load %arg1[%c1_62, %c0_63, %c0_64] : memref<6x5x32xbf16, #tpu.memory_space<vmem>>, vector<1x5x32xbf16>
    %133 = vector.shape_cast %132 : vector<1x5x32xbf16> to vector<5x32xbf16>
    %134 = arith.extf %133 : vector<5x32xbf16> to vector<5x32xf32>
    %135 = vector.broadcast %0 : vector<1x32xf32> to vector<5x32xf32>
    %136 = arith.mulf %134, %135 : vector<5x32xf32>
    %137 = vector.broadcast %1 : vector<1x32xf32> to vector<5x32xf32>
    %138 = arith.addf %136, %137 : vector<5x32xf32>
    %139 = arith.truncf %138 : vector<5x32xf32> to vector<5x32xbf16>
    %cst_65 = arith.constant dense<0.000000e+00> : vector<5x96xf32>
    %140 = tpu.matmul %139, %2, %cst_65 {dimension_numbers = #tpu.dot_dimension_numbers<[1], [0], [0], [1], [0, 0, 1, 1], [], []>} : vector<5x32xbf16>, vector<32x96xbf16>, vector<5x96xf32> -> vector<5x96xf32>
    %141 = vector.broadcast %3 : vector<1x96xf32> to vector<5x96xf32>
    %142 = arith.addf %140, %141 : vector<5x96xf32>
    %143 = arith.truncf %142 : vector<5x96xf32> to vector<5x96xbf16>
    %144 = vector.extract_strided_slice %143 {offsets = [0, 0], sizes = [5, 8], strides = [1, 1]} : vector<5x96xbf16> to vector<5x8xbf16>
    %145 = vector.extract_strided_slice %143 {offsets = [0, 32], sizes = [5, 8], strides = [1, 1]} : vector<5x96xbf16> to vector<5x8xbf16>
    %146 = vector.extract_strided_slice %143 {offsets = [0, 64], sizes = [5, 8], strides = [1, 1]} : vector<5x96xbf16> to vector<5x8xbf16>
    "tpu.trace_start"() <{level = 10 : i32, message = "qc,kc->qk"}> : () -> ()
    %cst_66 = arith.constant dense<0.000000e+00> : vector<5x5xf32>
    %147 = tpu.matmul %144, %145, %cst_66 {dimension_numbers = #tpu.dot_dimension_numbers<[1], [1], [0], [0], [0, 0, 1, 0], [], []>} : vector<5x8xbf16>, vector<5x8xbf16>, vector<5x5xf32> -> vector<5x5xf32>
    "tpu.trace_stop"() : () -> ()
    %cst_67 = arith.constant 0.353553385 : f32
    %148 = vector.broadcast %cst_67 : f32 to vector<5x5xf32>
    %149 = arith.mulf %147, %148 : vector<5x5xf32>
    %c1_68 = arith.constant 1 : index
    %c0_69 = arith.constant 0 : index
    %c0_70 = arith.constant 0 : index
    %c0_71 = arith.constant 0 : index
    %150 = vector.load %arg2[%c1_68, %c0_69, %c0_70, %c0_71] : memref<6x4x5x5xbf16, #tpu.memory_space<vmem>>, vector<1x1x5x5xbf16>
    %151 = vector.shape_cast %150 : vector<1x1x5x5xbf16> to vector<5x5xbf16>
    %152 = arith.extf %151 : vector<5x5xbf16> to vector<5x5xf32>
    %153 = arith.addf %149, %152 : vector<5x5xf32>
    %cst_72 = arith.constant dense<0xFF800000> : vector<5xf32>
    %154 = vector.multi_reduction <maximumf>, %153, %cst_72 [1] : vector<5x5xf32> to vector<5xf32>
    %155 = vector.shape_cast %154 : vector<5xf32> to vector<5x1xf32>
    %156 = vector.broadcast %155 : vector<5x1xf32> to vector<5x5xf32>
    %157 = arith.subf %153, %156 : vector<5x5xf32>
    %158 = math.exp %157 : vector<5x5xf32>
    %cst_73 = arith.constant dense<0.000000e+00> : vector<5xf32>
    %159 = vector.multi_reduction <add>, %158, %cst_73 [1] : vector<5x5xf32> to vector<5xf32>
    %160 = vector.shape_cast %159 : vector<5xf32> to vector<5x1xf32>
    %161 = tpu.reciprocal %160 {approx = true} : vector<5x1xf32> -> vector<5x1xf32>
    %162 = vector.broadcast %161 : vector<5x1xf32> to vector<5x5xf32>
    %163 = arith.mulf %158, %162 : vector<5x5xf32>
    %164 = arith.truncf %163 : vector<5x5xf32> to vector<5x5xbf16>
    %cst_74 = arith.constant dense<0.000000e+00> : vector<5x8xf32>
    %165 = tpu.matmul %164, %146, %cst_74 {dimension_numbers = #tpu.dot_dimension_numbers<[1], [0], [0], [1], [0, 0, 1, 1], [], []>} : vector<5x5xbf16>, vector<5x8xbf16>, vector<5x8xf32> -> vector<5x8xf32>
    %166 = arith.truncf %165 : vector<5x8xf32> to vector<5x8xbf16>
    %c0_75 = arith.constant 0 : index
    %c0_76 = arith.constant 0 : index
    %167 = vector.load %arg11[%c0_75, %c0_76] : memref<5x32xbf16, #tpu.memory_space<vmem>>, vector<5x8xbf16>
    tpu.vector_store %arg11[%c0_75, %c0_76], %166 {strides = array<i32>} : memref<5x32xbf16, #tpu.memory_space<vmem>>, vector<5x8xbf16>,
    %168 = vector.extract_strided_slice %143 {offsets = [0, 8], sizes = [5, 8], strides = [1, 1]} : vector<5x96xbf16> to vector<5x8xbf16>
    %169 = vector.extract_strided_slice %143 {offsets = [0, 40], sizes = [5, 8], strides = [1, 1]} : vector<5x96xbf16> to vector<5x8xbf16>
    %170 = vector.extract_strided_slice %143 {offsets = [0, 72], sizes = [5, 8], strides = [1, 1]} : vector<5x96xbf16> to vector<5x8xbf16>
    "tpu.trace_start"() <{level = 10 : i32, message = "qc,kc->qk"}> : () -> ()
    %cst_77 = arith.constant dense<0.000000e+00> : vector<5x5xf32>
    %171 = tpu.matmul %168, %169, %cst_77 {dimension_numbers = #tpu.dot_dimension_numbers<[1], [1], [0], [0], [0, 0, 1, 0], [], []>} : vector<5x8xbf16>, vector<5x8xbf16>, vector<5x5xf32> -> vector<5x5xf32>
    "tpu.trace_stop"() : () -> ()
    %cst_78 = arith.constant 0.353553385 : f32
    %172 = vector.broadcast %cst_78 : f32 to vector<5x5xf32>
    %173 = arith.mulf %171, %172 : vector<5x5xf32>
    %c1_79 = arith.constant 1 : index
    %c1_80 = arith.constant 1 : index
    %c0_81 = arith.constant 0 : index
    %c0_82 = arith.constant 0 : index
    %174 = vector.load %arg2[%c1_79, %c1_80, %c0_81, %c0_82] : memref<6x4x5x5xbf16, #tpu.memory_space<vmem>>, vector<1x1x5x5xbf16>
    %175 = vector.shape_cast %174 : vector<1x1x5x5xbf16> to vector<5x5xbf16>
    %176 = arith.extf %175 : vector<5x5xbf16> to vector<5x5xf32>
    %177 = arith.addf %173, %176 : vector<5x5xf32>
    %cst_83 = arith.constant dense<0xFF800000> : vector<5xf32>
    %178 = vector.multi_reduction <maximumf>, %177, %cst_83 [1] : vector<5x5xf32> to vector<5xf32>
    %179 = vector.shape_cast %178 : vector<5xf32> to vector<5x1xf32>
    %180 = vector.broadcast %179 : vector<5x1xf32> to vector<5x5xf32>
    %181 = arith.subf %177, %180 : vector<5x5xf32>
    %182 = math.exp %181 : vector<5x5xf32>
    %cst_84 = arith.constant dense<0.000000e+00> : vector<5xf32>
    %183 = vector.multi_reduction <add>, %182, %cst_84 [1] : vector<5x5xf32> to vector<5xf32>
    %184 = vector.shape_cast %183 : vector<5xf32> to vector<5x1xf32>
    %185 = tpu.reciprocal %184 {approx = true} : vector<5x1xf32> -> vector<5x1xf32>
    %186 = vector.broadcast %185 : vector<5x1xf32> to vector<5x5xf32>
    %187 = arith.mulf %182, %186 : vector<5x5xf32>
    %188 = arith.truncf %187 : vector<5x5xf32> to vector<5x5xbf16>
    %cst_85 = arith.constant dense<0.000000e+00> : vector<5x8xf32>
    %189 = tpu.matmul %188, %170, %cst_85 {dimension_numbers = #tpu.dot_dimension_numbers<[1], [0], [0], [1], [0, 0, 1, 1], [], []>} : vector<5x5xbf16>, vector<5x8xbf16>, vector<5x8xf32> -> vector<5x8xf32>
    %190 = arith.truncf %189 : vector<5x8xf32> to vector<5x8xbf16>
    %c0_86 = arith.constant 0 : index
    %c8_87 = arith.constant 8 : index
    %191 = vector.load %arg11[%c0_86, %c8_87] : memref<5x32xbf16, #tpu.memory_space<vmem>>, vector<5x8xbf16>
    tpu.vector_store %arg11[%c0_86, %c8_87], %190 {strides = array<i32>} : memref<5x32xbf16, #tpu.memory_space<vmem>>, vector<5x8xbf16>,
    %192 = vector.extract_strided_slice %143 {offsets = [0, 16], sizes = [5, 8], strides = [1, 1]} : vector<5x96xbf16> to vector<5x8xbf16>
    %193 = vector.extract_strided_slice %143 {offsets = [0, 48], sizes = [5, 8], strides = [1, 1]} : vector<5x96xbf16> to vector<5x8xbf16>
    %194 = vector.extract_strided_slice %143 {offsets = [0, 80], sizes = [5, 8], strides = [1, 1]} : vector<5x96xbf16> to vector<5x8xbf16>
    "tpu.trace_start"() <{level = 10 : i32, message = "qc,kc->qk"}> : () -> ()
    %cst_88 = arith.constant dense<0.000000e+00> : vector<5x5xf32>
    %195 = tpu.matmul %192, %193, %cst_88 {dimension_numbers = #tpu.dot_dimension_numbers<[1], [1], [0], [0], [0, 0, 1, 0], [], []>} : vector<5x8xbf16>, vector<5x8xbf16>, vector<5x5xf32> -> vector<5x5xf32>
    "tpu.trace_stop"() : () -> ()
    %cst_89 = arith.constant 0.353553385 : f32
    %196 = vector.broadcast %cst_89 : f32 to vector<5x5xf32>
    %197 = arith.mulf %195, %196 : vector<5x5xf32>
    %c1_90 = arith.constant 1 : index
    %c2_91 = arith.constant 2 : index
    %c0_92 = arith.constant 0 : index
    %c0_93 = arith.constant 0 : index
    %198 = vector.load %arg2[%c1_90, %c2_91, %c0_92, %c0_93] : memref<6x4x5x5xbf16, #tpu.memory_space<vmem>>, vector<1x1x5x5xbf16>
    %199 = vector.shape_cast %198 : vector<1x1x5x5xbf16> to vector<5x5xbf16>
    %200 = arith.extf %199 : vector<5x5xbf16> to vector<5x5xf32>
    %201 = arith.addf %197, %200 : vector<5x5xf32>
    %cst_94 = arith.constant dense<0xFF800000> : vector<5xf32>
    %202 = vector.multi_reduction <maximumf>, %201, %cst_94 [1] : vector<5x5xf32> to vector<5xf32>
    %203 = vector.shape_cast %202 : vector<5xf32> to vector<5x1xf32>
    %204 = vector.broadcast %203 : vector<5x1xf32> to vector<5x5xf32>
    %205 = arith.subf %201, %204 : vector<5x5xf32>
    %206 = math.exp %205 : vector<5x5xf32>
    %cst_95 = arith.constant dense<0.000000e+00> : vector<5xf32>
    %207 = vector.multi_reduction <add>, %206, %cst_95 [1] : vector<5x5xf32> to vector<5xf32>
    %208 = vector.shape_cast %207 : vector<5xf32> to vector<5x1xf32>
    %209 = tpu.reciprocal %208 {approx = true} : vector<5x1xf32> -> vector<5x1xf32>
    %210 = vector.broadcast %209 : vector<5x1xf32> to vector<5x5xf32>
    %211 = arith.mulf %206, %210 : vector<5x5xf32>
    %212 = arith.truncf %211 : vector<5x5xf32> to vector<5x5xbf16>
    %cst_96 = arith.constant dense<0.000000e+00> : vector<5x8xf32>
    %213 = tpu.matmul %212, %194, %cst_96 {dimension_numbers = #tpu.dot_dimension_numbers<[1], [0], [0], [1], [0, 0, 1, 1], [], []>} : vector<5x5xbf16>, vector<5x8xbf16>, vector<5x8xf32> -> vector<5x8xf32>
    %214 = arith.truncf %213 : vector<5x8xf32> to vector<5x8xbf16>
    %c0_97 = arith.constant 0 : index
    %c16_98 = arith.constant 16 : index
    %215 = vector.load %arg11[%c0_97, %c16_98] : memref<5x32xbf16, #tpu.memory_space<vmem>>, vector<5x8xbf16>
    tpu.vector_store %arg11[%c0_97, %c16_98], %214 {strides = array<i32>} : memref<5x32xbf16, #tpu.memory_space<vmem>>, vector<5x8xbf16>,
    %216 = vector.extract_strided_slice %143 {offsets = [0, 24], sizes = [5, 8], strides = [1, 1]} : vector<5x96xbf16> to vector<5x8xbf16>
    %217 = vector.extract_strided_slice %143 {offsets = [0, 56], sizes = [5, 8], strides = [1, 1]} : vector<5x96xbf16> to vector<5x8xbf16>
    %218 = vector.extract_strided_slice %143 {offsets = [0, 88], sizes = [5, 8], strides = [1, 1]} : vector<5x96xbf16> to vector<5x8xbf16>
    "tpu.trace_start"() <{level = 10 : i32, message = "qc,kc->qk"}> : () -> ()
    %cst_99 = arith.constant dense<0.000000e+00> : vector<5x5xf32>
    %219 = tpu.matmul %216, %217, %cst_99 {dimension_numbers = #tpu.dot_dimension_numbers<[1], [1], [0], [0], [0, 0, 1, 0], [], []>} : vector<5x8xbf16>, vector<5x8xbf16>, vector<5x5xf32> -> vector<5x5xf32>
    "tpu.trace_stop"() : () -> ()
    %cst_100 = arith.constant 0.353553385 : f32
    %220 = vector.broadcast %cst_100 : f32 to vector<5x5xf32>
    %221 = arith.mulf %219, %220 : vector<5x5xf32>
    %c1_101 = arith.constant 1 : index
    %c3_102 = arith.constant 3 : index
    %c0_103 = arith.constant 0 : index
    %c0_104 = arith.constant 0 : index
    %222 = vector.load %arg2[%c1_101, %c3_102, %c0_103, %c0_104] : memref<6x4x5x5xbf16, #tpu.memory_space<vmem>>, vector<1x1x5x5xbf16>
    %223 = vector.shape_cast %222 : vector<1x1x5x5xbf16> to vector<5x5xbf16>
    %224 = arith.extf %223 : vector<5x5xbf16> to vector<5x5xf32>
    %225 = arith.addf %221, %224 : vector<5x5xf32>
    %cst_105 = arith.constant dense<0xFF800000> : vector<5xf32>
    %226 = vector.multi_reduction <maximumf>, %225, %cst_105 [1] : vector<5x5xf32> to vector<5xf32>
    %227 = vector.shape_cast %226 : vector<5xf32> to vector<5x1xf32>
    %228 = vector.broadcast %227 : vector<5x1xf32> to vector<5x5xf32>
    %229 = arith.subf %225, %228 : vector<5x5xf32>
    %230 = math.exp %229 : vector<5x5xf32>
    %cst_106 = arith.constant dense<0.000000e+00> : vector<5xf32>
    %231 = vector.multi_reduction <add>, %230, %cst_106 [1] : vector<5x5xf32> to vector<5xf32>
    %232 = vector.shape_cast %231 : vector<5xf32> to vector<5x1xf32>
    %233 = tpu.reciprocal %232 {approx = true} : vector<5x1xf32> -> vector<5x1xf32>
    %234 = vector.broadcast %233 : vector<5x1xf32> to vector<5x5xf32>
    %235 = arith.mulf %230, %234 : vector<5x5xf32>
    %236 = arith.truncf %235 : vector<5x5xf32> to vector<5x5xbf16>
    %cst_107 = arith.constant dense<0.000000e+00> : vector<5x8xf32>
    %237 = tpu.matmul %236, %218, %cst_107 {dimension_numbers = #tpu.dot_dimension_numbers<[1], [0], [0], [1], [0, 0, 1, 1], [], []>} : vector<5x5xbf16>, vector<5x8xbf16>, vector<5x8xf32> -> vector<5x8xf32>
    %238 = arith.truncf %237 : vector<5x8xf32> to vector<5x8xbf16>
    %c0_108 = arith.constant 0 : index
    %c24_109 = arith.constant 24 : index
    %239 = vector.load %arg11[%c0_108, %c24_109] : memref<5x32xbf16, #tpu.memory_space<vmem>>, vector<5x8xbf16>
    tpu.vector_store %arg11[%c0_108, %c24_109], %238 {strides = array<i32>} : memref<5x32xbf16, #tpu.memory_space<vmem>>, vector<5x8xbf16>,
    %c0_110 = arith.constant 0 : index
    %c0_111 = arith.constant 0 : index
    %240 = vector.load %arg11[%c0_110, %c0_111] : memref<5x32xbf16, #tpu.memory_space<vmem>>, vector<5x32xbf16>
    %cst_112 = arith.constant dense<0.000000e+00> : vector<5x32xf32>
    %241 = tpu.matmul %240, %4, %cst_112 {dimension_numbers = #tpu.dot_dimension_numbers<[1], [0], [0], [1], [0, 0, 1, 1], [], []>} : vector<5x32xbf16>, vector<32x32xbf16>, vector<5x32xf32> -> vector<5x32xf32>
    %242 = arith.addf %138, %241 : vector<5x32xf32>
    %243 = vector.broadcast %5 : vector<1x32xf32> to vector<5x32xf32>
    %244 = arith.addf %242, %243 : vector<5x32xf32>
    %245 = arith.truncf %244 : vector<5x32xf32> to vector<5x32xbf16>
    %c1_113 = arith.constant 1 : index
    %c0_114 = arith.constant 0 : index
    %c0_115 = arith.constant 0 : index
    %246 = vector.load %arg9[%c1_113, %c0_114, %c0_115] : memref<6x5x32xbf16, #tpu.memory_space<vmem>>, vector<1x5x32xbf16>
    %247 = vector.shape_cast %246 : vector<1x5x32xbf16> to vector<5x32xbf16>
    %248 = vector.shape_cast %245 : vector<5x32xbf16> to vector<1x5x32xbf16>
    tpu.vector_store %arg9[%c1_113, %c0_114, %c0_115], %248 {strides = array<i32>} : memref<6x5x32xbf16, #tpu.memory_space<vmem>>, vector<1x5x32xbf16>,
    %cst_116 = arith.constant dense<0.000000e+00> : vector<32xf32>
    %249 = vector.multi_reduction <add>, %244, %cst_116 [0] : vector<5x32xf32> to vector<32xf32>
    %250 = vector.shape_cast %249 : vector<32xf32> to vector<1x32xf32>
    %251 = arith.addf %127, %250 : vector<1x32xf32>
    %252 = arith.mulf %244, %244 : vector<5x32xf32>
    %cst_117 = arith.constant dense<0.000000e+00> : vector<32xf32>
    %253 = vector.multi_reduction <add>, %252, %cst_117 [0] : vector<5x32xf32> to vector<32xf32>
    %254 = vector.shape_cast %253 : vector<32xf32> to vector<1x32xf32>
    %255 = arith.addf %131, %254 : vector<1x32xf32>
    %c2_118 = arith.constant 2 : index
    %c0_119 = arith.constant 0 : index
    %c0_120 = arith.constant 0 : index
    %256 = vector.load %arg1[%c2_118, %c0_119, %c0_120] : memref<6x5x32xbf16, #tpu.memory_space<vmem>>, vector<1x5x32xbf16>
    %257 = vector.shape_cast %256 : vector<1x5x32xbf16> to vector<5x32xbf16>
    %258 = arith.extf %257 : vector<5x32xbf16> to vector<5x32xf32>
    %259 = vector.broadcast %0 : vector<1x32xf32> to vector<5x32xf32>
    %260 = arith.mulf %258, %259 : vector<5x32xf32>
    %261 = vector.broadcast %1 : vector<1x32xf32> to vector<5x32xf32>
    %262 = arith.addf %260, %261 : vector<5x32xf32>
    %263 = arith.truncf %262 : vector<5x32xf32> to vector<5x32xbf16>
    %cst_121 = arith.constant dense<0.000000e+00> : vector<5x96xf32>
    %264 = tpu.matmul %263, %2, %cst_121 {dimension_numbers = #tpu.dot_dimension_numbers<[1], [0], [0], [1], [0, 0, 1, 1], [], []>} : vector<5x32xbf16>, vector<32x96xbf16>, vector<5x96xf32> -> vector<5x96xf32>
    %265 = vector.broadcast %3 : vector<1x96xf32> to vector<5x96xf32>
    %266 = arith.addf %264, %265 : vector<5x96xf32>
    %267 = arith.truncf %266 : vector<5x96xf32> to vector<5x96xbf16>
    %268 = vector.extract_strided_slice %267 {offsets = [0, 0], sizes = [5, 8], strides = [1, 1]} : vector<5x96xbf16> to vector<5x8xbf16>
    %269 = vector.extract_strided_slice %267 {offsets = [0, 32], sizes = [5, 8], strides = [1, 1]} : vector<5x96xbf16> to vector<5x8xbf16>
    %270 = vector.extract_strided_slice %267 {offsets = [0, 64], sizes = [5, 8], strides = [1, 1]} : vector<5x96xbf16> to vector<5x8xbf16>
    "tpu.trace_start"() <{level = 10 : i32, message = "qc,kc->qk"}> : () -> ()
    %cst_122 = arith.constant dense<0.000000e+00> : vector<5x5xf32>
    %271 = tpu.matmul %268, %269, %cst_122 {dimension_numbers = #tpu.dot_dimension_numbers<[1], [1], [0], [0], [0, 0, 1, 0], [], []>} : vector<5x8xbf16>, vector<5x8xbf16>, vector<5x5xf32> -> vector<5x5xf32>
    "tpu.trace_stop"() : () -> ()
    %cst_123 = arith.constant 0.353553385 : f32
    %272 = vector.broadcast %cst_123 : f32 to vector<5x5xf32>
    %273 = arith.mulf %271, %272 : vector<5x5xf32>
    %c2_124 = arith.constant 2 : index
    %c0_125 = arith.constant 0 : index
    %c0_126 = arith.constant 0 : index
    %c0_127 = arith.constant 0 : index
    %274 = vector.load %arg2[%c2_124, %c0_125, %c0_126, %c0_127] : memref<6x4x5x5xbf16, #tpu.memory_space<vmem>>, vector<1x1x5x5xbf16>
    %275 = vector.shape_cast %274 : vector<1x1x5x5xbf16> to vector<5x5xbf16>
    %276 = arith.extf %275 : vector<5x5xbf16> to vector<5x5xf32>
    %277 = arith.addf %273, %276 : vector<5x5xf32>
    %cst_128 = arith.constant dense<0xFF800000> : vector<5xf32>
    %278 = vector.multi_reduction <maximumf>, %277, %cst_128 [1] : vector<5x5xf32> to vector<5xf32>
    %279 = vector.shape_cast %278 : vector<5xf32> to vector<5x1xf32>
    %280 = vector.broadcast %279 : vector<5x1xf32> to vector<5x5xf32>
    %281 = arith.subf %277, %280 : vector<5x5xf32>
    %282 = math.exp %281 : vector<5x5xf32>
    %cst_129 = arith.constant dense<0.000000e+00> : vector<5xf32>
    %283 = vector.multi_reduction <add>, %282, %cst_129 [1] : vector<5x5xf32> to vector<5xf32>
    %284 = vector.shape_cast %283 : vector<5xf32> to vector<5x1xf32>
    %285 = tpu.reciprocal %284 {approx = true} : vector<5x1xf32> -> vector<5x1xf32>
    %286 = vector.broadcast %285 : vector<5x1xf32> to vector<5x5xf32>
    %287 = arith.mulf %282, %286 : vector<5x5xf32>
    %288 = arith.truncf %287 : vector<5x5xf32> to vector<5x5xbf16>
    %cst_130 = arith.constant dense<0.000000e+00> : vector<5x8xf32>
    %289 = tpu.matmul %288, %270, %cst_130 {dimension_numbers = #tpu.dot_dimension_numbers<[1], [0], [0], [1], [0, 0, 1, 1], [], []>} : vector<5x5xbf16>, vector<5x8xbf16>, vector<5x8xf32> -> vector<5x8xf32>
    %290 = arith.truncf %289 : vector<5x8xf32> to vector<5x8xbf16>
    %c0_131 = arith.constant 0 : index
    %c0_132 = arith.constant 0 : index
    %291 = vector.load %arg11[%c0_131, %c0_132] : memref<5x32xbf16, #tpu.memory_space<vmem>>, vector<5x8xbf16>
    tpu.vector_store %arg11[%c0_131, %c0_132], %290 {strides = array<i32>} : memref<5x32xbf16, #tpu.memory_space<vmem>>, vector<5x8xbf16>,
    %292 = vector.extract_strided_slice %267 {offsets = [0, 8], sizes = [5, 8], strides = [1, 1]} : vector<5x96xbf16> to vector<5x8xbf16>
    %293 = vector.extract_strided_slice %267 {offsets = [0, 40], sizes = [5, 8], strides = [1, 1]} : vector<5x96xbf16> to vector<5x8xbf16>
    %294 = vector.extract_strided_slice %267 {offsets = [0, 72], sizes = [5, 8], strides = [1, 1]} : vector<5x96xbf16> to vector<5x8xbf16>
    "tpu.trace_start"() <{level = 10 : i32, message = "qc,kc->qk"}> : () -> ()
    %cst_133 = arith.constant dense<0.000000e+00> : vector<5x5xf32>
    %295 = tpu.matmul %292, %293, %cst_133 {dimension_numbers = #tpu.dot_dimension_numbers<[1], [1], [0], [0], [0, 0, 1, 0], [], []>} : vector<5x8xbf16>, vector<5x8xbf16>, vector<5x5xf32> -> vector<5x5xf32>
    "tpu.trace_stop"() : () -> ()
    %cst_134 = arith.constant 0.353553385 : f32
    %296 = vector.broadcast %cst_134 : f32 to vector<5x5xf32>
    %297 = arith.mulf %295, %296 : vector<5x5xf32>
    %c2_135 = arith.constant 2 : index
    %c1_136 = arith.constant 1 : index
    %c0_137 = arith.constant 0 : index
    %c0_138 = arith.constant 0 : index
    %298 = vector.load %arg2[%c2_135, %c1_136, %c0_137, %c0_138] : memref<6x4x5x5xbf16, #tpu.memory_space<vmem>>, vector<1x1x5x5xbf16>
    %299 = vector.shape_cast %298 : vector<1x1x5x5xbf16> to vector<5x5xbf16>
    %300 = arith.extf %299 : vector<5x5xbf16> to vector<5x5xf32>
    %301 = arith.addf %297, %300 : vector<5x5xf32>
    %cst_139 = arith.constant dense<0xFF800000> : vector<5xf32>
    %302 = vector.multi_reduction <maximumf>, %301, %cst_139 [1] : vector<5x5xf32> to vector<5xf32>
    %303 = vector.shape_cast %302 : vector<5xf32> to vector<5x1xf32>
    %304 = vector.broadcast %303 : vector<5x1xf32> to vector<5x5xf32>
    %305 = arith.subf %301, %304 : vector<5x5xf32>
    %306 = math.exp %305 : vector<5x5xf32>
    %cst_140 = arith.constant dense<0.000000e+00> : vector<5xf32>
    %307 = vector.multi_reduction <add>, %306, %cst_140 [1] : vector<5x5xf32> to vector<5xf32>
    %308 = vector.shape_cast %307 : vector<5xf32> to vector<5x1xf32>
    %309 = tpu.reciprocal %308 {approx = true} : vector<5x1xf32> -> vector<5x1xf32>
    %310 = vector.broadcast %309 : vector<5x1xf32> to vector<5x5xf32>
    %311 = arith.mulf %306, %310 : vector<5x5xf32>
    %312 = arith.truncf %311 : vector<5x5xf32> to vector<5x5xbf16>
    %cst_141 = arith.constant dense<0.000000e+00> : vector<5x8xf32>
    %313 = tpu.matmul %312, %294, %cst_141 {dimension_numbers = #tpu.dot_dimension_numbers<[1], [0], [0], [1], [0, 0, 1, 1], [], []>} : vector<5x5xbf16>, vector<5x8xbf16>, vector<5x8xf32> -> vector<5x8xf32>
    %314 = arith.truncf %313 : vector<5x8xf32> to vector<5x8xbf16>
    %c0_142 = arith.constant 0 : index
    %c8_143 = arith.constant 8 : index
    %315 = vector.load %arg11[%c0_142, %c8_143] : memref<5x32xbf16, #tpu.memory_space<vmem>>, vector<5x8xbf16>
    tpu.vector_store %arg11[%c0_142, %c8_143], %314 {strides = array<i32>} : memref<5x32xbf16, #tpu.memory_space<vmem>>, vector<5x8xbf16>,
    %316 = vector.extract_strided_slice %267 {offsets = [0, 16], sizes = [5, 8], strides = [1, 1]} : vector<5x96xbf16> to vector<5x8xbf16>
    %317 = vector.extract_strided_slice %267 {offsets = [0, 48], sizes = [5, 8], strides = [1, 1]} : vector<5x96xbf16> to vector<5x8xbf16>
    %318 = vector.extract_strided_slice %267 {offsets = [0, 80], sizes = [5, 8], strides = [1, 1]} : vector<5x96xbf16> to vector<5x8xbf16>
    "tpu.trace_start"() <{level = 10 : i32, message = "qc,kc->qk"}> : () -> ()
    %cst_144 = arith.constant dense<0.000000e+00> : vector<5x5xf32>
    %319 = tpu.matmul %316, %317, %cst_144 {dimension_numbers = #tpu.dot_dimension_numbers<[1], [1], [0], [0], [0, 0, 1, 0], [], []>} : vector<5x8xbf16>, vector<5x8xbf16>, vector<5x5xf32> -> vector<5x5xf32>
    "tpu.trace_stop"() : () -> ()
    %cst_145 = arith.constant 0.353553385 : f32
    %320 = vector.broadcast %cst_145 : f32 to vector<5x5xf32>
    %321 = arith.mulf %319, %320 : vector<5x5xf32>
    %c2_146 = arith.constant 2 : index
    %c2_147 = arith.constant 2 : index
    %c0_148 = arith.constant 0 : index
    %c0_149 = arith.constant 0 : index
    %322 = vector.load %arg2[%c2_146, %c2_147, %c0_148, %c0_149] : memref<6x4x5x5xbf16, #tpu.memory_space<vmem>>, vector<1x1x5x5xbf16>
    %323 = vector.shape_cast %322 : vector<1x1x5x5xbf16> to vector<5x5xbf16>
    %324 = arith.extf %323 : vector<5x5xbf16> to vector<5x5xf32>
    %325 = arith.addf %321, %324 : vector<5x5xf32>
    %cst_150 = arith.constant dense<0xFF800000> : vector<5xf32>
    %326 = vector.multi_reduction <maximumf>, %325, %cst_150 [1] : vector<5x5xf32> to vector<5xf32>
    %327 = vector.shape_cast %326 : vector<5xf32> to vector<5x1xf32>
    %328 = vector.broadcast %327 : vector<5x1xf32> to vector<5x5xf32>
    %329 = arith.subf %325, %328 : vector<5x5xf32>
    %330 = math.exp %329 : vector<5x5xf32>
    %cst_151 = arith.constant dense<0.000000e+00> : vector<5xf32>
    %331 = vector.multi_reduction <add>, %330, %cst_151 [1] : vector<5x5xf32> to vector<5xf32>
    %332 = vector.shape_cast %331 : vector<5xf32> to vector<5x1xf32>
    %333 = tpu.reciprocal %332 {approx = true} : vector<5x1xf32> -> vector<5x1xf32>
    %334 = vector.broadcast %333 : vector<5x1xf32> to vector<5x5xf32>
    %335 = arith.mulf %330, %334 : vector<5x5xf32>
    %336 = arith.truncf %335 : vector<5x5xf32> to vector<5x5xbf16>
    %cst_152 = arith.constant dense<0.000000e+00> : vector<5x8xf32>
    %337 = tpu.matmul %336, %318, %cst_152 {dimension_numbers = #tpu.dot_dimension_numbers<[1], [0], [0], [1], [0, 0, 1, 1], [], []>} : vector<5x5xbf16>, vector<5x8xbf16>, vector<5x8xf32> -> vector<5x8xf32>
    %338 = arith.truncf %337 : vector<5x8xf32> to vector<5x8xbf16>
    %c0_153 = arith.constant 0 : index
    %c16_154 = arith.constant 16 : index
    %339 = vector.load %arg11[%c0_153, %c16_154] : memref<5x32xbf16, #tpu.memory_space<vmem>>, vector<5x8xbf16>
    tpu.vector_store %arg11[%c0_153, %c16_154], %338 {strides = array<i32>} : memref<5x32xbf16, #tpu.memory_space<vmem>>, vector<5x8xbf16>,
    %340 = vector.extract_strided_slice %267 {offsets = [0, 24], sizes = [5, 8], strides = [1, 1]} : vector<5x96xbf16> to vector<5x8xbf16>
    %341 = vector.extract_strided_slice %267 {offsets = [0, 56], sizes = [5, 8], strides = [1, 1]} : vector<5x96xbf16> to vector<5x8xbf16>
    %342 = vector.extract_strided_slice %267 {offsets = [0, 88], sizes = [5, 8], strides = [1, 1]} : vector<5x96xbf16> to vector<5x8xbf16>
    "tpu.trace_start"() <{level = 10 : i32, message = "qc,kc->qk"}> : () -> ()
    %cst_155 = arith.constant dense<0.000000e+00> : vector<5x5xf32>
    %343 = tpu.matmul %340, %341, %cst_155 {dimension_numbers = #tpu.dot_dimension_numbers<[1], [1], [0], [0], [0, 0, 1, 0], [], []>} : vector<5x8xbf16>, vector<5x8xbf16>, vector<5x5xf32> -> vector<5x5xf32>
    "tpu.trace_stop"() : () -> ()
    %cst_156 = arith.constant 0.353553385 : f32
    %344 = vector.broadcast %cst_156 : f32 to vector<5x5xf32>
    %345 = arith.mulf %343, %344 : vector<5x5xf32>
    %c2_157 = arith.constant 2 : index
    %c3_158 = arith.constant 3 : index
    %c0_159 = arith.constant 0 : index
    %c0_160 = arith.constant 0 : index
    %346 = vector.load %arg2[%c2_157, %c3_158, %c0_159, %c0_160] : memref<6x4x5x5xbf16, #tpu.memory_space<vmem>>, vector<1x1x5x5xbf16>
    %347 = vector.shape_cast %346 : vector<1x1x5x5xbf16> to vector<5x5xbf16>
    %348 = arith.extf %347 : vector<5x5xbf16> to vector<5x5xf32>
    %349 = arith.addf %345, %348 : vector<5x5xf32>
    %cst_161 = arith.constant dense<0xFF800000> : vector<5xf32>
    %350 = vector.multi_reduction <maximumf>, %349, %cst_161 [1] : vector<5x5xf32> to vector<5xf32>
    %351 = vector.shape_cast %350 : vector<5xf32> to vector<5x1xf32>
    %352 = vector.broadcast %351 : vector<5x1xf32> to vector<5x5xf32>
    %353 = arith.subf %349, %352 : vector<5x5xf32>
    %354 = math.exp %353 : vector<5x5xf32>
    %cst_162 = arith.constant dense<0.000000e+00> : vector<5xf32>
    %355 = vector.multi_reduction <add>, %354, %cst_162 [1] : vector<5x5xf32> to vector<5xf32>
    %356 = vector.shape_cast %355 : vector<5xf32> to vector<5x1xf32>
    %357 = tpu.reciprocal %356 {approx = true} : vector<5x1xf32> -> vector<5x1xf32>
    %358 = vector.broadcast %357 : vector<5x1xf32> to vector<5x5xf32>
    %359 = arith.mulf %354, %358 : vector<5x5xf32>
    %360 = arith.truncf %359 : vector<5x5xf32> to vector<5x5xbf16>
    %cst_163 = arith.constant dense<0.000000e+00> : vector<5x8xf32>
    %361 = tpu.matmul %360, %342, %cst_163 {dimension_numbers = #tpu.dot_dimension_numbers<[1], [0], [0], [1], [0, 0, 1, 1], [], []>} : vector<5x5xbf16>, vector<5x8xbf16>, vector<5x8xf32> -> vector<5x8xf32>
    %362 = arith.truncf %361 : vector<5x8xf32> to vector<5x8xbf16>
    %c0_164 = arith.constant 0 : index
    %c24_165 = arith.constant 24 : index
    %363 = vector.load %arg11[%c0_164, %c24_165] : memref<5x32xbf16, #tpu.memory_space<vmem>>, vector<5x8xbf16>
    tpu.vector_store %arg11[%c0_164, %c24_165], %362 {strides = array<i32>} : memref<5x32xbf16, #tpu.memory_space<vmem>>, vector<5x8xbf16>,
    %c0_166 = arith.constant 0 : index
    %c0_167 = arith.constant 0 : index
    %364 = vector.load %arg11[%c0_166, %c0_167] : memref<5x32xbf16, #tpu.memory_space<vmem>>, vector<5x32xbf16>
    %cst_168 = arith.constant dense<0.000000e+00> : vector<5x32xf32>
    %365 = tpu.matmul %364, %4, %cst_168 {dimension_numbers = #tpu.dot_dimension_numbers<[1], [0], [0], [1], [0, 0, 1, 1], [], []>} : vector<5x32xbf16>, vector<32x32xbf16>, vector<5x32xf32> -> vector<5x32xf32>
    %366 = arith.addf %262, %365 : vector<5x32xf32>
    %367 = vector.broadcast %5 : vector<1x32xf32> to vector<5x32xf32>
    %368 = arith.addf %366, %367 : vector<5x32xf32>
    %369 = arith.truncf %368 : vector<5x32xf32> to vector<5x32xbf16>
    %c2_169 = arith.constant 2 : index
    %c0_170 = arith.constant 0 : index
    %c0_171 = arith.constant 0 : index
    %370 = vector.load %arg9[%c2_169, %c0_170, %c0_171] : memref<6x5x32xbf16, #tpu.memory_space<vmem>>, vector<1x5x32xbf16>
    %371 = vector.shape_cast %370 : vector<1x5x32xbf16> to vector<5x32xbf16>
    %372 = vector.shape_cast %369 : vector<5x32xbf16> to vector<1x5x32xbf16>
    tpu.vector_store %arg9[%c2_169, %c0_170, %c0_171], %372 {strides = array<i32>} : memref<6x5x32xbf16, #tpu.memory_space<vmem>>, vector<1x5x32xbf16>,
    %cst_172 = arith.constant dense<0.000000e+00> : vector<32xf32>
    %373 = vector.multi_reduction <add>, %368, %cst_172 [0] : vector<5x32xf32> to vector<32xf32>
    %374 = vector.shape_cast %373 : vector<32xf32> to vector<1x32xf32>
    %375 = arith.addf %251, %374 : vector<1x32xf32>
    %376 = arith.mulf %368, %368 : vector<5x32xf32>
    %cst_173 = arith.constant dense<0.000000e+00> : vector<32xf32>
    %377 = vector.multi_reduction <add>, %376, %cst_173 [0] : vector<5x32xf32> to vector<32xf32>
    %378 = vector.shape_cast %377 : vector<32xf32> to vector<1x32xf32>
    %379 = arith.addf %255, %378 : vector<1x32xf32>
    %c3_174 = arith.constant 3 : index
    %c0_175 = arith.constant 0 : index
    %c0_176 = arith.constant 0 : index
    %380 = vector.load %arg1[%c3_174, %c0_175, %c0_176] : memref<6x5x32xbf16, #tpu.memory_space<vmem>>, vector<1x5x32xbf16>
    %381 = vector.shape_cast %380 : vector<1x5x32xbf16> to vector<5x32xbf16>
    %382 = arith.extf %381 : vector<5x32xbf16> to vector<5x32xf32>
    %383 = vector.broadcast %0 : vector<1x32xf32> to vector<5x32xf32>
    %384 = arith.mulf %382, %383 : vector<5x32xf32>
    %385 = vector.broadcast %1 : vector<1x32xf32> to vector<5x32xf32>
    %386 = arith.addf %384, %385 : vector<5x32xf32>
    %387 = arith.truncf %386 : vector<5x32xf32> to vector<5x32xbf16>
    %cst_177 = arith.constant dense<0.000000e+00> : vector<5x96xf32>
    %388 = tpu.matmul %387, %2, %cst_177 {dimension_numbers = #tpu.dot_dimension_numbers<[1], [0], [0], [1], [0, 0, 1, 1], [], []>} : vector<5x32xbf16>, vector<32x96xbf16>, vector<5x96xf32> -> vector<5x96xf32>
    %389 = vector.broadcast %3 : vector<1x96xf32> to vector<5x96xf32>
    %390 = arith.addf %388, %389 : vector<5x96xf32>
    %391 = arith.truncf %390 : vector<5x96xf32> to vector<5x96xbf16>
    %392 = vector.extract_strided_slice %391 {offsets = [0, 0], sizes = [5, 8], strides = [1, 1]} : vector<5x96xbf16> to vector<5x8xbf16>
    %393 = vector.extract_strided_slice %391 {offsets = [0, 32], sizes = [5, 8], strides = [1, 1]} : vector<5x96xbf16> to vector<5x8xbf16>
    %394 = vector.extract_strided_slice %391 {offsets = [0, 64], sizes = [5, 8], strides = [1, 1]} : vector<5x96xbf16> to vector<5x8xbf16>
    "tpu.trace_start"() <{level = 10 : i32, message = "qc,kc->qk"}> : () -> ()
    %cst_178 = arith.constant dense<0.000000e+00> : vector<5x5xf32>
    %395 = tpu.matmul %392, %393, %cst_178 {dimension_numbers = #tpu.dot_dimension_numbers<[1], [1], [0], [0], [0, 0, 1, 0], [], []>} : vector<5x8xbf16>, vector<5x8xbf16>, vector<5x5xf32> -> vector<5x5xf32>
    "tpu.trace_stop"() : () -> ()
    %cst_179 = arith.constant 0.353553385 : f32
    %396 = vector.broadcast %cst_179 : f32 to vector<5x5xf32>
    %397 = arith.mulf %395, %396 : vector<5x5xf32>
    %c3_180 = arith.constant 3 : index
    %c0_181 = arith.constant 0 : index
    %c0_182 = arith.constant 0 : index
    %c0_183 = arith.constant 0 : index
    %398 = vector.load %arg2[%c3_180, %c0_181, %c0_182, %c0_183] : memref<6x4x5x5xbf16, #tpu.memory_space<vmem>>, vector<1x1x5x5xbf16>
    %399 = vector.shape_cast %398 : vector<1x1x5x5xbf16> to vector<5x5xbf16>
    %400 = arith.extf %399 : vector<5x5xbf16> to vector<5x5xf32>
    %401 = arith.addf %397, %400 : vector<5x5xf32>
    %cst_184 = arith.constant dense<0xFF800000> : vector<5xf32>
    %402 = vector.multi_reduction <maximumf>, %401, %cst_184 [1] : vector<5x5xf32> to vector<5xf32>
    %403 = vector.shape_cast %402 : vector<5xf32> to vector<5x1xf32>
    %404 = vector.broadcast %403 : vector<5x1xf32> to vector<5x5xf32>
    %405 = arith.subf %401, %404 : vector<5x5xf32>
    %406 = math.exp %405 : vector<5x5xf32>
    %cst_185 = arith.constant dense<0.000000e+00> : vector<5xf32>
    %407 = vector.multi_reduction <add>, %406, %cst_185 [1] : vector<5x5xf32> to vector<5xf32>
    %408 = vector.shape_cast %407 : vector<5xf32> to vector<5x1xf32>
    %409 = tpu.reciprocal %408 {approx = true} : vector<5x1xf32> -> vector<5x1xf32>
    %410 = vector.broadcast %409 : vector<5x1xf32> to vector<5x5xf32>
    %411 = arith.mulf %406, %410 : vector<5x5xf32>
    %412 = arith.truncf %411 : vector<5x5xf32> to vector<5x5xbf16>
    %cst_186 = arith.constant dense<0.000000e+00> : vector<5x8xf32>
    %413 = tpu.matmul %412, %394, %cst_186 {dimension_numbers = #tpu.dot_dimension_numbers<[1], [0], [0], [1], [0, 0, 1, 1], [], []>} : vector<5x5xbf16>, vector<5x8xbf16>, vector<5x8xf32> -> vector<5x8xf32>
    %414 = arith.truncf %413 : vector<5x8xf32> to vector<5x8xbf16>
    %c0_187 = arith.constant 0 : index
    %c0_188 = arith.constant 0 : index
    %415 = vector.load %arg11[%c0_187, %c0_188] : memref<5x32xbf16, #tpu.memory_space<vmem>>, vector<5x8xbf16>
    tpu.vector_store %arg11[%c0_187, %c0_188], %414 {strides = array<i32>} : memref<5x32xbf16, #tpu.memory_space<vmem>>, vector<5x8xbf16>,
    %416 = vector.extract_strided_slice %391 {offsets = [0, 8], sizes = [5, 8], strides = [1, 1]} : vector<5x96xbf16> to vector<5x8xbf16>
    %417 = vector.extract_strided_slice %391 {offsets = [0, 40], sizes = [5, 8], strides = [1, 1]} : vector<5x96xbf16> to vector<5x8xbf16>
    %418 = vector.extract_strided_slice %391 {offsets = [0, 72], sizes = [5, 8], strides = [1, 1]} : vector<5x96xbf16> to vector<5x8xbf16>
    "tpu.trace_start"() <{level = 10 : i32, message = "qc,kc->qk"}> : () -> ()
    %cst_189 = arith.constant dense<0.000000e+00> : vector<5x5xf32>
    %419 = tpu.matmul %416, %417, %cst_189 {dimension_numbers = #tpu.dot_dimension_numbers<[1], [1], [0], [0], [0, 0, 1, 0], [], []>} : vector<5x8xbf16>, vector<5x8xbf16>, vector<5x5xf32> -> vector<5x5xf32>
    "tpu.trace_stop"() : () -> ()
    %cst_190 = arith.constant 0.353553385 : f32
    %420 = vector.broadcast %cst_190 : f32 to vector<5x5xf32>
    %421 = arith.mulf %419, %420 : vector<5x5xf32>
    %c3_191 = arith.constant 3 : index
    %c1_192 = arith.constant 1 : index
    %c0_193 = arith.constant 0 : index
    %c0_194 = arith.constant 0 : index
    %422 = vector.load %arg2[%c3_191, %c1_192, %c0_193, %c0_194] : memref<6x4x5x5xbf16, #tpu.memory_space<vmem>>, vector<1x1x5x5xbf16>
    %423 = vector.shape_cast %422 : vector<1x1x5x5xbf16> to vector<5x5xbf16>
    %424 = arith.extf %423 : vector<5x5xbf16> to vector<5x5xf32>
    %425 = arith.addf %421, %424 : vector<5x5xf32>
    %cst_195 = arith.constant dense<0xFF800000> : vector<5xf32>
    %426 = vector.multi_reduction <maximumf>, %425, %cst_195 [1] : vector<5x5xf32> to vector<5xf32>
    %427 = vector.shape_cast %426 : vector<5xf32> to vector<5x1xf32>
    %428 = vector.broadcast %427 : vector<5x1xf32> to vector<5x5xf32>
    %429 = arith.subf %425, %428 : vector<5x5xf32>
    %430 = math.exp %429 : vector<5x5xf32>
    %cst_196 = arith.constant dense<0.000000e+00> : vector<5xf32>
    %431 = vector.multi_reduction <add>, %430, %cst_196 [1] : vector<5x5xf32> to vector<5xf32>
    %432 = vector.shape_cast %431 : vector<5xf32> to vector<5x1xf32>
    %433 = tpu.reciprocal %432 {approx = true} : vector<5x1xf32> -> vector<5x1xf32>
    %434 = vector.broadcast %433 : vector<5x1xf32> to vector<5x5xf32>
    %435 = arith.mulf %430, %434 : vector<5x5xf32>
    %436 = arith.truncf %435 : vector<5x5xf32> to vector<5x5xbf16>
    %cst_197 = arith.constant dense<0.000000e+00> : vector<5x8xf32>
    %437 = tpu.matmul %436, %418, %cst_197 {dimension_numbers = #tpu.dot_dimension_numbers<[1], [0], [0], [1], [0, 0, 1, 1], [], []>} : vector<5x5xbf16>, vector<5x8xbf16>, vector<5x8xf32> -> vector<5x8xf32>
    %438 = arith.truncf %437 : vector<5x8xf32> to vector<5x8xbf16>
    %c0_198 = arith.constant 0 : index
    %c8_199 = arith.constant 8 : index
    %439 = vector.load %arg11[%c0_198, %c8_199] : memref<5x32xbf16, #tpu.memory_space<vmem>>, vector<5x8xbf16>
    tpu.vector_store %arg11[%c0_198, %c8_199], %438 {strides = array<i32>} : memref<5x32xbf16, #tpu.memory_space<vmem>>, vector<5x8xbf16>,
    %440 = vector.extract_strided_slice %391 {offsets = [0, 16], sizes = [5, 8], strides = [1, 1]} : vector<5x96xbf16> to vector<5x8xbf16>
    %441 = vector.extract_strided_slice %391 {offsets = [0, 48], sizes = [5, 8], strides = [1, 1]} : vector<5x96xbf16> to vector<5x8xbf16>
    %442 = vector.extract_strided_slice %391 {offsets = [0, 80], sizes = [5, 8], strides = [1, 1]} : vector<5x96xbf16> to vector<5x8xbf16>
    "tpu.trace_start"() <{level = 10 : i32, message = "qc,kc->qk"}> : () -> ()
    %cst_200 = arith.constant dense<0.000000e+00> : vector<5x5xf32>
    %443 = tpu.matmul %440, %441, %cst_200 {dimension_numbers = #tpu.dot_dimension_numbers<[1], [1], [0], [0], [0, 0, 1, 0], [], []>} : vector<5x8xbf16>, vector<5x8xbf16>, vector<5x5xf32> -> vector<5x5xf32>
    "tpu.trace_stop"() : () -> ()
    %cst_201 = arith.constant 0.353553385 : f32
    %444 = vector.broadcast %cst_201 : f32 to vector<5x5xf32>
    %445 = arith.mulf %443, %444 : vector<5x5xf32>
    %c3_202 = arith.constant 3 : index
    %c2_203 = arith.constant 2 : index
    %c0_204 = arith.constant 0 : index
    %c0_205 = arith.constant 0 : index
    %446 = vector.load %arg2[%c3_202, %c2_203, %c0_204, %c0_205] : memref<6x4x5x5xbf16, #tpu.memory_space<vmem>>, vector<1x1x5x5xbf16>
    %447 = vector.shape_cast %446 : vector<1x1x5x5xbf16> to vector<5x5xbf16>
    %448 = arith.extf %447 : vector<5x5xbf16> to vector<5x5xf32>
    %449 = arith.addf %445, %448 : vector<5x5xf32>
    %cst_206 = arith.constant dense<0xFF800000> : vector<5xf32>
    %450 = vector.multi_reduction <maximumf>, %449, %cst_206 [1] : vector<5x5xf32> to vector<5xf32>
    %451 = vector.shape_cast %450 : vector<5xf32> to vector<5x1xf32>
    %452 = vector.broadcast %451 : vector<5x1xf32> to vector<5x5xf32>
    %453 = arith.subf %449, %452 : vector<5x5xf32>
    %454 = math.exp %453 : vector<5x5xf32>
    %cst_207 = arith.constant dense<0.000000e+00> : vector<5xf32>
    %455 = vector.multi_reduction <add>, %454, %cst_207 [1] : vector<5x5xf32> to vector<5xf32>
    %456 = vector.shape_cast %455 : vector<5xf32> to vector<5x1xf32>
    %457 = tpu.reciprocal %456 {approx = true} : vector<5x1xf32> -> vector<5x1xf32>
    %458 = vector.broadcast %457 : vector<5x1xf32> to vector<5x5xf32>
    %459 = arith.mulf %454, %458 : vector<5x5xf32>
    %460 = arith.truncf %459 : vector<5x5xf32> to vector<5x5xbf16>
    %cst_208 = arith.constant dense<0.000000e+00> : vector<5x8xf32>
    %461 = tpu.matmul %460, %442, %cst_208 {dimension_numbers = #tpu.dot_dimension_numbers<[1], [0], [0], [1], [0, 0, 1, 1], [], []>} : vector<5x5xbf16>, vector<5x8xbf16>, vector<5x8xf32> -> vector<5x8xf32>
    %462 = arith.truncf %461 : vector<5x8xf32> to vector<5x8xbf16>
    %c0_209 = arith.constant 0 : index
    %c16_210 = arith.constant 16 : index
    %463 = vector.load %arg11[%c0_209, %c16_210] : memref<5x32xbf16, #tpu.memory_space<vmem>>, vector<5x8xbf16>
    tpu.vector_store %arg11[%c0_209, %c16_210], %462 {strides = array<i32>} : memref<5x32xbf16, #tpu.memory_space<vmem>>, vector<5x8xbf16>,
    %464 = vector.extract_strided_slice %391 {offsets = [0, 24], sizes = [5, 8], strides = [1, 1]} : vector<5x96xbf16> to vector<5x8xbf16>
    %465 = vector.extract_strided_slice %391 {offsets = [0, 56], sizes = [5, 8], strides = [1, 1]} : vector<5x96xbf16> to vector<5x8xbf16>
    %466 = vector.extract_strided_slice %391 {offsets = [0, 88], sizes = [5, 8], strides = [1, 1]} : vector<5x96xbf16> to vector<5x8xbf16>
    "tpu.trace_start"() <{level = 10 : i32, message = "qc,kc->qk"}> : () -> ()
    %cst_211 = arith.constant dense<0.000000e+00> : vector<5x5xf32>
    %467 = tpu.matmul %464, %465, %cst_211 {dimension_numbers = #tpu.dot_dimension_numbers<[1], [1], [0], [0], [0, 0, 1, 0], [], []>} : vector<5x8xbf16>, vector<5x8xbf16>, vector<5x5xf32> -> vector<5x5xf32>
    "tpu.trace_stop"() : () -> ()
    %cst_212 = arith.constant 0.353553385 : f32
    %468 = vector.broadcast %cst_212 : f32 to vector<5x5xf32>
    %469 = arith.mulf %467, %468 : vector<5x5xf32>
    %c3_213 = arith.constant 3 : index
    %c3_214 = arith.constant 3 : index
    %c0_215 = arith.constant 0 : index
    %c0_216 = arith.constant 0 : index
    %470 = vector.load %arg2[%c3_213, %c3_214, %c0_215, %c0_216] : memref<6x4x5x5xbf16, #tpu.memory_space<vmem>>, vector<1x1x5x5xbf16>
    %471 = vector.shape_cast %470 : vector<1x1x5x5xbf16> to vector<5x5xbf16>
    %472 = arith.extf %471 : vector<5x5xbf16> to vector<5x5xf32>
    %473 = arith.addf %469, %472 : vector<5x5xf32>
    %cst_217 = arith.constant dense<0xFF800000> : vector<5xf32>
    %474 = vector.multi_reduction <maximumf>, %473, %cst_217 [1] : vector<5x5xf32> to vector<5xf32>
    %475 = vector.shape_cast %474 : vector<5xf32> to vector<5x1xf32>
    %476 = vector.broadcast %475 : vector<5x1xf32> to vector<5x5xf32>
    %477 = arith.subf %473, %476 : vector<5x5xf32>
    %478 = math.exp %477 : vector<5x5xf32>
    %cst_218 = arith.constant dense<0.000000e+00> : vector<5xf32>
    %479 = vector.multi_reduction <add>, %478, %cst_218 [1] : vector<5x5xf32> to vector<5xf32>
    %480 = vector.shape_cast %479 : vector<5xf32> to vector<5x1xf32>
    %481 = tpu.reciprocal %480 {approx = true} : vector<5x1xf32> -> vector<5x1xf32>
    %482 = vector.broadcast %481 : vector<5x1xf32> to vector<5x5xf32>
    %483 = arith.mulf %478, %482 : vector<5x5xf32>
    %484 = arith.truncf %483 : vector<5x5xf32> to vector<5x5xbf16>
    %cst_219 = arith.constant dense<0.000000e+00> : vector<5x8xf32>
    %485 = tpu.matmul %484, %466, %cst_219 {dimension_numbers = #tpu.dot_dimension_numbers<[1], [0], [0], [1], [0, 0, 1, 1], [], []>} : vector<5x5xbf16>, vector<5x8xbf16>, vector<5x8xf32> -> vector<5x8xf32>
    %486 = arith.truncf %485 : vector<5x8xf32> to vector<5x8xbf16>
    %c0_220 = arith.constant 0 : index
    %c24_221 = arith.constant 24 : index
    %487 = vector.load %arg11[%c0_220, %c24_221] : memref<5x32xbf16, #tpu.memory_space<vmem>>, vector<5x8xbf16>
    tpu.vector_store %arg11[%c0_220, %c24_221], %486 {strides = array<i32>} : memref<5x32xbf16, #tpu.memory_space<vmem>>, vector<5x8xbf16>,
    %c0_222 = arith.constant 0 : index
    %c0_223 = arith.constant 0 : index
    %488 = vector.load %arg11[%c0_222, %c0_223] : memref<5x32xbf16, #tpu.memory_space<vmem>>, vector<5x32xbf16>
    %cst_224 = arith.constant dense<0.000000e+00> : vector<5x32xf32>
    %489 = tpu.matmul %488, %4, %cst_224 {dimension_numbers = #tpu.dot_dimension_numbers<[1], [0], [0], [1], [0, 0, 1, 1], [], []>} : vector<5x32xbf16>, vector<32x32xbf16>, vector<5x32xf32> -> vector<5x32xf32>
    %490 = arith.addf %386, %489 : vector<5x32xf32>
    %491 = vector.broadcast %5 : vector<1x32xf32> to vector<5x32xf32>
    %492 = arith.addf %490, %491 : vector<5x32xf32>
    %493 = arith.truncf %492 : vector<5x32xf32> to vector<5x32xbf16>
    %c3_225 = arith.constant 3 : index
    %c0_226 = arith.constant 0 : index
    %c0_227 = arith.constant 0 : index
    %494 = vector.load %arg9[%c3_225, %c0_226, %c0_227] : memref<6x5x32xbf16, #tpu.memory_space<vmem>>, vector<1x5x32xbf16>
    %495 = vector.shape_cast %494 : vector<1x5x32xbf16> to vector<5x32xbf16>
    %496 = vector.shape_cast %493 : vector<5x32xbf16> to vector<1x5x32xbf16>
    tpu.vector_store %arg9[%c3_225, %c0_226, %c0_227], %496 {strides = array<i32>} : memref<6x5x32xbf16, #tpu.memory_space<vmem>>, vector<1x5x32xbf16>,
    %cst_228 = arith.constant dense<0.000000e+00> : vector<32xf32>
    %497 = vector.multi_reduction <add>, %492, %cst_228 [0] : vector<5x32xf32> to vector<32xf32>
    %498 = vector.shape_cast %497 : vector<32xf32> to vector<1x32xf32>
    %499 = arith.addf %375, %498 : vector<1x32xf32>
    %500 = arith.mulf %492, %492 : vector<5x32xf32>
    %cst_229 = arith.constant dense<0.000000e+00> : vector<32xf32>
    %501 = vector.multi_reduction <add>, %500, %cst_229 [0] : vector<5x32xf32> to vector<32xf32>
    %502 = vector.shape_cast %501 : vector<32xf32> to vector<1x32xf32>
    %503 = arith.addf %379, %502 : vector<1x32xf32>
    %c4 = arith.constant 4 : index
    %c0_230 = arith.constant 0 : index
    %c0_231 = arith.constant 0 : index
    %504 = vector.load %arg1[%c4, %c0_230, %c0_231] : memref<6x5x32xbf16, #tpu.memory_space<vmem>>, vector<1x5x32xbf16>
    %505 = vector.shape_cast %504 : vector<1x5x32xbf16> to vector<5x32xbf16>
    %506 = arith.extf %505 : vector<5x32xbf16> to vector<5x32xf32>
    %507 = vector.broadcast %0 : vector<1x32xf32> to vector<5x32xf32>
    %508 = arith.mulf %506, %507 : vector<5x32xf32>
    %509 = vector.broadcast %1 : vector<1x32xf32> to vector<5x32xf32>
    %510 = arith.addf %508, %509 : vector<5x32xf32>
    %511 = arith.truncf %510 : vector<5x32xf32> to vector<5x32xbf16>
    %cst_232 = arith.constant dense<0.000000e+00> : vector<5x96xf32>
    %512 = tpu.matmul %511, %2, %cst_232 {dimension_numbers = #tpu.dot_dimension_numbers<[1], [0], [0], [1], [0, 0, 1, 1], [], []>} : vector<5x32xbf16>, vector<32x96xbf16>, vector<5x96xf32> -> vector<5x96xf32>
    %513 = vector.broadcast %3 : vector<1x96xf32> to vector<5x96xf32>
    %514 = arith.addf %512, %513 : vector<5x96xf32>
    %515 = arith.truncf %514 : vector<5x96xf32> to vector<5x96xbf16>
    %516 = vector.extract_strided_slice %515 {offsets = [0, 0], sizes = [5, 8], strides = [1, 1]} : vector<5x96xbf16> to vector<5x8xbf16>
    %517 = vector.extract_strided_slice %515 {offsets = [0, 32], sizes = [5, 8], strides = [1, 1]} : vector<5x96xbf16> to vector<5x8xbf16>
    %518 = vector.extract_strided_slice %515 {offsets = [0, 64], sizes = [5, 8], strides = [1, 1]} : vector<5x96xbf16> to vector<5x8xbf16>
    "tpu.trace_start"() <{level = 10 : i32, message = "qc,kc->qk"}> : () -> ()
    %cst_233 = arith.constant dense<0.000000e+00> : vector<5x5xf32>
    %519 = tpu.matmul %516, %517, %cst_233 {dimension_numbers = #tpu.dot_dimension_numbers<[1], [1], [0], [0], [0, 0, 1, 0], [], []>} : vector<5x8xbf16>, vector<5x8xbf16>, vector<5x5xf32> -> vector<5x5xf32>
    "tpu.trace_stop"() : () -> ()
    %cst_234 = arith.constant 0.353553385 : f32
    %520 = vector.broadcast %cst_234 : f32 to vector<5x5xf32>
    %521 = arith.mulf %519, %520 : vector<5x5xf32>
    %c4_235 = arith.constant 4 : index
    %c0_236 = arith.constant 0 : index
    %c0_237 = arith.constant 0 : index
    %c0_238 = arith.constant 0 : index
    %522 = vector.load %arg2[%c4_235, %c0_236, %c0_237, %c0_238] : memref<6x4x5x5xbf16, #tpu.memory_space<vmem>>, vector<1x1x5x5xbf16>
    %523 = vector.shape_cast %522 : vector<1x1x5x5xbf16> to vector<5x5xbf16>
    %524 = arith.extf %523 : vector<5x5xbf16> to vector<5x5xf32>
    %525 = arith.addf %521, %524 : vector<5x5xf32>
    %cst_239 = arith.constant dense<0xFF800000> : vector<5xf32>
    %526 = vector.multi_reduction <maximumf>, %525, %cst_239 [1] : vector<5x5xf32> to vector<5xf32>
    %527 = vector.shape_cast %526 : vector<5xf32> to vector<5x1xf32>
    %528 = vector.broadcast %527 : vector<5x1xf32> to vector<5x5xf32>
    %529 = arith.subf %525, %528 : vector<5x5xf32>
    %530 = math.exp %529 : vector<5x5xf32>
    %cst_240 = arith.constant dense<0.000000e+00> : vector<5xf32>
    %531 = vector.multi_reduction <add>, %530, %cst_240 [1] : vector<5x5xf32> to vector<5xf32>
    %532 = vector.shape_cast %531 : vector<5xf32> to vector<5x1xf32>
    %533 = tpu.reciprocal %532 {approx = true} : vector<5x1xf32> -> vector<5x1xf32>
    %534 = vector.broadcast %533 : vector<5x1xf32> to vector<5x5xf32>
    %535 = arith.mulf %530, %534 : vector<5x5xf32>
    %536 = arith.truncf %535 : vector<5x5xf32> to vector<5x5xbf16>
    %cst_241 = arith.constant dense<0.000000e+00> : vector<5x8xf32>
    %537 = tpu.matmul %536, %518, %cst_241 {dimension_numbers = #tpu.dot_dimension_numbers<[1], [0], [0], [1], [0, 0, 1, 1], [], []>} : vector<5x5xbf16>, vector<5x8xbf16>, vector<5x8xf32> -> vector<5x8xf32>
    %538 = arith.truncf %537 : vector<5x8xf32> to vector<5x8xbf16>
    %c0_242 = arith.constant 0 : index
    %c0_243 = arith.constant 0 : index
    %539 = vector.load %arg11[%c0_242, %c0_243] : memref<5x32xbf16, #tpu.memory_space<vmem>>, vector<5x8xbf16>
    tpu.vector_store %arg11[%c0_242, %c0_243], %538 {strides = array<i32>} : memref<5x32xbf16, #tpu.memory_space<vmem>>, vector<5x8xbf16>,
    %540 = vector.extract_strided_slice %515 {offsets = [0, 8], sizes = [5, 8], strides = [1, 1]} : vector<5x96xbf16> to vector<5x8xbf16>
    %541 = vector.extract_strided_slice %515 {offsets = [0, 40], sizes = [5, 8], strides = [1, 1]} : vector<5x96xbf16> to vector<5x8xbf16>
    %542 = vector.extract_strided_slice %515 {offsets = [0, 72], sizes = [5, 8], strides = [1, 1]} : vector<5x96xbf16> to vector<5x8xbf16>
    "tpu.trace_start"() <{level = 10 : i32, message = "qc,kc->qk"}> : () -> ()
    %cst_244 = arith.constant dense<0.000000e+00> : vector<5x5xf32>
    %543 = tpu.matmul %540, %541, %cst_244 {dimension_numbers = #tpu.dot_dimension_numbers<[1], [1], [0], [0], [0, 0, 1, 0], [], []>} : vector<5x8xbf16>, vector<5x8xbf16>, vector<5x5xf32> -> vector<5x5xf32>
    "tpu.trace_stop"() : () -> ()
    %cst_245 = arith.constant 0.353553385 : f32
    %544 = vector.broadcast %cst_245 : f32 to vector<5x5xf32>
    %545 = arith.mulf %543, %544 : vector<5x5xf32>
    %c4_246 = arith.constant 4 : index
    %c1_247 = arith.constant 1 : index
    %c0_248 = arith.constant 0 : index
    %c0_249 = arith.constant 0 : index
    %546 = vector.load %arg2[%c4_246, %c1_247, %c0_248, %c0_249] : memref<6x4x5x5xbf16, #tpu.memory_space<vmem>>, vector<1x1x5x5xbf16>
    %547 = vector.shape_cast %546 : vector<1x1x5x5xbf16> to vector<5x5xbf16>
    %548 = arith.extf %547 : vector<5x5xbf16> to vector<5x5xf32>
    %549 = arith.addf %545, %548 : vector<5x5xf32>
    %cst_250 = arith.constant dense<0xFF800000> : vector<5xf32>
    %550 = vector.multi_reduction <maximumf>, %549, %cst_250 [1] : vector<5x5xf32> to vector<5xf32>
    %551 = vector.shape_cast %550 : vector<5xf32> to vector<5x1xf32>
    %552 = vector.broadcast %551 : vector<5x1xf32> to vector<5x5xf32>
    %553 = arith.subf %549, %552 : vector<5x5xf32>
    %554 = math.exp %553 : vector<5x5xf32>
    %cst_251 = arith.constant dense<0.000000e+00> : vector<5xf32>
    %555 = vector.multi_reduction <add>, %554, %cst_251 [1] : vector<5x5xf32> to vector<5xf32>
    %556 = vector.shape_cast %555 : vector<5xf32> to vector<5x1xf32>
    %557 = tpu.reciprocal %556 {approx = true} : vector<5x1xf32> -> vector<5x1xf32>
    %558 = vector.broadcast %557 : vector<5x1xf32> to vector<5x5xf32>
    %559 = arith.mulf %554, %558 : vector<5x5xf32>
    %560 = arith.truncf %559 : vector<5x5xf32> to vector<5x5xbf16>
    %cst_252 = arith.constant dense<0.000000e+00> : vector<5x8xf32>
    %561 = tpu.matmul %560, %542, %cst_252 {dimension_numbers = #tpu.dot_dimension_numbers<[1], [0], [0], [1], [0, 0, 1, 1], [], []>} : vector<5x5xbf16>, vector<5x8xbf16>, vector<5x8xf32> -> vector<5x8xf32>
    %562 = arith.truncf %561 : vector<5x8xf32> to vector<5x8xbf16>
    %c0_253 = arith.constant 0 : index
    %c8_254 = arith.constant 8 : index
    %563 = vector.load %arg11[%c0_253, %c8_254] : memref<5x32xbf16, #tpu.memory_space<vmem>>, vector<5x8xbf16>
    tpu.vector_store %arg11[%c0_253, %c8_254], %562 {strides = array<i32>} : memref<5x32xbf16, #tpu.memory_space<vmem>>, vector<5x8xbf16>,
    %564 = vector.extract_strided_slice %515 {offsets = [0, 16], sizes = [5, 8], strides = [1, 1]} : vector<5x96xbf16> to vector<5x8xbf16>
    %565 = vector.extract_strided_slice %515 {offsets = [0, 48], sizes = [5, 8], strides = [1, 1]} : vector<5x96xbf16> to vector<5x8xbf16>
    %566 = vector.extract_strided_slice %515 {offsets = [0, 80], sizes = [5, 8], strides = [1, 1]} : vector<5x96xbf16> to vector<5x8xbf16>
    "tpu.trace_start"() <{level = 10 : i32, message = "qc,kc->qk"}> : () -> ()
    %cst_255 = arith.constant dense<0.000000e+00> : vector<5x5xf32>
    %567 = tpu.matmul %564, %565, %cst_255 {dimension_numbers = #tpu.dot_dimension_numbers<[1], [1], [0], [0], [0, 0, 1, 0], [], []>} : vector<5x8xbf16>, vector<5x8xbf16>, vector<5x5xf32> -> vector<5x5xf32>
    "tpu.trace_stop"() : () -> ()
    %cst_256 = arith.constant 0.353553385 : f32
    %568 = vector.broadcast %cst_256 : f32 to vector<5x5xf32>
    %569 = arith.mulf %567, %568 : vector<5x5xf32>
    %c4_257 = arith.constant 4 : index
    %c2_258 = arith.constant 2 : index
    %c0_259 = arith.constant 0 : index
    %c0_260 = arith.constant 0 : index
    %570 = vector.load %arg2[%c4_257, %c2_258, %c0_259, %c0_260] : memref<6x4x5x5xbf16, #tpu.memory_space<vmem>>, vector<1x1x5x5xbf16>
    %571 = vector.shape_cast %570 : vector<1x1x5x5xbf16> to vector<5x5xbf16>
    %572 = arith.extf %571 : vector<5x5xbf16> to vector<5x5xf32>
    %573 = arith.addf %569, %572 : vector<5x5xf32>
    %cst_261 = arith.constant dense<0xFF800000> : vector<5xf32>
    %574 = vector.multi_reduction <maximumf>, %573, %cst_261 [1] : vector<5x5xf32> to vector<5xf32>
    %575 = vector.shape_cast %574 : vector<5xf32> to vector<5x1xf32>
    %576 = vector.broadcast %575 : vector<5x1xf32> to vector<5x5xf32>
    %577 = arith.subf %573, %576 : vector<5x5xf32>
    %578 = math.exp %577 : vector<5x5xf32>
    %cst_262 = arith.constant dense<0.000000e+00> : vector<5xf32>
    %579 = vector.multi_reduction <add>, %578, %cst_262 [1] : vector<5x5xf32> to vector<5xf32>
    %580 = vector.shape_cast %579 : vector<5xf32> to vector<5x1xf32>
    %581 = tpu.reciprocal %580 {approx = true} : vector<5x1xf32> -> vector<5x1xf32>
    %582 = vector.broadcast %581 : vector<5x1xf32> to vector<5x5xf32>
    %583 = arith.mulf %578, %582 : vector<5x5xf32>
    %584 = arith.truncf %583 : vector<5x5xf32> to vector<5x5xbf16>
    %cst_263 = arith.constant dense<0.000000e+00> : vector<5x8xf32>
    %585 = tpu.matmul %584, %566, %cst_263 {dimension_numbers = #tpu.dot_dimension_numbers<[1], [0], [0], [1], [0, 0, 1, 1], [], []>} : vector<5x5xbf16>, vector<5x8xbf16>, vector<5x8xf32> -> vector<5x8xf32>
    %586 = arith.truncf %585 : vector<5x8xf32> to vector<5x8xbf16>
    %c0_264 = arith.constant 0 : index
    %c16_265 = arith.constant 16 : index
    %587 = vector.load %arg11[%c0_264, %c16_265] : memref<5x32xbf16, #tpu.memory_space<vmem>>, vector<5x8xbf16>
    tpu.vector_store %arg11[%c0_264, %c16_265], %586 {strides = array<i32>} : memref<5x32xbf16, #tpu.memory_space<vmem>>, vector<5x8xbf16>,
    %588 = vector.extract_strided_slice %515 {offsets = [0, 24], sizes = [5, 8], strides = [1, 1]} : vector<5x96xbf16> to vector<5x8xbf16>
    %589 = vector.extract_strided_slice %515 {offsets = [0, 56], sizes = [5, 8], strides = [1, 1]} : vector<5x96xbf16> to vector<5x8xbf16>
    %590 = vector.extract_strided_slice %515 {offsets = [0, 88], sizes = [5, 8], strides = [1, 1]} : vector<5x96xbf16> to vector<5x8xbf16>
    "tpu.trace_start"() <{level = 10 : i32, message = "qc,kc->qk"}> : () -> ()
    %cst_266 = arith.constant dense<0.000000e+00> : vector<5x5xf32>
    %591 = tpu.matmul %588, %589, %cst_266 {dimension_numbers = #tpu.dot_dimension_numbers<[1], [1], [0], [0], [0, 0, 1, 0], [], []>} : vector<5x8xbf16>, vector<5x8xbf16>, vector<5x5xf32> -> vector<5x5xf32>
    "tpu.trace_stop"() : () -> ()
    %cst_267 = arith.constant 0.353553385 : f32
    %592 = vector.broadcast %cst_267 : f32 to vector<5x5xf32>
    %593 = arith.mulf %591, %592 : vector<5x5xf32>
    %c4_268 = arith.constant 4 : index
    %c3_269 = arith.constant 3 : index
    %c0_270 = arith.constant 0 : index
    %c0_271 = arith.constant 0 : index
    %594 = vector.load %arg2[%c4_268, %c3_269, %c0_270, %c0_271] : memref<6x4x5x5xbf16, #tpu.memory_space<vmem>>, vector<1x1x5x5xbf16>
    %595 = vector.shape_cast %594 : vector<1x1x5x5xbf16> to vector<5x5xbf16>
    %596 = arith.extf %595 : vector<5x5xbf16> to vector<5x5xf32>
    %597 = arith.addf %593, %596 : vector<5x5xf32>
    %cst_272 = arith.constant dense<0xFF800000> : vector<5xf32>
    %598 = vector.multi_reduction <maximumf>, %597, %cst_272 [1] : vector<5x5xf32> to vector<5xf32>
    %599 = vector.shape_cast %598 : vector<5xf32> to vector<5x1xf32>
    %600 = vector.broadcast %599 : vector<5x1xf32> to vector<5x5xf32>
    %601 = arith.subf %597, %600 : vector<5x5xf32>
    %602 = math.exp %601 : vector<5x5xf32>
    %cst_273 = arith.constant dense<0.000000e+00> : vector<5xf32>
    %603 = vector.multi_reduction <add>, %602, %cst_273 [1] : vector<5x5xf32> to vector<5xf32>
    %604 = vector.shape_cast %603 : vector<5xf32> to vector<5x1xf32>
    %605 = tpu.reciprocal %604 {approx = true} : vector<5x1xf32> -> vector<5x1xf32>
    %606 = vector.broadcast %605 : vector<5x1xf32> to vector<5x5xf32>
    %607 = arith.mulf %602, %606 : vector<5x5xf32>
    %608 = arith.truncf %607 : vector<5x5xf32> to vector<5x5xbf16>
    %cst_274 = arith.constant dense<0.000000e+00> : vector<5x8xf32>
    %609 = tpu.matmul %608, %590, %cst_274 {dimension_numbers = #tpu.dot_dimension_numbers<[1], [0], [0], [1], [0, 0, 1, 1], [], []>} : vector<5x5xbf16>, vector<5x8xbf16>, vector<5x8xf32> -> vector<5x8xf32>
    %610 = arith.truncf %609 : vector<5x8xf32> to vector<5x8xbf16>
    %c0_275 = arith.constant 0 : index
    %c24_276 = arith.constant 24 : index
    %611 = vector.load %arg11[%c0_275, %c24_276] : memref<5x32xbf16, #tpu.memory_space<vmem>>, vector<5x8xbf16>
    tpu.vector_store %arg11[%c0_275, %c24_276], %610 {strides = array<i32>} : memref<5x32xbf16, #tpu.memory_space<vmem>>, vector<5x8xbf16>,
    %c0_277 = arith.constant 0 : index
    %c0_278 = arith.constant 0 : index
    %612 = vector.load %arg11[%c0_277, %c0_278] : memref<5x32xbf16, #tpu.memory_space<vmem>>, vector<5x32xbf16>
    %cst_279 = arith.constant dense<0.000000e+00> : vector<5x32xf32>
    %613 = tpu.matmul %612, %4, %cst_279 {dimension_numbers = #tpu.dot_dimension_numbers<[1], [0], [0], [1], [0, 0, 1, 1], [], []>} : vector<5x32xbf16>, vector<32x32xbf16>, vector<5x32xf32> -> vector<5x32xf32>
    %614 = arith.addf %510, %613 : vector<5x32xf32>
    %615 = vector.broadcast %5 : vector<1x32xf32> to vector<5x32xf32>
    %616 = arith.addf %614, %615 : vector<5x32xf32>
    %617 = arith.truncf %616 : vector<5x32xf32> to vector<5x32xbf16>
    %c4_280 = arith.constant 4 : index
    %c0_281 = arith.constant 0 : index
    %c0_282 = arith.constant 0 : index
    %618 = vector.load %arg9[%c4_280, %c0_281, %c0_282] : memref<6x5x32xbf16, #tpu.memory_space<vmem>>, vector<1x5x32xbf16>
    %619 = vector.shape_cast %618 : vector<1x5x32xbf16> to vector<5x32xbf16>
    %620 = vector.shape_cast %617 : vector<5x32xbf16> to vector<1x5x32xbf16>
    tpu.vector_store %arg9[%c4_280, %c0_281, %c0_282], %620 {strides = array<i32>} : memref<6x5x32xbf16, #tpu.memory_space<vmem>>, vector<1x5x32xbf16>,
    %cst_283 = arith.constant dense<0.000000e+00> : vector<32xf32>
    %621 = vector.multi_reduction <add>, %616, %cst_283 [0] : vector<5x32xf32> to vector<32xf32>
    %622 = vector.shape_cast %621 : vector<32xf32> to vector<1x32xf32>
    %623 = arith.addf %499, %622 : vector<1x32xf32>
    %624 = arith.mulf %616, %616 : vector<5x32xf32>
    %cst_284 = arith.constant dense<0.000000e+00> : vector<32xf32>
    %625 = vector.multi_reduction <add>, %624, %cst_284 [0] : vector<5x32xf32> to vector<32xf32>
    %626 = vector.shape_cast %625 : vector<32xf32> to vector<1x32xf32>
    %627 = arith.addf %503, %626 : vector<1x32xf32>
    %c5 = arith.constant 5 : index
    %c0_285 = arith.constant 0 : index
    %c0_286 = arith.constant 0 : index
    %628 = vector.load %arg1[%c5, %c0_285, %c0_286] : memref<6x5x32xbf16, #tpu.memory_space<vmem>>, vector<1x5x32xbf16>
    %629 = vector.shape_cast %628 : vector<1x5x32xbf16> to vector<5x32xbf16>
    %630 = arith.extf %629 : vector<5x32xbf16> to vector<5x32xf32>
    %631 = vector.broadcast %0 : vector<1x32xf32> to vector<5x32xf32>
    %632 = arith.mulf %630, %631 : vector<5x32xf32>
    %633 = vector.broadcast %1 : vector<1x32xf32> to vector<5x32xf32>
    %634 = arith.addf %632, %633 : vector<5x32xf32>
    %635 = arith.truncf %634 : vector<5x32xf32> to vector<5x32xbf16>
    %cst_287 = arith.constant dense<0.000000e+00> : vector<5x96xf32>
    %636 = tpu.matmul %635, %2, %cst_287 {dimension_numbers = #tpu.dot_dimension_numbers<[1], [0], [0], [1], [0, 0, 1, 1], [], []>} : vector<5x32xbf16>, vector<32x96xbf16>, vector<5x96xf32> -> vector<5x96xf32>
    %637 = vector.broadcast %3 : vector<1x96xf32> to vector<5x96xf32>
    %638 = arith.addf %636, %637 : vector<5x96xf32>
    %639 = arith.truncf %638 : vector<5x96xf32> to vector<5x96xbf16>
    %640 = vector.extract_strided_slice %639 {offsets = [0, 0], sizes = [5, 8], strides = [1, 1]} : vector<5x96xbf16> to vector<5x8xbf16>
    %641 = vector.extract_strided_slice %639 {offsets = [0, 32], sizes = [5, 8], strides = [1, 1]} : vector<5x96xbf16> to vector<5x8xbf16>
    %642 = vector.extract_strided_slice %639 {offsets = [0, 64], sizes = [5, 8], strides = [1, 1]} : vector<5x96xbf16> to vector<5x8xbf16>
    "tpu.trace_start"() <{level = 10 : i32, message = "qc,kc->qk"}> : () -> ()
    %cst_288 = arith.constant dense<0.000000e+00> : vector<5x5xf32>
    %643 = tpu.matmul %640, %641, %cst_288 {dimension_numbers = #tpu.dot_dimension_numbers<[1], [1], [0], [0], [0, 0, 1, 0], [], []>} : vector<5x8xbf16>, vector<5x8xbf16>, vector<5x5xf32> -> vector<5x5xf32>
    "tpu.trace_stop"() : () -> ()
    %cst_289 = arith.constant 0.353553385 : f32
    %644 = vector.broadcast %cst_289 : f32 to vector<5x5xf32>
    %645 = arith.mulf %643, %644 : vector<5x5xf32>
    %c5_290 = arith.constant 5 : index
    %c0_291 = arith.constant 0 : index
    %c0_292 = arith.constant 0 : index
    %c0_293 = arith.constant 0 : index
    %646 = vector.load %arg2[%c5_290, %c0_291, %c0_292, %c0_293] : memref<6x4x5x5xbf16, #tpu.memory_space<vmem>>, vector<1x1x5x5xbf16>
    %647 = vector.shape_cast %646 : vector<1x1x5x5xbf16> to vector<5x5xbf16>
    %648 = arith.extf %647 : vector<5x5xbf16> to vector<5x5xf32>
    %649 = arith.addf %645, %648 : vector<5x5xf32>
    %cst_294 = arith.constant dense<0xFF800000> : vector<5xf32>
    %650 = vector.multi_reduction <maximumf>, %649, %cst_294 [1] : vector<5x5xf32> to vector<5xf32>
    %651 = vector.shape_cast %650 : vector<5xf32> to vector<5x1xf32>
    %652 = vector.broadcast %651 : vector<5x1xf32> to vector<5x5xf32>
    %653 = arith.subf %649, %652 : vector<5x5xf32>
    %654 = math.exp %653 : vector<5x5xf32>
    %cst_295 = arith.constant dense<0.000000e+00> : vector<5xf32>
    %655 = vector.multi_reduction <add>, %654, %cst_295 [1] : vector<5x5xf32> to vector<5xf32>
    %656 = vector.shape_cast %655 : vector<5xf32> to vector<5x1xf32>
    %657 = tpu.reciprocal %656 {approx = true} : vector<5x1xf32> -> vector<5x1xf32>
    %658 = vector.broadcast %657 : vector<5x1xf32> to vector<5x5xf32>
    %659 = arith.mulf %654, %658 : vector<5x5xf32>
    %660 = arith.truncf %659 : vector<5x5xf32> to vector<5x5xbf16>
    %cst_296 = arith.constant dense<0.000000e+00> : vector<5x8xf32>
    %661 = tpu.matmul %660, %642, %cst_296 {dimension_numbers = #tpu.dot_dimension_numbers<[1], [0], [0], [1], [0, 0, 1, 1], [], []>} : vector<5x5xbf16>, vector<5x8xbf16>, vector<5x8xf32> -> vector<5x8xf32>
    %662 = arith.truncf %661 : vector<5x8xf32> to vector<5x8xbf16>
    %c0_297 = arith.constant 0 : index
    %c0_298 = arith.constant 0 : index
    %663 = vector.load %arg11[%c0_297, %c0_298] : memref<5x32xbf16, #tpu.memory_space<vmem>>, vector<5x8xbf16>
    tpu.vector_store %arg11[%c0_297, %c0_298], %662 {strides = array<i32>} : memref<5x32xbf16, #tpu.memory_space<vmem>>, vector<5x8xbf16>,
    %664 = vector.extract_strided_slice %639 {offsets = [0, 8], sizes = [5, 8], strides = [1, 1]} : vector<5x96xbf16> to vector<5x8xbf16>
    %665 = vector.extract_strided_slice %639 {offsets = [0, 40], sizes = [5, 8], strides = [1, 1]} : vector<5x96xbf16> to vector<5x8xbf16>
    %666 = vector.extract_strided_slice %639 {offsets = [0, 72], sizes = [5, 8], strides = [1, 1]} : vector<5x96xbf16> to vector<5x8xbf16>
    "tpu.trace_start"() <{level = 10 : i32, message = "qc,kc->qk"}> : () -> ()
    %cst_299 = arith.constant dense<0.000000e+00> : vector<5x5xf32>
    %667 = tpu.matmul %664, %665, %cst_299 {dimension_numbers = #tpu.dot_dimension_numbers<[1], [1], [0], [0], [0, 0, 1, 0], [], []>} : vector<5x8xbf16>, vector<5x8xbf16>, vector<5x5xf32> -> vector<5x5xf32>
    "tpu.trace_stop"() : () -> ()
    %cst_300 = arith.constant 0.353553385 : f32
    %668 = vector.broadcast %cst_300 : f32 to vector<5x5xf32>
    %669 = arith.mulf %667, %668 : vector<5x5xf32>
    %c5_301 = arith.constant 5 : index
    %c1_302 = arith.constant 1 : index
    %c0_303 = arith.constant 0 : index
    %c0_304 = arith.constant 0 : index
    %670 = vector.load %arg2[%c5_301, %c1_302, %c0_303, %c0_304] : memref<6x4x5x5xbf16, #tpu.memory_space<vmem>>, vector<1x1x5x5xbf16>
    %671 = vector.shape_cast %670 : vector<1x1x5x5xbf16> to vector<5x5xbf16>
    %672 = arith.extf %671 : vector<5x5xbf16> to vector<5x5xf32>
    %673 = arith.addf %669, %672 : vector<5x5xf32>
    %cst_305 = arith.constant dense<0xFF800000> : vector<5xf32>
    %674 = vector.multi_reduction <maximumf>, %673, %cst_305 [1] : vector<5x5xf32> to vector<5xf32>
    %675 = vector.shape_cast %674 : vector<5xf32> to vector<5x1xf32>
    %676 = vector.broadcast %675 : vector<5x1xf32> to vector<5x5xf32>
    %677 = arith.subf %673, %676 : vector<5x5xf32>
    %678 = math.exp %677 : vector<5x5xf32>
    %cst_306 = arith.constant dense<0.000000e+00> : vector<5xf32>
    %679 = vector.multi_reduction <add>, %678, %cst_306 [1] : vector<5x5xf32> to vector<5xf32>
    %680 = vector.shape_cast %679 : vector<5xf32> to vector<5x1xf32>
    %681 = tpu.reciprocal %680 {approx = true} : vector<5x1xf32> -> vector<5x1xf32>
    %682 = vector.broadcast %681 : vector<5x1xf32> to vector<5x5xf32>
    %683 = arith.mulf %678, %682 : vector<5x5xf32>
    %684 = arith.truncf %683 : vector<5x5xf32> to vector<5x5xbf16>
    %cst_307 = arith.constant dense<0.000000e+00> : vector<5x8xf32>
    %685 = tpu.matmul %684, %666, %cst_307 {dimension_numbers = #tpu.dot_dimension_numbers<[1], [0], [0], [1], [0, 0, 1, 1], [], []>} : vector<5x5xbf16>, vector<5x8xbf16>, vector<5x8xf32> -> vector<5x8xf32>
    %686 = arith.truncf %685 : vector<5x8xf32> to vector<5x8xbf16>
    %c0_308 = arith.constant 0 : index
    %c8_309 = arith.constant 8 : index
    %687 = vector.load %arg11[%c0_308, %c8_309] : memref<5x32xbf16, #tpu.memory_space<vmem>>, vector<5x8xbf16>
    tpu.vector_store %arg11[%c0_308, %c8_309], %686 {strides = array<i32>} : memref<5x32xbf16, #tpu.memory_space<vmem>>, vector<5x8xbf16>,
    %688 = vector.extract_strided_slice %639 {offsets = [0, 16], sizes = [5, 8], strides = [1, 1]} : vector<5x96xbf16> to vector<5x8xbf16>
    %689 = vector.extract_strided_slice %639 {offsets = [0, 48], sizes = [5, 8], strides = [1, 1]} : vector<5x96xbf16> to vector<5x8xbf16>
    %690 = vector.extract_strided_slice %639 {offsets = [0, 80], sizes = [5, 8], strides = [1, 1]} : vector<5x96xbf16> to vector<5x8xbf16>
    "tpu.trace_start"() <{level = 10 : i32, message = "qc,kc->qk"}> : () -> ()
    %cst_310 = arith.constant dense<0.000000e+00> : vector<5x5xf32>
    %691 = tpu.matmul %688, %689, %cst_310 {dimension_numbers = #tpu.dot_dimension_numbers<[1], [1], [0], [0], [0, 0, 1, 0], [], []>} : vector<5x8xbf16>, vector<5x8xbf16>, vector<5x5xf32> -> vector<5x5xf32>
    "tpu.trace_stop"() : () -> ()
    %cst_311 = arith.constant 0.353553385 : f32
    %692 = vector.broadcast %cst_311 : f32 to vector<5x5xf32>
    %693 = arith.mulf %691, %692 : vector<5x5xf32>
    %c5_312 = arith.constant 5 : index
    %c2_313 = arith.constant 2 : index
    %c0_314 = arith.constant 0 : index
    %c0_315 = arith.constant 0 : index
    %694 = vector.load %arg2[%c5_312, %c2_313, %c0_314, %c0_315] : memref<6x4x5x5xbf16, #tpu.memory_space<vmem>>, vector<1x1x5x5xbf16>
    %695 = vector.shape_cast %694 : vector<1x1x5x5xbf16> to vector<5x5xbf16>
    %696 = arith.extf %695 : vector<5x5xbf16> to vector<5x5xf32>
    %697 = arith.addf %693, %696 : vector<5x5xf32>
    %cst_316 = arith.constant dense<0xFF800000> : vector<5xf32>
    %698 = vector.multi_reduction <maximumf>, %697, %cst_316 [1] : vector<5x5xf32> to vector<5xf32>
    %699 = vector.shape_cast %698 : vector<5xf32> to vector<5x1xf32>
    %700 = vector.broadcast %699 : vector<5x1xf32> to vector<5x5xf32>
    %701 = arith.subf %697, %700 : vector<5x5xf32>
    %702 = math.exp %701 : vector<5x5xf32>
    %cst_317 = arith.constant dense<0.000000e+00> : vector<5xf32>
    %703 = vector.multi_reduction <add>, %702, %cst_317 [1] : vector<5x5xf32> to vector<5xf32>
    %704 = vector.shape_cast %703 : vector<5xf32> to vector<5x1xf32>
    %705 = tpu.reciprocal %704 {approx = true} : vector<5x1xf32> -> vector<5x1xf32>
    %706 = vector.broadcast %705 : vector<5x1xf32> to vector<5x5xf32>
    %707 = arith.mulf %702, %706 : vector<5x5xf32>
    %708 = arith.truncf %707 : vector<5x5xf32> to vector<5x5xbf16>
    %cst_318 = arith.constant dense<0.000000e+00> : vector<5x8xf32>
    %709 = tpu.matmul %708, %690, %cst_318 {dimension_numbers = #tpu.dot_dimension_numbers<[1], [0], [0], [1], [0, 0, 1, 1], [], []>} : vector<5x5xbf16>, vector<5x8xbf16>, vector<5x8xf32> -> vector<5x8xf32>
    %710 = arith.truncf %709 : vector<5x8xf32> to vector<5x8xbf16>
    %c0_319 = arith.constant 0 : index
    %c16_320 = arith.constant 16 : index
    %711 = vector.load %arg11[%c0_319, %c16_320] : memref<5x32xbf16, #tpu.memory_space<vmem>>, vector<5x8xbf16>
    tpu.vector_store %arg11[%c0_319, %c16_320], %710 {strides = array<i32>} : memref<5x32xbf16, #tpu.memory_space<vmem>>, vector<5x8xbf16>,
    %712 = vector.extract_strided_slice %639 {offsets = [0, 24], sizes = [5, 8], strides = [1, 1]} : vector<5x96xbf16> to vector<5x8xbf16>
    %713 = vector.extract_strided_slice %639 {offsets = [0, 56], sizes = [5, 8], strides = [1, 1]} : vector<5x96xbf16> to vector<5x8xbf16>
    %714 = vector.extract_strided_slice %639 {offsets = [0, 88], sizes = [5, 8], strides = [1, 1]} : vector<5x96xbf16> to vector<5x8xbf16>
    "tpu.trace_start"() <{level = 10 : i32, message = "qc,kc->qk"}> : () -> ()
    %cst_321 = arith.constant dense<0.000000e+00> : vector<5x5xf32>
    %715 = tpu.matmul %712, %713, %cst_321 {dimension_numbers = #tpu.dot_dimension_numbers<[1], [1], [0], [0], [0, 0, 1, 0], [], []>} : vector<5x8xbf16>, vector<5x8xbf16>, vector<5x5xf32> -> vector<5x5xf32>
    "tpu.trace_stop"() : () -> ()
    %cst_322 = arith.constant 0.353553385 : f32
    %716 = vector.broadcast %cst_322 : f32 to vector<5x5xf32>
    %717 = arith.mulf %715, %716 : vector<5x5xf32>
    %c5_323 = arith.constant 5 : index
    %c3_324 = arith.constant 3 : index
    %c0_325 = arith.constant 0 : index
    %c0_326 = arith.constant 0 : index
    %718 = vector.load %arg2[%c5_323, %c3_324, %c0_325, %c0_326] : memref<6x4x5x5xbf16, #tpu.memory_space<vmem>>, vector<1x1x5x5xbf16>
    %719 = vector.shape_cast %718 : vector<1x1x5x5xbf16> to vector<5x5xbf16>
    %720 = arith.extf %719 : vector<5x5xbf16> to vector<5x5xf32>
    %721 = arith.addf %717, %720 : vector<5x5xf32>
    %cst_327 = arith.constant dense<0xFF800000> : vector<5xf32>
    %722 = vector.multi_reduction <maximumf>, %721, %cst_327 [1] : vector<5x5xf32> to vector<5xf32>
    %723 = vector.shape_cast %722 : vector<5xf32> to vector<5x1xf32>
    %724 = vector.broadcast %723 : vector<5x1xf32> to vector<5x5xf32>
    %725 = arith.subf %721, %724 : vector<5x5xf32>
    %726 = math.exp %725 : vector<5x5xf32>
    %cst_328 = arith.constant dense<0.000000e+00> : vector<5xf32>
    %727 = vector.multi_reduction <add>, %726, %cst_328 [1] : vector<5x5xf32> to vector<5xf32>
    %728 = vector.shape_cast %727 : vector<5xf32> to vector<5x1xf32>
    %729 = tpu.reciprocal %728 {approx = true} : vector<5x1xf32> -> vector<5x1xf32>
    %730 = vector.broadcast %729 : vector<5x1xf32> to vector<5x5xf32>
    %731 = arith.mulf %726, %730 : vector<5x5xf32>
    %732 = arith.truncf %731 : vector<5x5xf32> to vector<5x5xbf16>
    %cst_329 = arith.constant dense<0.000000e+00> : vector<5x8xf32>
    %733 = tpu.matmul %732, %714, %cst_329 {dimension_numbers = #tpu.dot_dimension_numbers<[1], [0], [0], [1], [0, 0, 1, 1], [], []>} : vector<5x5xbf16>, vector<5x8xbf16>, vector<5x8xf32> -> vector<5x8xf32>
    %734 = arith.truncf %733 : vector<5x8xf32> to vector<5x8xbf16>
    %c0_330 = arith.constant 0 : index
    %c24_331 = arith.constant 24 : index
    %735 = vector.load %arg11[%c0_330, %c24_331] : memref<5x32xbf16, #tpu.memory_space<vmem>>, vector<5x8xbf16>
    tpu.vector_store %arg11[%c0_330, %c24_331], %734 {strides = array<i32>} : memref<5x32xbf16, #tpu.memory_space<vmem>>, vector<5x8xbf16>,
    %c0_332 = arith.constant 0 : index
    %c0_333 = arith.constant 0 : index
    %736 = vector.load %arg11[%c0_332, %c0_333] : memref<5x32xbf16, #tpu.memory_space<vmem>>, vector<5x32xbf16>
    %cst_334 = arith.constant dense<0.000000e+00> : vector<5x32xf32>
    %737 = tpu.matmul %736, %4, %cst_334 {dimension_numbers = #tpu.dot_dimension_numbers<[1], [0], [0], [1], [0, 0, 1, 1], [], []>} : vector<5x32xbf16>, vector<32x32xbf16>, vector<5x32xf32> -> vector<5x32xf32>
    %738 = arith.addf %634, %737 : vector<5x32xf32>
    %739 = vector.broadcast %5 : vector<1x32xf32> to vector<5x32xf32>
    %740 = arith.addf %738, %739 : vector<5x32xf32>
    %741 = arith.truncf %740 : vector<5x32xf32> to vector<5x32xbf16>
    %c5_335 = arith.constant 5 : index
    %c0_336 = arith.constant 0 : index
    %c0_337 = arith.constant 0 : index
    %742 = vector.load %arg9[%c5_335, %c0_336, %c0_337] : memref<6x5x32xbf16, #tpu.memory_space<vmem>>, vector<1x5x32xbf16>
    %743 = vector.shape_cast %742 : vector<1x5x32xbf16> to vector<5x32xbf16>
    %744 = vector.shape_cast %741 : vector<5x32xbf16> to vector<1x5x32xbf16>
    tpu.vector_store %arg9[%c5_335, %c0_336, %c0_337], %744 {strides = array<i32>} : memref<6x5x32xbf16, #tpu.memory_space<vmem>>, vector<1x5x32xbf16>,
    %cst_338 = arith.constant dense<0.000000e+00> : vector<32xf32>
    %745 = vector.multi_reduction <add>, %740, %cst_338 [0] : vector<5x32xf32> to vector<32xf32>
    %746 = vector.shape_cast %745 : vector<32xf32> to vector<1x32xf32>
    %747 = arith.addf %623, %746 : vector<1x32xf32>
    %748 = arith.mulf %740, %740 : vector<5x32xf32>
    %cst_339 = arith.constant dense<0.000000e+00> : vector<32xf32>
    %749 = vector.multi_reduction <add>, %748, %cst_339 [0] : vector<5x32xf32> to vector<32xf32>
    %750 = vector.shape_cast %749 : vector<32xf32> to vector<1x32xf32>
    %751 = arith.addf %627, %750 : vector<1x32xf32>
    %752 = tpu.concatenate %747, %751 in 0 : vector<1x32xf32>, vector<1x32xf32> -> vector<2x32xf32>
    %c0_340 = arith.constant 0 : index
    %c0_341 = arith.constant 0 : index
    %c0_342 = arith.constant 0 : index
    %753 = vector.load %arg10[%c0_340, %c0_341, %c0_342] : memref<1x2x32xf32, #tpu.memory_space<vmem>>, vector<1x2x32xf32>
    %754 = vector.shape_cast %753 : vector<1x2x32xf32> to vector<2x32xf32>
    %755 = vector.shape_cast %752 : vector<2x32xf32> to vector<1x2x32xf32>
    tpu.vector_store %arg10[%c0_340, %c0_341, %c0_342], %755 {strides = array<i32>} : memref<1x2x32xf32, #tpu.memory_space<vmem>>, vector<1x2x32xf32>,
    return
  }
  func.func @transform_0(%arg0: i32) -> (i32, i32, i32) {
    %c0_i32 = arith.constant 0 : i32
    %c0_i32_0 = arith.constant 0 : i32
    %c0_i32_1 = arith.constant 0 : i32
    return %arg0, %c0_i32, %c0_i32_0 : i32, i32, i32
  }
  func.func @transform_1(%arg0: i32) -> (i32, i32, i32, i32) {
    %c0_i32 = arith.constant 0 : i32
    %c0_i32_0 = arith.constant 0 : i32
    %c0_i32_1 = arith.constant 0 : i32
    %c0_i32_2 = arith.constant 0 : i32
    return %arg0, %c0_i32, %c0_i32_0, %c0_i32_1 : i32, i32, i32, i32
  }
  func.func @transform_2(%arg0: i32) -> (i32, i32) {
    %c0_i32 = arith.constant 0 : i32
    %c0_i32_0 = arith.constant 0 : i32
    %c0_i32_1 = arith.constant 0 : i32
    return %c0_i32, %c0_i32_0 : i32, i32
  }
  func.func @transform_3(%arg0: i32) -> (i32, i32) {
    %c0_i32 = arith.constant 0 : i32
    %c0_i32_0 = arith.constant 0 : i32
    %c0_i32_1 = arith.constant 0 : i32
    return %c0_i32, %c0_i32_0 : i32, i32
  }
  func.func @transform_4(%arg0: i32) -> (i32, i32) {
    %c0_i32 = arith.constant 0 : i32
    %c0_i32_0 = arith.constant 0 : i32
    %c0_i32_1 = arith.constant 0 : i32
    return %c0_i32, %c0_i32_0 : i32, i32
  }
  func.func @transform_5(%arg0: i32) -> (i32, i32) {
    %c0_i32 = arith.constant 0 : i32
    %c0_i32_0 = arith.constant 0 : i32
    %c0_i32_1 = arith.constant 0 : i32
    return %c0_i32, %c0_i32_0 : i32, i32
  }
  func.func @transform_6(%arg0: i32) -> (i32, i32) {
    %c0_i32 = arith.constant 0 : i32
    %c0_i32_0 = arith.constant 0 : i32
    %c0_i32_1 = arith.constant 0 : i32
    return %c0_i32, %c0_i32_0 : i32, i32
  }
  func.func @transform_7(%arg0: i32) -> (i32, i32) {
    %c0_i32 = arith.constant 0 : i32
    %c0_i32_0 = arith.constant 0 : i32
    %c0_i32_1 = arith.constant 0 : i32
    return %c0_i32, %c0_i32_0 : i32, i32
  }
  func.func @transform_8(%arg0: i32) -> (i32, i32, i32) {
    %c0_i32 = arith.constant 0 : i32
    %c0_i32_0 = arith.constant 0 : i32
    %c0_i32_1 = arith.constant 0 : i32
    return %arg0, %c0_i32, %c0_i32_0 : i32, i32, i32
  }
  func.func @transform_9(%arg0: i32) -> (i32, i32, i32) {
    %c0_i32 = arith.constant 0 : i32
    %c0_i32_0 = arith.constant 0 : i32
    %c0_i32_1 = arith.constant 0 : i32
    return %arg0, %c0_i32, %c0_i32_0 : i32, i32, i32
  }
}

module attributes {stable_mosaic.version = 11 : i64} {
  func.func @_head_kernel(%arg0: i32, %arg1: memref<6x160xbf16, #tpu.memory_space<vmem>>, %arg2: memref<1x160xf32, #tpu.memory_space<vmem>>, %arg3: memref<1x160xf32, #tpu.memory_space<vmem>>, %arg4: memref<160x8xbf16, #tpu.memory_space<vmem>>, %arg5: memref<1x8xf32, #tpu.memory_space<vmem>>, %arg6: memref<6x1xf32, #tpu.memory_space<vmem>>, %arg7: memref<6x1xf32, #tpu.memory_space<vmem>>, %arg8: memref<6x1xf32, #tpu.memory_space<vmem>>, %arg9: memref<6x1xf32, #tpu.memory_space<vmem>>, %arg10: memref<6x8xf32, #tpu.memory_space<vmem>>) attributes {dimension_semantics = [#tpu.dimension_semantics<parallel>], iteration_bounds = array<i64: 1>, scalar_prefetch = 0 : i64, scratch_operands = 0 : i64, tpu.core_type = #tpu.core_type<tc>, window_params = [{transform_indices = @transform_0, window_bounds = array<i64: 6, 160>}, {pipeline_mode = #tpu.pipeline_mode<synchronous>, transform_indices = @transform_1, window_bounds = array<i64: 1, 160>}, {pipeline_mode = #tpu.pipeline_mode<synchronous>, transform_indices = @transform_2, window_bounds = array<i64: 1, 160>}, {pipeline_mode = #tpu.pipeline_mode<synchronous>, transform_indices = @transform_3, window_bounds = array<i64: 160, 8>}, {pipeline_mode = #tpu.pipeline_mode<synchronous>, transform_indices = @transform_4, window_bounds = array<i64: 1, 8>}, {transform_indices = @transform_5, window_bounds = array<i64: 6, 1>}, {transform_indices = @transform_6, window_bounds = array<i64: 6, 1>}, {transform_indices = @transform_7, window_bounds = array<i64: 6, 1>}, {transform_indices = @transform_8, window_bounds = array<i64: 6, 1>}, {transform_indices = @transform_9, window_bounds = array<i64: 6, 8>}]} {
    %c0 = arith.constant 0 : index
    %c0_0 = arith.constant 0 : index
    %0 = vector.load %arg1[%c0, %c0_0] : memref<6x160xbf16, #tpu.memory_space<vmem>>, vector<6x160xbf16>
    %1 = arith.extf %0 : vector<6x160xbf16> to vector<6x160xf32>
    %c0_1 = arith.constant 0 : index
    %c0_2 = arith.constant 0 : index
    %2 = vector.load %arg2[%c0_1, %c0_2] : memref<1x160xf32, #tpu.memory_space<vmem>>, vector<1x160xf32>
    %3 = vector.broadcast %2 : vector<1x160xf32> to vector<6x160xf32>
    %4 = arith.mulf %1, %3 : vector<6x160xf32>
    %c0_3 = arith.constant 0 : index
    %c0_4 = arith.constant 0 : index
    %5 = vector.load %arg3[%c0_3, %c0_4] : memref<1x160xf32, #tpu.memory_space<vmem>>, vector<1x160xf32>
    %6 = vector.broadcast %5 : vector<1x160xf32> to vector<6x160xf32>
    %7 = arith.addf %4, %6 : vector<6x160xf32>
    %8 = arith.truncf %7 : vector<6x160xf32> to vector<6x160xbf16>
    %c0_5 = arith.constant 0 : index
    %c0_6 = arith.constant 0 : index
    %9 = vector.load %arg4[%c0_5, %c0_6] : memref<160x8xbf16, #tpu.memory_space<vmem>>, vector<160x8xbf16>
    %cst = arith.constant dense<0.000000e+00> : vector<6x8xf32>
    %10 = tpu.matmul %8, %9, %cst {dimension_numbers = #tpu.dot_dimension_numbers<[1], [0], [0], [1], [0, 0, 1, 1], [], []>} : vector<6x160xbf16>, vector<160x8xbf16>, vector<6x8xf32> -> vector<6x8xf32>
    %c0_7 = arith.constant 0 : index
    %c0_8 = arith.constant 0 : index
    %11 = vector.load %arg5[%c0_7, %c0_8] : memref<1x8xf32, #tpu.memory_space<vmem>>, vector<1x8xf32>
    %12 = vector.broadcast %11 : vector<1x8xf32> to vector<6x8xf32>
    %13 = arith.addf %10, %12 : vector<6x8xf32>
    %c0_9 = arith.constant 0 : index
    %c0_10 = arith.constant 0 : index
    %14 = vector.load %arg9[%c0_9, %c0_10] : memref<6x1xf32, #tpu.memory_space<vmem>>, vector<6x1xf32>
    %15 = vector.broadcast %14 : vector<6x1xf32> to vector<6x8xf32>
    %16 = arith.subf %13, %15 : vector<6x8xf32>
    %c0_11 = arith.constant 0 : index
    %c0_12 = arith.constant 0 : index
    %17 = vector.load %arg8[%c0_11, %c0_12] : memref<6x1xf32, #tpu.memory_space<vmem>>, vector<6x1xf32>
    %cst_13 = arith.constant 1.000000e-10 : f32
    %18 = vector.broadcast %cst_13 : f32 to vector<6x1xf32>
    %19 = arith.addf %17, %18 : vector<6x1xf32>
    %20 = vector.broadcast %19 : vector<6x1xf32> to vector<6x8xf32>
    %21 = arith.divf %16, %20 : vector<6x8xf32>
    %c0_14 = arith.constant 0 : index
    %c0_15 = arith.constant 0 : index
    %22 = vector.load %arg7[%c0_14, %c0_15] : memref<6x1xf32, #tpu.memory_space<vmem>>, vector<6x1xf32>
    %23 = vector.broadcast %22 : vector<6x1xf32> to vector<6x8xf32>
    %24 = arith.mulf %21, %23 : vector<6x8xf32>
    %c0_16 = arith.constant 0 : index
    %c0_17 = arith.constant 0 : index
    %25 = vector.load %arg6[%c0_16, %c0_17] : memref<6x1xf32, #tpu.memory_space<vmem>>, vector<6x1xf32>
    %26 = vector.broadcast %25 : vector<6x1xf32> to vector<6x8xf32>
    %27 = arith.addf %24, %26 : vector<6x8xf32>
    %c0_18 = arith.constant 0 : index
    %c0_19 = arith.constant 0 : index
    %28 = vector.load %arg10[%c0_18, %c0_19] : memref<6x8xf32, #tpu.memory_space<vmem>>, vector<6x8xf32>
    tpu.vector_store %arg10[%c0_18, %c0_19], %27 {strides = array<i32>} : memref<6x8xf32, #tpu.memory_space<vmem>>, vector<6x8xf32>,
    return
  }
  func.func @transform_0(%arg0: i32) -> (i32, i32) {
    %c0_i32 = arith.constant 0 : i32
    %c0_i32_0 = arith.constant 0 : i32
    return %arg0, %c0_i32 : i32, i32
  }
  func.func @transform_1(%arg0: i32) -> (i32, i32) {
    %c0_i32 = arith.constant 0 : i32
    %c0_i32_0 = arith.constant 0 : i32
    %c0_i32_1 = arith.constant 0 : i32
    return %c0_i32, %c0_i32_0 : i32, i32
  }
  func.func @transform_2(%arg0: i32) -> (i32, i32) {
    %c0_i32 = arith.constant 0 : i32
    %c0_i32_0 = arith.constant 0 : i32
    %c0_i32_1 = arith.constant 0 : i32
    return %c0_i32, %c0_i32_0 : i32, i32
  }
  func.func @transform_3(%arg0: i32) -> (i32, i32) {
    %c0_i32 = arith.constant 0 : i32
    %c0_i32_0 = arith.constant 0 : i32
    %c0_i32_1 = arith.constant 0 : i32
    return %c0_i32, %c0_i32_0 : i32, i32
  }
  func.func @transform_4(%arg0: i32) -> (i32, i32) {
    %c0_i32 = arith.constant 0 : i32
    %c0_i32_0 = arith.constant 0 : i32
    %c0_i32_1 = arith.constant 0 : i32
    return %c0_i32, %c0_i32_0 : i32, i32
  }
  func.func @transform_5(%arg0: i32) -> (i32, i32) {
    %c0_i32 = arith.constant 0 : i32
    %c0_i32_0 = arith.constant 0 : i32
    return %arg0, %c0_i32 : i32, i32
  }
  func.func @transform_6(%arg0: i32) -> (i32, i32) {
    %c0_i32 = arith.constant 0 : i32
    %c0_i32_0 = arith.constant 0 : i32
    return %arg0, %c0_i32 : i32, i32
  }
  func.func @transform_7(%arg0: i32) -> (i32, i32) {
    %c0_i32 = arith.constant 0 : i32
    %c0_i32_0 = arith.constant 0 : i32
    return %arg0, %c0_i32 : i32, i32
  }
  func.func @transform_8(%arg0: i32) -> (i32, i32) {
    %c0_i32 = arith.constant 0 : i32
    %c0_i32_0 = arith.constant 0 : i32
    return %arg0, %c0_i32 : i32, i32
  }
  func.func @transform_9(%arg0: i32) -> (i32, i32) {
    %c0_i32 = arith.constant 0 : i32
    %c0_i32_0 = arith.constant 0 : i32
    return %arg0, %c0_i32 : i32, i32
  }
}

</mosaic_0001>

<bundles_post_ra>
// kernel: tile.0
= control target key start
LH: loop header
LB: loop body
LE: loop exit
PB: predicated region body
PF: predicated region fallthrough
CT: control target
= control target key end

     0   :  { %s26_s8 = smov 126   ;;  %vm7_vm0 = vcmask 7168   ;;  %s49_s0 = inlined_call_operand.vmem [shape: f32[2,3], index: 0, kind: input, shape index: {}]   ;;  %s50_s1 = inlined_call_operand.vmem [shape: f32[6,1], index: 1, kind: output, shape index: {}]  }
   0x1   :  { %v4_v0 = vld [vmem:[%s49_s0] sm:$0x3]  ;;  %s25_s0 = smov 127  }
   0x2   :  { %5 = vst [vmem:[#allocation0] sm:$0x3] %v4_v0 }
   0x9   :  { %v9_v1 = vld [vmem:[#allocation0] sm:$0x3]  }
   0xa   :  { %10 = vrot.lane.b32.xlu0 %v9_v1, %s25_s0  ;;  %v15_v2 = vld [vmem:[#allocation0] sm:$0x3]  }
   0xb   :  { %v6_v3 = vld [vmem:[#allocation0] sm:$0x3]  }
   0xc   :  { %8 = vst.msk [vmem:[%s50_s1] ss:$3 sm:$0x3] %vm7_vm0, %v6_v3  }
  0x12   :  { %16 = vrot.lane.b32.xlu0 %v15_v2, %s26_s8 }
  0x7c   :  { %v11_v4 = vpop.permute.xlu0 %10  }
  0x7d   :  { %21 = vst.msk [vmem:[%s50_s1 + $0x1] ss:$3 sm:$0x3] %vm7_vm0, %v11_v4  }
  0x84   :  { %v17_v5 = vpop.permute.xlu0 %16  }
  0x85   :  { %22 = vst.msk [vmem:[%s50_s1 + $0x2] ss:$3 sm:$0x3] %vm7_vm0, %v17_v5  }

// kernel: tile.21
= control target key start
LH: loop header
LB: loop body
LE: loop exit
PB: predicated region body
PF: predicated region fallthrough
CT: control target
= control target key end

     0   :  { %s22_s0 = inlined_call_operand.vmem [shape: f32[3], index: 0, kind: input, shape index: {}]   ;;  %s23_s1 = inlined_call_operand.vmem [shape: f32[2,3], index: 1, kind: output, shape index: {}]  }
   0x1   :  { %v4_v0 = vld [vmem:[%s22_s0] ss:$0 sm:$0xff] }
   0x2   :  { %5 = vst [vmem:[%s23_s1] sm:$0x3] %v4_v0 }

// kernel: patchtst_forward.7
= control target key start
LH: loop header
LB: loop body
LE: loop exit
PB: predicated region body
PF: predicated region fallthrough
CT: control target
= control target key end

     0   :  { %vm18_vm0 = vcmask 128000   ;;  %v106_v2 = vmov 16.0   ;;  %v107_v4 = vmov 0   ;;  %vm81_vm2 = vcmask 5120   ;;  %s160_s0 = inlined_call_operand.vmem [shape: f32[6,16], index: 0, kind: input, shape index: {}]   ;;  %s161_s1 = inlined_call_operand.vmem [shape: f32[6,1], index: 1, kind: input, shape index: {}]   ;;  %s162_s2 = inlined_call_operand.vmem [shape: f32[6,1], index: 2, kind: input, shape index: {}]   ;;  %s163_s4 = inlined_call_operand.vmem [shape: f32[6,1], index: 4, kind: output, shape index: {1}]   ;;  %s164_s5 = inlined_call_operand.vmem [shape: f32[6,1], index: 5, kind: output, shape index: {2}]   ;;  %s165_s3 = inlined_call_operand.vmem [shape: bf16[6,16], index: 3, kind: output, shape index: {0}]  }
   0x1   :  { %v17_v0 = vld [vmem:[%s160_s0] sm:$0x3f]  ;;  %100 = vrcp.f32 %v106_v2  ;;  %98 = vset.pattern.permute.xlu1 %v107_v4  ;;  %99 = vset.pattern.permute.xlu0 %v107_v4  ;;  %vm79_vm9 = vcmask 124928  }
   0x2   :  { %v19_v1 = vsel %vm18_vm0, %v17_v0, 0.0  ;;  %v64_v3 = vld [vmem:[%s161_s1] sm:$0x3f] }
   0x3   :  { %20 = vadd.xlane.f32.xlu0 %v19_v1  ;;  %67 = vperm.xlu1 %98, %v64_v3   ;;  %v71_v7 = vld [vmem:[%s162_s2] sm:$0x3f] }
   0x7   :  { %v101_v5 = vpop.eup %100 }
   0x8   :  { %v23_v6 = vmul.f32 16.0, %v101_v5  ;;  %vm27_vm1 = vweird.f32 %v101_v5 }
   0xa   :  { %v24_v8 = vsub.f32 1.0, %v23_v6 }
   0xb   :  { %74 = vperm.xlu1 %98, %v71_v7  }
   0xc   :  { %v25_v9 = vmul.f32 %v101_v5, %v24_v8 }
   0xe   :  { %v26_v10 = vadd.f32 %v101_v5, %v25_v9 }
  0x10   :  { %v28_v11 = vsel %vm27_vm1, %v101_v5, %v26_v10 }
  0x75   :  { %v68_v33 = vpop.permute.xlu1 %67 }
  0x76   :  { %v21_v12 = vpop.xlane.xlu0 %20 }
  0x77   :  { %v29_v13 = vmul.f32 %v28_v11, %v21_v12 }
  0x79   :  { %v30_v14 = vsub.f32 %v17_v0, %v29_v13  ;;  %82 = vst.msk [vmem:[%s163_s4] sm:$0x3f] %vm81_vm2, %v29_v13 }
  0x7b   :  { %v31_v15 = vmul.f32 %v30_v14, %v30_v14 }
  0x7d   :  { %v32_v16 = vsel %vm18_vm0, %v31_v15, 0.0  ;;  %v75_v43 = vpop.permute.xlu1 %74 }
  0x7e   :  { %33 = vadd.xlane.f32.xlu0 %v32_v16 }
  0xf1   :  { %v34_v17 = vpop.xlane.xlu0 %33 }
  0xf2   :  { %v35_v18 = vmul.f32 %v34_v17, %v28_v11 }
  0xf4   :  { %v36_v19 = vadd.f32 1e-05, %v35_v18 }
  0xf6   :  { %102 = vrsqrt.f32 %v36_v19  ;;  %vm44_vm3 = vcmp.eq.f32.partialorder %v36_v19, inf  ;;  %v47_v27 = vand.u32 2147483648, %v36_v19  ;;  %vm46_vm4 = vcmp.eq.f32.partialorder %v36_v19, 0.0 }
  0xfc   :  { %v103_v20 = vpop.eup %102 }
  0xfd   :  { %v38_v21 = vmul.f32 %v103_v20, %v36_v19 }
  0xff   :  { %v39_v22 = vmul.f32 %v103_v20, %v38_v21 }
 0x101   :  { %v40_v23 = vmul.f32 0.5, %v39_v22 }
 0x103   :  { %v41_v24 = vsub.f32 1.5, %v40_v23 }
 0x105   :  { %v42_v25 = vmul.f32 %v103_v20, %v41_v24 }
 0x107   :  { %v43_v26 = vmul.f32 %v42_v25, %v36_v19 }
 0x109   :  { %v45_v28 = vsel %vm44_vm3, %v36_v19, %v43_v26 }
 0x10a   :  { %v48_v29 = vsel %vm46_vm4, %v47_v27, %v45_v28 }
 0x10b   :  { %104 = vrcp.f32 %v48_v29  ;;  %83 = vst.msk [vmem:[%s164_s5] sm:$0x3f] %vm81_vm2, %v48_v29  ;;  %v60_v34 = vand.u32 2147483648, %v48_v29  ;;  %v58_v36 = vand.u32 2147483647, %v48_v29  ;;  %vm54_vm6 = vweird.f32 %v48_v29 }
 0x10d   :  { %v61_v38 = vor.u32 1.1754944e-38, %v60_v34  ;;  %vm59_vm8 = vcmp.eq.f32.partialorder %v58_v36, 8.507059e+37 }
 0x111   :  { %v105_v30 = vpop.eup %104 }
 0x112   :  { %v50_v31 = vmul.f32 %v105_v30, %v48_v29  ;;  %vm55_vm5 = vweird.f32 %v105_v30 }
 0x113   :  { %vm56_vm7 = vmor %vm54_vm6, %vm55_vm5 }
 0x114   :  { %v51_v32 = vsub.f32 1.0, %v50_v31 }
 0x116   :  { %v52_v35 = vmul.f32 %v105_v30, %v51_v32 }
 0x118   :  { %v53_v37 = vadd.f32 %v105_v30, %v52_v35 }
 0x11a   :  { %v57_v39 = vsel %vm56_vm7, %v105_v30, %v53_v37 }
 0x11b   :  { %v62_v40 = vsel %vm59_vm8, %v61_v38, %v57_v39 }
 0x11c   :  { %v63_v41 = vmul.f32 %v62_v40, %v30_v14 }
 0x11e   :  { %v70_v42 = vmul.f32 %v68_v33, %v63_v41 }
 0x120   :  { %v77_v44 = vadd.f32 %v75_v43, %v70_v42 }
 0x122   :  { %v78_v45 = vpack.c.bf16 %v77_v44, %v77_v44 }
 0x124   :  { %80 = vst.msk [vmem:[%s165_s3] sm:$0x7] %vm79_vm9, %v78_v45 }

// kernel: patchtst_forward.8
= control target key start
LH: loop header
LB: loop body
LE: loop exit
PB: predicated region body
PF: predicated region fallthrough
CT: control target
= control target key end

     0   :  { %vm37_vm0 = vcmask 1041408   ;;  %vm59_vm1 = vcmask 31744   ;;  %vm35_vm2 = vcmask 1044480   ;;  %vm41_vm3 = vcmask 1043456   ;;  %s180_s1 = inlined_call_operand.vmem [shape: bf16[4,32], index: 1, kind: input, shape index: {}]   ;;  %s181_s0 = inlined_call_operand.vmem [shape: bf16[30,4], index: 0, kind: input, shape index: {}]   ;;  %s182_s2 = inlined_call_operand.vmem [shape: f32[1,32], index: 2, kind: input, shape index: {}]   ;;  %s183_s3 = inlined_call_operand.vmem [shape: f32[5,32], index: 3, kind: input, shape index: {}]   ;;  %s184_s4 = inlined_call_operand.vmem [shape: bf16[30,32], index: 4, kind: output, shape index: {}]  }
   0x1   :  { %v22_v0 = vld [vmem:[%s180_s1] sm:$0x3]  ;;  %v112_v3 = vld [vmem:[%s181_s0 + $0x8] sm:$0xf]  ;;  %v117_v4 = vld [vmem:[%s181_s0 + $0x8] sm:$0x70] }
   0x2   :  { %v67_v1 = vsel %vm37_vm0, %v22_v0, 0  ;;  %v116_v2 = vld [vmem:[%s181_s0] sm:$0xff]  ;;  %v113_v5 = vor.u32 %v117_v4, %v112_v3  ;;  %vm96_vm4 = vcmask 257024   ;;  %vm39_vm5 = vcmask 1046528  }
   0x3   :  { %76 = vmatpush.bf16.msra.mxu0 %v67_v1  ;;  %118 = vmatpush.bf16.msra.mxu1 %v67_v1  ;;  %v23_v6 = vld [vmem:[%s183_s3] sm:$0x1f]  ;;  %vm43_vm6 = vcmask 1040384   ;;  %vm100_vm7 = vcmask 256000  }
   0x4   :  { %v25_v7 = vrot.slane %v23_v6, 3  ;;  %v29_v8 = vrot.slane %v23_v6, 1  ;;  %v31_v9 = vrot.slane %v23_v6, 4  ;;  %v119_v10 = vld [vmem:[%s182_s2] ss:$0 sm:$0xff]  ;;  %v27_v11 = vrot.slane %v23_v6, 6 }
   0x5   :  { %v33_v21 = vrot.slane %v23_v6, 7 }
   0x6   :  { %114 = vmatmul.msk.bf16.vlgmr.msra.gmra.mxu0 %vm59_vm1, %v116_v2  ;;  %115 = vmatmul.msk.bf16.vlgmr.msra.gmra.mxu1 %vm59_vm1, %v113_v5  ;;  %v36_v12 = vsel %vm35_vm2, %v23_v6, %v25_v7  ;;  %v42_v14 = vsel %vm41_vm3, %v29_v8, %v31_v9  ;;  %v38_v20 = vsel %vm37_vm0, %v25_v7, %v27_v11 }
   0x7   :  { %v40_v24 = vsel %vm39_vm5, %v38_v20, %v29_v8  ;;  %v44_v26 = vsel %vm43_vm6, %v31_v9, %v33_v21 }
  0x83   :  { %v78_v13 = vpop.f32.mrf.mxu0  ;;  %v83_v15 = vpop.f32.mrf.mxu1 }
  0x84   :  { %v79_v16 = vadd.f32 %v119_v10, %v78_v13  ;;  %v84_v17 = vadd.f32 %v119_v10, %v83_v15 }
  0x86   :  { %v88_v18 = vadd.f32 %v79_v16, %v36_v12  ;;  %v90_v19 = vadd.f32 %v84_v17, %v42_v14 }
  0x88   :  { %v92_v22 = vpack.c.bf16 %v88_v18, %v88_v18  ;;  %v94_v23 = vpack.c.bf16 %v90_v19, %v90_v19 }
  0x8a   :  { %97 = vst.msk [vmem:[%s184_s4] sm:$0xf] %vm96_vm4, %v92_v22 }
  0x8b   :  { %99 = vst.msk [vmem:[%s184_s4 + $0x8] sm:$0xf] %vm96_vm4, %v94_v23  ;;  %v80_v25 = vpop.f32.mrf.mxu0  ;;  %v85_v27 = vpop.f32.mrf.mxu1 }
  0x8c   :  { %v81_v28 = vadd.f32 %v119_v10, %v80_v25  ;;  %v86_v29 = vadd.f32 %v119_v10, %v85_v27 }
  0x8e   :  { %v89_v30 = vadd.f32 %v81_v28, %v40_v24  ;;  %v91_v31 = vadd.f32 %v86_v29, %v44_v26 }
  0x90   :  { %v93_v32 = vpack.c.bf16 %v89_v30, %v89_v30  ;;  %v95_v33 = vpack.c.bf16 %v91_v31, %v91_v31 }
  0x92   :  { %98 = vst.msk [vmem:[%s184_s4 + $0x4] sm:$0xf] %vm96_vm4, %v93_v32 }
  0x93   :  { %101 = vst.msk [vmem:[%s184_s4 + $0xc] sm:$0x7] %vm100_vm7, %v95_v33 }

// kernel: tile.30
= control target key start
LH: loop header
LB: loop body
LE: loop exit
PB: predicated region body
PF: predicated region fallthrough
CT: control target
= control target key end

     0   :  { %s22_s0 = inlined_call_operand.vmem [shape: f32[32], index: 0, kind: input, shape index: {}]   ;;  %s23_s1 = inlined_call_operand.vmem [shape: f32[5,32], index: 1, kind: output, shape index: {}]  }
   0x1   :  { %v4_v0 = vld [vmem:[%s22_s0] ss:$0 sm:$0xff] }
   0x2   :  { %5 = vst [vmem:[%s23_s1] sm:$0xff] %v4_v0 }

// kernel: tile.31
= control target key start
LH: loop header
LB: loop body
LE: loop exit
PB: predicated region body
PF: predicated region fallthrough
CT: control target
= control target key end

     0   :  { %s43_s8 = smov 96   ;;  %s44_s11 = smov 32   ;;  %vm4_vm0 = vcmask 261120   ;;  %vm10_vm1 = vcmask 1048320   ;;  %vm16_vm2 = vcmask 785920   ;;  %vm22_vm3 = vcmask 523520   ;;  %s74_s0 = inlined_call_operand.vmem [shape: f32[5,32], index: 0, kind: input, shape index: {}]   ;;  %s75_s1 = inlined_call_operand.vmem [shape: f32[1,160], index: 1, kind: output, shape index: {}]  }
   0x1   :  { %v36_v0 = vld [vmem:[%s74_s0 + $0x3] sm:$0x1]   ;;  %v38_v1 = vld [vmem:[%s74_s0 + $0x1] sm:$0x1]   ;;  %v37_v2 = vld [vmem:[%s74_s0 + $0x2] sm:$0x1]  }
   0x2   :  { %8 = vrot.lane.b32.xlu0 %v36_v0, %s43_s8  ;;  %20 = vrot.lane.b32.xlu1 %v38_v1, %s44_s11  ;;  %s45_s14 = smov 64   ;;  %s2_s15 = smov 3 }
   0x3   :  { %v3_v3 = vld [vmem:[%s74_s0] ss:$4 sm:%s2_s15]  }
   0x4   :  { %5 = vst.msk [vmem:[#allocation0] ss:$8 sm:$0x3] %vm4_vm0, %v3_v3  }
   0xa   :  { %14 = vrot.lane.b32.xlu0 %v37_v2, %s45_s14 }
   0xb   :  { %v31_v4 = vld [vmem:[#allocation0 + $0x8] sm:$0x1] }
   0xc   :  { %39 = vst [vmem:[%s75_s1 + $0x1] sm:$0x1] %v31_v4 }
  0x74   :  { %v9_v5 = vpop.permute.xlu0 %8   ;;  %v21_v6 = vpop.permute.xlu1 %20  }
  0x75   :  { %11 = vst.msk [vmem:[#allocation0] sm:$0x1] %vm10_vm1, %v9_v5  }
  0x7c   :  { %v15_v7 = vpop.permute.xlu0 %14  }
  0x7d   :  { %17 = vst.msk [vmem:[#allocation0] sm:$0x1] %vm16_vm2, %v15_v7  }
  0x7e   :  { %23 = vst.msk [vmem:[#allocation0] sm:$0x1] %vm22_vm3, %v21_v6  }
  0x85   :  { %v26_v8 = vld [vmem:[#allocation0] sm:$0x1] }
  0x86   :  { %29 = vst [vmem:[%s75_s1] sm:$0x1] %v26_v8 }

// kernel: patchtst_forward.10
= control target key start
LH: loop header
LB: loop body
LE: loop exit
PB: predicated region body
PF: predicated region fallthrough
CT: control target
= control target key end

     0   :  { %vm75_vm0 = vcmask 261120   ;;  %s642_s3 = inlined_call_operand.vmem [shape: bf16[32,64], index: 3, kind: input, shape index: {}]   ;;  %s643_s0 = inlined_call_operand.vmem [shape: bf16[30,32], index: 0, kind: input, shape index: {}]   ;;  %s644_s1 = inlined_call_operand.vmem [shape: f32[1,32], index: 1, kind: input, shape index: {}]   ;;  %s645_s2 = inlined_call_operand.vmem [shape: f32[1,32], index: 2, kind: input, shape index: {}]   ;;  %s646_s4 = inlined_call_operand.vmem [shape: f32[1,64], index: 4, kind: input, shape index: {}]   ;;  %s647_s6 = inlined_call_operand.vmem [shape: f32[1,32], index: 6, kind: input, shape index: {}]   ;;  %s648_s5 = inlined_call_operand.vmem [shape: bf16[64,32], index: 5, kind: input, shape index: {}]   ;;  %s649_s7 = inlined_call_operand.vmem [shape: bf16[30,32], index: 7, kind: output, shape index: {0}]   ;;  %s650_s8 = inlined_call_operand.vmem [shape: f32[1,2,32], index: 8, kind: output, shape index: {1}]  }
   0x1   :  { %v415_v0 = vld [vmem:[%s642_s3 + $0x8] sm:$0xff]  ;;  %v414_v1 = vld [vmem:[%s642_s3] sm:$0xff]  ;;  %v419_v50 = vld [vmem:[%s648_s5 + $0x18] sm:$0xff] }
   0x2   :  { %v421_v2 = vld [vmem:[%s643_s0] sm:$0xff]   ;;  %88 = vmatpush.bf16.msra.mxu0 %v415_v0  ;;  %424 = vmatpush.bf16.msra.mxu3 %v415_v0  ;;  %v31_v7 = vld [vmem:[%s643_s0 + $0x8] sm:$0xf]  ;;  %v32_v8 = vld [vmem:[%s643_s0 + $0xc] sm:$0x7] }
   0x3   :  { %v422_v3 = vunpack.c.l.bf16 %v421_v2  ;;  %v423_v4 = vunpack.c.h.bf16 %v421_v2  ;;  %v430_v5 = vld [vmem:[%s644_s1] ss:$0 sm:$0xff]  ;;  %v35_v11 = vunpack.c.l.bf16 %v31_v7  ;;  %v36_v12 = vunpack.c.l.bf16 %v32_v8  ;;  %306 = vmatpush.bf16.msra.mxu1 %v419_v50  ;;  %426 = vmatpush.bf16.msra.mxu2 %v419_v50  ;;  %v418_v61 = vld [vmem:[%s648_s5 + $0x10] sm:$0xff] }
   0x4   :  { %v431_v6 = vld [vmem:[%s645_s2] ss:$0 sm:$0xff] }
   0x5   :  { %v41_v9 = vmul.f32 %v430_v5, %v422_v3  ;;  %v42_v10 = vmul.f32 %v430_v5, %v423_v4  ;;  %v43_v15 = vmul.f32 %v430_v5, %v35_v11  ;;  %v44_v16 = vmul.f32 %v430_v5, %v36_v12  ;;  %v432_v21 = vld [vmem:[%s646_s4] ss:$0 sm:$0xff] }
   0x6   :  { %89 = vmatpush.bf16.msra.mxu0 %v414_v1  ;;  %425 = vmatpush.bf16.msra.mxu3 %v414_v1 }
   0x7   :  { %v516_v13 = vadd.f32 %v431_v6, %v41_v9  ;;  %v518_v14 = vadd.f32 %v431_v6, %v42_v10  ;;  %v522_v18 = vadd.f32 %v431_v6, %v43_v15  ;;  %v524_v19 = vadd.f32 %v431_v6, %v44_v16  ;;  %307 = vmatpush.bf16.msra.mxu1 %v418_v61  ;;  %v417_v9 = vld [vmem:[%s648_s5 + $0x8] sm:$0xff] }
   0x8   :  { %427 = vmatpush.bf16.msra.mxu2 %v418_v61 }
   0x9   :  { %v53_v17 = vpack.c.bf16 %v518_v14, %v516_v13  ;;  %v54_v20 = vpack.c.bf16 %v524_v19, %v522_v18 }
   0xb   :  { %394 = vmatmul.msk.bf16.vlgmr.msra.gmra.mxu0 %vm75_vm0, %v53_v17  ;;  %395 = vmatmul.msk.bf16.vlgmr.msra.gmra.mxu3 %vm75_vm0, %v54_v20 }
   0xc   :  { %308 = vmatpush.bf16.msra.mxu1 %v417_v9  ;;  %428 = vmatpush.bf16.msra.mxu2 %v417_v9 }
  0x88   :  { %v91_v22 = vpop.f32.mrf.mxu0 }
  0x89   :  { %v533_v23 = vadd.f32 %v432_v21, %v91_v22 }
  0x8b   :  { %v536_v24 = vmul.f32 0.70710677, %v533_v23 }
  0x8d   :  { %v109_v25 = vand.u32 2147483647, %v536_v24 }
  0x8e   :  { %v96_v27 = vpop.f32.mrf.mxu3 }
  0x8f   :  { %v113_v26 = vmul.f32 0.3275911, %v109_v25  ;;  %v539_v30 = vadd.f32 %v432_v21, %v96_v27  ;;  %v217_v53 = vsub.f32 0.0, %v109_v25  ;;  %v416_v27 = vld [vmem:[%s648_s5] sm:$0xff] }
  0x90   :  { %v93_v28 = vpop.f32.mrf.mxu0  ;;  %309 = vmatpush.bf16.msra.mxu1 %v416_v27  ;;  %429 = vmatpush.bf16.msra.mxu2 %v416_v27 }
  0x91   :  { %v117_v29 = vadd.f32 1.0, %v113_v26  ;;  %v541_v31 = vadd.f32 %v432_v21, %v93_v28  ;;  %v544_v32 = vmul.f32 0.70710677, %v539_v30  ;;  %v221_v0 = vmul.f32 %v217_v53, %v109_v25 }
  0x93   :  { %434 = vrcp.f32 %v117_v29  ;;  %v547_v33 = vmul.f32 0.70710677, %v541_v31  ;;  %v550_v34 = vand.u32 2147483647, %v544_v32  ;;  %v132_v46 = vand.u32 2147483648, %v117_v29 }
  0x94   :  { %vm126_vm1 = vweird.f32 %v117_v29  ;;  %v130_v48 = vand.u32 2147483647, %v117_v29  ;;  %v225_v12 = vmul.f32 1.442695, %v221_v0 }
  0x95   :  { %v553_v35 = vand.u32 2147483647, %v547_v33  ;;  %v115_v36 = vmul.f32 0.3275911, %v550_v34  ;;  %v133_v52 = vor.u32 1.1754944e-38, %v132_v46  ;;  %v219_v16 = vsub.f32 0.0, %v550_v34 }
  0x96   :  { %v98_v37 = vpop.f32.mrf.mxu3  ;;  %vm131_vm4 = vcmp.eq.f32.partialorder %v130_v48, 8.507059e+37 }
  0x97   :  { %v114_v39 = vmul.f32 0.3275911, %v553_v35  ;;  %v557_v40 = vadd.f32 %v432_v21, %v98_v37  ;;  %v119_v42 = vadd.f32 1.0, %v115_v36 }
  0x99   :  { %v435_v38 = vpop.eup %434  ;;  %v559_v43 = vadd.f32 1.0, %v114_v39  ;;  %v562_v44 = vmul.f32 0.70710677, %v557_v40  ;;  %436 = vrcp.f32 %v119_v42  ;;  %v160_v3 = vand.u32 2147483647, %v119_v42 }
  0x9a   :  { %v122_v41 = vmul.f32 %v435_v38, %v117_v29  ;;  %vm127_vm2 = vweird.f32 %v435_v38  ;;  %v162_v4 = vand.u32 2147483648, %v119_v42  ;;  %vm156_vm7 = vweird.f32 %v119_v42 }
  0x9b   :  { %438 = vrcp.f32 %v559_v43  ;;  %v566_v49 = vand.u32 2147483647, %v562_v44  ;;  %vm128_vm3 = vmor %vm126_vm1, %vm127_vm2  ;;  %v145_v7 = vand.u32 2147483647, %v559_v43  ;;  %v147_v8 = vand.u32 2147483648, %v559_v43 }
  0x9c   :  { %v123_v45 = vsub.f32 1.0, %v122_v41  ;;  %v163_v20 = vor.u32 1.1754944e-38, %v162_v4  ;;  %vm141_vm9 = vweird.f32 %v559_v43  ;;  %vm161_vm10 = vcmp.eq.f32.partialorder %v160_v3, 8.507059e+37 }
  0x9d   :  { %v116_v54 = vmul.f32 0.3275911, %v566_v49  ;;  %vm146_vm12 = vcmp.eq.f32.partialorder %v145_v7, 8.507059e+37  ;;  %v148_v26 = vor.u32 1.1754944e-38, %v147_v8  ;;  %v218_v41 = vsub.f32 0.0, %v553_v35 }
  0x9e   :  { %v124_v47 = vmul.f32 %v435_v38, %v123_v45  ;;  %vm241_vm2 = vcmp.ge.f32.partialorder %v536_v24, 0.0 }
  0x9f   :  { %v437_v55 = vpop.eup %436  ;;  %v574_v60 = vadd.f32 1.0, %v116_v54 }
  0xa0   :  { %v125_v51 = vadd.f32 %v435_v38, %v124_v47  ;;  %v152_v59 = vmul.f32 %v437_v55, %v119_v42  ;;  %vm157_vm5 = vweird.f32 %v437_v55  ;;  %v223_v47 = vmul.f32 %v219_v16, %v550_v34 }
  0xa1   :  { %v439_v57 = vpop.eup %438  ;;  %440 = vrcp.f32 %v574_v60  ;;  %vm158_vm8 = vmor %vm156_vm7, %vm157_vm5  ;;  %v175_v48 = vand.u32 2147483647, %v574_v60  ;;  %v177_v50 = vand.u32 2147483648, %v574_v60  ;;  %vm171_vm14 = vweird.f32 %v574_v60 }
  0xa2   :  { %v129_v56 = vsel %vm128_vm3, %v435_v38, %v125_v51  ;;  %v137_v63 = vmul.f32 %v439_v57, %v559_v43  ;;  %v153_v1 = vsub.f32 1.0, %v152_v59  ;;  %vm142_vm6 = vweird.f32 %v439_v57 }
  0xa3   :  { %v572_v58 = vsel %vm131_vm4, %v133_v52, %v129_v56  ;;  %vm143_vm11 = vmor %vm141_vm9, %vm142_vm6  ;;  %442 = vpow2.f32 %v225_v12  ;;  %v178_v34 = vor.u32 1.1754944e-38, %v177_v50  ;;  %vm176_vm1 = vcmp.eq.f32.partialorder %v175_v48, 8.507059e+37 }
  0xa4   :  { %v181_v62 = vmul.f32 1.0614054, %v572_v58  ;;  %v138_v5 = vsub.f32 1.0, %v137_v63  ;;  %v154_v6 = vmul.f32 %v437_v55, %v153_v1  ;;  %vm242_vm3 = vcmp.ge.f32.partialorder %v547_v33, 0.0 }
  0xa5   :  { %vm243_vm4 = vcmp.ge.f32.partialorder %v544_v32, 0.0  ;;  %vm295_vm5 = vcmask 523264   ;;  %vm244_vm6 = vcmp.ge.f32.partialorder %v562_v44, 0.0  ;;  %v433_v32 = vld [vmem:[%s647_s6] ss:$0 sm:$0xff]  ;;  %vm337_vm7 = vcmask 257024  }
  0xa6   :  { %v185_v2 = vadd.f32 -1.4531521, %v181_v62  ;;  %v139_v11 = vmul.f32 %v439_v57, %v138_v5  ;;  %v155_v15 = vadd.f32 %v437_v55, %v154_v6  ;;  %v229_v62 = vmul.f32 1.442695, %v223_v47 }
  0xa7   :  { %v441_v22 = vpop.eup %440  ;;  %vm341_vm9 = vcmask 256000  }
  0xa8   :  { %v189_v10 = vmul.f32 %v185_v2, %v572_v58  ;;  %v140_v21 = vadd.f32 %v439_v57, %v139_v11  ;;  %v159_v25 = vsel %vm158_vm8, %v437_v55, %v155_v15  ;;  %v167_v37 = vmul.f32 %v441_v22, %v574_v60 }
  0xa9   :  { %v164_v29 = vsel %vm161_vm10, %v163_v20, %v159_v25  ;;  %vm172_vm13 = vweird.f32 %v441_v22  ;;  %v222_v55 = vmul.f32 %v218_v41, %v553_v35  ;;  %v443_v63 = vpop.eup %442  ;;  %v220_v35 = vsub.f32 0.0, %v566_v49 }
  0xaa   :  { %v193_v17 = vadd.f32 1.4214138, %v189_v10  ;;  %v144_v36 = vsel %vm143_vm11, %v439_v57, %v140_v21  ;;  %v183_v38 = vmul.f32 1.0614054, %v164_v29  ;;  %v168_v45 = vsub.f32 1.0, %v167_v37  ;;  %vm173_vm15 = vmor %vm171_vm14, %vm172_vm13 }
  0xab   :  { %v149_v39 = vsel %vm146_vm12, %v148_v26, %v144_v36  ;;  %v227_v4 = vmul.f32 1.442695, %v222_v55  ;;  %444 = vpow2.f32 %v229_v62  ;;  %v224_v12 = vmul.f32 %v220_v35, %v566_v49 }
  0xac   :  { %v197_v28 = vmul.f32 %v193_v17, %v572_v58  ;;  %v182_v43 = vmul.f32 1.0614054, %v149_v39  ;;  %v187_v46 = vadd.f32 -1.4531521, %v183_v38  ;;  %v169_v53 = vmul.f32 %v441_v22, %v168_v45 }
  0xad   :  { %446 = vpow2.f32 %v227_v4  ;;  %v231_v25 = vmul.f32 1.442695, %v224_v12  ;;  %vm348_vm8 = vcmask 259072   ;;  %vm376_vm10 = vcmask 254976  }
  0xae   :  { %v201_v42 = vadd.f32 -0.28449672, %v197_v28  ;;  %v186_v52 = vadd.f32 -1.4531521, %v182_v43  ;;  %v191_v54 = vmul.f32 %v187_v46, %v164_v29  ;;  %v170_v59 = vadd.f32 %v441_v22, %v169_v53 }
  0xaf   :  { %448 = vpow2.f32 %v231_v25  ;;  %v101_v53 = vmul.f32 0.5, %v533_v23  ;;  %v103_v23 = vmul.f32 0.5, %v539_v30 }
  0xb0   :  { %v205_v51 = vmul.f32 %v201_v42, %v572_v58  ;;  %v190_v57 = vmul.f32 %v186_v52, %v149_v39  ;;  %v195_v61 = vadd.f32 1.4214138, %v191_v54  ;;  %v174_v2 = vsel %vm173_vm15, %v441_v22, %v170_v59 }
  0xb1   :  { %v179_v5 = vsel %vm176_vm1, %v178_v34, %v174_v2  ;;  %v445_v26 = vpop.eup %444  ;;  %v102_v54 = vmul.f32 0.5, %v541_v31  ;;  %v104_v31 = vmul.f32 0.5, %v557_v40 }
  0xb2   :  { %v209_v56 = vadd.f32 0.2548296, %v205_v51  ;;  %v194_v1 = vadd.f32 1.4214138, %v190_v57  ;;  %v199_v3 = vmul.f32 %v195_v61, %v164_v29  ;;  %v184_v8 = vmul.f32 1.0614054, %v179_v5 }
  0xb3   :  { %v447_v37 = vpop.eup %446 }
  0xb4   :  { %v213_v0 = vmul.f32 %v209_v56, %v572_v58  ;;  %v198_v7 = vmul.f32 %v194_v1, %v149_v39  ;;  %v203_v9 = vadd.f32 -0.28449672, %v199_v3  ;;  %v188_v10 = vadd.f32 -1.4531521, %v184_v8 }
  0xb5   :  { %v449_v52 = vpop.eup %448 }
  0xb6   :  { %v233_v6 = vmul.f32 %v443_v63, %v213_v0  ;;  %v202_v60 = vadd.f32 -0.28449672, %v198_v7  ;;  %v207_v11 = vmul.f32 %v203_v9, %v164_v29  ;;  %v192_v16 = vmul.f32 %v188_v10, %v179_v5 }
  0xb8   :  { %v237_v58 = vsub.f32 1.0, %v233_v6  ;;  %v206_v15 = vmul.f32 %v202_v60, %v149_v39  ;;  %v211_v17 = vadd.f32 0.2548296, %v207_v11  ;;  %v196_v21 = vadd.f32 1.4214138, %v192_v16 }
  0xba   :  { %v210_v20 = vadd.f32 0.2548296, %v206_v15  ;;  %v215_v22 = vmul.f32 %v211_v17, %v164_v29  ;;  %v245_v27 = vsub.f32 0.0, %v237_v58  ;;  %v200_v36 = vmul.f32 %v196_v21, %v179_v5 }
  0xbc   :  { %v214_v28 = vmul.f32 %v210_v20, %v149_v39  ;;  %v235_v38 = vmul.f32 %v445_v26, %v215_v22  ;;  %v204_v42 = vadd.f32 -0.28449672, %v200_v36  ;;  %v249_v49 = vsel %vm241_vm2, %v237_v58, %v245_v27 }
  0xbd   :  { %v253_v50 = vadd.f32 1.0, %v249_v49 }
  0xbe   :  { %v234_v41 = vmul.f32 %v447_v37, %v214_v28  ;;  %v239_v43 = vsub.f32 1.0, %v235_v38  ;;  %v208_v46 = vmul.f32 %v204_v42, %v179_v5 }
  0xbf   :  { %v257_v56 = vmul.f32 %v253_v50, %v101_v53 }
  0xc0   :  { %v238_v45 = vsub.f32 1.0, %v234_v41  ;;  %v212_v48 = vadd.f32 0.2548296, %v208_v46  ;;  %v247_v29 = vsub.f32 0.0, %v239_v43 }
  0xc2   :  { %v246_v47 = vsub.f32 0.0, %v238_v45  ;;  %v216_v39 = vmul.f32 %v212_v48, %v179_v5  ;;  %v251_v59 = vsel %vm243_vm4, %v239_v43, %v247_v29 }
  0xc3   :  { %v255_v33 = vadd.f32 1.0, %v251_v59 }
  0xc4   :  { %v250_v51 = vsel %vm242_vm3, %v238_v45, %v246_v47  ;;  %v236_v24 = vmul.f32 %v449_v52, %v216_v39 }
  0xc5   :  { %v254_v55 = vadd.f32 1.0, %v250_v51  ;;  %v259_v1 = vmul.f32 %v255_v33, %v103_v23 }
  0xc6   :  { %v240_v61 = vsub.f32 1.0, %v236_v24 }
  0xc7   :  { %v258_v57 = vmul.f32 %v254_v55, %v102_v54 }
  0xc8   :  { %v248_v34 = vsub.f32 0.0, %v240_v61 }
  0xc9   :  { %v261_v62 = vpack.c.bf16 %v258_v57, %v257_v56 }
  0xca   :  { %v252_v63 = vsel %vm244_vm6, %v240_v61, %v248_v34 }
  0xcb   :  { %412 = vmatmul.msk.bf16.vlgmr.msra.gmra.mxu1 %vm295_vm5, %v261_v62  ;;  %v256_v0 = vadd.f32 1.0, %v252_v63 }
  0xcd   :  { %v260_v2 = vmul.f32 %v256_v0, %v104_v31 }
  0xcf   :  { %v262_v3 = vpack.c.bf16 %v260_v2, %v259_v1 }
  0xd1   :  { %413 = vmatmul.msk.bf16.vlgmr.msra.gmra.mxu2 %vm295_vm5, %v262_v3 }
 0x148   :  { %v311_v4 = vpop.f32.mrf.mxu1 }
 0x149   :  { %v321_v5 = vadd.f32 %v311_v4, %v516_v13 }
 0x14b   :  { %v329_v35 = vadd.f32 %v433_v32, %v321_v5 }
 0x14d   :  { %v333_v44 = vpack.c.bf16 %v329_v35, %v329_v35  ;;  %v357_v11 = vmul.f32 %v329_v35, %v329_v35  ;;  %v343_v15 = vsel %vm75_vm0, %v329_v35, 0.0 }
 0x14f   :  { %338 = vst.msk [vmem:[%s649_s7] sm:$0xf] %vm337_vm7, %v333_v44  ;;  %v361_v21 = vsel %vm75_vm0, %v357_v11, 0.0 }
 0x150   :  { %v313_v30 = vpop.f32.mrf.mxu1 }
 0x151   :  { %v322_v40 = vadd.f32 %v313_v30, %v518_v14 }
 0x153   :  { %v330_v6 = vadd.f32 %v433_v32, %v322_v40 }
 0x154   :  { %v316_v8 = vpop.f32.mrf.mxu2 }
 0x155   :  { %v334_v7 = vpack.c.bf16 %v330_v6, %v330_v6  ;;  %v323_v9 = vadd.f32 %v316_v8, %v522_v18  ;;  %v358_v60 = vmul.f32 %v330_v6, %v330_v6  ;;  %v344_v12 = vsel %vm75_vm0, %v330_v6, 0.0 }
 0x156   :  { %v345_v20 = vadd.f32 %v344_v12, %v343_v15 }
 0x157   :  { %339 = vst.msk [vmem:[%s649_s7 + $0x4] sm:$0xf] %vm337_vm7, %v334_v7  ;;  %v331_v13 = vadd.f32 %v433_v32, %v323_v9  ;;  %v362_v16 = vsel %vm75_vm0, %v358_v60, 0.0 }
 0x158   :  { %v363_v26 = vadd.f32 %v362_v16, %v361_v21 }
 0x159   :  { %v335_v10 = vpack.c.bf16 %v331_v13, %v331_v13  ;;  %v359_v14 = vmul.f32 %v331_v13, %v331_v13  ;;  %v346_v17 = vsel %vm75_vm0, %v331_v13, 0.0 }
 0x15a   :  { %v347_v27 = vadd.f32 %v346_v17, %v345_v20 }
 0x15b   :  { %340 = vst.msk [vmem:[%s649_s7 + $0x8] sm:$0xf] %vm337_vm7, %v335_v10  ;;  %v364_v22 = vsel %vm75_vm0, %v359_v14, 0.0  ;;  %vm374_vm0 = vcmask 1040384  }
 0x15c   :  { %v318_v58 = vpop.f32.mrf.mxu2  ;;  %v365_v38 = vadd.f32 %v364_v22, %v363_v26 }
 0x15d   :  { %v324_v18 = vadd.f32 %v318_v58, %v524_v19 }
 0x15f   :  { %v332_v25 = vadd.f32 %v433_v32, %v324_v18 }
 0x161   :  { %v336_v28 = vpack.c.bf16 %v332_v25, %v332_v25  ;;  %v349_v36 = vsel %vm348_vm8, %v332_v25, 0.0  ;;  %v360_v37 = vmul.f32 %v332_v25, %v332_v25 }
 0x162   :  { %v350_v41 = vadd.f32 %v349_v36, %v347_v27 }
 0x163   :  { %342 = vst.msk [vmem:[%s649_s7 + $0xc] sm:$0x7] %vm341_vm9, %v336_v28  ;;  %v366_v19 = vsel %vm348_vm8, %v360_v37, 0.0 }
 0x164   :  { %v351_v42 = vrot.slane %v350_v41, 4  ;;  %v367_v49 = vadd.f32 %v366_v19, %v365_v38 }
 0x166   :  { %v352_v43 = vadd.f32 %v351_v42, %v350_v41  ;;  %v368_v45 = vrot.slane %v367_v49, 4 }
 0x168   :  { %v353_v46 = vrot.slane %v352_v43, 2  ;;  %v369_v47 = vadd.f32 %v368_v45, %v367_v49 }
 0x16a   :  { %v354_v48 = vadd.f32 %v353_v46, %v352_v43  ;;  %v370_v50 = vrot.slane %v369_v47, 2 }
 0x16c   :  { %v355_v29 = vrot.slane %v354_v48, 1  ;;  %v371_v51 = vadd.f32 %v370_v50, %v369_v47 }
 0x16e   :  { %v372_v39 = vrot.slane %v371_v51, 1  ;;  %v356_v52 = vadd.f32 %v355_v29, %v354_v48 }
 0x170   :  { %v373_v53 = vadd.f32 %v372_v39, %v371_v51 }
 0x172   :  { %v375_v54 = vsel %vm374_vm0, %v356_v52, %v373_v53 }
 0x173   :  { %377 = vst.msk [vmem:[%s650_s8] sm:$0x3] %vm376_vm10, %v375_v54 }

// kernel: patchtst_forward.13
= control target key start
LH: loop header
LB: loop body
LE: loop exit
PB: predicated region body
PF: predicated region fallthrough
CT: control target
= control target key end

     0   :  { %v274_v1 = vmov 0   ;;  %vm138_vm0 = vcmask 261120   ;;  %vm211_vm5 = vcmask 62464   ;;  %s382_s3 = inlined_call_operand.vmem [shape: bf16[160,8], index: 3, kind: input, shape index: {}]   ;;  %s383_s7 = inlined_call_operand.vmem [shape: f32[6,1], index: 7, kind: input, shape index: {}]   ;;  %s384_s0 = inlined_call_operand.vmem [shape: bf16[6,160], index: 0, kind: input, shape index: {}]   ;;  %s385_s1 = inlined_call_operand.vmem [shape: f32[1,160], index: 1, kind: input, shape index: {}]   ;;  %s386_s2 = inlined_call_operand.vmem [shape: f32[1,160], index: 2, kind: input, shape index: {}]   ;;  %s387_s6 = inlined_call_operand.vmem [shape: f32[6,1], index: 6, kind: input, shape index: {}]   ;;  %s388_s8 = inlined_call_operand.vmem [shape: f32[6,1], index: 8, kind: input, shape index: {}]   ;;  %s389_s5 = inlined_call_operand.vmem [shape: f32[6,1], index: 5, kind: input, shape index: {}]   ;;  %s390_s4 = inlined_call_operand.vmem [shape: f32[1,8], index: 4, kind: input, shape index: {}]   ;;  %s391_s9 = inlined_call_operand.vmem [shape: f32[6,8], index: 9, kind: output, shape index: {}]  }
   0x1   :  { %v265_v0 = vld [vmem:[%s382_s3 + $0x38] sm:$0xff]  ;;  %269 = vset.pattern.permute.xlu0 %v274_v1  ;;  %270 = vset.pattern.permute.xlu1 %v274_v1  ;;  %v175_v2 = vld [vmem:[%s383_s7] sm:$0x3f]  ;;  %v264_v3 = vld [vmem:[%s382_s3 + $0x30] sm:$0xff] }
   0x2   :  { %142 = vmatpush.bf16.msra.mxu0 %v265_v0  ;;  %v176_v4 = vadd.f32 1e-10, %v175_v2  ;;  %v267_v5 = vld [vmem:[%s382_s3 + $0x48] sm:$0xff]  ;;  %v33_v6 = vld [vmem:[%s384_s0] sm:$0x77]  ;;  %v261_v21 = vld [vmem:[%s382_s3 + $0x18] sm:$0xff] }
   0x3   :  { %v36_v7 = vld [vmem:[%s385_s1] sm:$0x3]  ;;  %161 = vmatpush.bf16.msra.mxu1 %v267_v5  ;;  %v35_v9 = vunpack.c.h.bf16 %v33_v6  ;;  %v263_v14 = vld [vmem:[%s382_s3 + $0x28] sm:$0xff]  ;;  %v34_v22 = vunpack.c.l.bf16 %v33_v6  ;;  %v260_v24 = vld [vmem:[%s382_s3 + $0x10] sm:$0xff] }
   0x4   :  { %179 = vperm.xlu0 %269, %v176_v4   ;;  %v266_v8 = vld [vmem:[%s382_s3 + $0x40] sm:$0xff]  ;;  %v39_v10 = vperm.slane %v36_v7, 1  ;;  %v38_v23 = vperm.slane %v36_v7, 0  ;;  %v259_v27 = vld [vmem:[%s382_s3 + $0x8] sm:$0xff] }
   0x5   :  { %v44_v11 = vld [vmem:[%s386_s2] sm:$0x3] }
   0x6   :  { %v47_v12 = vperm.slane %v44_v11, 1  ;;  %v197_v13 = vld [vmem:[%s387_s6] sm:$0x3f]  ;;  %143 = vmatpush.bf16.msra.mxu0 %v264_v3  ;;  %v43_v15 = vmul.f32 %v39_v10, %v35_v9  ;;  %v42_v25 = vmul.f32 %v38_v23, %v34_v22  ;;  %v46_v26 = vperm.slane %v44_v11, 0 }
   0x7   :  { %200 = vperm.xlu1 %270, %v197_v13   ;;  %162 = vmatpush.bf16.msra.mxu1 %v266_v8  ;;  %v168_v17 = vld [vmem:[%s388_s8] sm:$0x3f] }
   0x8   :  { %v51_v16 = vadd.f32 %v47_v12, %v43_v15  ;;  %v262_v18 = vld [vmem:[%s382_s3 + $0x20] sm:$0xff]  ;;  %v50_v28 = vadd.f32 %v46_v26, %v42_v25 }
   0x9   :  { %v204_v20 = vld [vmem:[%s389_s5] sm:$0x3f] }
   0xa   :  { %144 = vmatpush.bf16.msra.mxu0 %v263_v14  ;;  %v53_v19 = vpack.c.bf16 %v51_v16, %v51_v16  ;;  %v258_v29 = vld [vmem:[%s382_s3] sm:$0xff]  ;;  %v52_v30 = vpack.c.bf16 %v50_v28, %v50_v28 }
   0xb   :  { %v271_v38 = vld [vmem:[%s390_s4] ss:$0 sm:$0xff] }
   0xc   :  { %257 = vmatmul.msk.bf16.vlgmr.msra.gmra.mxu1 %vm138_vm0, %v53_v19  ;;  %171 = vperm.xlu0 %269, %v168_v17  }
   0xe   :  { %145 = vmatpush.bf16.msra.mxu0 %v262_v18 }
   0xf   :  { %207 = vperm.xlu1 %270, %v204_v20  }
  0x12   :  { %146 = vmatpush.bf16.msra.mxu0 %v261_v21 }
  0x16   :  { %147 = vmatpush.bf16.msra.mxu0 %v260_v24 }
  0x1a   :  { %148 = vmatpush.bf16.msra.mxu0 %v259_v27 }
  0x1e   :  { %149 = vmatpush.bf16.msra.mxu0 %v258_v29 }
  0x21   :  { %150 = vmatmul.bf16.vlgmr.msra.gmra.mxu0 %v52_v30 }
  0x76   :  { %v180_v31 = vpop.permute.xlu0 %179 }
  0x77   :  { %272 = vrcp.f32 %v180_v31  ;;  %vm187_vm1 = vweird.f32 %v180_v31  ;;  %v193_v39 = vand.u32 2147483648, %v180_v31  ;;  %v191_v41 = vand.u32 2147483647, %v180_v31 }
  0x79   :  { %v201_v42 = vpop.permute.xlu1 %200  ;;  %v194_v45 = vor.u32 1.1754944e-38, %v193_v39  ;;  %vm192_vm4 = vcmp.eq.f32.partialorder %v191_v41, 8.507059e+37 }
  0x7d   :  { %v273_v33 = vpop.eup %272 }
  0x7e   :  { %v183_v34 = vmul.f32 %v273_v33, %v180_v31  ;;  %vm188_vm2 = vweird.f32 %v273_v33  ;;  %v172_v48 = vpop.permute.xlu0 %171 }
  0x7f   :  { %vm189_vm3 = vmor %vm187_vm1, %vm188_vm2 }
  0x80   :  { %v184_v36 = vsub.f32 1.0, %v183_v34 }
  0x81   :  { %v208_v54 = vpop.permute.xlu1 %207 }
  0x82   :  { %v185_v37 = vmul.f32 %v273_v33, %v184_v36 }
  0x84   :  { %v186_v40 = vadd.f32 %v273_v33, %v185_v37 }
  0x86   :  { %v190_v47 = vsel %vm189_vm3, %v273_v33, %v186_v40 }
  0x87   :  { %v195_v50 = vsel %vm192_vm4, %v194_v45, %v190_v47 }
  0x89   :  { %v164_v32 = vpop.f32.mrf.mxu1 }
  0x91   :  { %v166_v35 = vpop.f32.mrf.mxu1 }
  0x9e   :  { %v151_v43 = vpop.f32.mrf.mxu0 }
  0x9f   :  { %v152_v44 = vadd.f32 %v271_v38, %v151_v43 }
  0xa1   :  { %v165_v46 = vadd.f32 %v164_v32, %v152_v44 }
  0xa3   :  { %v174_v49 = vsub.f32 %v165_v46, %v172_v48 }
  0xa5   :  { %v196_v51 = vmul.f32 %v195_v50, %v174_v49 }
  0xa6   :  { %v153_v52 = vpop.f32.mrf.mxu0 }
  0xa7   :  { %v203_v53 = vmul.f32 %v201_v42, %v196_v51 }
  0xa9   :  { %v210_v55 = vadd.f32 %v208_v54, %v203_v53 }
  0xab   :  { %212 = vst.msk [vmem:[%s391_s9] sm:$0x3f] %vm211_vm5, %v210_v55 }

// kernel: patchtst_forward.9
= control target key start
LH: loop header
LB: loop body
LE: loop exit
PB: predicated region body
PF: predicated region fallthrough
CT: control target
= control target key end

     0   :  { %vm68_vm0 = vcmask 261120   ;;  %s2423_s21 = smov 120   ;;  %s2424_s22 = smov 88   ;;  %vm91_vm1 = vcmask 64512   ;;  %vm113_vm2 = vcmask 34816   ;;  %vm119_vm4 = vcmask 36864   ;;  %s3372_s3 = inlined_call_operand.vmem [shape: bf16[32,96], index: 3, kind: input, shape index: {}]   ;;  %s3373_s0 = inlined_call_operand.vmem [shape: bf16[6,5,32], index: 0, kind: input, shape index: {}]   ;;  %s3374_s1 = inlined_call_operand.vmem [shape: f32[1,32], index: 1, kind: input, shape index: {}]   ;;  %s3375_s2 = inlined_call_operand.vmem [shape: f32[1,32], index: 2, kind: input, shape index: {}]   ;;  %s3376_s4 = inlined_call_operand.vmem [shape: f32[1,96], index: 4, kind: input, shape index: {}]   ;;  %s3377_s8 = inlined_call_operand.vmem [shape: bf16[6,4,5,5], index: 8, kind: output, shape index: {1}]   ;;  %s3378_s5 = inlined_call_operand.vmem [shape: bf16[32,32], index: 5, kind: input, shape index: {}]   ;;  %s3379_s6 = inlined_call_operand.vmem [shape: f32[1,32], index: 6, kind: input, shape index: {}]   ;;  %s3380_s7 = inlined_call_operand.vmem [shape: bf16[6,5,32], index: 7, kind: output, shape index: {0}]   ;;  %s3381_s9 = inlined_call_operand.vmem [shape: f32[1,2,32], index: 9, kind: output, shape index: {2}]  }
   0x1   :  { %v2491_v0 = vld [vmem:[%s3372_s3 + $0x8] sm:$0xff]  ;;  %v42_v1 = vld [vmem:[%s3373_s0] sm:$0x7]  ;;  %s2425_s23 = smov 96   ;;  %s2426_s24 = smov 72   ;;  %vm138_vm6 = vcmask 1041408  }
   0x2   :  { %v2499_v2 = vld [vmem:[%s3374_s1] ss:$0 sm:$0xff]  ;;  %78 = vmatpush.bf16.msra.mxu0 %v2491_v0  ;;  %v43_v4 = vunpack.c.l.bf16 %v42_v1  ;;  %s2427_s25 = smov 112   ;;  %s2428_s26 = smov 80   ;;  %vm114_vm3 = vsmask.f32 2304 }
   0x3   :  { %v2505_v3 = vld [vmem:[%s3372_s3] sm:$0xff]  ;;  %s2429_s27 = smov 104   ;;  %vm2551_vm5 = vmand %vm113_vm2, %vm114_vm3  ;;  %v2175_v43 = vld [vmem:[%s3377_s8 + $0x8] sm:$0x7]  ;;  %s2430_s30 = smov 48   ;;  %vm139_vm7 = vcmask 1042432  }
   0x4   :  { %v2510_v5 = vld [vmem:[%s3375_s2] ss:$0 sm:$0xff]  ;;  %v47_v6 = vmul.f32 %v2499_v2, %v43_v4  ;;  %v2171_v36 = vld [vmem:[%s3377_s8 + $0x4] sm:$0x7]  ;;  %v2179_v51 = vld [vmem:[%s3377_s8 + $0xc] sm:$0x7] }
   0x5   :  { %v2523_v9 = vld [vmem:[%s3376_s4] ss:$0 sm:$0xff]  ;;  %s2431_s10 = smov 64   ;;  %s2433_s11 = smov 40   ;;  %vm134_vm8 = vcmask 39936   ;;  %vm159_vm9 = vcmask 59392  }
   0x6   :  { %79 = vmatpush.bf16.msra.mxu0 %v2505_v3  ;;  %v2515_v7 = vadd.f32 %v2510_v5, %v47_v6  ;;  %v116_v30 = vld [vmem:[%s3377_s8] sm:$0x7]  ;;  %s2434_s12 = smov 56   ;;  %vm2626_vm10 = vmand %vm159_vm9, %vm114_vm3  ;;  %s2435_s15 = smov 8   ;;  %vm231_vm11 = vcmask 124992   ;;  %vm303_vm13 = vcmask 190592  }
   0x7   :  { %s2436_s16 = smov 16   ;;  %s2437_s17 = smov 24   ;;  %vm2667_vm12 = vmand %vm231_vm11, %vm114_vm3  ;;  %vm375_vm15 = vcmask 256192  }
   0x8   :  { %v52_v8 = vpack.c.bf16 %v2515_v7, %v2515_v7  ;;  %vm2674_vm14 = vmand %vm303_vm13, %vm114_vm3 }
   0x9   :  { %vm2681_vm2 = vmand %vm375_vm15, %vm114_vm3 }
   0xa   :  { %2167 = vmatmul.msk.bf16.vlgmr.msra.gmra.mxu0 %vm68_vm0, %v52_v8 }
  0x87   :  { %v81_v10 = vpop.f32.mrf.mxu0 }
  0x88   :  { %v82_v11 = vadd.f32 %v2523_v9, %v81_v10  ;;  %v2432_v10 = vmov 65535  }
  0x8a   :  { %v85_v12 = vpack.c.bf16 %v82_v11, %v82_v11  ;;  %v140_v11 = vsel %vm138_vm6, 4294967295, %v2432_v10  ;;  %vm415_vm6 = vcmask 256000  }
  0x8c   :  { %v87_v13 = vunpack.c.l.b16 %v85_v12 }
  0x8e   :  { %v2526_v14 = vpack.c.b16 %v87_v13, %v87_v13 }
  0x8f   :  { %v83_v15 = vpop.f32.mrf.mxu0 }
  0x90   :  { %164 = vrot.lane.b32.xlu2 %v2526_v14, %s2423_s21  ;;  %166 = vrot.lane.b32.xlu1 %v2526_v14, %s2424_s22 }
  0x91   :  { %89 = vrot.lane.b32.xlu0 %v2526_v14, %s2425_s23 }
  0x98   :  { %310 = vrot.lane.b32.xlu2 %v2526_v14, %s2426_s24  ;;  %236 = vrot.lane.b32.xlu1 %v2526_v14, %s2427_s25 }
  0x99   :  { %238 = vrot.lane.b32.xlu0 %v2526_v14, %s2428_s26 }
  0xa1   :  { %308 = vrot.lane.b32.xlu0 %v2526_v14, %s2429_s27 }
  0xea   :  { %v165_v16 = vpop.permute.xlu2 %164 }
  0xf2   :  { %v311_v17 = vpop.permute.xlu2 %310 }
  0xf3   :  { %v316_v22 = vsel %vm91_vm1, %v311_v17, 0 }
 0x102   :  { %v167_v18 = vpop.permute.xlu1 %166 }
 0x103   :  { %v90_v19 = vpop.permute.xlu0 %89  ;;  %v172_v20 = vsel %vm91_vm1, %v167_v18, 0 }
 0x104   :  { %v96_v21 = vsel %vm91_vm1, %v90_v19, 0  ;;  %181 = vmatpush.bf16.xpose.msra.mxu3 %v172_v20 }
 0x105   :  { %105 = vmatpush.bf16.xpose.msra.mxu1 %v96_v21 }
 0x10a   :  { %v237_v25 = vpop.permute.xlu1 %236 }
 0x10b   :  { %v239_v23 = vpop.permute.xlu0 %238  ;;  %2170 = vmatmul.msk.bf16.vlgmr.msra.gmra.mxu3 %vm91_vm1, %v165_v16  ;;  %v2597_v16 = vsel %vm139_vm7, %v140_v11, 0  ;;  %vm2715_vm7 = vmand %vm415_vm6, %vm114_vm3  ;;  %vm420_vm3 = vcmask 258048  }
 0x10c   :  { %325 = vmatpush.bf16.xpose.msrb.mxu3 %v316_v22  ;;  %2168 = vmatmul.msk.bf16.vlgmr.msra.gmra.mxu1 %vm91_vm1, %v85_v12  ;;  %v244_v24 = vsel %vm91_vm1, %v239_v23, 0 }
 0x10d   :  { %253 = vmatpush.bf16.xpose.msrb.mxu0 %v244_v24 }
 0x113   :  { %v309_v26 = vpop.permute.xlu0 %308 }
 0x114   :  { %2174 = vmatmul.msk.bf16.vlgmr.msrb.gmra.mxu0 %vm91_vm1, %v237_v25 }
 0x11b   :  { %2178 = vmatmul.msk.bf16.vlgmr.msrb.gmra.mxu3 %vm91_vm1, %v309_v26 }
 0x189   :  { %v107_v27 = vpop.f32.mrf.mxu1 }
 0x18a   :  { %v111_v28 = vmul.f32 0.35355338, %v107_v27 }
 0x18c   :  { %v112_v31 = vpack.c.bf16 %v111_v28, %v111_v28  ;;  %v120_v32 = vsel %vm119_vm4, %v111_v28, -inf }
 0x18d   :  { %121 = vmax.xlane.f32.xlu1 %v120_v32 }
 0x18e   :  { %v117_v33 = vsel %vm2551_vm5, %v112_v31, %v116_v30  ;;  %v183_v34 = vpop.f32.mrf.mxu3 }
 0x18f   :  { %118 = vst [vmem:[%s3377_s8] sm:$0x7] %v117_v33  ;;  %v187_v35 = vmul.f32 0.35355338, %v183_v34 }
 0x191   :  { %v188_v37 = vpack.c.bf16 %v187_v35, %v187_v35  ;;  %v109_v38 = vpop.f32.mrf.mxu1  ;;  %v255_v39 = vpop.f32.mrf.mxu0  ;;  %v193_v40 = vsel %vm119_vm4, %v187_v35, -inf }
 0x192   :  { %v259_v41 = vmul.f32 0.35355338, %v255_v39  ;;  %194 = vmax.xlane.f32.xlu0 %v193_v40 }
 0x193   :  { %v191_v42 = vsel %vm2551_vm5, %v188_v37, %v2171_v36 }
 0x194   :  { %2172 = vst [vmem:[%s3377_s8 + $0x4] sm:$0x7] %v191_v42  ;;  %v260_v44 = vpack.c.bf16 %v259_v41, %v259_v41  ;;  %v265_v45 = vsel %vm119_vm4, %v259_v41, -inf }
 0x195   :  { %266 = vmax.xlane.f32.xlu2 %v265_v45 }
 0x196   :  { %v263_v46 = vsel %vm2551_vm5, %v260_v44, %v2175_v43  ;;  %v185_v47 = vpop.f32.mrf.mxu3 }
 0x197   :  { %2176 = vst [vmem:[%s3377_s8 + $0x8] sm:$0x7] %v263_v46 }
 0x199   :  { %v257_v48 = vpop.f32.mrf.mxu0 }
 0x19e   :  { %v327_v49 = vpop.f32.mrf.mxu3 }
 0x19f   :  { %v331_v50 = vmul.f32 0.35355338, %v327_v49 }
 0x1a1   :  { %v332_v52 = vpack.c.bf16 %v331_v50, %v331_v50  ;;  %v337_v53 = vsel %vm119_vm4, %v331_v50, -inf }
 0x1a2   :  { %338 = vmax.xlane.f32.xlu2 %v337_v53  ;;  %v161_v53 = vld [vmem:[#allocation2] sm:$0x7] }
 0x1a3   :  { %v335_v54 = vsel %vm2551_vm5, %v332_v52, %v2179_v51 }
 0x1a4   :  { %2180 = vst [vmem:[%s3377_s8 + $0xc] sm:$0x7] %v335_v54 }
 0x1a6   :  { %277 = vrot.lane.b32.xlu1 %v2526_v14, %s2430_s30  ;;  %132 = vrot.lane.b32.xlu0 %v2526_v14, %s2431_s10  ;;  %v329_v55 = vpop.f32.mrf.mxu3 }
 0x200   :  { %v122_v56 = vpop.xlane.xlu1 %121 }
 0x201   :  { %v123_v57 = vsub.f32 %v111_v28, %v122_v56 }
 0x203   :  { %v124_v58 = vmul.f32 1.442695, %v123_v57 }
 0x205   :  { %2319 = vpow2.f32 %v124_v58  ;;  %v195_v59 = vpop.xlane.xlu0 %194 }
 0x206   :  { %v196_v63 = vsub.f32 %v187_v35, %v195_v59  ;;  %v2191_v35 = vld [vmem:[%s3373_s0 + $0x4] sm:$0x7] }
 0x208   :  { %v267_v60 = vpop.xlane.xlu2 %266  ;;  %v197_v6 = vmul.f32 1.442695, %v196_v63 }
 0x209   :  { %v268_v61 = vsub.f32 %v259_v41, %v267_v60 }
 0x20b   :  { %v2320_v62 = vpop.eup %2319  ;;  %v269_v1 = vmul.f32 1.442695, %v268_v61 }
 0x20c   :  { %v126_v4 = vsel %vm119_vm4, %v2320_v62, 0.0 }
 0x20d   :  { %2321 = vpow2.f32 %v269_v1  ;;  %127 = vadd.xlane.f32.xlu1 %v126_v4 }
 0x20e   :  { %2323 = vpow2.f32 %v197_v6 }
 0x213   :  { %v2322_v8 = vpop.eup %2321 }
 0x214   :  { %v271_v12 = vsel %vm119_vm4, %v2322_v8, 0.0  ;;  %v2324_v20 = vpop.eup %2323 }
 0x215   :  { %272 = vadd.xlane.f32.xlu2 %v271_v12  ;;  %v339_v13 = vpop.xlane.xlu2 %338  ;;  %v199_v23 = vsel %vm119_vm4, %v2324_v20, 0.0 }
 0x216   :  { %v340_v15 = vsub.f32 %v331_v50, %v339_v13 }
 0x218   :  { %v341_v17 = vmul.f32 1.442695, %v340_v15  ;;  %v278_v18 = vpop.permute.xlu1 %277  ;;  %v133_v19 = vpop.permute.xlu0 %132 }
 0x219   :  { %v283_v21 = vand.u32 %v278_v18, %v2597_v16  ;;  %v143_v22 = vand.u32 %v2597_v16, %v133_v19  ;;  %v2656_v18 = vld [vmem:[%s3378_s5 + $0x8] sm:$0xff]  ;;  %v2662_v19 = vld [vmem:[%s3378_s5] sm:$0xff] }
 0x21a   :  { %2325 = vpow2.f32 %v341_v17  ;;  %402 = vmatpush.bf16.msra.mxu0 %v2656_v18 }
 0x21b   :  { %292 = vmatpush.bf16.msrb.mxu1 %v283_v21  ;;  %152 = vmatpush.bf16.msra.mxu2 %v143_v22 }
 0x21d   :  { %200 = vadd.xlane.f32.xlu2 %v199_v23 }
 0x21e   :  { %403 = vmatpush.bf16.msra.mxu0 %v2662_v19 }
 0x21f   :  { %453 = vmatpush.bf16.msra.mxu1 %v2491_v0 }
 0x220   :  { %v2326_v24 = vpop.eup %2325 }
 0x221   :  { %v343_v25 = vsel %vm119_vm4, %v2326_v24, 0.0 }
 0x222   :  { %344 = vadd.xlane.f32.xlu0 %v343_v25  ;;  %v2294_v25 = vld [vmem:[%s3380_s7 + $0x14] sm:$0x7] }
 0x223   :  { %454 = vmatpush.bf16.msra.mxu1 %v2505_v3 }
 0x226   :  { %349 = vrot.lane.b32.xlu1 %v2526_v14, %s2433_s11 }
 0x235   :  { %205 = vrot.lane.b32.xlu2 %v2526_v14, %s2434_s12  ;;  %v440_v14 = vunpack.c.l.bf16 %v2191_v35 }
 0x237   :  { %v441_v41 = vmul.f32 %v2499_v2, %v440_v14 }
 0x239   :  { %v2618_v46 = vadd.f32 %v2510_v5, %v441_v41 }
 0x23b   :  { %v443_v47 = vpack.c.bf16 %v2618_v46, %v2618_v46 }
 0x280   :  { %v128_v26 = vpop.xlane.xlu1 %127 }
 0x281   :  { %2327 = vrcp.f32 %v128_v26 }
 0x287   :  { %v2328_v27 = vpop.eup %2327 }
 0x288   :  { %v273_v28 = vpop.xlane.xlu2 %272  ;;  %v130_v30 = vmul.f32 %v2328_v27, %v2320_v62 }
 0x289   :  { %2329 = vrcp.f32 %v273_v28 }
 0x28a   :  { %v131_v31 = vpack.c.bf16 %v130_v30, %v130_v30 }
 0x28c   :  { %2169 = vmatmul.msk.bf16.vlgmr.msra.gmra.mxu2 %vm134_vm8, %v131_v31 }
 0x28f   :  { %v2330_v32 = vpop.eup %2329 }
 0x290   :  { %v275_v33 = vmul.f32 %v2330_v32, %v2322_v8  ;;  %v201_v34 = vpop.xlane.xlu2 %200 }
 0x291   :  { %2331 = vrcp.f32 %v201_v34 }
 0x292   :  { %v276_v36 = vpack.c.bf16 %v275_v33, %v275_v33 }
 0x294   :  { %2177 = vmatmul.msk.bf16.vlgmr.msrb.gmra.mxu1 %vm134_vm8, %v276_v36 }
 0x295   :  { %v345_v44 = vpop.xlane.xlu0 %344 }
 0x296   :  { %2333 = vrcp.f32 %v345_v44  ;;  %v2194_v44 = vld [vmem:[%s3377_s8 + $0x10] sm:$0x7] }
 0x297   :  { %v2332_v37 = vpop.eup %2331 }
 0x298   :  { %v203_v38 = vmul.f32 %v2332_v37, %v2324_v20  ;;  %v350_v39 = vpop.permute.xlu1 %349  ;;  %v206_v40 = vpop.permute.xlu2 %205 }
 0x299   :  { %v355_v42 = vand.u32 %v350_v39, %v2597_v16  ;;  %v211_v43 = vand.u32 %v206_v40, %v2597_v16 }
 0x29a   :  { %v204_v45 = vpack.c.bf16 %v203_v38, %v203_v38 }
 0x29b   :  { %220 = vmatpush.bf16.msrb.mxu2 %v211_v43 }
 0x29c   :  { %v2334_v48 = vpop.eup %2333 }
 0x29d   :  { %v347_v49 = vmul.f32 %v2334_v48, %v2326_v24 }
 0x29e   :  { %2173 = vmatmul.msk.bf16.vlgmr.msrb.gmra.mxu2 %vm134_vm8, %v204_v45 }
 0x29f   :  { %364 = vmatpush.bf16.msra.mxu2 %v355_v42  ;;  %v348_v50 = vpack.c.bf16 %v347_v49, %v347_v49 }
 0x2a4   :  { %2192 = vmatmul.msk.bf16.vlgmr.msra.gmra.mxu1 %vm68_vm0, %v443_v47 }
 0x2ae   :  { %2181 = vmatmul.msk.bf16.vlgmr.msra.gmra.mxu2 %vm134_vm8, %v348_v50  ;;  %v2708_v50 = vld [vmem:[%s3379_s6] ss:$0 sm:$0xff] }
 0x30f   :  { %v154_v51 = vpop.f32.mrf.mxu2 }
 0x310   :  { %v158_v54 = vpack.c.bf16 %v154_v51, %v154_v51 }
 0x311   :  { %v294_v55 = vpop.f32.mrf.mxu1 }
 0x312   :  { %v162_v56 = vsel %vm2626_vm10, %v158_v54, %v161_v53  ;;  %v298_v10 = vpack.c.bf16 %v294_v55, %v294_v55 }
 0x313   :  { %163 = vst [vmem:[#allocation2] sm:$0x7] %v162_v56 }
 0x317   :  { %v156_v57 = vpop.f32.mrf.mxu2 }
 0x318   :  { %v417_v57 = vld [vmem:[%s3380_s7] sm:$0x7] }
 0x319   :  { %v296_v58 = vpop.f32.mrf.mxu1 }
 0x31a   :  { %v233_v21 = vld [vmem:[#allocation2] sm:$0x7] }
 0x321   :  { %v222_v59 = vpop.f32.mrf.mxu2  ;;  %v456_v60 = vpop.f32.mrf.mxu1 }
 0x322   :  { %v226_v61 = vpack.c.bf16 %v222_v59, %v222_v59  ;;  %v457_v62 = vadd.f32 %v2523_v9, %v456_v60 }
 0x324   :  { %v460_v63 = vpack.c.bf16 %v457_v62, %v457_v62  ;;  %228 = vrot.lane.b32.xlu1 %v226_v61, %s2435_s15 }
 0x326   :  { %v462_v1 = vunpack.c.l.b16 %v460_v63 }
 0x328   :  { %v2634_v4 = vpack.c.b16 %v462_v1, %v462_v1 }
 0x329   :  { %v224_v6 = vpop.f32.mrf.mxu2  ;;  %v458_v8 = vpop.f32.mrf.mxu1 }
 0x32a   :  { %464 = vrot.lane.b32.xlu2 %v2634_v4, %s2425_s23  ;;  %528 = vrot.lane.b32.xlu0 %v2634_v4, %s2423_s21 }
 0x32c   :  { %300 = vrot.lane.b32.xlu1 %v298_v10, %s2436_s16 }
 0x331   :  { %v366_v11 = vpop.f32.mrf.mxu2 }
 0x332   :  { %v370_v12 = vpack.c.bf16 %v366_v11, %v366_v11  ;;  %v2198_v11 = vld [vmem:[%s3377_s8 + $0x14] sm:$0x7] }
 0x334   :  { %600 = vrot.lane.b32.xlu1 %v2634_v4, %s2428_s26  ;;  %372 = vrot.lane.b32.xlu2 %v370_v12, %s2437_s17 }
 0x339   :  { %v368_v13 = vpop.f32.mrf.mxu2 }
 0x33c   :  { %530 = vrot.lane.b32.xlu1 %v2634_v4, %s2424_s22  ;;  %598 = vrot.lane.b32.xlu2 %v2634_v4, %s2427_s25 }
 0x344   :  { %668 = vrot.lane.b32.xlu1 %v2634_v4, %s2429_s27  ;;  %670 = vrot.lane.b32.xlu2 %v2634_v4, %s2426_s24 }
 0x384   :  { %v465_v15 = vpop.permute.xlu2 %464 }
 0x385   :  { %v470_v17 = vsel %vm91_vm1, %v465_v15, 0 }
 0x386   :  { %479 = vmatpush.bf16.xpose.msra.mxu3 %v470_v17 }
 0x38d   :  { %2193 = vmatmul.msk.bf16.vlgmr.msra.gmra.mxu3 %vm91_vm1, %v460_v63 }
 0x38e   :  { %v373_v24 = vpop.permute.xlu2 %372 }
 0x396   :  { %v229_v22 = vpop.permute.xlu1 %228  ;;  %v599_v30 = vpop.permute.xlu2 %598 }
 0x397   :  { %v234_v23 = vsel %vm2667_vm12, %v229_v22, %v233_v21 }
 0x398   :  { %235 = vst [vmem:[#allocation2] sm:$0x7] %v234_v23  ;;  %v2206_v23 = vld [vmem:[%s3377_s8 + $0x1c] sm:$0x7] }
 0x39c   :  { %v529_v40 = vpop.permute.xlu0 %528 }
 0x39e   :  { %v301_v26 = vpop.permute.xlu1 %300  ;;  %v671_v14 = vpop.permute.xlu2 %670 }
 0x39f   :  { %v305_v27 = vld [vmem:[#allocation2] sm:$0x7]  ;;  %v676_v39 = vsel %vm91_vm1, %v671_v14, 0 }
 0x3a0   :  { %v306_v28 = vsel %vm2674_vm14, %v301_v26, %v305_v27 }
 0x3a1   :  { %307 = vst [vmem:[#allocation2] sm:$0x7] %v306_v28 }
 0x3a6   :  { %v601_v32 = vpop.permute.xlu1 %600 }
 0x3a7   :  { %v606_v33 = vsel %vm91_vm1, %v601_v32, 0 }
 0x3a8   :  { %v377_v34 = vld [vmem:[#allocation2] sm:$0x7]  ;;  %615 = vmatpush.bf16.xpose.msrb.mxu3 %v606_v33 }
 0x3a9   :  { %v378_v35 = vsel %vm2681_vm2, %v373_v24, %v377_v34 }
 0x3aa   :  { %379 = vst [vmem:[#allocation2] sm:$0x7] %v378_v35 }
 0x3ae   :  { %v531_v36 = vpop.permute.xlu1 %530 }
 0x3af   :  { %v536_v37 = vsel %vm91_vm1, %v531_v36, 0  ;;  %2201 = vmatmul.msk.bf16.vlgmr.msrb.gmra.mxu3 %vm91_vm1, %v599_v30 }
 0x3b0   :  { %748 = vmatpush.bf16.msra.mxu3 %v2656_v18  ;;  %545 = vmatpush.bf16.xpose.msrb.mxu0 %v536_v37 }
 0x3b1   :  { %v380_v38 = vld [vmem:[#allocation2] sm:$0x7] }
 0x3b2   :  { %2190 = vmatmul.msk.bf16.vlgmr.msra.gmra.mxu0 %vm68_vm0, %v380_v38 }
 0x3b4   :  { %749 = vmatpush.bf16.msra.mxu3 %v2662_v19 }
 0x3b6   :  { %v669_v41 = vpop.permute.xlu1 %668 }
 0x3b8   :  { %685 = vmatpush.bf16.xpose.msra.mxu0 %v676_v39 }
 0x3c2   :  { %2197 = vmatmul.msk.bf16.vlgmr.msrb.gmra.mxu0 %vm91_vm1, %v529_v40 }
 0x3d2   :  { %2205 = vmatmul.msk.bf16.vlgmr.msra.gmra.mxu0 %vm91_vm1, %v669_v41 }
 0x410   :  { %v481_v42 = vpop.f32.mrf.mxu3 }
 0x411   :  { %v485_v43 = vmul.f32 0.35355338, %v481_v42 }
 0x413   :  { %v486_v45 = vpack.c.bf16 %v485_v43, %v485_v43  ;;  %v491_v47 = vsel %vm119_vm4, %v485_v43, -inf }
 0x414   :  { %492 = vmax.xlane.f32.xlu2 %v491_v47 }
 0x415   :  { %v489_v48 = vsel %vm2551_vm5, %v486_v45, %v2194_v44 }
 0x416   :  { %2195 = vst [vmem:[%s3377_s8 + $0x10] sm:$0x7] %v489_v48 }
 0x418   :  { %v483_v49 = vpop.f32.mrf.mxu3 }
 0x42f   :  { %v405_v51 = vpop.f32.mrf.mxu0 }
 0x430   :  { %v409_v53 = vadd.f32 %v405_v51, %v2515_v7  ;;  %v2202_v7 = vld [vmem:[%s3377_s8 + $0x18] sm:$0x7] }
 0x432   :  { %v2712_v54 = vadd.f32 %v2708_v50, %v409_v53  ;;  %v617_v55 = vpop.f32.mrf.mxu3 }
 0x433   :  { %v621_v58 = vmul.f32 0.35355338, %v617_v55 }
 0x434   :  { %v414_v59 = vpack.c.bf16 %v2712_v54, %v2712_v54 }
 0x435   :  { %v622_v60 = vpack.c.bf16 %v621_v58, %v621_v58  ;;  %v627_v61 = vsel %vm119_vm4, %v621_v58, -inf }
 0x436   :  { %v418_v62 = vsel %vm2715_vm7, %v414_v59, %v417_v57  ;;  %628 = vmax.xlane.f32.xlu1 %v627_v61 }
 0x437   :  { %419 = vst [vmem:[%s3380_s7] sm:$0x7] %v418_v62  ;;  %v625_v63 = vsel %vm2551_vm5, %v622_v60, %v2202_v7  ;;  %v407_v1 = vpop.f32.mrf.mxu0 }
 0x438   :  { %2203 = vst [vmem:[%s3377_s8 + $0x18] sm:$0x7] %v625_v63 }
 0x43a   :  { %v619_v6 = vpop.f32.mrf.mxu3 }
 0x43b   :  { %v2212_v6 = vld [vmem:[%s3373_s0 + $0x8] sm:$0x7] }
 0x43f   :  { %v547_v8 = vpop.f32.mrf.mxu0 }
 0x440   :  { %v551_v10 = vmul.f32 0.35355338, %v547_v8  ;;  %v781_v8 = vunpack.c.l.bf16 %v2212_v6 }
 0x442   :  { %v552_v12 = vpack.c.bf16 %v551_v10, %v551_v10  ;;  %v557_v13 = vsel %vm119_vm4, %v551_v10, -inf }
 0x443   :  { %558 = vmax.xlane.f32.xlu0 %v557_v13 }
 0x444   :  { %v555_v15 = vsel %vm2551_vm5, %v552_v12, %v2198_v11 }
 0x445   :  { %2199 = vst [vmem:[%s3377_s8 + $0x14] sm:$0x7] %v555_v15 }
 0x447   :  { %v549_v17 = vpop.f32.mrf.mxu0 }
 0x44f   :  { %v687_v21 = vpop.f32.mrf.mxu0 }
 0x450   :  { %v691_v22 = vmul.f32 0.35355338, %v687_v21 }
 0x452   :  { %v692_v24 = vpack.c.bf16 %v691_v22, %v691_v22  ;;  %v697_v26 = vsel %vm119_vm4, %v691_v22, -inf }
 0x453   :  { %698 = vmax.xlane.f32.xlu2 %v697_v26 }
 0x454   :  { %v695_v27 = vsel %vm2551_vm5, %v692_v24, %v2206_v23 }
 0x455   :  { %2207 = vst [vmem:[%s3377_s8 + $0x1c] sm:$0x7] %v695_v27 }
 0x457   :  { %639 = vrot.lane.b32.xlu0 %v2634_v4, %s2430_s30  ;;  %v689_v28 = vpop.f32.mrf.mxu0 }
 0x46b   :  { %503 = vrot.lane.b32.xlu2 %v2634_v4, %s2431_s10 }
 0x473   :  { %709 = vrot.lane.b32.xlu2 %v2634_v4, %s2433_s11 }
 0x487   :  { %v493_v30 = vpop.xlane.xlu2 %492 }
 0x488   :  { %v494_v32 = vsub.f32 %v485_v43, %v493_v30  ;;  %v525_v30 = vld [vmem:[#allocation2] sm:$0x7] }
 0x48a   :  { %v495_v33 = vmul.f32 1.442695, %v494_v32 }
 0x48c   :  { %2335 = vpow2.f32 %v495_v33 }
 0x492   :  { %v2336_v34 = vpop.eup %2335 }
 0x493   :  { %v497_v35 = vsel %vm119_vm4, %v2336_v34, 0.0 }
 0x494   :  { %498 = vadd.xlane.f32.xlu1 %v497_v35 }
 0x4a9   :  { %v629_v36 = vpop.xlane.xlu1 %628 }
 0x4aa   :  { %v630_v14 = vsub.f32 %v621_v58, %v629_v36 }
 0x4ac   :  { %v631_v37 = vmul.f32 1.442695, %v630_v14 }
 0x4ae   :  { %2337 = vpow2.f32 %v631_v37 }
 0x4b4   :  { %v2338_v38 = vpop.eup %2337 }
 0x4b5   :  { %v633_v39 = vsel %vm119_vm4, %v2338_v38, 0.0 }
 0x4b6   :  { %634 = vadd.xlane.f32.xlu1 %v633_v39  ;;  %v559_v40 = vpop.xlane.xlu0 %558 }
 0x4b7   :  { %v560_v41 = vsub.f32 %v551_v10, %v559_v40  ;;  %v782_v10 = vmul.f32 %v2499_v2, %v781_v8 }
 0x4b9   :  { %v561_v42 = vmul.f32 1.442695, %v560_v41  ;;  %v2779_v11 = vadd.f32 %v2510_v5, %v782_v10 }
 0x4bb   :  { %2339 = vpow2.f32 %v561_v42 }
 0x4c1   :  { %v2340_v44 = vpop.eup %2339 }
 0x4c2   :  { %v563_v43 = vsel %vm119_vm4, %v2340_v44, 0.0 }
 0x4c3   :  { %564 = vadd.xlane.f32.xlu1 %v563_v43 }
 0x4c6   :  { %v699_v45 = vpop.xlane.xlu2 %698 }
 0x4c7   :  { %v700_v47 = vsub.f32 %v691_v22, %v699_v45 }
 0x4c9   :  { %v701_v48 = vmul.f32 1.442695, %v700_v47  ;;  %v640_v49 = vpop.permute.xlu0 %639 }
 0x4ca   :  { %v645_v55 = vand.u32 %v640_v49, %v2597_v16 }
 0x4cb   :  { %2341 = vpow2.f32 %v701_v48 }
 0x4ce   :  { %v504_v51 = vpop.permute.xlu2 %503 }
 0x4cf   :  { %v509_v53 = vand.u32 %v504_v51, %v2597_v16 }
 0x4d1   :  { %v2342_v57 = vpop.eup %2341  ;;  %518 = vmatpush.bf16.msrb.mxu2 %v509_v53 }
 0x4d2   :  { %v703_v58 = vsel %vm119_vm4, %v2342_v57, 0.0 }
 0x4d3   :  { %704 = vadd.xlane.f32.xlu0 %v703_v58 }
 0x4d5   :  { %654 = vmatpush.bf16.msra.mxu2 %v645_v55 }
 0x4d6   :  { %v710_v13 = vpop.permute.xlu2 %709 }
 0x4d7   :  { %v715_v22 = vand.u32 %v710_v13, %v2597_v16 }
 0x4dc   :  { %569 = vrot.lane.b32.xlu1 %v2634_v4, %s2434_s12 }
 0x507   :  { %v499_v59 = vpop.xlane.xlu1 %498 }
 0x508   :  { %2343 = vrcp.f32 %v499_v59 }
 0x50e   :  { %v2344_v7 = vpop.eup %2343 }
 0x50f   :  { %v501_v60 = vmul.f32 %v2344_v7, %v2336_v34 }
 0x511   :  { %v502_v61 = vpack.c.bf16 %v501_v60, %v501_v60 }
 0x513   :  { %2196 = vmatmul.msk.bf16.vlgmr.msrb.gmra.mxu2 %vm134_vm8, %v502_v61 }
 0x514   :  { %794 = vmatpush.bf16.msrb.mxu2 %v2491_v0  ;;  %v784_v0 = vpack.c.bf16 %v2779_v11, %v2779_v11 }
 0x518   :  { %795 = vmatpush.bf16.msrb.mxu2 %v2505_v3 }
 0x529   :  { %v635_v62 = vpop.xlane.xlu1 %634 }
 0x52a   :  { %2345 = vrcp.f32 %v635_v62 }
 0x530   :  { %v2346_v63 = vpop.eup %2345 }
 0x531   :  { %v637_v1 = vmul.f32 %v2346_v63, %v2338_v38 }
 0x533   :  { %v638_v4 = vpack.c.bf16 %v637_v1, %v637_v1 }
 0x535   :  { %2204 = vmatmul.msk.bf16.vlgmr.msra.gmra.mxu2 %vm134_vm8, %v638_v4 }
 0x536   :  { %v565_v3 = vpop.xlane.xlu1 %564 }
 0x537   :  { %2347 = vrcp.f32 %v565_v3 }
 0x53d   :  { %v2348_v12 = vpop.eup %2347 }
 0x53e   :  { %v567_v15 = vmul.f32 %v2348_v12, %v2340_v44 }
 0x540   :  { %v568_v2 = vpack.c.bf16 %v567_v15, %v567_v15 }
 0x545   :  { %2213 = vmatmul.msk.bf16.vlgmr.msrb.gmra.mxu2 %vm68_vm0, %v784_v0 }
 0x546   :  { %v705_v23 = vpop.xlane.xlu0 %704 }
 0x547   :  { %2349 = vrcp.f32 %v705_v23 }
 0x54d   :  { %v2350_v5 = vpop.eup %2349 }
 0x54e   :  { %v570_v17 = vpop.permute.xlu1 %569  ;;  %v707_v24 = vmul.f32 %v2350_v5, %v2342_v57 }
 0x54f   :  { %v575_v21 = vand.u32 %v570_v17, %v2597_v16  ;;  %v2215_v17 = vld [vmem:[%s3377_s8 + $0x20] sm:$0x7] }
 0x550   :  { %v708_v26 = vpack.c.bf16 %v707_v24, %v707_v24 }
 0x551   :  { %584 = vmatpush.bf16.msrb.mxu1 %v575_v21 }
 0x554   :  { %2200 = vmatmul.msk.bf16.vlgmr.msrb.gmra.mxu1 %vm134_vm8, %v568_v2 }
 0x555   :  { %724 = vmatpush.bf16.msra.mxu1 %v715_v22 }
 0x564   :  { %2208 = vmatmul.msk.bf16.vlgmr.msra.gmra.mxu1 %vm134_vm8, %v708_v26  ;;  %v2223_v26 = vld [vmem:[%s3377_s8 + $0x28] sm:$0x7] }
 0x596   :  { %v520_v27 = vpop.f32.mrf.mxu2 }
 0x597   :  { %v524_v28 = vpack.c.bf16 %v520_v27, %v520_v27 }
 0x599   :  { %v526_v32 = vsel %vm2626_vm10, %v524_v28, %v525_v30 }
 0x59a   :  { %527 = vst [vmem:[#allocation2] sm:$0x7] %v526_v32  ;;  %v429_v32 = vmul.f32 %v2712_v54, %v2712_v54 }
 0x59e   :  { %v522_v33 = vpop.f32.mrf.mxu2 }
 0x59f   :  { %v421_v33 = vsel %vm420_vm3, %v2712_v54, 0.0 }
 0x5a1   :  { %v595_v48 = vld [vmem:[#allocation2] sm:$0x7] }
 0x5b8   :  { %v656_v34 = vpop.f32.mrf.mxu2 }
 0x5b9   :  { %v660_v43 = vpack.c.bf16 %v656_v34, %v656_v34 }
 0x5c0   :  { %v658_v35 = vpop.f32.mrf.mxu2 }
 0x5c1   :  { %v430_v35 = vsel %vm420_vm3, %v429_v32, 0.0 }
 0x5c8   :  { %v797_v36 = vpop.f32.mrf.mxu2 }
 0x5c9   :  { %v798_v14 = vadd.f32 %v2523_v9, %v797_v36  ;;  %v422_v36 = vrot.slane %v421_v33, 4 }
 0x5cb   :  { %v801_v37 = vpack.c.bf16 %v798_v14, %v798_v14  ;;  %v431_v14 = vrot.slane %v430_v35, 4 }
 0x5cd   :  { %v803_v38 = vunpack.c.l.b16 %v801_v37 }
 0x5cf   :  { %v2791_v39 = vpack.c.b16 %v803_v38, %v803_v38 }
 0x5d0   :  { %v799_v40 = vpop.f32.mrf.mxu2 }
 0x5d1   :  { %v586_v41 = vpop.f32.mrf.mxu1  ;;  %1011 = vrot.lane.b32.xlu0 %v2791_v39, %s2426_s24 }
 0x5d2   :  { %v590_v42 = vpack.c.bf16 %v586_v41, %v586_v41  ;;  %v432_v41 = vadd.f32 %v431_v14, %v430_v35 }
 0x5d4   :  { %592 = vrot.lane.b32.xlu2 %v590_v42, %s2435_s15 }
 0x5d9   :  { %v588_v44 = vpop.f32.mrf.mxu1 }
 0x5dc   :  { %662 = vrot.lane.b32.xlu2 %v660_v43, %s2436_s16  ;;  %v2210_v43 = vld [vmem:[%s3380_s7 + $0x4] sm:$0x7] }
 0x5e1   :  { %v726_v45 = vpop.f32.mrf.mxu1 }
 0x5e2   :  { %v730_v47 = vpack.c.bf16 %v726_v45, %v726_v45 }
 0x5e4   :  { %805 = vrot.lane.b32.xlu2 %v2791_v39, %s2425_s23  ;;  %732 = vrot.lane.b32.xlu1 %v730_v47, %s2437_s17 }
 0x5e9   :  { %v728_v9 = vpop.f32.mrf.mxu1 }
 0x5ea   :  { %v433_v9 = vrot.slane %v432_v41, 2 }
 0x5ec   :  { %941 = vrot.lane.b32.xlu2 %v2791_v39, %s2428_s26  ;;  %871 = vrot.lane.b32.xlu1 %v2791_v39, %s2424_s22 }
 0x5f4   :  { %939 = vrot.lane.b32.xlu2 %v2791_v39, %s2427_s25  ;;  %869 = vrot.lane.b32.xlu1 %v2791_v39, %s2423_s21 }
 0x5fc   :  { %1009 = vrot.lane.b32.xlu1 %v2791_v39, %s2429_s27 }
 0x62e   :  { %v593_v49 = vpop.permute.xlu2 %592 }
 0x62f   :  { %v596_v51 = vsel %vm2667_vm12, %v593_v49, %v595_v48 }
 0x630   :  { %597 = vst [vmem:[#allocation2] sm:$0x7] %v596_v51 }
 0x636   :  { %v663_v53 = vpop.permute.xlu2 %662 }
 0x637   :  { %v665_v55 = vld [vmem:[#allocation2] sm:$0x7] }
 0x638   :  { %v666_v57 = vsel %vm2674_vm14, %v663_v53, %v665_v55 }
 0x639   :  { %667 = vst [vmem:[#allocation2] sm:$0x7] %v666_v57 }
 0x63e   :  { %v806_v58 = vpop.permute.xlu2 %805 }
 0x63f   :  { %v811_v59 = vsel %vm91_vm1, %v806_v58, 0  ;;  %v434_v58 = vadd.f32 %v433_v9, %v432_v41 }
 0x640   :  { %820 = vmatpush.bf16.xpose.msrb.mxu0 %v811_v59  ;;  %v735_v61 = vld [vmem:[#allocation2] sm:$0x7] }
 0x643   :  { %v1012_v6 = vpop.permute.xlu0 %1011 }
 0x644   :  { %v1017_v0 = vsel %vm91_vm1, %v1012_v6, 0 }
 0x646   :  { %v942_v7 = vpop.permute.xlu2 %941 }
 0x647   :  { %v947_v60 = vsel %vm91_vm1, %v942_v7, 0  ;;  %2214 = vmatmul.msk.bf16.vlgmr.msrb.gmra.mxu0 %vm91_vm1, %v801_v37  ;;  %v423_v37 = vadd.f32 %v422_v36, %v421_v33 }
 0x648   :  { %956 = vmatpush.bf16.xpose.msra.mxu0 %v947_v60 }
 0x649   :  { %v424_v44 = vrot.slane %v423_v37, 2 }
 0x64e   :  { %v940_v62 = vpop.permute.xlu2 %939 }
 0x650   :  { %1089 = vmatpush.bf16.msrb.mxu0 %v2656_v18 }
 0x654   :  { %1090 = vmatpush.bf16.msrb.mxu0 %v2662_v19 }
 0x656   :  { %v733_v63 = vpop.permute.xlu1 %732 }
 0x657   :  { %v736_v1 = vsel %vm2681_vm2, %v733_v63, %v735_v61  ;;  %2222 = vmatmul.msk.bf16.vlgmr.msra.gmra.mxu0 %vm91_vm1, %v940_v62  ;;  %v435_v63 = vrot.slane %v434_v58, 1 }
 0x658   :  { %737 = vst [vmem:[#allocation2] sm:$0x7] %v736_v1 }
 0x65e   :  { %v872_v4 = vpop.permute.xlu1 %871 }
 0x65f   :  { %v738_v8 = vld [vmem:[#allocation2] sm:$0x7]  ;;  %v877_v10 = vsel %vm91_vm1, %v872_v4, 0 }
 0x660   :  { %2209 = vmatmul.msk.bf16.vlgmr.msra.gmra.mxu3 %vm68_vm0, %v738_v8 }
 0x661   :  { %886 = vmatpush.bf16.xpose.msrb.mxu3 %v877_v10 }
 0x666   :  { %v870_v3 = vpop.permute.xlu1 %869 }
 0x669   :  { %1026 = vmatpush.bf16.xpose.msra.mxu3 %v1017_v0 }
 0x66e   :  { %v1010_v12 = vpop.permute.xlu1 %1009 }
 0x670   :  { %2218 = vmatmul.msk.bf16.vlgmr.msrb.gmra.mxu3 %vm91_vm1, %v870_v3 }
 0x680   :  { %2226 = vmatmul.msk.bf16.vlgmr.msra.gmra.mxu3 %vm91_vm1, %v1010_v12  ;;  %v436_v12 = vadd.f32 %v435_v63, %v434_v58 }
 0x6c4   :  { %v822_v13 = vpop.f32.mrf.mxu0 }
 0x6c5   :  { %v2827_v15 = vmul.f32 0.35355338, %v822_v13 }
 0x6c7   :  { %v827_v21 = vpack.c.bf16 %v2827_v15, %v2827_v15  ;;  %v832_v22 = vsel %vm119_vm4, %v2827_v15, -inf }
 0x6c8   :  { %833 = vmax.xlane.f32.xlu2 %v832_v22 }
 0x6c9   :  { %v830_v2 = vsel %vm2551_vm5, %v827_v21, %v2215_v17  ;;  %v2219_v21 = vld [vmem:[%s3377_s8 + $0x24] sm:$0x7] }
 0x6ca   :  { %2216 = vst [vmem:[%s3377_s8 + $0x20] sm:$0x7] %v830_v2 }
 0x6cc   :  { %v824_v23 = vpop.f32.mrf.mxu0 }
 0x6d4   :  { %v958_v5 = vpop.f32.mrf.mxu0 }
 0x6d5   :  { %v2841_v24 = vmul.f32 0.35355338, %v958_v5 }
 0x6d7   :  { %v963_v27 = vpack.c.bf16 %v2841_v24, %v2841_v24  ;;  %v968_v28 = vsel %vm119_vm4, %v2841_v24, -inf }
 0x6d8   :  { %969 = vmax.xlane.f32.xlu1 %v968_v28 }
 0x6d9   :  { %v966_v30 = vsel %vm2551_vm5, %v963_v27, %v2223_v26 }
 0x6da   :  { %2224 = vst [vmem:[%s3377_s8 + $0x28] sm:$0x7] %v966_v30  ;;  %v2227_v30 = vld [vmem:[%s3377_s8 + $0x2c] sm:$0x7] }
 0x6dc   :  { %v960_v34 = vpop.f32.mrf.mxu0 }
 0x6e3   :  { %v751_v38 = vpop.f32.mrf.mxu3 }
 0x6e4   :  { %v755_v40 = vadd.f32 %v751_v38, %v2618_v46  ;;  %v425_v46 = vadd.f32 %v424_v44, %v423_v37 }
 0x6e6   :  { %v756_v42 = vadd.f32 %v2708_v50, %v755_v40  ;;  %v426_v60 = vrot.slane %v425_v46, 1 }
 0x6e8   :  { %v757_v45 = vpack.c.bf16 %v756_v42, %v756_v42  ;;  %v762_v54 = vsel %vm420_vm3, %v756_v42, 0.0  ;;  %v770_v47 = vmul.f32 %v756_v42, %v756_v42  ;;  %v427_v4 = vadd.f32 %v426_v60, %v425_v46 }
 0x6e9   :  { %v763_v48 = vrot.slane %v762_v54, 4 }
 0x6ea   :  { %v760_v49 = vsel %vm2715_vm7, %v757_v45, %v2210_v43  ;;  %v771_v51 = vsel %vm420_vm3, %v770_v47, 0.0 }
 0x6eb   :  { %2211 = vst [vmem:[%s3380_s7 + $0x4] sm:$0x7] %v760_v49  ;;  %v764_v53 = vadd.f32 %v763_v48, %v762_v54  ;;  %v772_v55 = vrot.slane %v771_v51, 4  ;;  %v753_v57 = vpop.f32.mrf.mxu3 }
 0x6ed   :  { %v765_v59 = vrot.slane %v764_v53, 2  ;;  %v773_v7 = vadd.f32 %v772_v55, %v771_v51 }
 0x6ef   :  { %v766_v61 = vadd.f32 %v765_v59, %v764_v53  ;;  %v774_v62 = vrot.slane %v773_v7, 2 }
 0x6f1   :  { %v767_v1 = vrot.slane %v766_v61, 1  ;;  %v775_v6 = vadd.f32 %v774_v62, %v773_v7 }
 0x6f3   :  { %v768_v8 = vadd.f32 %v767_v1, %v766_v61  ;;  %v776_v10 = vrot.slane %v775_v6, 1  ;;  %v888_v0 = vpop.f32.mrf.mxu3 }
 0x6f4   :  { %v892_v3 = vmul.f32 0.35355338, %v888_v0  ;;  %v2918_v0 = vld [vmem:[%s3372_s3 + $0x8] sm:$0xff] }
 0x6f5   :  { %v2872_v13 = vadd.f32 %v768_v8, %v427_v4  ;;  %v777_v17 = vadd.f32 %v776_v10, %v775_v6  ;;  %v2233_v10 = vld [vmem:[%s3373_s0 + $0xc] sm:$0x7] }
 0x6f6   :  { %v893_v22 = vpack.c.bf16 %v892_v3, %v892_v3  ;;  %v898_v2 = vsel %vm119_vm4, %v892_v3, -inf }
 0x6f7   :  { %v2878_v23 = vadd.f32 %v777_v17, %v436_v12  ;;  %899 = vmax.xlane.f32.xlu0 %v898_v2  ;;  %v2925_v17 = vld [vmem:[%s3372_s3] sm:$0xff] }
 0x6f8   :  { %v896_v5 = vsel %vm2551_vm5, %v893_v22, %v2219_v21  ;;  %v2931_v21 = vld [vmem:[%s3374_s1] ss:$0 sm:$0xff] }
 0x6f9   :  { %2220 = vst [vmem:[%s3377_s8 + $0x24] sm:$0x7] %v896_v5  ;;  %v2937_v5 = vld [vmem:[%s3375_s2] ss:$0 sm:$0xff] }
 0x6fb   :  { %v890_v26 = vpop.f32.mrf.mxu3 }
 0x703   :  { %v1028_v27 = vpop.f32.mrf.mxu3 }
 0x704   :  { %v1032_v28 = vmul.f32 0.35355338, %v1028_v27 }
 0x706   :  { %v1033_v32 = vpack.c.bf16 %v1032_v28, %v1032_v28  ;;  %v1038_v33 = vsel %vm119_vm4, %v1032_v28, -inf }
 0x707   :  { %1039 = vmax.xlane.f32.xlu2 %v1038_v33 }
 0x708   :  { %v1036_v34 = vsel %vm2551_vm5, %v1033_v32, %v2227_v30 }
 0x709   :  { %2228 = vst [vmem:[%s3377_s8 + $0x2c] sm:$0x7] %v1036_v34 }
 0x70b   :  { %910 = vrot.lane.b32.xlu0 %v2791_v39, %s2434_s12  ;;  %v1030_v35 = vpop.f32.mrf.mxu3 }
 0x71f   :  { %844 = vrot.lane.b32.xlu2 %v2791_v39, %s2431_s10 }
 0x73b   :  { %v834_v36 = vpop.xlane.xlu2 %833 }
 0x73c   :  { %v835_v14 = vsub.f32 %v2827_v15, %v834_v36 }
 0x73e   :  { %v836_v37 = vmul.f32 1.442695, %v835_v14 }
 0x740   :  { %2351 = vpow2.f32 %v836_v37 }
 0x746   :  { %v2352_v38 = vpop.eup %2351 }
 0x747   :  { %v838_v40 = vsel %vm119_vm4, %v2352_v38, 0.0 }
 0x748   :  { %839 = vadd.xlane.f32.xlu1 %v838_v40  ;;  %v866_v40 = vld [vmem:[#allocation2] sm:$0x7] }
 0x74b   :  { %v970_v41 = vpop.xlane.xlu1 %969 }
 0x74c   :  { %v971_v42 = vsub.f32 %v2841_v24, %v970_v41 }
 0x74e   :  { %v972_v44 = vmul.f32 1.442695, %v971_v42 }
 0x750   :  { %2353 = vpow2.f32 %v972_v44 }
 0x756   :  { %v2354_v43 = vpop.eup %2353 }
 0x757   :  { %v974_v45 = vsel %vm119_vm4, %v2354_v43, 0.0 }
 0x758   :  { %975 = vadd.xlane.f32.xlu1 %v974_v45 }
 0x76a   :  { %v900_v54 = vpop.xlane.xlu0 %899 }
 0x76b   :  { %v901_v47 = vsub.f32 %v892_v3, %v900_v54  ;;  %v1122_v3 = vunpack.c.l.bf16 %v2233_v10 }
 0x76d   :  { %v902_v9 = vmul.f32 1.442695, %v901_v47  ;;  %v1123_v22 = vmul.f32 %v2931_v21, %v1122_v3  ;;  %v2954_v47 = vld [vmem:[%s3376_s4] ss:$0 sm:$0xff] }
 0x76f   :  { %2355 = vpow2.f32 %v902_v9  ;;  %v2940_v26 = vadd.f32 %v2937_v5, %v1123_v22 }
 0x771   :  { %980 = vrot.lane.b32.xlu1 %v2791_v39, %s2430_s30  ;;  %v1125_v30 = vpack.c.bf16 %v2940_v26, %v2940_v26 }
 0x775   :  { %v2356_v15 = vpop.eup %2355 }
 0x776   :  { %v904_v48 = vsel %vm119_vm4, %v2356_v15, 0.0 }
 0x777   :  { %905 = vadd.xlane.f32.xlu0 %v904_v48 }
 0x77a   :  { %v1040_v49 = vpop.xlane.xlu2 %1039 }
 0x77b   :  { %v1041_v51 = vsub.f32 %v1032_v28, %v1040_v49 }
 0x77d   :  { %v1042_v24 = vmul.f32 1.442695, %v1041_v51  ;;  %v911_v46 = vpop.permute.xlu0 %910 }
 0x77e   :  { %v916_v53 = vand.u32 %v911_v46, %v2597_v16 }
 0x77f   :  { %2357 = vpow2.f32 %v1042_v24 }
 0x780   :  { %925 = vmatpush.bf16.msra.mxu2 %v916_v53 }
 0x782   :  { %v845_v55 = vpop.permute.xlu2 %844 }
 0x783   :  { %v850_v57 = vand.u32 %v845_v55, %v2597_v16 }
 0x785   :  { %v2358_v58 = vpop.eup %2357  ;;  %859 = vmatpush.bf16.msrb.mxu1 %v850_v57 }
 0x786   :  { %v1044_v59 = vsel %vm119_vm4, %v2358_v58, 0.0 }
 0x787   :  { %1045 = vadd.xlane.f32.xlu2 %v1044_v59 }
 0x78b   :  { %1050 = vrot.lane.b32.xlu0 %v2791_v39, %s2433_s11 }
 0x7bb   :  { %v840_v7 = vpop.xlane.xlu1 %839 }
 0x7bc   :  { %2359 = vrcp.f32 %v840_v7 }
 0x7c2   :  { %v2360_v60 = vpop.eup %2359 }
 0x7c3   :  { %v842_v61 = vmul.f32 %v2360_v60, %v2352_v38 }
 0x7c5   :  { %v843_v62 = vpack.c.bf16 %v842_v61, %v842_v61 }
 0x7c7   :  { %2217 = vmatmul.msk.bf16.vlgmr.msrb.gmra.mxu1 %vm134_vm8, %v843_v62 }
 0x7cb   :  { %v976_v63 = vpop.xlane.xlu1 %975 }
 0x7cc   :  { %2361 = vrcp.f32 %v976_v63 }
 0x7d2   :  { %v2362_v1 = vpop.eup %2361 }
 0x7d3   :  { %v978_v6 = vmul.f32 %v2362_v1, %v2354_v43 }
 0x7d5   :  { %v979_v39 = vpack.c.bf16 %v978_v6, %v978_v6 }
 0x7e3   :  { %v981_v4 = vpop.permute.xlu1 %980 }
 0x7e4   :  { %v986_v8 = vand.u32 %v981_v4, %v2597_v16 }
 0x7e6   :  { %995 = vmatpush.bf16.msra.mxu1 %v986_v8 }
 0x7e9   :  { %2225 = vmatmul.msk.bf16.vlgmr.msra.gmra.mxu1 %vm134_vm8, %v979_v39 }
 0x7ea   :  { %1135 = vmatpush.bf16.msrb.mxu1 %v2918_v0  ;;  %v906_v12 = vpop.xlane.xlu0 %905 }
 0x7eb   :  { %2363 = vrcp.f32 %v906_v12 }
 0x7ee   :  { %1136 = vmatpush.bf16.msrb.mxu1 %v2925_v17 }
 0x7f1   :  { %v2364_v2 = vpop.eup %2363 }
 0x7f2   :  { %v908_v27 = vmul.f32 %v2364_v2, %v2356_v15 }
 0x7f4   :  { %v909_v28 = vpack.c.bf16 %v908_v27, %v908_v27 }
 0x7f6   :  { %2221 = vmatmul.msk.bf16.vlgmr.msra.gmra.mxu2 %vm134_vm8, %v909_v28 }
 0x7f9   :  { %2234 = vmatmul.msk.bf16.vlgmr.msrb.gmra.mxu1 %vm68_vm0, %v1125_v30 }
 0x7fa   :  { %v1046_v32 = vpop.xlane.xlu2 %1045 }
 0x7fb   :  { %2365 = vrcp.f32 %v1046_v32 }
 0x7fd   :  { %v1051_v33 = vpop.permute.xlu0 %1050 }
 0x7fe   :  { %v1056_v34 = vand.u32 %v1051_v33, %v2597_v16 }
 0x800   :  { %1065 = vmatpush.bf16.msrb.mxu2 %v1056_v34  ;;  %v2236_v34 = vld [vmem:[%s3377_s8 + $0x30] sm:$0x7] }
 0x801   :  { %v2366_v35 = vpop.eup %2365 }
 0x802   :  { %v1048_v36 = vmul.f32 %v2366_v35, %v2358_v58 }
 0x804   :  { %v1049_v14 = vpack.c.bf16 %v1048_v36, %v1048_v36 }
 0x806   :  { %2229 = vmatmul.msk.bf16.vlgmr.msrb.gmra.mxu2 %vm134_vm8, %v1049_v14 }
 0x844   :  { %v861_v37 = vpop.f32.mrf.mxu1 }
 0x845   :  { %v865_v38 = vpack.c.bf16 %v861_v37, %v861_v37 }
 0x847   :  { %v867_v41 = vsel %vm2626_vm10, %v865_v38, %v866_v40 }
 0x848   :  { %868 = vst [vmem:[#allocation2] sm:$0x7] %v867_v41 }
 0x84c   :  { %v863_v42 = vpop.f32.mrf.mxu1 }
 0x84d   :  { %v2231_v42 = vld [vmem:[%s3380_s7 + $0x8] sm:$0x7] }
 0x84f   :  { %v936_v59 = vld [vmem:[#allocation2] sm:$0x7] }
 0x866   :  { %v997_v44 = vpop.f32.mrf.mxu1 }
 0x867   :  { %v1001_v43 = vpack.c.bf16 %v997_v44, %v997_v44 }
 0x869   :  { %1003 = vrot.lane.b32.xlu0 %v1001_v43, %s2436_s16 }
 0x86e   :  { %v999_v45 = vpop.f32.mrf.mxu1 }
 0x876   :  { %v1138_v54 = vpop.f32.mrf.mxu1 }
 0x877   :  { %v1139_v9 = vadd.f32 %v2954_v47, %v1138_v54 }
 0x879   :  { %v1142_v15 = vpack.c.bf16 %v1139_v9, %v1139_v9  ;;  %v927_v48 = vpop.f32.mrf.mxu2 }
 0x87a   :  { %v931_v49 = vpack.c.bf16 %v927_v48, %v927_v48 }
 0x87b   :  { %v1144_v51 = vunpack.c.l.b16 %v1142_v15 }
 0x87c   :  { %933 = vrot.lane.b32.xlu1 %v931_v49, %s2435_s15 }
 0x87d   :  { %v2958_v24 = vpack.c.b16 %v1144_v51, %v1144_v51 }
 0x87e   :  { %v1140_v46 = vpop.f32.mrf.mxu1 }
 0x87f   :  { %1210 = vrot.lane.b32.xlu2 %v2958_v24, %s2423_s21 }
 0x881   :  { %v929_v53 = vpop.f32.mrf.mxu2 }
 0x884   :  { %1146 = vrot.lane.b32.xlu1 %v2958_v24, %s2425_s23 }
 0x889   :  { %v1067_v55 = vpop.f32.mrf.mxu2 }
 0x88a   :  { %v1071_v57 = vpack.c.bf16 %v1067_v55, %v1067_v55 }
 0x88c   :  { %1073 = vrot.lane.b32.xlu0 %v1071_v57, %s2437_s17  ;;  %1282 = vrot.lane.b32.xlu1 %v2958_v24, %s2428_s26 }
 0x891   :  { %v1069_v58 = vpop.f32.mrf.mxu2 }
 0x892   :  { %v2244_v58 = vld [vmem:[%s3377_s8 + $0x38] sm:$0x7] }
 0x894   :  { %1280 = vrot.lane.b32.xlu0 %v2958_v24, %s2427_s25  ;;  %1212 = vrot.lane.b32.xlu1 %v2958_v24, %s2424_s22 }
 0x89c   :  { %1352 = vrot.lane.b32.xlu0 %v2958_v24, %s2426_s24  ;;  %1350 = vrot.lane.b32.xlu1 %v2958_v24, %s2429_s27 }
 0x8d9   :  { %v1211_v32 = vpop.permute.xlu2 %1210 }
 0x8db   :  { %v1004_v61 = vpop.permute.xlu0 %1003 }
 0x8ee   :  { %v934_v7 = vpop.permute.xlu1 %933 }
 0x8ef   :  { %v937_v60 = vsel %vm2667_vm12, %v934_v7, %v936_v59 }
 0x8f0   :  { %938 = vst [vmem:[#allocation2] sm:$0x7] %v937_v60 }
 0x8f6   :  { %v1147_v62 = vpop.permute.xlu1 %1146 }
 0x8f7   :  { %v1006_v63 = vld [vmem:[#allocation2] sm:$0x7]  ;;  %v1152_v1 = vsel %vm91_vm1, %v1147_v62, 0 }
 0x8f8   :  { %1161 = vmatpush.bf16.xpose.msrb.mxu3 %v1152_v1  ;;  %v1007_v6 = vsel %vm2674_vm14, %v1004_v61, %v1006_v63 }
 0x8f9   :  { %1008 = vst [vmem:[#allocation2] sm:$0x7] %v1007_v6 }
 0x8fe   :  { %v1074_v4 = vpop.permute.xlu0 %1073  ;;  %v1283_v8 = vpop.permute.xlu1 %1282 }
 0x8ff   :  { %v1288_v10 = vsel %vm91_vm1, %v1283_v8, 0  ;;  %2235 = vmatmul.msk.bf16.vlgmr.msrb.gmra.mxu3 %vm91_vm1, %v1142_v15 }
 0x900   :  { %v1076_v39 = vld [vmem:[#allocation2] sm:$0x7]  ;;  %1297 = vmatpush.bf16.xpose.msra.mxu3 %v1288_v10 }
 0x901   :  { %v1077_v3 = vsel %vm2681_vm2, %v1074_v4, %v1076_v39  ;;  %v2240_v39 = vld [vmem:[%s3377_s8 + $0x34] sm:$0x7] }
 0x902   :  { %1078 = vst [vmem:[#allocation2] sm:$0x7] %v1077_v3 }
 0x906   :  { %v1281_v12 = vpop.permute.xlu0 %1280  ;;  %v1213_v22 = vpop.permute.xlu1 %1212 }
 0x907   :  { %v1218_v2 = vsel %vm91_vm1, %v1213_v22, 0 }
 0x908   :  { %1430 = vmatpush.bf16.msrb.mxu3 %v2656_v18  ;;  %1227 = vmatpush.bf16.xpose.msra.mxu0 %v1218_v2 }
 0x909   :  { %v1079_v27 = vld [vmem:[#allocation2] sm:$0x7] }
 0x90a   :  { %2230 = vmatmul.msk.bf16.vlgmr.msrb.gmra.mxu0 %vm68_vm0, %v1079_v27 }
 0x90c   :  { %1431 = vmatpush.bf16.msrb.mxu3 %v2662_v19 }
 0x90e   :  { %v1353_v28 = vpop.permute.xlu0 %1352  ;;  %v1351_v18 = vpop.permute.xlu1 %1350 }
 0x90f   :  { %v1358_v30 = vsel %vm91_vm1, %v1353_v28, 0  ;;  %2243 = vmatmul.msk.bf16.vlgmr.msra.gmra.mxu3 %vm91_vm1, %v1281_v12 }
 0x910   :  { %1367 = vmatpush.bf16.xpose.msrb.mxu0 %v1358_v30 }
 0x91a   :  { %2239 = vmatmul.msk.bf16.vlgmr.msra.gmra.mxu0 %vm91_vm1, %v1211_v32  ;;  %v2248_v32 = vld [vmem:[%s3377_s8 + $0x3c] sm:$0x7] }
 0x92a   :  { %2247 = vmatmul.msk.bf16.vlgmr.msrb.gmra.mxu0 %vm91_vm1, %v1351_v18 }
 0x982   :  { %v1163_v19 = vpop.f32.mrf.mxu3 }
 0x983   :  { %v2992_v33 = vmul.f32 0.35355338, %v1163_v19 }
 0x985   :  { %v1168_v35 = vpack.c.bf16 %v2992_v33, %v2992_v33  ;;  %v1173_v36 = vsel %vm119_vm4, %v2992_v33, -inf }
 0x986   :  { %1174 = vmax.xlane.f32.xlu0 %v1173_v36 }
 0x987   :  { %v1171_v14 = vsel %vm2551_vm5, %v1168_v35, %v2236_v34  ;;  %v1092_v37 = vpop.f32.mrf.mxu0 }
 0x988   :  { %2237 = vst [vmem:[%s3377_s8 + $0x30] sm:$0x7] %v1171_v14  ;;  %v1096_v38 = vadd.f32 %v1092_v37, %v2779_v11 }
 0x98a   :  { %v1097_v40 = vadd.f32 %v2708_v50, %v1096_v38  ;;  %v1165_v41 = vpop.f32.mrf.mxu3 }
 0x98c   :  { %v1098_v44 = vpack.c.bf16 %v1097_v40, %v1097_v40  ;;  %v1103_v43 = vsel %vm420_vm3, %v1097_v40, 0.0  ;;  %v1111_v45 = vmul.f32 %v1097_v40, %v1097_v40 }
 0x98d   :  { %v1104_v54 = vrot.slane %v1103_v43, 4 }
 0x98e   :  { %v1101_v9 = vsel %vm2715_vm7, %v1098_v44, %v2231_v42  ;;  %v1112_v15 = vsel %vm420_vm3, %v1111_v45, 0.0 }
 0x98f   :  { %2232 = vst [vmem:[%s3380_s7 + $0x8] sm:$0x7] %v1101_v9  ;;  %v1105_v50 = vadd.f32 %v1104_v54, %v1103_v43  ;;  %v1113_v11 = vrot.slane %v1112_v15, 4  ;;  %v1094_v48 = vpop.f32.mrf.mxu0 }
 0x991   :  { %v1106_v49 = vrot.slane %v1105_v50, 2  ;;  %v1114_v51 = vadd.f32 %v1113_v11, %v1112_v15 }
 0x992   :  { %v1299_v46 = vpop.f32.mrf.mxu3 }
 0x993   :  { %v1107_v53 = vadd.f32 %v1106_v49, %v1105_v50  ;;  %v1115_v55 = vrot.slane %v1114_v51, 2  ;;  %v1303_v57 = vmul.f32 0.35355338, %v1299_v46 }
 0x995   :  { %v1108_v59 = vrot.slane %v1107_v53, 1  ;;  %v1116_v7 = vadd.f32 %v1115_v55, %v1114_v51  ;;  %v1304_v60 = vpack.c.bf16 %v1303_v57, %v1303_v57  ;;  %v1309_v61 = vsel %vm119_vm4, %v1303_v57, -inf }
 0x996   :  { %1310 = vmax.xlane.f32.xlu1 %v1309_v61 }
 0x997   :  { %v1109_v62 = vadd.f32 %v1108_v59, %v1107_v53  ;;  %v1117_v63 = vrot.slane %v1116_v7, 1  ;;  %v1307_v1 = vsel %vm2551_vm5, %v1304_v60, %v2244_v58  ;;  %v1229_v6 = vpop.f32.mrf.mxu0 }
 0x998   :  { %2245 = vst [vmem:[%s3377_s8 + $0x38] sm:$0x7] %v1307_v1  ;;  %v1233_v4 = vmul.f32 0.35355338, %v1229_v6 }
 0x999   :  { %v3028_v8 = vadd.f32 %v1109_v62, %v2872_v13  ;;  %v1118_v10 = vadd.f32 %v1117_v63, %v1116_v7 }
 0x99a   :  { %v1234_v3 = vpack.c.bf16 %v1233_v4, %v1233_v4  ;;  %v1301_v12 = vpop.f32.mrf.mxu3  ;;  %v1239_v22 = vsel %vm119_vm4, %v1233_v4, -inf }
 0x99b   :  { %v3035_v2 = vadd.f32 %v1118_v10, %v2878_v23  ;;  %1240 = vmax.xlane.f32.xlu2 %v1239_v22 }
 0x99c   :  { %v1237_v27 = vsel %vm2551_vm5, %v1234_v3, %v2240_v39 }
 0x99d   :  { %2241 = vst [vmem:[%s3377_s8 + $0x34] sm:$0x7] %v1237_v27 }
 0x99f   :  { %v1231_v13 = vpop.f32.mrf.mxu0 }
 0x9a7   :  { %v1369_v28 = vpop.f32.mrf.mxu0 }
 0x9a8   :  { %v1373_v30 = vmul.f32 0.35355338, %v1369_v28 }
 0x9aa   :  { %v1374_v18 = vpack.c.bf16 %v1373_v30, %v1373_v30  ;;  %v1379_v19 = vsel %vm119_vm4, %v1373_v30, -inf }
 0x9ab   :  { %1380 = vmax.xlane.f32.xlu0 %v1379_v19 }
 0x9ac   :  { %v1377_v23 = vsel %vm2551_vm5, %v1374_v18, %v2248_v32 }
 0x9ad   :  { %2249 = vst [vmem:[%s3377_s8 + $0x3c] sm:$0x7] %v1377_v23 }
 0x9af   :  { %1321 = vrot.lane.b32.xlu1 %v2958_v24, %s2430_s30  ;;  %v1371_v34 = vpop.f32.mrf.mxu0 }
 0x9bf   :  { %1185 = vrot.lane.b32.xlu0 %v2958_v24, %s2431_s10 }
 0x9f9   :  { %v1175_v35 = vpop.xlane.xlu0 %1174 }
 0x9fa   :  { %v1176_v36 = vsub.f32 %v2992_v33, %v1175_v35 }
 0x9fc   :  { %v1177_v14 = vmul.f32 1.442695, %v1176_v36 }
 0x9fe   :  { %2367 = vpow2.f32 %v1177_v14  ;;  %v1207_v14 = vld [vmem:[#allocation2] sm:$0x7] }
 0xa04   :  { %v2368_v37 = vpop.eup %2367 }
 0xa05   :  { %v1179_v38 = vsel %vm119_vm4, %v2368_v37, 0.0 }
 0xa06   :  { %1180 = vadd.xlane.f32.xlu1 %v1179_v38 }
 0xa09   :  { %v1311_v40 = vpop.xlane.xlu1 %1310 }
 0xa0a   :  { %v1312_v41 = vsub.f32 %v1303_v57, %v1311_v40 }
 0xa0c   :  { %v1313_v42 = vmul.f32 1.442695, %v1312_v41 }
 0xa0e   :  { %2369 = vpow2.f32 %v1313_v42  ;;  %v1241_v44 = vpop.xlane.xlu2 %1240 }
 0xa0f   :  { %v1242_v43 = vsub.f32 %v1233_v4, %v1241_v44 }
 0xa11   :  { %v1243_v45 = vmul.f32 1.442695, %v1242_v43 }
 0xa13   :  { %2371 = vpow2.f32 %v1243_v45 }
 0xa14   :  { %v2370_v54 = vpop.eup %2369 }
 0xa15   :  { %v1315_v9 = vsel %vm119_vm4, %v2370_v54, 0.0 }
 0xa16   :  { %1316 = vadd.xlane.f32.xlu1 %v1315_v9 }
 0xa19   :  { %v2372_v15 = vpop.eup %2371 }
 0xa1a   :  { %v1245_v33 = vsel %vm119_vm4, %v2372_v15, 0.0 }
 0xa1b   :  { %1246 = vadd.xlane.f32.xlu2 %v1245_v33 }
 0xa1e   :  { %v1381_v50 = vpop.xlane.xlu0 %1380 }
 0xa1f   :  { %v1382_v11 = vsub.f32 %v1373_v30, %v1381_v50 }
 0xa21   :  { %v1383_v48 = vmul.f32 1.442695, %v1382_v11  ;;  %v1322_v46 = vpop.permute.xlu1 %1321 }
 0xa22   :  { %v1327_v57 = vand.u32 %v1322_v46, %v2597_v16 }
 0xa23   :  { %2373 = vpow2.f32 %v1383_v48 }
 0xa29   :  { %v2374_v49 = vpop.eup %2373 }
 0xa2a   :  { %v1385_v51 = vsel %vm119_vm4, %v2374_v49, 0.0 }
 0xa2b   :  { %1386 = vadd.xlane.f32.xlu0 %v1385_v51 }
 0xa2f   :  { %1391 = vrot.lane.b32.xlu1 %v2958_v24, %s2433_s11 }
 0xa31   :  { %v1186_v53 = vpop.permute.xlu0 %1185 }
 0xa32   :  { %v1191_v55 = vand.u32 %v1186_v53, %v2597_v16 }
 0xa33   :  { %1251 = vrot.lane.b32.xlu2 %v2958_v24, %s2434_s12  ;;  %v2254_v24 = vld [vmem:[%s3373_s0 + $0x10] sm:$0x7] }
 0xa34   :  { %1200 = vmatpush.bf16.msra.mxu2 %v1191_v55  ;;  %v1463_v10 = vunpack.c.l.bf16 %v2254_v24 }
 0xa36   :  { %v1464_v22 = vmul.f32 %v2931_v21, %v1463_v10 }
 0xa38   :  { %1336 = vmatpush.bf16.msrb.mxu2 %v1327_v57  ;;  %v3077_v13 = vadd.f32 %v2937_v5, %v1464_v22 }
 0xa3a   :  { %v1466_v32 = vpack.c.bf16 %v3077_v13, %v3077_v13 }
 0xa79   :  { %v1181_v58 = vpop.xlane.xlu1 %1180 }
 0xa7a   :  { %2375 = vrcp.f32 %v1181_v58 }
 0xa80   :  { %v2376_v59 = vpop.eup %2375 }
 0xa81   :  { %v1183_v7 = vmul.f32 %v2376_v59, %v2368_v37 }
 0xa83   :  { %v1184_v60 = vpack.c.bf16 %v1183_v7, %v1183_v7 }
 0xa85   :  { %2238 = vmatmul.msk.bf16.vlgmr.msra.gmra.mxu2 %vm134_vm8, %v1184_v60 }
 0xa86   :  { %1476 = vmatpush.bf16.msra.mxu2 %v2918_v0 }
 0xa89   :  { %v1317_v61 = vpop.xlane.xlu1 %1316 }
 0xa8a   :  { %2377 = vrcp.f32 %v1317_v61  ;;  %1477 = vmatpush.bf16.msra.mxu2 %v2925_v17 }
 0xa8e   :  { %v1247_v62 = vpop.xlane.xlu2 %1246 }
 0xa8f   :  { %2379 = vrcp.f32 %v1247_v62 }
 0xa90   :  { %v2378_v63 = vpop.eup %2377 }
 0xa91   :  { %v1319_v1 = vmul.f32 %v2378_v63, %v2370_v54 }
 0xa93   :  { %v1320_v6 = vpack.c.bf16 %v1319_v1, %v1319_v1 }
 0xa95   :  { %v2380_v4 = vpop.eup %2379  ;;  %2246 = vmatmul.msk.bf16.vlgmr.msrb.gmra.mxu2 %vm134_vm8, %v1320_v6 }
 0xa96   :  { %v1249_v39 = vmul.f32 %v2380_v4, %v2372_v15  ;;  %v1252_v3 = vpop.permute.xlu2 %1251 }
 0xa97   :  { %v1257_v12 = vand.u32 %v1252_v3, %v2597_v16 }
 0xa98   :  { %v1250_v27 = vpack.c.bf16 %v1249_v39, %v1249_v39  ;;  %v3120_v39 = vld [vmem:[%s3378_s5 + $0x8] sm:$0xff] }
 0xa99   :  { %1266 = vmatpush.bf16.msra.mxu1 %v1257_v12  ;;  %v3127_v12 = vld [vmem:[%s3378_s5] sm:$0xff] }
 0xa9c   :  { %2242 = vmatmul.msk.bf16.vlgmr.msra.gmra.mxu1 %vm134_vm8, %v1250_v27 }
 0xa9e   :  { %v1387_v28 = vpop.xlane.xlu0 %1386 }
 0xa9f   :  { %2381 = vrcp.f32 %v1387_v28 }
 0xaa1   :  { %v1392_v30 = vpop.permute.xlu1 %1391 }
 0xaa2   :  { %v1397_v18 = vand.u32 %v1392_v30, %v2597_v16 }
 0xaa4   :  { %1406 = vmatpush.bf16.msrb.mxu1 %v1397_v18 }
 0xaa5   :  { %v2382_v19 = vpop.eup %2381  ;;  %2255 = vmatmul.msk.bf16.vlgmr.msra.gmra.mxu2 %vm68_vm0, %v1466_v32 }
 0xaa6   :  { %v1389_v23 = vmul.f32 %v2382_v19, %v2374_v49  ;;  %v3137_v19 = vld [vmem:[%s3379_s6] ss:$0 sm:$0xff] }
 0xaa8   :  { %v1390_v34 = vpack.c.bf16 %v1389_v23, %v1389_v23 }
 0xaac   :  { %2250 = vmatmul.msk.bf16.vlgmr.msrb.gmra.mxu1 %vm134_vm8, %v1390_v34  ;;  %v2252_v34 = vld [vmem:[%s3380_s7 + $0xc] sm:$0x7] }
 0xb08   :  { %v1202_v35 = vpop.f32.mrf.mxu2 }
 0xb09   :  { %v1206_v36 = vpack.c.bf16 %v1202_v35, %v1202_v35 }
 0xb0b   :  { %v1208_v37 = vsel %vm2626_vm10, %v1206_v36, %v1207_v14 }
 0xb0c   :  { %1209 = vst [vmem:[#allocation2] sm:$0x7] %v1208_v37 }
 0xb10   :  { %v1204_v38 = vpop.f32.mrf.mxu2 }
 0xb13   :  { %v1277_v53 = vld [vmem:[#allocation2] sm:$0x7] }
 0xb18   :  { %v1338_v40 = vpop.f32.mrf.mxu2 }
 0xb19   :  { %v1342_v41 = vpack.c.bf16 %v1338_v40, %v1338_v40  ;;  %v1268_v42 = vpop.f32.mrf.mxu1 }
 0xb1a   :  { %v1272_v44 = vpack.c.bf16 %v1268_v42, %v1268_v42 }
 0xb1b   :  { %1344 = vrot.lane.b32.xlu1 %v1342_v41, %s2436_s16 }
 0xb1c   :  { %1274 = vrot.lane.b32.xlu2 %v1272_v44, %s2435_s15 }
 0xb20   :  { %v1340_v43 = vpop.f32.mrf.mxu2 }
 0xb21   :  { %v1270_v45 = vpop.f32.mrf.mxu1  ;;  %v2257_v43 = vld [vmem:[%s3377_s8 + $0x40] sm:$0x7] }
 0xb28   :  { %v1479_v54 = vpop.f32.mrf.mxu2 }
 0xb29   :  { %v1480_v9 = vadd.f32 %v2954_v47, %v1479_v54  ;;  %v1408_v15 = vpop.f32.mrf.mxu1 }
 0xb2a   :  { %v1412_v33 = vpack.c.bf16 %v1408_v15, %v1408_v15 }
 0xb2b   :  { %v1483_v50 = vpack.c.bf16 %v1480_v9, %v1480_v9 }
 0xb2c   :  { %1414 = vrot.lane.b32.xlu2 %v1412_v33, %s2437_s17 }
 0xb2d   :  { %v1485_v11 = vunpack.c.l.b16 %v1483_v50 }
 0xb2f   :  { %v3090_v48 = vpack.c.b16 %v1485_v11, %v1485_v11 }
 0xb30   :  { %v1481_v49 = vpop.f32.mrf.mxu2 }
 0xb31   :  { %1487 = vrot.lane.b32.xlu1 %v3090_v48, %s2425_s23  ;;  %v1410_v51 = vpop.f32.mrf.mxu1  ;;  %1621 = vrot.lane.b32.xlu0 %v3090_v48, %s2427_s25 }
 0xb34   :  { %1553 = vrot.lane.b32.xlu2 %v3090_v48, %s2424_s22 }
 0xb39   :  { %1623 = vrot.lane.b32.xlu1 %v3090_v48, %s2428_s26 }
 0xb3c   :  { %1551 = vrot.lane.b32.xlu2 %v3090_v48, %s2423_s21 }
 0xb41   :  { %1693 = vrot.lane.b32.xlu1 %v3090_v48, %s2426_s24 }
 0xb44   :  { %1691 = vrot.lane.b32.xlu2 %v3090_v48, %s2429_s27 }
 0xb76   :  { %v1275_v46 = vpop.permute.xlu2 %1274 }
 0xb77   :  { %v1278_v55 = vsel %vm2667_vm12, %v1275_v46, %v1277_v53 }
 0xb78   :  { %1279 = vst [vmem:[#allocation2] sm:$0x7] %v1278_v55 }
 0xb7f   :  { %v1347_v58 = vld [vmem:[#allocation2] sm:$0x7] }
 0xb86   :  { %v1415_v57 = vpop.permute.xlu2 %1414 }
 0xb8d   :  { %v1345_v59 = vpop.permute.xlu1 %1344 }
 0xb8e   :  { %v1348_v7 = vsel %vm2674_vm14, %v1345_v59, %v1347_v58  ;;  %v1554_v60 = vpop.permute.xlu2 %1553 }
 0xb8f   :  { %1349 = vst [vmem:[#allocation2] sm:$0x7] %v1348_v7  ;;  %v1559_v61 = vsel %vm91_vm1, %v1554_v60, 0 }
 0xb90   :  { %1568 = vmatpush.bf16.xpose.msra.mxu3 %v1559_v61  ;;  %v2261_v61 = vld [vmem:[%s3377_s8 + $0x44] sm:$0x7] }
 0xb96   :  { %v1417_v62 = vld [vmem:[#allocation2] sm:$0x7]  ;;  %v1552_v3 = vpop.permute.xlu2 %1551 }
 0xb97   :  { %v1418_v63 = vsel %vm2681_vm2, %v1415_v57, %v1417_v62 }
 0xb98   :  { %1419 = vst [vmem:[#allocation2] sm:$0x7] %v1418_v63 }
 0xb9e   :  { %v1692_v30 = vpop.permute.xlu2 %1691 }
 0xb9f   :  { %v1420_v1 = vld [vmem:[#allocation2] sm:$0x7] }
 0xba0   :  { %2251 = vmatmul.msk.bf16.vlgmr.msrb.gmra.mxu3 %vm68_vm0, %v1420_v1 }
 0xba3   :  { %v1488_v24 = vpop.permute.xlu1 %1487  ;;  %v1622_v28 = vpop.permute.xlu0 %1621 }
 0xba4   :  { %v1493_v6 = vsel %vm91_vm1, %v1488_v24, 0 }
 0xba5   :  { %1502 = vmatpush.bf16.xpose.msra.mxu0 %v1493_v6 }
 0xbab   :  { %v1624_v4 = vpop.permute.xlu1 %1623 }
 0xbac   :  { %v1629_v10 = vsel %vm91_vm1, %v1624_v4, 0  ;;  %2256 = vmatmul.msk.bf16.vlgmr.msra.gmra.mxu0 %vm91_vm1, %v1483_v50  ;;  %v2265_v4 = vld [vmem:[%s3377_s8 + $0x48] sm:$0x7] }
 0xbad   :  { %1638 = vmatpush.bf16.xpose.msrb.mxu0 %v1629_v10 }
 0xbb0   :  { %2260 = vmatmul.msk.bf16.vlgmr.msra.gmra.mxu3 %vm91_vm1, %v1552_v3 }
 0xbb3   :  { %v1694_v22 = vpop.permute.xlu1 %1693 }
 0xbb4   :  { %v1699_v27 = vsel %vm91_vm1, %v1694_v22, 0 }
 0xbb5   :  { %1771 = vmatpush.bf16.msra.mxu0 %v3120_v39  ;;  %1708 = vmatpush.bf16.xpose.msrb.mxu3 %v1699_v27 }
 0xbb9   :  { %1772 = vmatpush.bf16.msra.mxu0 %v3127_v12 }
 0xbbc   :  { %2264 = vmatmul.msk.bf16.vlgmr.msrb.gmra.mxu0 %vm91_vm1, %v1622_v28 }
 0xbc0   :  { %2268 = vmatmul.msk.bf16.vlgmr.msrb.gmra.mxu3 %vm91_vm1, %v1692_v30 }
 0xc23   :  { %v1433_v32 = vpop.f32.mrf.mxu3 }
 0xc24   :  { %v1437_v18 = vadd.f32 %v1433_v32, %v2940_v26  ;;  %v2269_v32 = vld [vmem:[%s3377_s8 + $0x4c] sm:$0x7] }
 0xc26   :  { %v1438_v23 = vadd.f32 %v3137_v19, %v1437_v18 }
 0xc28   :  { %v1439_v35 = vpack.c.bf16 %v1438_v23, %v1438_v23  ;;  %v1444_v36 = vsel %vm420_vm3, %v1438_v23, 0.0  ;;  %v1452_v14 = vmul.f32 %v1438_v23, %v1438_v23 }
 0xc29   :  { %v1445_v37 = vrot.slane %v1444_v36, 4  ;;  %v1504_v38 = vpop.f32.mrf.mxu0 }
 0xc2a   :  { %v1442_v26 = vsel %vm2715_vm7, %v1439_v35, %v2252_v34  ;;  %v1453_v40 = vsel %vm420_vm3, %v1452_v14, 0.0  ;;  %v1508_v41 = vmul.f32 0.35355338, %v1504_v38 }
 0xc2b   :  { %2253 = vst [vmem:[%s3380_s7 + $0xc] sm:$0x7] %v1442_v26  ;;  %v1446_v42 = vadd.f32 %v1445_v37, %v1444_v36  ;;  %v1454_v44 = vrot.slane %v1453_v40, 4  ;;  %v1435_v45 = vpop.f32.mrf.mxu3 }
 0xc2c   :  { %v1509_v54 = vpack.c.bf16 %v1508_v41, %v1508_v41  ;;  %v1514_v9 = vsel %vm119_vm4, %v1508_v41, -inf }
 0xc2d   :  { %v1447_v15 = vrot.slane %v1446_v42, 2  ;;  %v1455_v33 = vadd.f32 %v1454_v44, %v1453_v40  ;;  %1515 = vmax.xlane.f32.xlu1 %v1514_v9 }
 0xc2e   :  { %v1512_v50 = vsel %vm2551_vm5, %v1509_v54, %v2257_v43 }
 0xc2f   :  { %v1448_v11 = vadd.f32 %v1447_v15, %v1446_v42  ;;  %v1456_v49 = vrot.slane %v1455_v33, 2  ;;  %2258 = vst [vmem:[%s3377_s8 + $0x40] sm:$0x7] %v1512_v50 }
 0xc31   :  { %v1449_v51 = vrot.slane %v1448_v11, 1  ;;  %v1457_v46 = vadd.f32 %v1456_v49, %v1455_v33  ;;  %v1506_v53 = vpop.f32.mrf.mxu0 }
 0xc33   :  { %v1450_v55 = vadd.f32 %v1449_v51, %v1448_v11  ;;  %v1458_v57 = vrot.slane %v1457_v46, 1  ;;  %v1570_v58 = vpop.f32.mrf.mxu3 }
 0xc34   :  { %v1574_v59 = vmul.f32 0.35355338, %v1570_v58 }
 0xc35   :  { %v3160_v7 = vadd.f32 %v1450_v55, %v3028_v8  ;;  %v1459_v60 = vadd.f32 %v1458_v57, %v1457_v46 }
 0xc36   :  { %v1575_v62 = vpack.c.bf16 %v1574_v59, %v1574_v59  ;;  %v1580_v63 = vsel %vm119_vm4, %v1574_v59, -inf }
 0xc37   :  { %v3167_v1 = vadd.f32 %v1459_v60, %v3035_v2  ;;  %1581 = vmax.xlane.f32.xlu2 %v1580_v63 }
 0xc38   :  { %v1578_v24 = vsel %vm2551_vm5, %v1575_v62, %v2261_v61 }
 0xc39   :  { %2262 = vst [vmem:[%s3377_s8 + $0x44] sm:$0x7] %v1578_v24  ;;  %v1640_v8 = vpop.f32.mrf.mxu0 }
 0xc3a   :  { %v1644_v6 = vmul.f32 0.35355338, %v1640_v8 }
 0xc3b   :  { %v1572_v10 = vpop.f32.mrf.mxu3 }
 0xc3c   :  { %v1645_v3 = vpack.c.bf16 %v1644_v6, %v1644_v6  ;;  %v1650_v22 = vsel %vm119_vm4, %v1644_v6, -inf }
 0xc3d   :  { %1651 = vmax.xlane.f32.xlu0 %v1650_v22 }
 0xc3e   :  { %v1648_v2 = vsel %vm2551_vm5, %v1645_v3, %v2265_v4 }
 0xc3f   :  { %2266 = vst [vmem:[%s3377_s8 + $0x48] sm:$0x7] %v1648_v2 }
 0xc41   :  { %v1642_v27 = vpop.f32.mrf.mxu0 }
 0xc43   :  { %v1710_v28 = vpop.f32.mrf.mxu3 }
 0xc44   :  { %v1714_v30 = vmul.f32 0.35355338, %v1710_v28 }
 0xc46   :  { %v1715_v18 = vpack.c.bf16 %v1714_v30, %v1714_v30  ;;  %v1720_v23 = vsel %vm119_vm4, %v1714_v30, -inf }
 0xc47   :  { %1721 = vmax.xlane.f32.xlu1 %v1720_v23 }
 0xc48   :  { %v1718_v34 = vsel %vm2551_vm5, %v1715_v18, %v2269_v32 }
 0xc49   :  { %2270 = vst [vmem:[%s3377_s8 + $0x4c] sm:$0x7] %v1718_v34 }
 0xc4b   :  { %v1712_v35 = vpop.f32.mrf.mxu3 }
 0xc51   :  { %1526 = vrot.lane.b32.xlu0 %v3090_v48, %s2431_s10 }
 0xca0   :  { %v1516_v36 = vpop.xlane.xlu1 %1515 }
 0xca1   :  { %v1517_v14 = vsub.f32 %v1508_v41, %v1516_v36 }
 0xca3   :  { %v1518_v37 = vmul.f32 1.442695, %v1517_v14 }
 0xca5   :  { %2383 = vpow2.f32 %v1518_v37  ;;  %v1548_v37 = vld [vmem:[#allocation2] sm:$0x7] }
 0xcaa   :  { %v1582_v38 = vpop.xlane.xlu2 %1581 }
 0xcab   :  { %v2384_v26 = vpop.eup %2383  ;;  %v1583_v40 = vsub.f32 %v1574_v59, %v1582_v38 }
 0xcac   :  { %v1520_v42 = vsel %vm119_vm4, %v2384_v26, 0.0 }
 0xcad   :  { %v1584_v44 = vmul.f32 1.442695, %v1583_v40  ;;  %1521 = vadd.xlane.f32.xlu2 %v1520_v42 }
 0xcaf   :  { %2385 = vpow2.f32 %v1584_v44 }
 0xcb0   :  { %v1652_v43 = vpop.xlane.xlu0 %1651 }
 0xcb1   :  { %v1653_v45 = vsub.f32 %v1644_v6, %v1652_v43 }
 0xcb3   :  { %v1654_v54 = vmul.f32 1.442695, %v1653_v45 }
 0xcb5   :  { %v2386_v9 = vpop.eup %2385  ;;  %2387 = vpow2.f32 %v1654_v54 }
 0xcb6   :  { %v1586_v15 = vsel %vm119_vm4, %v2386_v9, 0.0 }
 0xcb7   :  { %1587 = vadd.xlane.f32.xlu1 %v1586_v15 }
 0xcba   :  { %v1722_v33 = vpop.xlane.xlu1 %1721 }
 0xcbb   :  { %v2388_v41 = vpop.eup %2387  ;;  %v1723_v50 = vsub.f32 %v1714_v30, %v1722_v33 }
 0xcbc   :  { %v1656_v11 = vsel %vm119_vm4, %v2388_v41, 0.0 }
 0xcbd   :  { %v1724_v49 = vmul.f32 1.442695, %v1723_v50  ;;  %1657 = vadd.xlane.f32.xlu2 %v1656_v11 }
 0xcbf   :  { %2389 = vpow2.f32 %v1724_v49 }
 0xcc3   :  { %v1527_v51 = vpop.permute.xlu0 %1526 }
 0xcc4   :  { %v1532_v46 = vand.u32 %v1527_v51, %v2597_v16 }
 0xcc5   :  { %v2390_v53 = vpop.eup %2389 }
 0xcc6   :  { %1541 = vmatpush.bf16.msra.mxu1 %v1532_v46  ;;  %v1726_v55 = vsel %vm119_vm4, %v2390_v53, 0.0 }
 0xcc7   :  { %1727 = vadd.xlane.f32.xlu0 %v1726_v55 }
 0xcd0   :  { %1592 = vrot.lane.b32.xlu1 %v3090_v48, %s2434_s12 }
 0xcd5   :  { %1662 = vrot.lane.b32.xlu2 %v3090_v48, %s2430_s30 }
 0xcdd   :  { %1732 = vrot.lane.b32.xlu2 %v3090_v48, %s2433_s11  ;;  %v2275_v48 = vld [vmem:[%s3373_s0 + $0x14] sm:$0x7] }
 0xcde   :  { %v1804_v10 = vunpack.c.l.bf16 %v2275_v48 }
 0xce0   :  { %v1805_v28 = vmul.f32 %v2931_v21, %v1804_v10 }
 0xd20   :  { %v1522_v57 = vpop.xlane.xlu2 %1521 }
 0xd21   :  { %2391 = vrcp.f32 %v1522_v57 }
 0xd27   :  { %v2392_v58 = vpop.eup %2391 }
 0xd28   :  { %v1524_v59 = vmul.f32 %v2392_v58, %v2384_v26 }
 0xd2a   :  { %v1525_v60 = vpack.c.bf16 %v1524_v59, %v1524_v59  ;;  %v1588_v62 = vpop.xlane.xlu1 %1587 }
 0xd2c   :  { %2259 = vmatmul.msk.bf16.vlgmr.msra.gmra.mxu1 %vm134_vm8, %v1525_v60 }
 0xd30   :  { %v1658_v61 = vpop.xlane.xlu2 %1657 }
 0xd31   :  { %2393 = vrcp.f32 %v1658_v61 }
 0xd32   :  { %2395 = vrcp.f32 %v1588_v62 }
 0xd37   :  { %v2394_v63 = vpop.eup %2393 }
 0xd38   :  { %v1660_v24 = vmul.f32 %v2394_v63, %v2388_v41  ;;  %v1663_v8 = vpop.permute.xlu2 %1662  ;;  %v2396_v3 = vpop.eup %2395 }
 0xd39   :  { %v1668_v6 = vand.u32 %v1663_v8, %v2597_v16  ;;  %v1590_v2 = vmul.f32 %v2396_v3, %v2386_v9 }
 0xd3a   :  { %v1661_v4 = vpack.c.bf16 %v1660_v24, %v1660_v24  ;;  %v1728_v23 = vpop.xlane.xlu0 %1727 }
 0xd3b   :  { %1677 = vmatpush.bf16.msrb.mxu1 %v1668_v6  ;;  %v1591_v18 = vpack.c.bf16 %v1590_v2, %v1590_v2  ;;  %2397 = vrcp.f32 %v1728_v23 }
 0xd3e   :  { %2267 = vmatmul.msk.bf16.vlgmr.msrb.gmra.mxu1 %vm134_vm8, %v1661_v4 }
 0xd3f   :  { %1817 = vmatpush.bf16.msra.mxu1 %v2918_v0  ;;  %v3217_v0 = vadd.f32 %v2937_v5, %v1805_v28 }
 0xd40   :  { %v1733_v22 = vpop.permute.xlu2 %1732 }
 0xd41   :  { %v1738_v32 = vand.u32 %v1733_v22, %v2597_v16  ;;  %v2398_v21 = vpop.eup %2397 }
 0xd42   :  { %v1593_v27 = vpop.permute.xlu1 %1592  ;;  %v1730_v34 = vmul.f32 %v2398_v21, %v2390_v53 }
 0xd43   :  { %1818 = vmatpush.bf16.msra.mxu1 %v2925_v17  ;;  %v1598_v30 = vand.u32 %v1593_v27, %v2597_v16  ;;  %v1807_v17 = vpack.c.bf16 %v3217_v0, %v3217_v0 }
 0xd44   :  { %v1731_v35 = vpack.c.bf16 %v1730_v34, %v1730_v34 }
 0xd45   :  { %1607 = vmatpush.bf16.msrb.mxu2 %v1598_v30 }
 0xd48   :  { %2263 = vmatmul.msk.bf16.vlgmr.msrb.gmra.mxu2 %vm134_vm8, %v1591_v18 }
 0xd49   :  { %1747 = vmatpush.bf16.msra.mxu2 %v1738_v32 }
 0xd4e   :  { %2276 = vmatmul.msk.bf16.vlgmr.msra.gmra.mxu1 %vm68_vm0, %v1807_v17 }
 0xd58   :  { %2271 = vmatmul.msk.bf16.vlgmr.msra.gmra.mxu2 %vm134_vm8, %v1731_v35  ;;  %v2273_v35 = vld [vmem:[%s3380_s7 + $0x10] sm:$0x7] }
 0xda9   :  { %v1543_v36 = vpop.f32.mrf.mxu1 }
 0xdaa   :  { %v1547_v14 = vpack.c.bf16 %v1543_v36, %v1543_v36 }
 0xdac   :  { %v1549_v5 = vsel %vm2626_vm10, %v1547_v14, %v1548_v37 }
 0xdad   :  { %1550 = vst [vmem:[#allocation2] sm:$0x7] %v1549_v5 }
 0xdb1   :  { %v1545_v38 = vpop.f32.mrf.mxu1 }
 0xdb4   :  { %v1618_v55 = vld [vmem:[#allocation2] sm:$0x7] }
 0xdbb   :  { %v1679_v26 = vpop.f32.mrf.mxu1 }
 0xdbc   :  { %v1683_v40 = vpack.c.bf16 %v1679_v26, %v1679_v26 }
 0xdbe   :  { %1685 = vrot.lane.b32.xlu2 %v1683_v40, %s2436_s16 }
 0xdc3   :  { %v1681_v42 = vpop.f32.mrf.mxu1 }
 0xdcb   :  { %v1609_v44 = vpop.f32.mrf.mxu2  ;;  %v1820_v43 = vpop.f32.mrf.mxu1 }
 0xdcc   :  { %v1613_v45 = vpack.c.bf16 %v1609_v44, %v1609_v44  ;;  %v1821_v54 = vadd.f32 %v2954_v47, %v1820_v43 }
 0xdce   :  { %v1824_v9 = vpack.c.bf16 %v1821_v54, %v1821_v54  ;;  %1615 = vrot.lane.b32.xlu1 %v1613_v45, %s2435_s15 }
 0xdd0   :  { %v1826_v15 = vunpack.c.l.b16 %v1824_v9 }
 0xdd2   :  { %v3229_v33 = vpack.c.b16 %v1826_v15, %v1826_v15 }
 0xdd3   :  { %v1611_v41 = vpop.f32.mrf.mxu2  ;;  %v1822_v50 = vpop.f32.mrf.mxu1 }
 0xdd4   :  { %1892 = vrot.lane.b32.xlu0 %v3229_v33, %s2423_s21  ;;  %v2286_v41 = vld [vmem:[%s3377_s8 + $0x58] sm:$0x7] }
 0xdd6   :  { %1828 = vrot.lane.b32.xlu1 %v3229_v33, %s2425_s23 }
 0xddb   :  { %v1749_v11 = vpop.f32.mrf.mxu2 }
 0xddc   :  { %v1753_v49 = vpack.c.bf16 %v1749_v11, %v1749_v11 }
 0xdde   :  { %1964 = vrot.lane.b32.xlu1 %v3229_v33, %s2428_s26  ;;  %1755 = vrot.lane.b32.xlu2 %v1753_v49, %s2437_s17 }
 0xde3   :  { %v1751_v47 = vpop.f32.mrf.mxu2 }
 0xde6   :  { %1962 = vrot.lane.b32.xlu1 %v3229_v33, %s2427_s25  ;;  %1894 = vrot.lane.b32.xlu2 %v3229_v33, %s2424_s22 }
 0xdee   :  { %2032 = vrot.lane.b32.xlu1 %v3229_v33, %s2429_s27  ;;  %2034 = vrot.lane.b32.xlu2 %v3229_v33, %s2426_s24 }
 0xe18   :  { %v1686_v51 = vpop.permute.xlu2 %1685 }
 0xe38   :  { %v1756_v46 = vpop.permute.xlu2 %1755 }
 0xe40   :  { %v1616_v53 = vpop.permute.xlu1 %1615  ;;  %v1895_v57 = vpop.permute.xlu2 %1894 }
 0xe41   :  { %v1619_v58 = vsel %vm2667_vm12, %v1616_v53, %v1618_v55  ;;  %v1900_v59 = vsel %vm91_vm1, %v1895_v57, 0 }
 0xe42   :  { %1620 = vst [vmem:[#allocation2] sm:$0x7] %v1619_v58  ;;  %1909 = vmatpush.bf16.xpose.msrb.mxu0 %v1900_v59 }
 0xe46   :  { %v1893_v2 = vpop.permute.xlu0 %1892 }
 0xe48   :  { %v1829_v60 = vpop.permute.xlu1 %1828  ;;  %v2035_v4 = vpop.permute.xlu2 %2034 }
 0xe49   :  { %v1688_v61 = vld [vmem:[#allocation2] sm:$0x7]  ;;  %v1834_v62 = vsel %vm91_vm1, %v1829_v60, 0  ;;  %v2040_v3 = vsel %vm91_vm1, %v2035_v4, 0  ;;  %v2282_v60 = vld [vmem:[%s3377_s8 + $0x54] sm:$0x7] }
 0xe4a   :  { %v1689_v63 = vsel %vm2674_vm14, %v1686_v51, %v1688_v61  ;;  %1843 = vmatpush.bf16.xpose.msra.mxu3 %v1834_v62  ;;  %v2290_v4 = vld [vmem:[%s3377_s8 + $0x5c] sm:$0x7] }
 0xe4b   :  { %1690 = vst [vmem:[#allocation2] sm:$0x7] %v1689_v63 }
 0xe50   :  { %v1965_v24 = vpop.permute.xlu1 %1964 }
 0xe51   :  { %v1970_v8 = vsel %vm91_vm1, %v1965_v24, 0  ;;  %2277 = vmatmul.msk.bf16.vlgmr.msra.gmra.mxu3 %vm91_vm1, %v1824_v9 }
 0xe52   :  { %v1758_v6 = vld [vmem:[#allocation2] sm:$0x7]  ;;  %1979 = vmatpush.bf16.xpose.msrb.mxu3 %v1970_v8 }
 0xe53   :  { %v1759_v48 = vsel %vm2681_vm2, %v1756_v46, %v1758_v6 }
 0xe54   :  { %1760 = vst [vmem:[#allocation2] sm:$0x7] %v1759_v48 }
 0xe58   :  { %v1963_v22 = vpop.permute.xlu1 %1962 }
 0xe5a   :  { %2112 = vmatpush.bf16.msra.mxu3 %v3120_v39 }
 0xe5b   :  { %v1761_v10 = vld [vmem:[#allocation2] sm:$0x7] }
 0xe5c   :  { %2272 = vmatmul.msk.bf16.vlgmr.msra.gmra.mxu0 %vm68_vm0, %v1761_v10 }
 0xe5d   :  { %2049 = vmatpush.bf16.xpose.msra.mxu0 %v2040_v3 }
 0xe5e   :  { %2113 = vmatpush.bf16.msra.mxu3 %v3127_v12  ;;  %v2278_v12 = vld [vmem:[%s3377_s8 + $0x50] sm:$0x7] }
 0xe60   :  { %v2033_v27 = vpop.permute.xlu1 %2032 }
 0xe61   :  { %2285 = vmatmul.msk.bf16.vlgmr.msrb.gmra.mxu3 %vm91_vm1, %v1963_v22 }
 0xe6c   :  { %2281 = vmatmul.msk.bf16.vlgmr.msrb.gmra.mxu0 %vm91_vm1, %v1893_v2 }
 0xe7c   :  { %2289 = vmatmul.msk.bf16.vlgmr.msra.gmra.mxu0 %vm91_vm1, %v2033_v27  ;;  %vm2145_vm1 = vcmask 254976  }
 0xed4   :  { %v1845_v39 = vpop.f32.mrf.mxu3 }
 0xed5   :  { %v3263_v28 = vmul.f32 0.35355338, %v1845_v39 }
 0xed7   :  { %v1850_v30 = vpack.c.bf16 %v3263_v28, %v3263_v28  ;;  %v1855_v32 = vsel %vm119_vm4, %v3263_v28, -inf }
 0xed8   :  { %1856 = vmax.xlane.f32.xlu2 %v1855_v32 }
 0xed9   :  { %v1853_v18 = vsel %vm2551_vm5, %v1850_v30, %v2278_v12  ;;  %v1774_v23 = vpop.f32.mrf.mxu0 }
 0xeda   :  { %2279 = vst [vmem:[%s3377_s8 + $0x50] sm:$0x7] %v1853_v18  ;;  %v1778_v17 = vadd.f32 %v1774_v23, %v3077_v13 }
 0xedc   :  { %v1779_v21 = vadd.f32 %v3137_v19, %v1778_v17  ;;  %v1847_v34 = vpop.f32.mrf.mxu3 }
 0xede   :  { %v1780_v36 = vpack.c.bf16 %v1779_v21, %v1779_v21  ;;  %v1785_v14 = vsel %vm420_vm3, %v1779_v21, 0.0  ;;  %v1793_v37 = vmul.f32 %v1779_v21, %v1779_v21 }
 0xedf   :  { %v1786_v5 = vrot.slane %v1785_v14, 4 }
 0xee0   :  { %v1783_v38 = vsel %vm2715_vm7, %v1780_v36, %v2273_v35  ;;  %v1794_v26 = vsel %vm420_vm3, %v1793_v37, 0.0 }
 0xee1   :  { %2274 = vst [vmem:[%s3380_s7 + $0x10] sm:$0x7] %v1783_v38  ;;  %v1787_v13 = vadd.f32 %v1786_v5, %v1785_v14  ;;  %v1795_v40 = vrot.slane %v1794_v26, 4  ;;  %v1776_v42 = vpop.f32.mrf.mxu0 }
 0xee3   :  { %v1788_v44 = vrot.slane %v1787_v13, 2  ;;  %v1796_v43 = vadd.f32 %v1795_v40, %v1794_v26 }
 0xee4   :  { %v1981_v45 = vpop.f32.mrf.mxu3 }
 0xee5   :  { %v1789_v54 = vadd.f32 %v1788_v44, %v1787_v13  ;;  %v1797_v9 = vrot.slane %v1796_v43, 2  ;;  %v1985_v15 = vmul.f32 0.35355338, %v1981_v45 }
 0xee7   :  { %v1790_v50 = vrot.slane %v1789_v54, 1  ;;  %v1798_v11 = vadd.f32 %v1797_v9, %v1796_v43  ;;  %v1986_v49 = vpack.c.bf16 %v1985_v15, %v1985_v15  ;;  %v1991_v47 = vsel %vm119_vm4, %v1985_v15, -inf }
 0xee8   :  { %1992 = vmax.xlane.f32.xlu0 %v1991_v47 }
 0xee9   :  { %v1791_v51 = vadd.f32 %v1790_v50, %v1789_v54  ;;  %v1799_v46 = vrot.slane %v1798_v11, 1  ;;  %v1989_v53 = vsel %vm2551_vm5, %v1986_v49, %v2286_v41  ;;  %v1911_v55 = vpop.f32.mrf.mxu0 }
 0xeea   :  { %2287 = vst [vmem:[%s3377_s8 + $0x58] sm:$0x7] %v1989_v53  ;;  %v1915_v57 = vmul.f32 0.35355338, %v1911_v55 }
 0xeeb   :  { %v3299_v58 = vadd.f32 %v1791_v51, %v3160_v7  ;;  %v1800_v59 = vadd.f32 %v1799_v46, %v1798_v11 }
 0xeec   :  { %v1916_v61 = vpack.c.bf16 %v1915_v57, %v1915_v57  ;;  %v1983_v62 = vpop.f32.mrf.mxu3  ;;  %v1921_v63 = vsel %vm119_vm4, %v1915_v57, -inf }
 0xeed   :  { %v3306_v24 = vadd.f32 %v1800_v59, %v3167_v1  ;;  %1922 = vmax.xlane.f32.xlu1 %v1921_v63 }
 0xeee   :  { %v1919_v8 = vsel %vm2551_vm5, %v1916_v61, %v2282_v60 }
 0xeef   :  { %2283 = vst [vmem:[%s3377_s8 + $0x54] sm:$0x7] %v1919_v8 }
 0xef1   :  { %v1913_v7 = vpop.f32.mrf.mxu0 }
 0xef2   :  { %v1889_v7 = vld [vmem:[#allocation2] sm:$0x7] }
 0xef9   :  { %v2051_v6 = vpop.f32.mrf.mxu0 }
 0xefa   :  { %v2055_v48 = vmul.f32 0.35355338, %v2051_v6 }
 0xefc   :  { %v2056_v10 = vpack.c.bf16 %v2055_v48, %v2055_v48  ;;  %1933 = vrot.lane.b32.xlu0 %v3229_v33, %s2434_s12  ;;  %v2061_v1 = vsel %vm119_vm4, %v2055_v48, -inf }
 0xefd   :  { %2062 = vmax.xlane.f32.xlu2 %v2061_v1 }
 0xefe   :  { %v2059_v3 = vsel %vm2551_vm5, %v2056_v10, %v2290_v4 }
 0xeff   :  { %2291 = vst [vmem:[%s3377_s8 + $0x5c] sm:$0x7] %v2059_v3 }
 0xf01   :  { %v2053_v22 = vpop.f32.mrf.mxu0 }
 0xf15   :  { %1867 = vrot.lane.b32.xlu2 %v3229_v33, %s2431_s10 }
 0xf4b   :  { %v1857_v2 = vpop.xlane.xlu2 %1856 }
 0xf4c   :  { %v1858_v27 = vsub.f32 %v3263_v28, %v1857_v2 }
 0xf4e   :  { %v1859_v39 = vmul.f32 1.442695, %v1858_v27 }
 0xf50   :  { %2399 = vpow2.f32 %v1859_v39 }
 0xf56   :  { %v2400_v12 = vpop.eup %2399 }
 0xf57   :  { %v1861_v30 = vsel %vm119_vm4, %v2400_v12, 0.0 }
 0xf58   :  { %1862 = vadd.xlane.f32.xlu1 %v1861_v30 }
 0xf5b   :  { %v1993_v32 = vpop.xlane.xlu0 %1992 }
 0xf5c   :  { %v1994_v29 = vsub.f32 %v1985_v15, %v1993_v32 }
 0xf5e   :  { %v1995_v18 = vmul.f32 1.442695, %v1994_v29 }
 0xf60   :  { %2401 = vpow2.f32 %v1995_v18  ;;  %v1923_v23 = vpop.xlane.xlu1 %1922 }
 0xf61   :  { %v1924_v17 = vsub.f32 %v1915_v57, %v1923_v23 }
 0xf63   :  { %v1925_v21 = vmul.f32 1.442695, %v1924_v17 }
 0xf65   :  { %2403 = vpow2.f32 %v1925_v21 }
 0xf66   :  { %v2402_v34 = vpop.eup %2401 }
 0xf67   :  { %v1997_v35 = vsel %vm119_vm4, %v2402_v34, 0.0 }
 0xf68   :  { %1998 = vadd.xlane.f32.xlu1 %v1997_v35 }
 0xf6b   :  { %v2404_v36 = vpop.eup %2403 }
 0xf6c   :  { %v1927_v28 = vsel %vm119_vm4, %v2404_v36, 0.0 }
 0xf6d   :  { %1928 = vadd.xlane.f32.xlu0 %v1927_v28 }
 0xf6e   :  { %v1934_v14 = vpop.permute.xlu0 %1933 }
 0xf6f   :  { %v1939_v37 = vand.u32 %v1934_v14, %v2597_v16 }
 0xf70   :  { %v2063_v5 = vpop.xlane.xlu2 %2062 }
 0xf71   :  { %v2064_v38 = vsub.f32 %v2055_v48, %v2063_v5  ;;  %1948 = vmatpush.bf16.msrb.mxu1 %v1939_v37 }
 0xf73   :  { %v2065_v26 = vmul.f32 1.442695, %v2064_v38 }
 0xf75   :  { %2405 = vpow2.f32 %v2065_v26 }
 0xf78   :  { %v1868_v13 = vpop.permute.xlu2 %1867 }
 0xf79   :  { %v1873_v40 = vand.u32 %v1868_v13, %v2597_v16 }
 0xf7b   :  { %v2406_v42 = vpop.eup %2405  ;;  %1882 = vmatpush.bf16.msrb.mxu2 %v1873_v40 }
 0xf7c   :  { %v2067_v44 = vsel %vm119_vm4, %v2406_v42, 0.0 }
 0xf7d   :  { %2068 = vadd.xlane.f32.xlu2 %v2067_v44 }
 0xf81   :  { %2003 = vrot.lane.b32.xlu1 %v3229_v33, %s2430_s30  ;;  %2073 = vrot.lane.b32.xlu0 %v3229_v33, %s2433_s11 }
 0xfcb   :  { %v1863_v43 = vpop.xlane.xlu1 %1862 }
 0xfcc   :  { %2407 = vrcp.f32 %v1863_v43 }
 0xfd2   :  { %v2408_v45 = vpop.eup %2407 }
 0xfd3   :  { %v1865_v54 = vmul.f32 %v2408_v45, %v2400_v12 }
 0xfd5   :  { %v1866_v9 = vpack.c.bf16 %v1865_v54, %v1865_v54 }
 0xfd7   :  { %2280 = vmatmul.msk.bf16.vlgmr.msrb.gmra.mxu2 %vm134_vm8, %v1866_v9 }
 0xfdb   :  { %v1999_v50 = vpop.xlane.xlu1 %1998 }
 0xfe0   :  { %v1929_v15 = vpop.xlane.xlu0 %1928 }
 0xfe1   :  { %2409 = vrcp.f32 %v1929_v15 }
 0xfe2   :  { %2411 = vrcp.f32 %v1999_v50 }
 0xfe7   :  { %v2410_v41 = vpop.eup %2409 }
 0xfe8   :  { %v1931_v11 = vmul.f32 %v2410_v41, %v2404_v36  ;;  %v2412_v47 = vpop.eup %2411 }
 0xfe9   :  { %v2001_v33 = vmul.f32 %v2412_v47, %v2402_v34 }
 0xfea   :  { %v1932_v49 = vpack.c.bf16 %v1931_v11, %v1931_v11 }
 0xfeb   :  { %v2002_v60 = vpack.c.bf16 %v2001_v33, %v2001_v33 }
 0xfec   :  { %2284 = vmatmul.msk.bf16.vlgmr.msrb.gmra.mxu1 %vm134_vm8, %v1932_v49 }
 0xff0   :  { %v2069_v51 = vpop.xlane.xlu2 %2068 }
 0xff1   :  { %2413 = vrcp.f32 %v2069_v51 }
 0xff3   :  { %v2074_v46 = vpop.permute.xlu0 %2073  ;;  %v2004_v53 = vpop.permute.xlu1 %2003 }
 0xff4   :  { %v2079_v55 = vand.u32 %v2074_v46, %v2597_v16  ;;  %v2009_v57 = vand.u32 %v2004_v53, %v2597_v16 }
 0xff6   :  { %2018 = vmatpush.bf16.msra.mxu2 %v2009_v57  ;;  %2088 = vmatpush.bf16.msra.mxu1 %v2079_v55 }
 0xff7   :  { %v2414_v59 = vpop.eup %2413 }
 0xff8   :  { %v2071_v61 = vmul.f32 %v2414_v59, %v2406_v42 }
 0xff9   :  { %2288 = vmatmul.msk.bf16.vlgmr.msra.gmra.mxu2 %vm134_vm8, %v2002_v60 }
 0xffa   :  { %v2072_v62 = vpack.c.bf16 %v2071_v61, %v2071_v61 }
 0xffc   :  { %2292 = vmatmul.msk.bf16.vlgmr.msra.gmra.mxu1 %vm134_vm8, %v2072_v62 }
0x105a   :  { %v1884_v63 = vpop.f32.mrf.mxu2 }
0x105b   :  { %v1888_v8 = vpack.c.bf16 %v1884_v63, %v1884_v63 }
0x105d   :  { %v1890_v6 = vsel %vm2626_vm10, %v1888_v8, %v1889_v7 }
0x105e   :  { %1891 = vst [vmem:[#allocation2] sm:$0x7] %v1890_v6 }
0x1062   :  { %v1886_v48 = vpop.f32.mrf.mxu2 }
0x1065   :  { %v1959_v52 = vld [vmem:[#allocation2] sm:$0x7] }
0x1069   :  { %v1950_v4 = vpop.f32.mrf.mxu1 }
0x106a   :  { %v1954_v16 = vpack.c.bf16 %v1950_v4, %v1950_v4 }
0x106c   :  { %1956 = vrot.lane.b32.xlu1 %v1954_v16, %s2435_s15 }
0x1071   :  { %v1952_v10 = vpop.f32.mrf.mxu1 }
0x1079   :  { %v2090_v1 = vpop.f32.mrf.mxu1 }
0x107a   :  { %v2094_v3 = vpack.c.bf16 %v2090_v1, %v2090_v1 }
0x107c   :  { %v2020_v22 = vpop.f32.mrf.mxu2  ;;  %2096 = vrot.lane.b32.xlu1 %v2094_v3, %s2437_s17 }
0x107d   :  { %v2024_v2 = vpack.c.bf16 %v2020_v22, %v2020_v22 }
0x107f   :  { %2026 = vrot.lane.b32.xlu0 %v2024_v2, %s2436_s16 }
0x1081   :  { %v2092_v27 = vpop.f32.mrf.mxu1 }
0x1084   :  { %v2022_v39 = vpop.f32.mrf.mxu2 }
0x10de   :  { %v1957_v12 = vpop.permute.xlu1 %1956 }
0x10df   :  { %v1960_v30 = vsel %vm2667_vm12, %v1957_v12, %v1959_v52 }
0x10e0   :  { %1961 = vst [vmem:[#allocation2] sm:$0x7] %v1960_v30 }
0x10e7   :  { %v2029_v32 = vld [vmem:[#allocation2] sm:$0x7] }
0x10ee   :  { %v2097_v23 = vpop.permute.xlu1 %2096 }
0x10f1   :  { %v2027_v29 = vpop.permute.xlu0 %2026 }
0x10f2   :  { %v2030_v18 = vsel %vm2674_vm14, %v2027_v29, %v2029_v32 }
0x10f3   :  { %2031 = vst [vmem:[#allocation2] sm:$0x7] %v2030_v18 }
0x10fa   :  { %v2099_v17 = vld [vmem:[#allocation2] sm:$0x7] }
0x10fb   :  { %v2100_v21 = vsel %vm2681_vm2, %v2097_v23, %v2099_v17 }
0x10fc   :  { %2101 = vst [vmem:[#allocation2] sm:$0x7] %v2100_v21 }
0x1103   :  { %v2102_v34 = vld [vmem:[#allocation2] sm:$0x7] }
0x1104   :  { %2293 = vmatmul.msk.bf16.vlgmr.msra.gmra.mxu3 %vm68_vm0, %v2102_v34  ;;  %vm2143_vm0 = vcmask 1040384  }
0x1187   :  { %v2115_v35 = vpop.f32.mrf.mxu3 }
0x1188   :  { %v2119_v20 = vadd.f32 %v2115_v35, %v3217_v0 }
0x118a   :  { %v2120_v36 = vadd.f32 %v3137_v19, %v2119_v20 }
0x118c   :  { %v2121_v28 = vpack.c.bf16 %v2120_v36, %v2120_v36  ;;  %v2126_v14 = vsel %vm420_vm3, %v2120_v36, 0.0  ;;  %v2134_v37 = vmul.f32 %v2120_v36, %v2120_v36 }
0x118d   :  { %v2127_v5 = vrot.slane %v2126_v14, 4 }
0x118e   :  { %v2124_v31 = vsel %vm2715_vm7, %v2121_v28, %v2294_v25  ;;  %v2135_v38 = vsel %vm420_vm3, %v2134_v37, 0.0 }
0x118f   :  { %2295 = vst [vmem:[%s3380_s7 + $0x14] sm:$0x7] %v2124_v31  ;;  %v2128_v0 = vadd.f32 %v2127_v5, %v2126_v14  ;;  %v2136_v19 = vrot.slane %v2135_v38, 4  ;;  %v2117_v26 = vpop.f32.mrf.mxu3 }
0x1191   :  { %v2129_v13 = vrot.slane %v2128_v0, 2  ;;  %v2137_v40 = vadd.f32 %v2136_v19, %v2135_v38 }
0x1193   :  { %v2130_v42 = vadd.f32 %v2129_v13, %v2128_v0  ;;  %v2138_v44 = vrot.slane %v2137_v40, 2 }
0x1195   :  { %v2131_v43 = vrot.slane %v2130_v42, 1  ;;  %v2139_v45 = vadd.f32 %v2138_v44, %v2137_v40 }
0x1197   :  { %v2132_v54 = vadd.f32 %v2131_v43, %v2130_v42  ;;  %v2140_v9 = vrot.slane %v2139_v45, 1 }
0x1199   :  { %v2141_v15 = vadd.f32 %v2140_v9, %v2139_v45  ;;  %v2133_v56 = vadd.f32 %v2132_v54, %v3299_v58 }
0x119b   :  { %v2142_v41 = vadd.f32 %v2141_v15, %v3306_v24 }
0x119d   :  { %v2144_v50 = vsel %vm2143_vm0, %v2133_v56, %v2142_v41 }
0x119e   :  { %2146 = vst.msk [vmem:[%s3381_s9] sm:$0x3] %vm2145_vm1, %v2144_v50 }

// kernel: patchtst_forward.11
= control target key start
LH: loop header
LB: loop body
LE: loop exit
PB: predicated region body
PF: predicated region fallthrough
CT: control target
= control target key end

     0   :  { %vm70_vm0 = vcmask 261120   ;;  %s2372_s21 = smov 120   ;;  %s2373_s22 = smov 88   ;;  %vm93_vm1 = vcmask 64512   ;;  %vm117_vm2 = vcmask 36864   ;;  %vm136_vm3 = vcmask 1041408   ;;  %s3180_s4 = inlined_call_operand.vmem [shape: bf16[32,96], index: 4, kind: input, shape index: {}]   ;;  %s3181_s0 = inlined_call_operand.vmem [shape: bf16[6,5,32], index: 0, kind: input, shape index: {}]   ;;  %s3182_s2 = inlined_call_operand.vmem [shape: f32[1,32], index: 2, kind: input, shape index: {}]   ;;  %s3183_s3 = inlined_call_operand.vmem [shape: f32[1,32], index: 3, kind: input, shape index: {}]   ;;  %s3184_s5 = inlined_call_operand.vmem [shape: f32[1,96], index: 5, kind: input, shape index: {}]   ;;  %s3185_s1 = inlined_call_operand.vmem [shape: bf16[6,4,5,5], index: 1, kind: input, shape index: {}]   ;;  %s3186_s6 = inlined_call_operand.vmem [shape: bf16[32,32], index: 6, kind: input, shape index: {}]   ;;  %s3187_s7 = inlined_call_operand.vmem [shape: f32[1,32], index: 7, kind: input, shape index: {}]   ;;  %s3188_s8 = inlined_call_operand.vmem [shape: bf16[6,5,32], index: 8, kind: output, shape index: {0}]   ;;  %s3189_s9 = inlined_call_operand.vmem [shape: f32[1,2,32], index: 9, kind: output, shape index: {1}]  }
   0x1   :  { %v2440_v0 = vld [vmem:[%s3180_s4 + $0x8] sm:$0xff]  ;;  %v44_v1 = vld [vmem:[%s3181_s0] sm:$0x7]  ;;  %s2374_s23 = smov 96   ;;  %s2375_s24 = smov 72   ;;  %vm137_vm4 = vcmask 1042432  }
   0x2   :  { %v2448_v2 = vld [vmem:[%s3182_s2] ss:$0 sm:$0xff]  ;;  %80 = vmatpush.bf16.msra.mxu0 %v2440_v0  ;;  %v45_v4 = vunpack.c.l.bf16 %v44_v1  ;;  %s2376_s25 = smov 112   ;;  %s2377_s26 = smov 80   ;;  %v2143_v31 = vld [vmem:[%s3185_s1 + $0x4] sm:$0x7] }
   0x3   :  { %v2454_v3 = vld [vmem:[%s3180_s4] sm:$0xff]  ;;  %s2378_s27 = smov 104   ;;  %v189_v33 = vunpack.c.l.bf16 %v2143_v31  ;;  %v2146_v34 = vld [vmem:[%s3185_s1 + $0x8] sm:$0x7]  ;;  %v2149_v48 = vld [vmem:[%s3185_s1 + $0xc] sm:$0x7] }
   0x4   :  { %v2459_v5 = vld [vmem:[%s3183_s3] ss:$0 sm:$0xff]  ;;  %v49_v6 = vmul.f32 %v2448_v2, %v45_v4  ;;  %v260_v38 = vunpack.c.l.bf16 %v2146_v34  ;;  %v331_v49 = vunpack.c.l.bf16 %v2149_v48  ;;  %s2379_s15 = smov 48   ;;  %s2380_s16 = smov 64   ;;  %vm132_vm5 = vcmask 39936  }
   0x5   :  { %v2472_v9 = vld [vmem:[%s3184_s5] ss:$0 sm:$0xff]  ;;  %s2382_s17 = smov 40   ;;  %s2383_s18 = smov 56   ;;  %vm157_vm6 = vcmask 59392   ;;  %vm229_vm9 = vcmask 124992  }
   0x6   :  { %81 = vmatpush.bf16.msra.mxu0 %v2454_v3  ;;  %v2464_v7 = vadd.f32 %v2459_v5, %v49_v6  ;;  %v114_v27 = vld [vmem:[%s3185_s1] sm:$0x7]  ;;  %vm158_vm7 = vsmask.f32 2304  ;;  %s2384_s28 = smov 8   ;;  %s2385_s29 = smov 16  }
   0x7   :  { %v115_v28 = vunpack.c.l.bf16 %v114_v27  ;;  %vm2550_vm8 = vmand %vm157_vm6, %vm158_vm7  ;;  %s2386_s30 = smov 24   ;;  %vm300_vm11 = vcmask 190592   ;;  %vm371_vm13 = vcmask 256192   ;;  %vm411_vm15 = vcmask 256000  }
   0x8   :  { %v54_v8 = vpack.c.bf16 %v2464_v7, %v2464_v7  ;;  %vm2591_vm10 = vmand %vm229_vm9, %vm158_vm7 }
   0x9   :  { %vm2598_vm12 = vmand %vm300_vm11, %vm158_vm7 }
   0xa   :  { %2139 = vmatmul.msk.bf16.vlgmr.msra.gmra.mxu0 %vm70_vm0, %v54_v8  ;;  %v2381_v8 = vmov 65535   ;;  %vm2605_vm14 = vmand %vm371_vm13, %vm158_vm7 }
  0x87   :  { %v83_v10 = vpop.f32.mrf.mxu0 }
  0x88   :  { %v84_v11 = vadd.f32 %v2472_v9, %v83_v10  ;;  %v138_v10 = vsel %vm136_vm3, 4294967295, %v2381_v8  ;;  %vm2637_vm3 = vmand %vm411_vm15, %vm158_vm7 }
  0x8a   :  { %v87_v12 = vpack.c.bf16 %v84_v11, %v84_v11 }
  0x8c   :  { %v89_v13 = vunpack.c.l.b16 %v87_v12 }
  0x8e   :  { %v2475_v14 = vpack.c.b16 %v89_v13, %v89_v13 }
  0x8f   :  { %v85_v15 = vpop.f32.mrf.mxu0 }
  0x90   :  { %163 = vrot.lane.b32.xlu2 %v2475_v14, %s2372_s21  ;;  %165 = vrot.lane.b32.xlu1 %v2475_v14, %s2373_s22  ;;  %v2521_v15 = vsel %vm137_vm4, %v138_v10, 0  ;;  %vm416_vm4 = vcmask 258048  }
  0x91   :  { %91 = vrot.lane.b32.xlu0 %v2475_v14, %s2374_s23 }
  0x98   :  { %307 = vrot.lane.b32.xlu2 %v2475_v14, %s2375_s24  ;;  %234 = vrot.lane.b32.xlu1 %v2475_v14, %s2376_s25 }
  0x99   :  { %236 = vrot.lane.b32.xlu0 %v2475_v14, %s2377_s26 }
  0xa1   :  { %305 = vrot.lane.b32.xlu0 %v2475_v14, %s2378_s27 }
  0xea   :  { %v164_v16 = vpop.permute.xlu2 %163 }
  0xf2   :  { %v308_v17 = vpop.permute.xlu2 %307 }
  0xf3   :  { %v313_v22 = vsel %vm93_vm1, %v308_v17, 0 }
 0x102   :  { %v166_v18 = vpop.permute.xlu1 %165 }
 0x103   :  { %v92_v19 = vpop.permute.xlu0 %91  ;;  %v171_v20 = vsel %vm93_vm1, %v166_v18, 0 }
 0x104   :  { %v98_v21 = vsel %vm93_vm1, %v92_v19, 0  ;;  %180 = vmatpush.bf16.xpose.msra.mxu3 %v171_v20 }
 0x105   :  { %107 = vmatpush.bf16.xpose.msra.mxu1 %v98_v21 }
 0x10a   :  { %v235_v25 = vpop.permute.xlu1 %234 }
 0x10b   :  { %v237_v23 = vpop.permute.xlu0 %236  ;;  %2142 = vmatmul.msk.bf16.vlgmr.msra.gmra.mxu3 %vm93_vm1, %v164_v16 }
 0x10c   :  { %322 = vmatpush.bf16.xpose.msrb.mxu3 %v313_v22  ;;  %2140 = vmatmul.msk.bf16.vlgmr.msra.gmra.mxu1 %vm93_vm1, %v87_v12  ;;  %v242_v24 = vsel %vm93_vm1, %v237_v23, 0 }
 0x10d   :  { %251 = vmatpush.bf16.xpose.msrb.mxu0 %v242_v24 }
 0x113   :  { %v306_v26 = vpop.permute.xlu0 %305 }
 0x114   :  { %2145 = vmatmul.msk.bf16.vlgmr.msrb.gmra.mxu0 %vm93_vm1, %v235_v25 }
 0x11b   :  { %2148 = vmatmul.msk.bf16.vlgmr.msrb.gmra.mxu3 %vm93_vm1, %v306_v26 }
 0x189   :  { %v109_v29 = vpop.f32.mrf.mxu1 }
 0x18a   :  { %v113_v30 = vmul.f32 0.35355338, %v109_v29 }
 0x18c   :  { %v116_v32 = vadd.f32 %v115_v28, %v113_v30 }
 0x18e   :  { %v182_v35 = vpop.f32.mrf.mxu3  ;;  %v118_v36 = vsel %vm117_vm2, %v116_v32, -inf }
 0x18f   :  { %v186_v37 = vmul.f32 0.35355338, %v182_v35  ;;  %119 = vmax.xlane.f32.xlu1 %v118_v36 }
 0x191   :  { %v111_v39 = vpop.f32.mrf.mxu1  ;;  %v253_v40 = vpop.f32.mrf.mxu0  ;;  %v190_v41 = vadd.f32 %v189_v33, %v186_v37  ;;  %v2160_v33 = vld [vmem:[%s3181_s0 + $0x4] sm:$0x7] }
 0x192   :  { %v257_v42 = vmul.f32 0.35355338, %v253_v40 }
 0x193   :  { %v191_v43 = vsel %vm117_vm2, %v190_v41, -inf }
 0x194   :  { %192 = vmax.xlane.f32.xlu0 %v191_v43  ;;  %v261_v44 = vadd.f32 %v260_v38, %v257_v42 }
 0x196   :  { %v184_v45 = vpop.f32.mrf.mxu3  ;;  %v262_v46 = vsel %vm117_vm2, %v261_v44, -inf }
 0x197   :  { %263 = vmax.xlane.f32.xlu2 %v262_v46 }
 0x199   :  { %v255_v47 = vpop.f32.mrf.mxu0 }
 0x19e   :  { %v324_v50 = vpop.f32.mrf.mxu3 }
 0x19f   :  { %v328_v51 = vmul.f32 0.35355338, %v324_v50 }
 0x1a1   :  { %v332_v52 = vadd.f32 %v331_v49, %v328_v51  ;;  %v160_v51 = vld [vmem:[#allocation2] sm:$0x7] }
 0x1a3   :  { %v333_v53 = vsel %vm117_vm2, %v332_v52, -inf }
 0x1a4   :  { %334 = vmax.xlane.f32.xlu2 %v333_v53 }
 0x1a6   :  { %v326_v54 = vpop.f32.mrf.mxu3 }
 0x1a8   :  { %274 = vrot.lane.b32.xlu1 %v2475_v14, %s2379_s15  ;;  %130 = vrot.lane.b32.xlu0 %v2475_v14, %s2380_s16 }
 0x202   :  { %v120_v55 = vpop.xlane.xlu1 %119 }
 0x203   :  { %v121_v56 = vsub.f32 %v116_v32, %v120_v55 }
 0x205   :  { %v122_v57 = vmul.f32 1.442695, %v121_v56 }
 0x207   :  { %2268 = vpow2.f32 %v122_v57  ;;  %v193_v58 = vpop.xlane.xlu0 %192 }
 0x208   :  { %v194_v62 = vsub.f32 %v190_v41, %v193_v58 }
 0x20a   :  { %v264_v59 = vpop.xlane.xlu2 %263  ;;  %v195_v4 = vmul.f32 1.442695, %v194_v62 }
 0x20b   :  { %v265_v60 = vsub.f32 %v261_v44, %v264_v59 }
 0x20d   :  { %v2269_v61 = vpop.eup %2268  ;;  %v266_v63 = vmul.f32 1.442695, %v265_v60 }
 0x20e   :  { %v124_v1 = vsel %vm117_vm2, %v2269_v61, 0.0 }
 0x20f   :  { %2270 = vpow2.f32 %v266_v63  ;;  %125 = vadd.xlane.f32.xlu1 %v124_v1 }
 0x210   :  { %2272 = vpow2.f32 %v195_v4 }
 0x215   :  { %v2271_v6 = vpop.eup %2270 }
 0x216   :  { %v268_v11 = vsel %vm117_vm2, %v2271_v6, 0.0  ;;  %v2273_v19 = vpop.eup %2272 }
 0x217   :  { %269 = vadd.xlane.f32.xlu2 %v268_v11  ;;  %v335_v12 = vpop.xlane.xlu2 %334  ;;  %v197_v22 = vsel %vm117_vm2, %v2273_v19, 0.0 }
 0x218   :  { %v336_v13 = vsub.f32 %v332_v52, %v335_v12 }
 0x21a   :  { %v337_v16 = vmul.f32 1.442695, %v336_v13  ;;  %v275_v17 = vpop.permute.xlu1 %274  ;;  %v131_v18 = vpop.permute.xlu0 %130 }
 0x21b   :  { %v280_v20 = vand.u32 %v275_v17, %v2521_v15  ;;  %v141_v21 = vand.u32 %v2521_v15, %v131_v18  ;;  %v2586_v17 = vld [vmem:[%s3186_s6] sm:$0xff] }
 0x21c   :  { %2274 = vpow2.f32 %v337_v16  ;;  %v2580_v16 = vld [vmem:[%s3186_s6 + $0x8] sm:$0xff] }
 0x21d   :  { %289 = vmatpush.bf16.msrb.mxu1 %v280_v20  ;;  %150 = vmatpush.bf16.msra.mxu2 %v141_v21 }
 0x21e   :  { %398 = vmatpush.bf16.msra.mxu0 %v2580_v16 }
 0x21f   :  { %198 = vadd.xlane.f32.xlu2 %v197_v22 }
 0x221   :  { %449 = vmatpush.bf16.msra.mxu1 %v2440_v0 }
 0x222   :  { %v2275_v23 = vpop.eup %2274  ;;  %399 = vmatpush.bf16.msra.mxu0 %v2586_v17 }
 0x223   :  { %v339_v24 = vsel %vm117_vm2, %v2275_v23, 0.0 }
 0x224   :  { %340 = vadd.xlane.f32.xlu0 %v339_v24 }
 0x225   :  { %450 = vmatpush.bf16.msra.mxu1 %v2454_v3 }
 0x228   :  { %345 = vrot.lane.b32.xlu1 %v2475_v14, %s2382_s17 }
 0x237   :  { %203 = vrot.lane.b32.xlu2 %v2475_v14, %s2383_s18  ;;  %v436_v14 = vunpack.c.l.bf16 %v2160_v33 }
 0x239   :  { %v437_v39 = vmul.f32 %v2448_v2, %v436_v14 }
 0x23b   :  { %v2542_v44 = vadd.f32 %v2459_v5, %v437_v39  ;;  %v2163_v39 = vld [vmem:[%s3185_s1 + $0x10] sm:$0x7] }
 0x23d   :  { %v439_v45 = vpack.c.bf16 %v2542_v44, %v2542_v44 }
 0x282   :  { %v126_v25 = vpop.xlane.xlu1 %125 }
 0x283   :  { %2276 = vrcp.f32 %v126_v25 }
 0x289   :  { %v2277_v26 = vpop.eup %2276 }
 0x28a   :  { %v270_v27 = vpop.xlane.xlu2 %269  ;;  %v128_v28 = vmul.f32 %v2277_v26, %v2269_v61 }
 0x28b   :  { %2278 = vrcp.f32 %v270_v27 }
 0x28c   :  { %v129_v29 = vpack.c.bf16 %v128_v28, %v128_v28 }
 0x28e   :  { %2141 = vmatmul.msk.bf16.vlgmr.msra.gmra.mxu2 %vm132_vm5, %v129_v29 }
 0x291   :  { %v2279_v30 = vpop.eup %2278 }
 0x292   :  { %v272_v31 = vmul.f32 %v2279_v30, %v2271_v6  ;;  %v199_v32 = vpop.xlane.xlu2 %198 }
 0x293   :  { %2280 = vrcp.f32 %v199_v32 }
 0x294   :  { %v273_v34 = vpack.c.bf16 %v272_v31, %v272_v31 }
 0x296   :  { %2147 = vmatmul.msk.bf16.vlgmr.msrb.gmra.mxu1 %vm132_vm5, %v273_v34 }
 0x297   :  { %v341_v42 = vpop.xlane.xlu0 %340 }
 0x298   :  { %2282 = vrcp.f32 %v341_v42 }
 0x299   :  { %v2281_v35 = vpop.eup %2280 }
 0x29a   :  { %v201_v36 = vmul.f32 %v2281_v35, %v2273_v19  ;;  %v346_v37 = vpop.permute.xlu1 %345  ;;  %v204_v38 = vpop.permute.xlu2 %203 }
 0x29b   :  { %v351_v40 = vand.u32 %v346_v37, %v2521_v15  ;;  %v209_v41 = vand.u32 %v204_v38, %v2521_v15 }
 0x29c   :  { %v202_v43 = vpack.c.bf16 %v201_v36, %v201_v36 }
 0x29d   :  { %218 = vmatpush.bf16.msrb.mxu2 %v209_v41 }
 0x29e   :  { %v2283_v46 = vpop.eup %2282 }
 0x29f   :  { %v343_v47 = vmul.f32 %v2283_v46, %v2275_v23  ;;  %v2243_v23 = vld [vmem:[%s3188_s8 + $0x14] sm:$0x7] }
 0x2a0   :  { %2144 = vmatmul.msk.bf16.vlgmr.msrb.gmra.mxu2 %vm132_vm5, %v202_v43 }
 0x2a1   :  { %360 = vmatpush.bf16.msra.mxu2 %v351_v40  ;;  %v344_v48 = vpack.c.bf16 %v343_v47, %v343_v47  ;;  %v484_v40 = vunpack.c.l.bf16 %v2163_v39  ;;  %v2627_v47 = vld [vmem:[%s3187_s7] ss:$0 sm:$0xff] }
 0x2a6   :  { %2161 = vmatmul.msk.bf16.vlgmr.msra.gmra.mxu1 %vm70_vm0, %v439_v45 }
 0x2b0   :  { %2150 = vmatmul.msk.bf16.vlgmr.msra.gmra.mxu2 %vm132_vm5, %v344_v48  ;;  %v2169_v48 = vld [vmem:[%s3185_s1 + $0x18] sm:$0x7] }
 0x311   :  { %v152_v49 = vpop.f32.mrf.mxu2 }
 0x312   :  { %v156_v52 = vpack.c.bf16 %v152_v49, %v152_v49 }
 0x313   :  { %v291_v53 = vpop.f32.mrf.mxu1 }
 0x314   :  { %v161_v54 = vsel %vm2550_vm8, %v156_v52, %v160_v51  ;;  %v295_v6 = vpack.c.bf16 %v291_v53, %v291_v53  ;;  %v618_v52 = vunpack.c.l.bf16 %v2169_v48 }
 0x315   :  { %162 = vst [vmem:[#allocation2] sm:$0x7] %v161_v54 }
 0x319   :  { %v154_v55 = vpop.f32.mrf.mxu2 }
 0x31b   :  { %v293_v56 = vpop.f32.mrf.mxu1 }
 0x31c   :  { %v231_v19 = vld [vmem:[#allocation2] sm:$0x7] }
 0x31d   :  { %v413_v56 = vld [vmem:[%s3188_s8] sm:$0x7] }
 0x323   :  { %v220_v57 = vpop.f32.mrf.mxu2  ;;  %v452_v58 = vpop.f32.mrf.mxu1 }
 0x324   :  { %v224_v59 = vpack.c.bf16 %v220_v57, %v220_v57  ;;  %v453_v60 = vadd.f32 %v2472_v9, %v452_v58 }
 0x326   :  { %v456_v61 = vpack.c.bf16 %v453_v60, %v453_v60  ;;  %226 = vrot.lane.b32.xlu1 %v224_v59, %s2384_s28 }
 0x328   :  { %v458_v62 = vunpack.c.l.b16 %v456_v61 }
 0x32a   :  { %v2558_v63 = vpack.c.b16 %v458_v62, %v458_v62 }
 0x32b   :  { %v222_v1 = vpop.f32.mrf.mxu2  ;;  %v454_v4 = vpop.f32.mrf.mxu1 }
 0x32c   :  { %460 = vrot.lane.b32.xlu2 %v2558_v63, %s2374_s23  ;;  %523 = vrot.lane.b32.xlu0 %v2558_v63, %s2372_s21  ;;  %v2166_v1 = vld [vmem:[%s3185_s1 + $0x14] sm:$0x7] }
 0x32d   :  { %v549_v4 = vunpack.c.l.bf16 %v2166_v1 }
 0x32e   :  { %297 = vrot.lane.b32.xlu1 %v295_v6, %s2385_s29 }
 0x333   :  { %v362_v8 = vpop.f32.mrf.mxu2 }
 0x334   :  { %v366_v10 = vpack.c.bf16 %v362_v8, %v362_v8 }
 0x336   :  { %594 = vrot.lane.b32.xlu1 %v2558_v63, %s2377_s26  ;;  %368 = vrot.lane.b32.xlu2 %v366_v10, %s2386_s30 }
 0x33b   :  { %v364_v11 = vpop.f32.mrf.mxu2 }
 0x33e   :  { %525 = vrot.lane.b32.xlu1 %v2558_v63, %s2373_s22  ;;  %592 = vrot.lane.b32.xlu2 %v2558_v63, %s2376_s25 }
 0x346   :  { %661 = vrot.lane.b32.xlu1 %v2558_v63, %s2378_s27  ;;  %663 = vrot.lane.b32.xlu2 %v2558_v63, %s2375_s24 }
 0x386   :  { %v461_v12 = vpop.permute.xlu2 %460 }
 0x387   :  { %v466_v13 = vsel %vm93_vm1, %v461_v12, 0 }
 0x388   :  { %475 = vmatpush.bf16.xpose.msra.mxu3 %v466_v13  ;;  %v2172_v13 = vld [vmem:[%s3185_s1 + $0x1c] sm:$0x7] }
 0x38f   :  { %2162 = vmatmul.msk.bf16.vlgmr.msra.gmra.mxu3 %vm93_vm1, %v456_v61 }
 0x390   :  { %v369_v22 = vpop.permute.xlu2 %368 }
 0x398   :  { %v227_v20 = vpop.permute.xlu1 %226  ;;  %v593_v27 = vpop.permute.xlu2 %592 }
 0x399   :  { %v232_v21 = vsel %vm2591_vm10, %v227_v20, %v231_v19  ;;  %v687_v19 = vunpack.c.l.bf16 %v2172_v13 }
 0x39a   :  { %233 = vst [vmem:[#allocation2] sm:$0x7] %v232_v21 }
 0x39e   :  { %v524_v37 = vpop.permute.xlu0 %523 }
 0x3a0   :  { %v298_v24 = vpop.permute.xlu1 %297  ;;  %v664_v34 = vpop.permute.xlu2 %663 }
 0x3a1   :  { %v302_v25 = vld [vmem:[#allocation2] sm:$0x7]  ;;  %v669_v36 = vsel %vm93_vm1, %v664_v34, 0 }
 0x3a2   :  { %v303_v26 = vsel %vm2598_vm12, %v298_v24, %v302_v25 }
 0x3a3   :  { %304 = vst [vmem:[#allocation2] sm:$0x7] %v303_v26 }
 0x3a8   :  { %v595_v29 = vpop.permute.xlu1 %594 }
 0x3a9   :  { %v600_v30 = vsel %vm93_vm1, %v595_v29, 0 }
 0x3aa   :  { %v373_v31 = vld [vmem:[#allocation2] sm:$0x7]  ;;  %609 = vmatpush.bf16.xpose.msrb.mxu3 %v600_v30 }
 0x3ab   :  { %v374_v32 = vsel %vm2605_vm14, %v369_v22, %v373_v31 }
 0x3ac   :  { %375 = vst [vmem:[#allocation2] sm:$0x7] %v374_v32 }
 0x3b0   :  { %v526_v33 = vpop.permute.xlu1 %525 }
 0x3b1   :  { %v531_v14 = vsel %vm93_vm1, %v526_v33, 0  ;;  %2168 = vmatmul.msk.bf16.vlgmr.msrb.gmra.mxu3 %vm93_vm1, %v593_v27 }
 0x3b2   :  { %740 = vmatpush.bf16.msra.mxu3 %v2580_v16  ;;  %540 = vmatpush.bf16.xpose.msrb.mxu0 %v531_v14 }
 0x3b3   :  { %v376_v35 = vld [vmem:[#allocation2] sm:$0x7] }
 0x3b4   :  { %2159 = vmatmul.msk.bf16.vlgmr.msra.gmra.mxu0 %vm70_vm0, %v376_v35 }
 0x3b6   :  { %741 = vmatpush.bf16.msra.mxu3 %v2586_v17 }
 0x3b8   :  { %v662_v38 = vpop.permute.xlu1 %661 }
 0x3ba   :  { %678 = vmatpush.bf16.xpose.msra.mxu0 %v669_v36 }
 0x3c4   :  { %2165 = vmatmul.msk.bf16.vlgmr.msrb.gmra.mxu0 %vm93_vm1, %v524_v37 }
 0x3d4   :  { %2171 = vmatmul.msk.bf16.vlgmr.msra.gmra.mxu0 %vm93_vm1, %v662_v38 }
 0x412   :  { %v477_v41 = vpop.f32.mrf.mxu3 }
 0x413   :  { %v481_v42 = vmul.f32 0.35355338, %v477_v41 }
 0x415   :  { %v485_v43 = vadd.f32 %v484_v40, %v481_v42 }
 0x417   :  { %v486_v45 = vsel %vm117_vm2, %v485_v43, -inf }
 0x418   :  { %487 = vmax.xlane.f32.xlu2 %v486_v45 }
 0x41a   :  { %v479_v46 = vpop.f32.mrf.mxu3 }
 0x431   :  { %v401_v49 = vpop.f32.mrf.mxu0 }
 0x432   :  { %v405_v51 = vadd.f32 %v401_v49, %v2464_v7 }
 0x434   :  { %v2634_v53 = vadd.f32 %v2627_v47, %v405_v51  ;;  %v611_v54 = vpop.f32.mrf.mxu3 }
 0x435   :  { %v615_v57 = vmul.f32 0.35355338, %v611_v54 }
 0x436   :  { %v410_v58 = vpack.c.bf16 %v2634_v53, %v2634_v53 }
 0x437   :  { %v619_v7 = vadd.f32 %v618_v52, %v615_v57 }
 0x438   :  { %v414_v59 = vsel %vm2637_vm3, %v410_v58, %v413_v56 }
 0x439   :  { %415 = vst [vmem:[%s3188_s8] sm:$0x7] %v414_v59  ;;  %v403_v60 = vpop.f32.mrf.mxu0  ;;  %v620_v61 = vsel %vm117_vm2, %v619_v7, -inf }
 0x43a   :  { %621 = vmax.xlane.f32.xlu1 %v620_v61  ;;  %v2177_v61 = vld [vmem:[%s3181_s0 + $0x8] sm:$0x7] }
 0x43c   :  { %v613_v62 = vpop.f32.mrf.mxu3 }
 0x43d   :  { %v773_v62 = vunpack.c.l.bf16 %v2177_v61 }
 0x43f   :  { %v774_v1 = vmul.f32 %v2448_v2, %v773_v62 }
 0x441   :  { %v542_v6 = vpop.f32.mrf.mxu0 }
 0x442   :  { %v546_v8 = vmul.f32 0.35355338, %v542_v6 }
 0x444   :  { %v550_v10 = vadd.f32 %v549_v4, %v546_v8  ;;  %v2683_v4 = vadd.f32 %v2459_v5, %v774_v1 }
 0x446   :  { %v551_v11 = vsel %vm117_vm2, %v550_v10, -inf }
 0x447   :  { %552 = vmax.xlane.f32.xlu0 %v551_v11 }
 0x449   :  { %v544_v12 = vpop.f32.mrf.mxu0 }
 0x451   :  { %v680_v20 = vpop.f32.mrf.mxu0 }
 0x452   :  { %v684_v21 = vmul.f32 0.35355338, %v680_v20 }
 0x454   :  { %v688_v22 = vadd.f32 %v687_v19, %v684_v21 }
 0x456   :  { %v689_v24 = vsel %vm117_vm2, %v688_v22, -inf }
 0x457   :  { %690 = vmax.xlane.f32.xlu2 %v689_v24 }
 0x459   :  { %v682_v25 = vpop.f32.mrf.mxu0 }
 0x45a   :  { %v520_v25 = vld [vmem:[#allocation2] sm:$0x7] }
 0x45b   :  { %632 = vrot.lane.b32.xlu0 %v2558_v63, %s2379_s15 }
 0x46f   :  { %498 = vrot.lane.b32.xlu2 %v2558_v63, %s2380_s16 }
 0x477   :  { %701 = vrot.lane.b32.xlu2 %v2558_v63, %s2382_s17 }
 0x48b   :  { %v488_v26 = vpop.xlane.xlu2 %487 }
 0x48c   :  { %v489_v27 = vsub.f32 %v485_v43, %v488_v26 }
 0x48e   :  { %v490_v29 = vmul.f32 1.442695, %v489_v27 }
 0x490   :  { %2284 = vpow2.f32 %v490_v29 }
 0x496   :  { %v2285_v30 = vpop.eup %2284 }
 0x497   :  { %v492_v31 = vsel %vm117_vm2, %v2285_v30, 0.0 }
 0x498   :  { %493 = vadd.xlane.f32.xlu1 %v492_v31 }
 0x4ad   :  { %v622_v32 = vpop.xlane.xlu1 %621 }
 0x4ae   :  { %v623_v33 = vsub.f32 %v619_v7, %v622_v32 }
 0x4b0   :  { %v624_v34 = vmul.f32 1.442695, %v623_v33 }
 0x4b2   :  { %2286 = vpow2.f32 %v624_v34 }
 0x4b8   :  { %v2287_v14 = vpop.eup %2286 }
 0x4b9   :  { %v626_v35 = vsel %vm117_vm2, %v2287_v14, 0.0 }
 0x4ba   :  { %627 = vadd.xlane.f32.xlu1 %v626_v35  ;;  %v553_v36 = vpop.xlane.xlu0 %552 }
 0x4bb   :  { %v554_v37 = vsub.f32 %v550_v10, %v553_v36 }
 0x4bd   :  { %v555_v38 = vmul.f32 1.442695, %v554_v37 }
 0x4bf   :  { %2288 = vpow2.f32 %v555_v38 }
 0x4c5   :  { %v2289_v39 = vpop.eup %2288 }
 0x4c6   :  { %v557_v40 = vsel %vm117_vm2, %v2289_v39, 0.0 }
 0x4c7   :  { %558 = vadd.xlane.f32.xlu1 %v557_v40 }
 0x4ca   :  { %v691_v41 = vpop.xlane.xlu2 %690 }
 0x4cb   :  { %v692_v42 = vsub.f32 %v688_v22, %v691_v41 }
 0x4cd   :  { %v693_v43 = vmul.f32 1.442695, %v692_v42  ;;  %v633_v45 = vpop.permute.xlu0 %632 }
 0x4ce   :  { %v638_v49 = vand.u32 %v633_v45, %v2521_v15 }
 0x4cf   :  { %2290 = vpow2.f32 %v693_v43 }
 0x4d2   :  { %v499_v46 = vpop.permute.xlu2 %498 }
 0x4d3   :  { %v504_v48 = vand.u32 %v499_v46, %v2521_v15 }
 0x4d5   :  { %v2291_v51 = vpop.eup %2290  ;;  %513 = vmatpush.bf16.msrb.mxu2 %v504_v48 }
 0x4d6   :  { %v695_v52 = vsel %vm117_vm2, %v2291_v51, 0.0 }
 0x4d7   :  { %696 = vadd.xlane.f32.xlu0 %v695_v52 }
 0x4d9   :  { %647 = vmatpush.bf16.msra.mxu2 %v638_v49 }
 0x4da   :  { %v702_v8 = vpop.permute.xlu2 %701 }
 0x4db   :  { %v707_v13 = vand.u32 %v702_v8, %v2521_v15 }
 0x4e0   :  { %563 = vrot.lane.b32.xlu1 %v2558_v63, %s2383_s18 }
 0x50b   :  { %v494_v54 = vpop.xlane.xlu1 %493 }
 0x50c   :  { %2292 = vrcp.f32 %v494_v54 }
 0x512   :  { %v2293_v56 = vpop.eup %2292 }
 0x513   :  { %v496_v57 = vmul.f32 %v2293_v56, %v2285_v30 }
 0x515   :  { %v497_v58 = vpack.c.bf16 %v496_v57, %v496_v57 }
 0x517   :  { %2164 = vmatmul.msk.bf16.vlgmr.msrb.gmra.mxu2 %vm132_vm5, %v497_v58 }
 0x518   :  { %786 = vmatpush.bf16.msrb.mxu2 %v2440_v0  ;;  %v776_v0 = vpack.c.bf16 %v2683_v4, %v2683_v4 }
 0x51c   :  { %787 = vmatpush.bf16.msrb.mxu2 %v2454_v3 }
 0x52d   :  { %v628_v7 = vpop.xlane.xlu1 %627 }
 0x52e   :  { %2294 = vrcp.f32 %v628_v7 }
 0x534   :  { %v2295_v59 = vpop.eup %2294 }
 0x535   :  { %v630_v60 = vmul.f32 %v2295_v59, %v2287_v14 }
 0x537   :  { %v631_v63 = vpack.c.bf16 %v630_v60, %v630_v60 }
 0x539   :  { %2170 = vmatmul.msk.bf16.vlgmr.msra.gmra.mxu2 %vm132_vm5, %v631_v63 }
 0x53a   :  { %v559_v3 = vpop.xlane.xlu1 %558 }
 0x53b   :  { %2296 = vrcp.f32 %v559_v3 }
 0x541   :  { %v2297_v6 = vpop.eup %2296 }
 0x542   :  { %v561_v10 = vmul.f32 %v2297_v6, %v2289_v39  ;;  %v2180_v6 = vld [vmem:[%s3185_s1 + $0x20] sm:$0x7] }
 0x543   :  { %v821_v8 = vunpack.c.l.bf16 %v2180_v6 }
 0x544   :  { %v562_v2 = vpack.c.bf16 %v561_v10, %v561_v10 }
 0x549   :  { %2178 = vmatmul.msk.bf16.vlgmr.msrb.gmra.mxu2 %vm70_vm0, %v776_v0 }
 0x54a   :  { %v697_v19 = vpop.xlane.xlu0 %696 }
 0x54b   :  { %2298 = vrcp.f32 %v697_v19  ;;  %v2186_v19 = vld [vmem:[%s3185_s1 + $0x28] sm:$0x7] }
 0x551   :  { %v2299_v5 = vpop.eup %2298 }
 0x552   :  { %v564_v11 = vpop.permute.xlu1 %563  ;;  %v699_v20 = vmul.f32 %v2299_v5, %v2291_v51  ;;  %v955_v5 = vunpack.c.l.bf16 %v2186_v19 }
 0x553   :  { %v569_v12 = vand.u32 %v564_v11, %v2521_v15 }
 0x554   :  { %v700_v21 = vpack.c.bf16 %v699_v20, %v699_v20 }
 0x555   :  { %578 = vmatpush.bf16.msrb.mxu1 %v569_v12 }
 0x558   :  { %2167 = vmatmul.msk.bf16.vlgmr.msrb.gmra.mxu1 %vm132_vm5, %v562_v2 }
 0x559   :  { %716 = vmatpush.bf16.msra.mxu1 %v707_v13 }
 0x568   :  { %2173 = vmatmul.msk.bf16.vlgmr.msra.gmra.mxu1 %vm132_vm5, %v700_v21 }
 0x59a   :  { %v515_v22 = vpop.f32.mrf.mxu2 }
 0x59b   :  { %v519_v24 = vpack.c.bf16 %v515_v22, %v515_v22 }
 0x59d   :  { %v521_v26 = vsel %vm2550_vm8, %v519_v24, %v520_v25  ;;  %v425_v25 = vmul.f32 %v2634_v53, %v2634_v53 }
 0x59e   :  { %522 = vst [vmem:[#allocation2] sm:$0x7] %v521_v26  ;;  %v417_v26 = vsel %vm416_vm4, %v2634_v53, 0.0 }
 0x5a2   :  { %v517_v27 = vpop.f32.mrf.mxu2 }
 0x5a5   :  { %v589_v42 = vld [vmem:[#allocation2] sm:$0x7] }
 0x5bc   :  { %v649_v29 = vpop.f32.mrf.mxu2 }
 0x5bd   :  { %v653_v39 = vpack.c.bf16 %v649_v29, %v649_v29  ;;  %v426_v29 = vsel %vm416_vm4, %v425_v25, 0.0 }
 0x5c4   :  { %v651_v30 = vpop.f32.mrf.mxu2 }
 0x5c5   :  { %v418_v30 = vrot.slane %v417_v26, 4 }
 0x5cc   :  { %v789_v31 = vpop.f32.mrf.mxu2 }
 0x5cd   :  { %v790_v32 = vadd.f32 %v2472_v9, %v789_v31  ;;  %v427_v31 = vrot.slane %v426_v29, 4 }
 0x5cf   :  { %v793_v33 = vpack.c.bf16 %v790_v32, %v790_v32  ;;  %v419_v32 = vadd.f32 %v418_v30, %v417_v26 }
 0x5d1   :  { %v795_v34 = vunpack.c.l.b16 %v793_v33 }
 0x5d3   :  { %v2695_v14 = vpack.c.b16 %v795_v34, %v795_v34 }
 0x5d4   :  { %v791_v35 = vpop.f32.mrf.mxu2 }
 0x5d5   :  { %v580_v36 = vpop.f32.mrf.mxu1  ;;  %1000 = vrot.lane.b32.xlu0 %v2695_v14, %s2375_s24  ;;  %v428_v35 = vadd.f32 %v427_v31, %v426_v29 }
 0x5d6   :  { %v584_v37 = vpack.c.bf16 %v580_v36, %v580_v36 }
 0x5d8   :  { %586 = vrot.lane.b32.xlu2 %v584_v37, %s2384_s28  ;;  %v420_v37 = vrot.slane %v419_v32, 2 }
 0x5dd   :  { %v582_v38 = vpop.f32.mrf.mxu1 }
 0x5de   :  { %v2175_v38 = vld [vmem:[%s3188_s8 + $0x4] sm:$0x7] }
 0x5e0   :  { %655 = vrot.lane.b32.xlu2 %v653_v39, %s2385_s29 }
 0x5e5   :  { %v718_v40 = vpop.f32.mrf.mxu1 }
 0x5e6   :  { %v722_v41 = vpack.c.bf16 %v718_v40, %v718_v40 }
 0x5e8   :  { %797 = vrot.lane.b32.xlu2 %v2695_v14, %s2374_s23  ;;  %724 = vrot.lane.b32.xlu1 %v722_v41, %s2386_s30  ;;  %v429_v41 = vrot.slane %v428_v35, 2 }
 0x5ed   :  { %v720_v9 = vpop.f32.mrf.mxu1 }
 0x5f0   :  { %931 = vrot.lane.b32.xlu2 %v2695_v14, %s2377_s26  ;;  %862 = vrot.lane.b32.xlu1 %v2695_v14, %s2373_s22 }
 0x5f8   :  { %929 = vrot.lane.b32.xlu2 %v2695_v14, %s2376_s25  ;;  %860 = vrot.lane.b32.xlu1 %v2695_v14, %s2372_s21 }
 0x600   :  { %998 = vrot.lane.b32.xlu1 %v2695_v14, %s2378_s27 }
 0x632   :  { %v587_v43 = vpop.permute.xlu2 %586 }
 0x633   :  { %v590_v45 = vsel %vm2591_vm10, %v587_v43, %v589_v42 }
 0x634   :  { %591 = vst [vmem:[#allocation2] sm:$0x7] %v590_v45 }
 0x63a   :  { %v656_v46 = vpop.permute.xlu2 %655 }
 0x63b   :  { %v658_v48 = vld [vmem:[#allocation2] sm:$0x7] }
 0x63c   :  { %v659_v49 = vsel %vm2598_vm12, %v656_v46, %v658_v48 }
 0x63d   :  { %660 = vst [vmem:[#allocation2] sm:$0x7] %v659_v49  ;;  %v430_v49 = vadd.f32 %v429_v41, %v428_v35 }
 0x642   :  { %v798_v51 = vpop.permute.xlu2 %797 }
 0x643   :  { %v803_v52 = vsel %vm93_vm1, %v798_v51, 0 }
 0x644   :  { %812 = vmatpush.bf16.xpose.msrb.mxu0 %v803_v52  ;;  %v727_v57 = vld [vmem:[#allocation2] sm:$0x7] }
 0x647   :  { %v1001_v60 = vpop.permute.xlu0 %1000 }
 0x648   :  { %v1006_v1 = vsel %vm93_vm1, %v1001_v60, 0 }
 0x64a   :  { %v932_v54 = vpop.permute.xlu2 %931 }
 0x64b   :  { %v937_v56 = vsel %vm93_vm1, %v932_v54, 0  ;;  %2179 = vmatmul.msk.bf16.vlgmr.msrb.gmra.mxu0 %vm93_vm1, %v793_v33 }
 0x64c   :  { %946 = vmatpush.bf16.xpose.msra.mxu0 %v937_v56 }
 0x652   :  { %v930_v58 = vpop.permute.xlu2 %929 }
 0x654   :  { %1077 = vmatpush.bf16.msrb.mxu0 %v2580_v16 }
 0x658   :  { %1078 = vmatpush.bf16.msrb.mxu0 %v2586_v17 }
 0x65a   :  { %v725_v7 = vpop.permute.xlu1 %724 }
 0x65b   :  { %v728_v59 = vsel %vm2605_vm14, %v725_v7, %v727_v57  ;;  %2185 = vmatmul.msk.bf16.vlgmr.msra.gmra.mxu0 %vm93_vm1, %v930_v58  ;;  %v2183_v58 = vld [vmem:[%s3185_s1 + $0x24] sm:$0x7]  ;;  %v431_v7 = vrot.slane %v430_v49, 1 }
 0x65c   :  { %729 = vst [vmem:[#allocation2] sm:$0x7] %v728_v59 }
 0x65d   :  { %v432_v6 = vadd.f32 %v431_v7, %v430_v49 }
 0x662   :  { %v863_v61 = vpop.permute.xlu1 %862 }
 0x663   :  { %v730_v63 = vld [vmem:[#allocation2] sm:$0x7]  ;;  %v868_v62 = vsel %vm93_vm1, %v863_v61, 0  ;;  %v886_v61 = vunpack.c.l.bf16 %v2183_v58 }
 0x664   :  { %2174 = vmatmul.msk.bf16.vlgmr.msra.gmra.mxu3 %vm70_vm0, %v730_v63 }
 0x665   :  { %877 = vmatpush.bf16.xpose.msrb.mxu3 %v868_v62 }
 0x66a   :  { %v861_v0 = vpop.permute.xlu1 %860 }
 0x66d   :  { %1015 = vmatpush.bf16.xpose.msra.mxu3 %v1006_v1 }
 0x672   :  { %v999_v3 = vpop.permute.xlu1 %998 }
 0x674   :  { %2182 = vmatmul.msk.bf16.vlgmr.msrb.gmra.mxu3 %vm93_vm1, %v861_v0 }
 0x684   :  { %2188 = vmatmul.msk.bf16.vlgmr.msra.gmra.mxu3 %vm93_vm1, %v999_v3 }
 0x6c8   :  { %v814_v10 = vpop.f32.mrf.mxu0 }
 0x6c9   :  { %v818_v11 = vmul.f32 0.35355338, %v814_v10 }
 0x6cb   :  { %v2734_v12 = vadd.f32 %v821_v8, %v818_v11 }
 0x6cd   :  { %v823_v13 = vsel %vm117_vm2, %v2734_v12, -inf }
 0x6ce   :  { %824 = vmax.xlane.f32.xlu2 %v823_v13 }
 0x6d0   :  { %v816_v2 = vpop.f32.mrf.mxu0 }
 0x6d8   :  { %v948_v20 = vpop.f32.mrf.mxu0 }
 0x6d9   :  { %v952_v21 = vmul.f32 0.35355338, %v948_v20 }
 0x6db   :  { %v2741_v22 = vadd.f32 %v955_v5, %v952_v21  ;;  %v2189_v5 = vld [vmem:[%s3185_s1 + $0x2c] sm:$0x7] }
 0x6dc   :  { %v1024_v20 = vunpack.c.l.bf16 %v2189_v5 }
 0x6dd   :  { %v957_v24 = vsel %vm117_vm2, %v2741_v22, -inf }
 0x6de   :  { %958 = vmax.xlane.f32.xlu1 %v957_v24 }
 0x6e0   :  { %v950_v27 = vpop.f32.mrf.mxu0 }
 0x6e7   :  { %v743_v33 = vpop.f32.mrf.mxu3 }
 0x6e8   :  { %v747_v34 = vadd.f32 %v743_v33, %v2542_v44  ;;  %v421_v44 = vadd.f32 %v420_v37, %v419_v32 }
 0x6ea   :  { %v748_v36 = vadd.f32 %v2627_v47, %v747_v34  ;;  %v422_v54 = vrot.slane %v421_v44, 1 }
 0x6ec   :  { %v749_v39 = vpack.c.bf16 %v748_v36, %v748_v36  ;;  %v754_v53 = vsel %vm416_vm4, %v748_v36, 0.0  ;;  %v762_v40 = vmul.f32 %v748_v36, %v748_v36  ;;  %v423_v63 = vadd.f32 %v422_v54, %v421_v44 }
 0x6ed   :  { %v755_v9 = vrot.slane %v754_v53, 4 }
 0x6ee   :  { %v752_v42 = vsel %vm2637_vm3, %v749_v39, %v2175_v38  ;;  %v763_v43 = vsel %vm416_vm4, %v762_v40, 0.0 }
 0x6ef   :  { %2176 = vst [vmem:[%s3188_s8 + $0x4] sm:$0x7] %v752_v42  ;;  %v756_v45 = vadd.f32 %v755_v9, %v754_v53  ;;  %v764_v46 = vrot.slane %v763_v43, 4  ;;  %v745_v48 = vpop.f32.mrf.mxu3 }
 0x6f1   :  { %v757_v51 = vrot.slane %v756_v45, 2  ;;  %v765_v52 = vadd.f32 %v764_v46, %v763_v43 }
 0x6f3   :  { %v758_v56 = vadd.f32 %v757_v51, %v756_v45  ;;  %v766_v57 = vrot.slane %v765_v52, 2 }
 0x6f5   :  { %v759_v59 = vrot.slane %v758_v56, 1  ;;  %v767_v60 = vadd.f32 %v766_v57, %v765_v52 }
 0x6f7   :  { %v760_v62 = vadd.f32 %v759_v59, %v758_v56  ;;  %v768_v1 = vrot.slane %v767_v60, 1  ;;  %v879_v0 = vpop.f32.mrf.mxu3 }
 0x6f8   :  { %v883_v3 = vmul.f32 0.35355338, %v879_v0  ;;  %v2805_v0 = vld [vmem:[%s3180_s4] sm:$0xff] }
 0x6f9   :  { %v2765_v8 = vadd.f32 %v760_v62, %v423_v63  ;;  %v769_v10 = vadd.f32 %v768_v1, %v767_v60  ;;  %v2798_v63 = vld [vmem:[%s3180_s4 + $0x8] sm:$0xff] }
 0x6fa   :  { %v887_v11 = vadd.f32 %v886_v61, %v883_v3  ;;  %v2194_v61 = vld [vmem:[%s3181_s0 + $0xc] sm:$0x7]  ;;  %v2811_v3 = vld [vmem:[%s3182_s2] ss:$0 sm:$0xff] }
 0x6fb   :  { %v2767_v13 = vadd.f32 %v769_v10, %v432_v6  ;;  %v1110_v62 = vunpack.c.l.bf16 %v2194_v61 }
 0x6fc   :  { %v888_v2 = vsel %vm117_vm2, %v887_v11, -inf }
 0x6fd   :  { %889 = vmax.xlane.f32.xlu0 %v888_v2  ;;  %v1111_v6 = vmul.f32 %v2811_v3, %v1110_v62 }
 0x6ff   :  { %v881_v19 = vpop.f32.mrf.mxu3 }
 0x707   :  { %v1017_v21 = vpop.f32.mrf.mxu3 }
 0x708   :  { %v1021_v24 = vmul.f32 0.35355338, %v1017_v21 }
 0x70a   :  { %v1025_v25 = vadd.f32 %v1024_v20, %v1021_v24 }
 0x70c   :  { %v1026_v26 = vsel %vm117_vm2, %v1025_v25, -inf }
 0x70d   :  { %1027 = vmax.xlane.f32.xlu2 %v1026_v26 }
 0x70f   :  { %v1019_v27 = vpop.f32.mrf.mxu3 }
 0x711   :  { %900 = vrot.lane.b32.xlu0 %v2695_v14, %s2383_s18 }
 0x725   :  { %835 = vrot.lane.b32.xlu2 %v2695_v14, %s2380_s16 }
 0x741   :  { %v825_v29 = vpop.xlane.xlu2 %824 }
 0x742   :  { %v826_v30 = vsub.f32 %v2734_v12, %v825_v29 }
 0x744   :  { %v827_v31 = vmul.f32 1.442695, %v826_v30 }
 0x746   :  { %2300 = vpow2.f32 %v827_v31 }
 0x74c   :  { %v2301_v32 = vpop.eup %2300 }
 0x74d   :  { %v829_v33 = vsel %vm117_vm2, %v2301_v32, 0.0 }
 0x74e   :  { %830 = vadd.xlane.f32.xlu1 %v829_v33 }
 0x751   :  { %v959_v34 = vpop.xlane.xlu1 %958 }
 0x752   :  { %v960_v35 = vsub.f32 %v2741_v22, %v959_v34 }
 0x754   :  { %v961_v36 = vmul.f32 1.442695, %v960_v35 }
 0x756   :  { %2302 = vpow2.f32 %v961_v36 }
 0x75c   :  { %v2303_v37 = vpop.eup %2302 }
 0x75d   :  { %v963_v38 = vsel %vm117_vm2, %v2303_v37, 0.0 }
 0x75e   :  { %964 = vadd.xlane.f32.xlu1 %v963_v38 }
 0x770   :  { %v890_v39 = vpop.xlane.xlu0 %889 }
 0x771   :  { %v891_v53 = vsub.f32 %v887_v11, %v890_v39  ;;  %v2817_v11 = vld [vmem:[%s3183_s3] ss:$0 sm:$0xff] }
 0x772   :  { %v2820_v2 = vadd.f32 %v2817_v11, %v1111_v6  ;;  %v2834_v39 = vld [vmem:[%s3184_s5] ss:$0 sm:$0xff] }
 0x773   :  { %v892_v40 = vmul.f32 1.442695, %v891_v53 }
 0x774   :  { %v1113_v20 = vpack.c.bf16 %v2820_v2, %v2820_v2 }
 0x775   :  { %2304 = vpow2.f32 %v892_v40 }
 0x777   :  { %969 = vrot.lane.b32.xlu1 %v2695_v14, %s2379_s15 }
 0x77b   :  { %v2305_v12 = vpop.eup %2304 }
 0x77c   :  { %v894_v41 = vsel %vm117_vm2, %v2305_v12, 0.0 }
 0x77d   :  { %895 = vadd.xlane.f32.xlu0 %v894_v41 }
 0x780   :  { %v1028_v9 = vpop.xlane.xlu2 %1027 }
 0x781   :  { %v1029_v42 = vsub.f32 %v1025_v25, %v1028_v9 }
 0x783   :  { %v1030_v22 = vmul.f32 1.442695, %v1029_v42  ;;  %v901_v43 = vpop.permute.xlu0 %900 }
 0x784   :  { %v906_v44 = vand.u32 %v901_v43, %v2521_v15 }
 0x785   :  { %2306 = vpow2.f32 %v1030_v22 }
 0x786   :  { %915 = vmatpush.bf16.msra.mxu2 %v906_v44 }
 0x788   :  { %v836_v45 = vpop.permute.xlu2 %835 }
 0x789   :  { %v841_v46 = vand.u32 %v836_v45, %v2521_v15 }
 0x78b   :  { %v2307_v48 = vpop.eup %2306  ;;  %850 = vmatpush.bf16.msrb.mxu1 %v841_v46 }
 0x78c   :  { %v1032_v49 = vsel %vm117_vm2, %v2307_v48, 0.0 }
 0x78d   :  { %1033 = vadd.xlane.f32.xlu2 %v1032_v49 }
 0x791   :  { %1038 = vrot.lane.b32.xlu0 %v2695_v14, %s2382_s17 }
 0x7c1   :  { %v831_v51 = vpop.xlane.xlu1 %830 }
 0x7c2   :  { %2308 = vrcp.f32 %v831_v51 }
 0x7c8   :  { %v2309_v52 = vpop.eup %2308 }
 0x7c9   :  { %v833_v54 = vmul.f32 %v2309_v52, %v2301_v32  ;;  %v857_v32 = vld [vmem:[#allocation2] sm:$0x7] }
 0x7cb   :  { %v834_v56 = vpack.c.bf16 %v833_v54, %v833_v54 }
 0x7cd   :  { %2181 = vmatmul.msk.bf16.vlgmr.msrb.gmra.mxu1 %vm132_vm5, %v834_v56 }
 0x7d1   :  { %v965_v57 = vpop.xlane.xlu1 %964 }
 0x7d2   :  { %2310 = vrcp.f32 %v965_v57 }
 0x7d8   :  { %v2311_v58 = vpop.eup %2310 }
 0x7d9   :  { %v967_v7 = vmul.f32 %v2311_v58, %v2303_v37 }
 0x7db   :  { %v968_v14 = vpack.c.bf16 %v967_v7, %v967_v7 }
 0x7e9   :  { %v970_v59 = vpop.permute.xlu1 %969 }
 0x7ea   :  { %v975_v60 = vand.u32 %v970_v59, %v2521_v15 }
 0x7ec   :  { %984 = vmatpush.bf16.msra.mxu1 %v975_v60 }
 0x7ef   :  { %2187 = vmatmul.msk.bf16.vlgmr.msra.gmra.mxu1 %vm132_vm5, %v968_v14 }
 0x7f0   :  { %1123 = vmatpush.bf16.msrb.mxu1 %v2798_v63  ;;  %v896_v1 = vpop.xlane.xlu0 %895 }
 0x7f1   :  { %2312 = vrcp.f32 %v896_v1 }
 0x7f4   :  { %1124 = vmatpush.bf16.msrb.mxu1 %v2805_v0 }
 0x7f7   :  { %v2313_v10 = vpop.eup %2312 }
 0x7f8   :  { %v898_v19 = vmul.f32 %v2313_v10, %v2305_v12 }
 0x7fa   :  { %v899_v5 = vpack.c.bf16 %v898_v19, %v898_v19 }
 0x7fc   :  { %2184 = vmatmul.msk.bf16.vlgmr.msra.gmra.mxu2 %vm132_vm5, %v899_v5 }
 0x7ff   :  { %2195 = vmatmul.msk.bf16.vlgmr.msrb.gmra.mxu1 %vm70_vm0, %v1113_v20 }
 0x800   :  { %v1034_v21 = vpop.xlane.xlu2 %1033 }
 0x801   :  { %2314 = vrcp.f32 %v1034_v21 }
 0x803   :  { %v1039_v24 = vpop.permute.xlu0 %1038 }
 0x804   :  { %v1044_v25 = vand.u32 %v1039_v24, %v2521_v15 }
 0x806   :  { %1053 = vmatpush.bf16.msrb.mxu2 %v1044_v25 }
 0x807   :  { %v2315_v26 = vpop.eup %2314 }
 0x808   :  { %v1036_v27 = vmul.f32 %v2315_v26, %v2307_v48 }
 0x80a   :  { %v1037_v29 = vpack.c.bf16 %v1036_v27, %v1036_v27 }
 0x80c   :  { %2190 = vmatmul.msk.bf16.vlgmr.msrb.gmra.mxu2 %vm132_vm5, %v1037_v29 }
 0x84a   :  { %v852_v30 = vpop.f32.mrf.mxu1 }
 0x84b   :  { %v856_v31 = vpack.c.bf16 %v852_v30, %v852_v30 }
 0x84d   :  { %v858_v33 = vsel %vm2550_vm8, %v856_v31, %v857_v32 }
 0x84e   :  { %859 = vst [vmem:[#allocation2] sm:$0x7] %v858_v33  ;;  %v2192_v33 = vld [vmem:[%s3188_s8 + $0x8] sm:$0x7] }
 0x852   :  { %v854_v34 = vpop.f32.mrf.mxu1 }
 0x855   :  { %v926_v48 = vld [vmem:[#allocation2] sm:$0x7] }
 0x86c   :  { %v986_v35 = vpop.f32.mrf.mxu1 }
 0x86d   :  { %v990_v36 = vpack.c.bf16 %v986_v35, %v986_v35 }
 0x86f   :  { %992 = vrot.lane.b32.xlu0 %v990_v36, %s2385_s29 }
 0x874   :  { %v988_v37 = vpop.f32.mrf.mxu1 }
 0x87c   :  { %v1126_v38 = vpop.f32.mrf.mxu1 }
 0x87d   :  { %v1127_v53 = vadd.f32 %v2834_v39, %v1126_v38 }
 0x87f   :  { %v1130_v40 = vpack.c.bf16 %v1127_v53, %v1127_v53  ;;  %v917_v12 = vpop.f32.mrf.mxu2 }
 0x880   :  { %v921_v41 = vpack.c.bf16 %v917_v12, %v917_v12 }
 0x881   :  { %v1132_v9 = vunpack.c.l.b16 %v1130_v40 }
 0x882   :  { %923 = vrot.lane.b32.xlu1 %v921_v41, %s2384_s28 }
 0x883   :  { %v2838_v42 = vpack.c.b16 %v1132_v9, %v1132_v9 }
 0x884   :  { %v1128_v22 = vpop.f32.mrf.mxu1 }
 0x885   :  { %1197 = vrot.lane.b32.xlu2 %v2838_v42, %s2372_s21 }
 0x887   :  { %v919_v43 = vpop.f32.mrf.mxu2 }
 0x88a   :  { %1134 = vrot.lane.b32.xlu1 %v2838_v42, %s2374_s23 }
 0x88f   :  { %v1055_v44 = vpop.f32.mrf.mxu2 }
 0x890   :  { %v1059_v45 = vpack.c.bf16 %v1055_v44, %v1055_v44 }
 0x892   :  { %1061 = vrot.lane.b32.xlu0 %v1059_v45, %s2386_s30  ;;  %1268 = vrot.lane.b32.xlu1 %v2838_v42, %s2377_s26 }
 0x897   :  { %v1057_v46 = vpop.f32.mrf.mxu2 }
 0x89a   :  { %1266 = vrot.lane.b32.xlu0 %v2838_v42, %s2376_s25  ;;  %1199 = vrot.lane.b32.xlu1 %v2838_v42, %s2373_s22 }
 0x8a2   :  { %1337 = vrot.lane.b32.xlu0 %v2838_v42, %s2375_s24  ;;  %1335 = vrot.lane.b32.xlu1 %v2838_v42, %s2378_s27 }
 0x8df   :  { %v1198_v20 = vpop.permute.xlu2 %1197 }
 0x8e1   :  { %v993_v52 = vpop.permute.xlu0 %992 }
 0x8f4   :  { %v924_v49 = vpop.permute.xlu1 %923 }
 0x8f5   :  { %v927_v51 = vsel %vm2591_vm10, %v924_v49, %v926_v48  ;;  %v2200_v48 = vld [vmem:[%s3185_s1 + $0x34] sm:$0x7] }
 0x8f6   :  { %928 = vst [vmem:[#allocation2] sm:$0x7] %v927_v51 }
 0x8fc   :  { %v1135_v54 = vpop.permute.xlu1 %1134 }
 0x8fd   :  { %v995_v56 = vld [vmem:[#allocation2] sm:$0x7]  ;;  %v1140_v57 = vsel %vm93_vm1, %v1135_v54, 0  ;;  %v1223_v54 = vunpack.c.l.bf16 %v2200_v48 }
 0x8fe   :  { %1149 = vmatpush.bf16.xpose.msrb.mxu3 %v1140_v57  ;;  %v996_v58 = vsel %vm2598_vm12, %v993_v52, %v995_v56 }
 0x8ff   :  { %997 = vst [vmem:[#allocation2] sm:$0x7] %v996_v58 }
 0x904   :  { %v1062_v7 = vpop.permute.xlu0 %1061  ;;  %v1269_v59 = vpop.permute.xlu1 %1268 }
 0x905   :  { %v1274_v60 = vsel %vm93_vm1, %v1269_v59, 0  ;;  %2196 = vmatmul.msk.bf16.vlgmr.msrb.gmra.mxu3 %vm93_vm1, %v1130_v40 }
 0x906   :  { %v1064_v61 = vld [vmem:[#allocation2] sm:$0x7]  ;;  %1283 = vmatpush.bf16.xpose.msra.mxu3 %v1274_v60 }
 0x907   :  { %v1065_v14 = vsel %vm2605_vm14, %v1062_v7, %v1064_v61 }
 0x908   :  { %1066 = vst [vmem:[#allocation2] sm:$0x7] %v1065_v14 }
 0x90c   :  { %v1267_v62 = vpop.permute.xlu0 %1266  ;;  %v1200_v1 = vpop.permute.xlu1 %1199 }
 0x90d   :  { %v1205_v6 = vsel %vm93_vm1, %v1200_v1, 0 }
 0x90e   :  { %1414 = vmatpush.bf16.msrb.mxu3 %v2580_v16  ;;  %1214 = vmatpush.bf16.xpose.msra.mxu0 %v1205_v6 }
 0x90f   :  { %v1067_v10 = vld [vmem:[#allocation2] sm:$0x7] }
 0x910   :  { %2191 = vmatmul.msk.bf16.vlgmr.msrb.gmra.mxu0 %vm70_vm0, %v1067_v10 }
 0x912   :  { %1415 = vmatpush.bf16.msrb.mxu3 %v2586_v17  ;;  %v2197_v17 = vld [vmem:[%s3185_s1 + $0x30] sm:$0x7] }
 0x913   :  { %v1158_v21 = vunpack.c.l.bf16 %v2197_v17 }
 0x914   :  { %v1338_v19 = vpop.permute.xlu0 %1337  ;;  %v1336_v16 = vpop.permute.xlu1 %1335 }
 0x915   :  { %v1343_v5 = vsel %vm93_vm1, %v1338_v19, 0  ;;  %2202 = vmatmul.msk.bf16.vlgmr.msra.gmra.mxu3 %vm93_vm1, %v1267_v62  ;;  %v2206_v19 = vld [vmem:[%s3185_s1 + $0x3c] sm:$0x7] }
 0x916   :  { %1352 = vmatpush.bf16.xpose.msrb.mxu0 %v1343_v5  ;;  %v1361_v5 = vunpack.c.l.bf16 %v2206_v19 }
 0x920   :  { %2199 = vmatmul.msk.bf16.vlgmr.msra.gmra.mxu0 %vm93_vm1, %v1198_v20 }
 0x930   :  { %2205 = vmatmul.msk.bf16.vlgmr.msrb.gmra.mxu0 %vm93_vm1, %v1336_v16 }
 0x988   :  { %v1151_v24 = vpop.f32.mrf.mxu3 }
 0x989   :  { %v1155_v25 = vmul.f32 0.35355338, %v1151_v24 }
 0x98b   :  { %v1159_v26 = vadd.f32 %v1158_v21, %v1155_v25 }
 0x98d   :  { %v1080_v27 = vpop.f32.mrf.mxu0  ;;  %v1160_v29 = vsel %vm117_vm2, %v1159_v26, -inf }
 0x98e   :  { %v1084_v30 = vadd.f32 %v1080_v27, %v2683_v4  ;;  %1161 = vmax.xlane.f32.xlu0 %v1160_v29  ;;  %v2203_v4 = vld [vmem:[%s3185_s1 + $0x38] sm:$0x7] }
 0x98f   :  { %v1292_v22 = vunpack.c.l.bf16 %v2203_v4 }
 0x990   :  { %v1085_v31 = vadd.f32 %v2627_v47, %v1084_v30  ;;  %v1153_v32 = vpop.f32.mrf.mxu3 }
 0x992   :  { %v1086_v34 = vpack.c.bf16 %v1085_v31, %v1085_v31  ;;  %v1091_v35 = vsel %vm416_vm4, %v1085_v31, 0.0  ;;  %v1099_v36 = vmul.f32 %v1085_v31, %v1085_v31 }
 0x993   :  { %v1092_v37 = vrot.slane %v1091_v35, 4 }
 0x994   :  { %v1089_v38 = vsel %vm2637_vm3, %v1086_v34, %v2192_v33  ;;  %v1100_v53 = vsel %vm416_vm4, %v1099_v36, 0.0 }
 0x995   :  { %2193 = vst [vmem:[%s3188_s8 + $0x8] sm:$0x7] %v1089_v38  ;;  %v1093_v47 = vadd.f32 %v1092_v37, %v1091_v35  ;;  %v1101_v40 = vrot.slane %v1100_v53, 4  ;;  %v1082_v12 = vpop.f32.mrf.mxu0 }
 0x997   :  { %v1094_v41 = vrot.slane %v1093_v47, 2  ;;  %v1102_v9 = vadd.f32 %v1101_v40, %v1100_v53 }
 0x998   :  { %v1285_v43 = vpop.f32.mrf.mxu3 }
 0x999   :  { %v1095_v44 = vadd.f32 %v1094_v41, %v1093_v47  ;;  %v1103_v45 = vrot.slane %v1102_v9, 2  ;;  %v1289_v46 = vmul.f32 0.35355338, %v1285_v43 }
 0x99b   :  { %v1096_v49 = vrot.slane %v1095_v44, 1  ;;  %v1104_v51 = vadd.f32 %v1103_v45, %v1102_v9  ;;  %v1293_v52 = vadd.f32 %v1292_v22, %v1289_v46 }
 0x99d   :  { %v1097_v56 = vadd.f32 %v1096_v49, %v1095_v44  ;;  %v1105_v57 = vrot.slane %v1104_v51, 1  ;;  %v1216_v58 = vpop.f32.mrf.mxu0  ;;  %v1294_v7 = vsel %vm117_vm2, %v1293_v52, -inf }
 0x99e   :  { %v1220_v59 = vmul.f32 0.35355338, %v1216_v58  ;;  %1295 = vmax.xlane.f32.xlu1 %v1294_v7 }
 0x99f   :  { %v2896_v60 = vadd.f32 %v1097_v56, %v2765_v8  ;;  %v1106_v61 = vadd.f32 %v1105_v57, %v1104_v51 }
 0x9a0   :  { %v1287_v14 = vpop.f32.mrf.mxu3  ;;  %v1224_v62 = vadd.f32 %v1223_v54, %v1220_v59 }
 0x9a1   :  { %v2899_v1 = vadd.f32 %v1106_v61, %v2767_v13 }
 0x9a2   :  { %v1225_v6 = vsel %vm117_vm2, %v1224_v62, -inf }
 0x9a3   :  { %1226 = vmax.xlane.f32.xlu2 %v1225_v6 }
 0x9a5   :  { %v1218_v10 = vpop.f32.mrf.mxu0 }
 0x9ad   :  { %v1354_v20 = vpop.f32.mrf.mxu0 }
 0x9ae   :  { %v1358_v16 = vmul.f32 0.35355338, %v1354_v20 }
 0x9b0   :  { %v1362_v17 = vadd.f32 %v1361_v5, %v1358_v16 }
 0x9b2   :  { %v1363_v8 = vsel %vm117_vm2, %v1362_v17, -inf }
 0x9b3   :  { %1364 = vmax.xlane.f32.xlu0 %v1363_v8 }
 0x9b5   :  { %v1356_v21 = vpop.f32.mrf.mxu0 }
 0x9b7   :  { %1306 = vrot.lane.b32.xlu1 %v2838_v42, %s2379_s15 }
 0x9c7   :  { %1172 = vrot.lane.b32.xlu0 %v2838_v42, %s2380_s16 }
 0xa01   :  { %v1162_v13 = vpop.xlane.xlu0 %1161 }
 0xa02   :  { %v1163_v24 = vsub.f32 %v1159_v26, %v1162_v13 }
 0xa04   :  { %v1164_v25 = vmul.f32 1.442695, %v1163_v24  ;;  %v1194_v24 = vld [vmem:[#allocation2] sm:$0x7] }
 0xa06   :  { %2316 = vpow2.f32 %v1164_v25 }
 0xa0c   :  { %v2317_v27 = vpop.eup %2316 }
 0xa0d   :  { %v1166_v29 = vsel %vm117_vm2, %v2317_v27, 0.0 }
 0xa0e   :  { %1167 = vadd.xlane.f32.xlu1 %v1166_v29 }
 0xa11   :  { %v1296_v30 = vpop.xlane.xlu1 %1295 }
 0xa12   :  { %v1297_v31 = vsub.f32 %v1293_v52, %v1296_v30 }
 0xa14   :  { %v1298_v32 = vmul.f32 1.442695, %v1297_v31 }
 0xa16   :  { %2318 = vpow2.f32 %v1298_v32  ;;  %v1227_v33 = vpop.xlane.xlu2 %1226 }
 0xa17   :  { %v1228_v34 = vsub.f32 %v1224_v62, %v1227_v33 }
 0xa19   :  { %v1229_v35 = vmul.f32 1.442695, %v1228_v34 }
 0xa1b   :  { %2320 = vpow2.f32 %v1229_v35 }
 0xa1c   :  { %v2319_v36 = vpop.eup %2318 }
 0xa1d   :  { %v1300_v37 = vsel %vm117_vm2, %v2319_v36, 0.0 }
 0xa1e   :  { %1301 = vadd.xlane.f32.xlu1 %v1300_v37 }
 0xa21   :  { %v2321_v38 = vpop.eup %2320 }
 0xa22   :  { %v1231_v26 = vsel %vm117_vm2, %v2321_v38, 0.0 }
 0xa23   :  { %1232 = vadd.xlane.f32.xlu2 %v1231_v26 }
 0xa26   :  { %v1365_v53 = vpop.xlane.xlu0 %1364 }
 0xa27   :  { %v1366_v4 = vsub.f32 %v1362_v17, %v1365_v53 }
 0xa29   :  { %v1367_v47 = vmul.f32 1.442695, %v1366_v4  ;;  %v1307_v41 = vpop.permute.xlu1 %1306 }
 0xa2a   :  { %v1312_v43 = vand.u32 %v1307_v41, %v2521_v15 }
 0xa2b   :  { %2322 = vpow2.f32 %v1367_v47 }
 0xa31   :  { %v2323_v40 = vpop.eup %2322 }
 0xa32   :  { %v1369_v12 = vsel %vm117_vm2, %v2323_v40, 0.0 }
 0xa33   :  { %1370 = vadd.xlane.f32.xlu0 %v1369_v12 }
 0xa37   :  { %1375 = vrot.lane.b32.xlu1 %v2838_v42, %s2382_s17 }
 0xa39   :  { %v1173_v9 = vpop.permute.xlu0 %1172 }
 0xa3a   :  { %v1178_v22 = vand.u32 %v1173_v9, %v2521_v15 }
 0xa3b   :  { %1237 = vrot.lane.b32.xlu2 %v2838_v42, %s2383_s18  ;;  %v2211_v42 = vld [vmem:[%s3181_s0 + $0x10] sm:$0x7] }
 0xa3c   :  { %1187 = vmatpush.bf16.msra.mxu2 %v1178_v22  ;;  %v1447_v58 = vunpack.c.l.bf16 %v2211_v42 }
 0xa3e   :  { %v1448_v14 = vmul.f32 %v2811_v3, %v1447_v58  ;;  %v2974_v58 = vld [vmem:[%s3186_s6 + $0x8] sm:$0xff] }
 0xa40   :  { %1321 = vmatpush.bf16.msrb.mxu2 %v1312_v43  ;;  %v2931_v6 = vadd.f32 %v2817_v11, %v1448_v14 }
 0xa42   :  { %v1450_v5 = vpack.c.bf16 %v2931_v6, %v2931_v6 }
 0xa81   :  { %v1168_v44 = vpop.xlane.xlu1 %1167 }
 0xa82   :  { %2324 = vrcp.f32 %v1168_v44 }
 0xa88   :  { %v2325_v45 = vpop.eup %2324 }
 0xa89   :  { %v1170_v46 = vmul.f32 %v2325_v45, %v2317_v27 }
 0xa8b   :  { %v1171_v48 = vpack.c.bf16 %v1170_v46, %v1170_v46 }
 0xa8d   :  { %2198 = vmatmul.msk.bf16.vlgmr.msra.gmra.mxu2 %vm132_vm5, %v1171_v48 }
 0xa8e   :  { %1460 = vmatpush.bf16.msra.mxu2 %v2798_v63 }
 0xa91   :  { %v1302_v49 = vpop.xlane.xlu1 %1301 }
 0xa92   :  { %2326 = vrcp.f32 %v1302_v49  ;;  %1461 = vmatpush.bf16.msra.mxu2 %v2805_v0 }
 0xa96   :  { %v1233_v51 = vpop.xlane.xlu2 %1232 }
 0xa97   :  { %2328 = vrcp.f32 %v1233_v51 }
 0xa98   :  { %v2327_v52 = vpop.eup %2326 }
 0xa99   :  { %v1304_v54 = vmul.f32 %v2327_v52, %v2319_v36 }
 0xa9b   :  { %v1305_v56 = vpack.c.bf16 %v1304_v54, %v1304_v54 }
 0xa9d   :  { %v2329_v57 = vpop.eup %2328  ;;  %2204 = vmatmul.msk.bf16.vlgmr.msrb.gmra.mxu2 %vm132_vm5, %v1305_v56 }
 0xa9e   :  { %v1235_v7 = vmul.f32 %v2329_v57, %v2321_v38  ;;  %v1238_v59 = vpop.permute.xlu2 %1237 }
 0xa9f   :  { %v1243_v61 = vand.u32 %v1238_v59, %v2521_v15  ;;  %v2981_v59 = vld [vmem:[%s3186_s6] sm:$0xff] }
 0xaa0   :  { %v1236_v62 = vpack.c.bf16 %v1235_v7, %v1235_v7 }
 0xaa1   :  { %1252 = vmatpush.bf16.msra.mxu1 %v1243_v61 }
 0xaa4   :  { %2201 = vmatmul.msk.bf16.vlgmr.msra.gmra.mxu1 %vm132_vm5, %v1236_v62 }
 0xaa6   :  { %v1371_v10 = vpop.xlane.xlu0 %1370 }
 0xaa7   :  { %2330 = vrcp.f32 %v1371_v10 }
 0xaa9   :  { %v1376_v19 = vpop.permute.xlu1 %1375 }
 0xaaa   :  { %v1381_v20 = vand.u32 %v1376_v19, %v2521_v15 }
 0xaac   :  { %1390 = vmatpush.bf16.msrb.mxu1 %v1381_v20  ;;  %v2214_v20 = vld [vmem:[%s3185_s1 + $0x40] sm:$0x7] }
 0xaad   :  { %v2331_v16 = vpop.eup %2330  ;;  %2212 = vmatmul.msk.bf16.vlgmr.msra.gmra.mxu2 %vm70_vm0, %v1450_v5 }
 0xaae   :  { %v1373_v17 = vmul.f32 %v2331_v16, %v2323_v40  ;;  %v2994_v16 = vld [vmem:[%s3187_s7] ss:$0 sm:$0xff] }
 0xab0   :  { %v1374_v8 = vpack.c.bf16 %v1373_v17, %v1373_v17 }
 0xab4   :  { %2207 = vmatmul.msk.bf16.vlgmr.msrb.gmra.mxu1 %vm132_vm5, %v1374_v8  ;;  %v2209_v8 = vld [vmem:[%s3188_s8 + $0xc] sm:$0x7] }
 0xb10   :  { %v1189_v21 = vpop.f32.mrf.mxu2 }
 0xb11   :  { %v1193_v13 = vpack.c.bf16 %v1189_v21, %v1189_v21 }
 0xb13   :  { %v1195_v25 = vsel %vm2550_vm8, %v1193_v13, %v1194_v24 }
 0xb14   :  { %1196 = vst [vmem:[#allocation2] sm:$0x7] %v1195_v25 }
 0xb18   :  { %v1191_v27 = vpop.f32.mrf.mxu2 }
 0xb1b   :  { %v1263_v41 = vld [vmem:[#allocation2] sm:$0x7] }
 0xb20   :  { %v1323_v29 = vpop.f32.mrf.mxu2 }
 0xb21   :  { %v1327_v30 = vpack.c.bf16 %v1323_v29, %v1323_v29  ;;  %v1254_v31 = vpop.f32.mrf.mxu1 }
 0xb22   :  { %v1258_v32 = vpack.c.bf16 %v1254_v31, %v1254_v31 }
 0xb23   :  { %1329 = vrot.lane.b32.xlu1 %v1327_v30, %s2385_s29 }
 0xb24   :  { %1260 = vrot.lane.b32.xlu2 %v1258_v32, %s2384_s28 }
 0xb28   :  { %v1325_v33 = vpop.f32.mrf.mxu2 }
 0xb29   :  { %v1256_v34 = vpop.f32.mrf.mxu1 }
 0xb30   :  { %v1463_v35 = vpop.f32.mrf.mxu2 }
 0xb31   :  { %v1464_v36 = vadd.f32 %v2834_v39, %v1463_v35  ;;  %v1392_v37 = vpop.f32.mrf.mxu1 }
 0xb32   :  { %v1396_v38 = vpack.c.bf16 %v1392_v37, %v1392_v37 }
 0xb33   :  { %v1467_v26 = vpack.c.bf16 %v1464_v36, %v1464_v36 }
 0xb34   :  { %1398 = vrot.lane.b32.xlu2 %v1396_v38, %s2386_s30 }
 0xb35   :  { %v1469_v53 = vunpack.c.l.b16 %v1467_v26 }
 0xb37   :  { %v2944_v4 = vpack.c.b16 %v1469_v53, %v1469_v53 }
 0xb38   :  { %v1465_v47 = vpop.f32.mrf.mxu2 }
 0xb39   :  { %1471 = vrot.lane.b32.xlu1 %v2944_v4, %s2374_s23  ;;  %v1394_v40 = vpop.f32.mrf.mxu1  ;;  %1603 = vrot.lane.b32.xlu0 %v2944_v4, %s2376_s25  ;;  %v2217_v47 = vld [vmem:[%s3185_s1 + $0x44] sm:$0x7] }
 0xb3c   :  { %1536 = vrot.lane.b32.xlu2 %v2944_v4, %s2373_s22 }
 0xb41   :  { %1605 = vrot.lane.b32.xlu1 %v2944_v4, %s2377_s26 }
 0xb44   :  { %1534 = vrot.lane.b32.xlu2 %v2944_v4, %s2372_s21 }
 0xb49   :  { %1674 = vrot.lane.b32.xlu1 %v2944_v4, %s2375_s24 }
 0xb4c   :  { %1672 = vrot.lane.b32.xlu2 %v2944_v4, %s2378_s27 }
 0xb7e   :  { %v1261_v12 = vpop.permute.xlu2 %1260 }
 0xb7f   :  { %v1264_v9 = vsel %vm2591_vm10, %v1261_v12, %v1263_v41 }
 0xb80   :  { %1265 = vst [vmem:[#allocation2] sm:$0x7] %v1264_v9  ;;  %v1560_v9 = vunpack.c.l.bf16 %v2217_v47 }
 0xb87   :  { %v1332_v43 = vld [vmem:[#allocation2] sm:$0x7] }
 0xb8e   :  { %v1399_v22 = vpop.permute.xlu2 %1398 }
 0xb95   :  { %v1330_v44 = vpop.permute.xlu1 %1329 }
 0xb96   :  { %v1333_v45 = vsel %vm2598_vm12, %v1330_v44, %v1332_v43  ;;  %v1537_v46 = vpop.permute.xlu2 %1536 }
 0xb97   :  { %1334 = vst [vmem:[#allocation2] sm:$0x7] %v1333_v45  ;;  %v1542_v48 = vsel %vm93_vm1, %v1537_v46, 0 }
 0xb98   :  { %1551 = vmatpush.bf16.xpose.msra.mxu3 %v1542_v48 }
 0xb9e   :  { %v1401_v49 = vld [vmem:[#allocation2] sm:$0x7]  ;;  %v1535_v7 = vpop.permute.xlu2 %1534 }
 0xb9f   :  { %v1402_v51 = vsel %vm2605_vm14, %v1399_v22, %v1401_v49  ;;  %v2220_v49 = vld [vmem:[%s3185_s1 + $0x48] sm:$0x7] }
 0xba0   :  { %1403 = vst [vmem:[#allocation2] sm:$0x7] %v1402_v51 }
 0xba6   :  { %v1673_v10 = vpop.permute.xlu2 %1672 }
 0xba7   :  { %v1404_v52 = vld [vmem:[#allocation2] sm:$0x7] }
 0xba8   :  { %2208 = vmatmul.msk.bf16.vlgmr.msrb.gmra.mxu3 %vm70_vm0, %v1404_v52 }
 0xbab   :  { %v1472_v54 = vpop.permute.xlu1 %1471  ;;  %v1604_v62 = vpop.permute.xlu0 %1603 }
 0xbac   :  { %v1477_v42 = vsel %vm93_vm1, %v1472_v54, 0 }
 0xbad   :  { %1486 = vmatpush.bf16.xpose.msra.mxu0 %v1477_v42  ;;  %v1629_v42 = vunpack.c.l.bf16 %v2220_v49 }
 0xbb3   :  { %v1606_v56 = vpop.permute.xlu1 %1605 }
 0xbb4   :  { %v1611_v57 = vsel %vm93_vm1, %v1606_v56, 0  ;;  %2213 = vmatmul.msk.bf16.vlgmr.msra.gmra.mxu0 %vm93_vm1, %v1467_v26 }
 0xbb5   :  { %1620 = vmatpush.bf16.xpose.msrb.mxu0 %v1611_v57 }
 0xbb8   :  { %2216 = vmatmul.msk.bf16.vlgmr.msra.gmra.mxu3 %vm93_vm1, %v1535_v7 }
 0xbbb   :  { %v1675_v61 = vpop.permute.xlu1 %1674 }
 0xbbc   :  { %v1680_v14 = vsel %vm93_vm1, %v1675_v61, 0 }
 0xbbd   :  { %1751 = vmatpush.bf16.msra.mxu0 %v2974_v58  ;;  %1689 = vmatpush.bf16.xpose.msrb.mxu3 %v1680_v14  ;;  %v2223_v14 = vld [vmem:[%s3185_s1 + $0x4c] sm:$0x7] }
 0xbc1   :  { %1752 = vmatpush.bf16.msra.mxu0 %v2981_v59 }
 0xbc4   :  { %2219 = vmatmul.msk.bf16.vlgmr.msrb.gmra.mxu0 %vm93_vm1, %v1604_v62 }
 0xbc8   :  { %2222 = vmatmul.msk.bf16.vlgmr.msrb.gmra.mxu3 %vm93_vm1, %v1673_v10  ;;  %v1698_v10 = vunpack.c.l.bf16 %v2223_v14 }
 0xc2b   :  { %v1417_v19 = vpop.f32.mrf.mxu3 }
 0xc2c   :  { %v1421_v5 = vadd.f32 %v1417_v19, %v2820_v2  ;;  %v1495_v2 = vunpack.c.l.bf16 %v2214_v20 }
 0xc2e   :  { %v1422_v17 = vadd.f32 %v2994_v16, %v1421_v5 }
 0xc30   :  { %v1423_v21 = vpack.c.bf16 %v1422_v17, %v1422_v17  ;;  %v1428_v13 = vsel %vm416_vm4, %v1422_v17, 0.0  ;;  %v1436_v24 = vmul.f32 %v1422_v17, %v1422_v17 }
 0xc31   :  { %v1429_v25 = vrot.slane %v1428_v13, 4  ;;  %v1488_v27 = vpop.f32.mrf.mxu0 }
 0xc32   :  { %v1426_v29 = vsel %vm2637_vm3, %v1423_v21, %v2209_v8  ;;  %v1437_v30 = vsel %vm416_vm4, %v1436_v24, 0.0  ;;  %v1492_v31 = vmul.f32 0.35355338, %v1488_v27 }
 0xc33   :  { %2210 = vst [vmem:[%s3188_s8 + $0xc] sm:$0x7] %v1426_v29  ;;  %v1430_v32 = vadd.f32 %v1429_v25, %v1428_v13  ;;  %v1438_v33 = vrot.slane %v1437_v30, 4  ;;  %v1419_v34 = vpop.f32.mrf.mxu3 }
 0xc34   :  { %v1496_v35 = vadd.f32 %v1495_v2, %v1492_v31 }
 0xc35   :  { %v1431_v36 = vrot.slane %v1430_v32, 2  ;;  %v1439_v37 = vadd.f32 %v1438_v33, %v1437_v30 }
 0xc36   :  { %v1497_v38 = vsel %vm117_vm2, %v1496_v35, -inf }
 0xc37   :  { %v1432_v26 = vadd.f32 %v1431_v36, %v1430_v32  ;;  %v1440_v53 = vrot.slane %v1439_v37, 2  ;;  %1498 = vmax.xlane.f32.xlu1 %v1497_v38 }
 0xc39   :  { %v1433_v40 = vrot.slane %v1432_v26, 1  ;;  %v1441_v12 = vadd.f32 %v1440_v53, %v1439_v37  ;;  %v1490_v41 = vpop.f32.mrf.mxu0 }
 0xc3b   :  { %v1434_v22 = vadd.f32 %v1433_v40, %v1432_v26  ;;  %v1442_v43 = vrot.slane %v1441_v12, 1  ;;  %v1553_v44 = vpop.f32.mrf.mxu3 }
 0xc3c   :  { %v1557_v45 = vmul.f32 0.35355338, %v1553_v44 }
 0xc3d   :  { %v3012_v46 = vadd.f32 %v1434_v22, %v2896_v60  ;;  %v1443_v48 = vadd.f32 %v1442_v43, %v1441_v12 }
 0xc3e   :  { %v1561_v51 = vadd.f32 %v1560_v9, %v1557_v45 }
 0xc3f   :  { %v3018_v52 = vadd.f32 %v1443_v48, %v2899_v1 }
 0xc40   :  { %v1562_v54 = vsel %vm117_vm2, %v1561_v51, -inf }
 0xc41   :  { %1563 = vmax.xlane.f32.xlu2 %v1562_v54  ;;  %v1622_v56 = vpop.f32.mrf.mxu0 }
 0xc42   :  { %v1626_v57 = vmul.f32 0.35355338, %v1622_v56 }
 0xc43   :  { %v1555_v7 = vpop.f32.mrf.mxu3 }
 0xc44   :  { %v1630_v61 = vadd.f32 %v1629_v42, %v1626_v57 }
 0xc46   :  { %v1631_v60 = vsel %vm117_vm2, %v1630_v61, -inf }
 0xc47   :  { %1632 = vmax.xlane.f32.xlu0 %v1631_v60 }
 0xc49   :  { %v1624_v62 = vpop.f32.mrf.mxu0 }
 0xc4b   :  { %v1691_v19 = vpop.f32.mrf.mxu3 }
 0xc4c   :  { %v1695_v1 = vmul.f32 0.35355338, %v1691_v19 }
 0xc4e   :  { %v1699_v5 = vadd.f32 %v1698_v10, %v1695_v1 }
 0xc50   :  { %v1700_v20 = vsel %vm117_vm2, %v1699_v5, -inf }
 0xc51   :  { %1701 = vmax.xlane.f32.xlu1 %v1700_v20 }
 0xc53   :  { %v1693_v17 = vpop.f32.mrf.mxu3 }
 0xc5b   :  { %1509 = vrot.lane.b32.xlu0 %v2944_v4, %s2380_s16 }
 0xcaa   :  { %v1499_v8 = vpop.xlane.xlu1 %1498 }
 0xcab   :  { %v1500_v21 = vsub.f32 %v1496_v35, %v1499_v8 }
 0xcad   :  { %v1501_v13 = vmul.f32 1.442695, %v1500_v21  ;;  %v1531_v21 = vld [vmem:[#allocation2] sm:$0x7] }
 0xcaf   :  { %2332 = vpow2.f32 %v1501_v13 }
 0xcb4   :  { %v1564_v24 = vpop.xlane.xlu2 %1563 }
 0xcb5   :  { %v2333_v2 = vpop.eup %2332  ;;  %v1565_v25 = vsub.f32 %v1561_v51, %v1564_v24 }
 0xcb6   :  { %v1503_v27 = vsel %vm117_vm2, %v2333_v2, 0.0 }
 0xcb7   :  { %v1566_v29 = vmul.f32 1.442695, %v1565_v25  ;;  %1504 = vadd.xlane.f32.xlu2 %v1503_v27 }
 0xcb9   :  { %2334 = vpow2.f32 %v1566_v29 }
 0xcba   :  { %v1633_v30 = vpop.xlane.xlu0 %1632 }
 0xcbb   :  { %v1634_v31 = vsub.f32 %v1630_v61, %v1633_v30 }
 0xcbd   :  { %v1635_v32 = vmul.f32 1.442695, %v1634_v31 }
 0xcbf   :  { %v2335_v33 = vpop.eup %2334  ;;  %2336 = vpow2.f32 %v1635_v32 }
 0xcc0   :  { %v1568_v34 = vsel %vm117_vm2, %v2335_v33, 0.0 }
 0xcc1   :  { %1569 = vadd.xlane.f32.xlu1 %v1568_v34 }
 0xcc4   :  { %v1702_v36 = vpop.xlane.xlu1 %1701 }
 0xcc5   :  { %v2337_v35 = vpop.eup %2336  ;;  %v1703_v37 = vsub.f32 %v1699_v5, %v1702_v36 }
 0xcc6   :  { %v1637_v38 = vsel %vm117_vm2, %v2337_v35, 0.0 }
 0xcc7   :  { %v1704_v26 = vmul.f32 1.442695, %v1703_v37  ;;  %1638 = vadd.xlane.f32.xlu2 %v1637_v38 }
 0xcc9   :  { %2338 = vpow2.f32 %v1704_v26 }
 0xccd   :  { %v1510_v53 = vpop.permute.xlu0 %1509 }
 0xcce   :  { %v1515_v47 = vand.u32 %v1510_v53, %v2521_v15 }
 0xccf   :  { %v2339_v40 = vpop.eup %2338 }
 0xcd0   :  { %1524 = vmatpush.bf16.msra.mxu1 %v1515_v47  ;;  %v1706_v12 = vsel %vm117_vm2, %v2339_v40, 0.0 }
 0xcd1   :  { %1707 = vadd.xlane.f32.xlu0 %v1706_v12 }
 0xcda   :  { %1574 = vrot.lane.b32.xlu1 %v2944_v4, %s2383_s18 }
 0xcdf   :  { %1643 = vrot.lane.b32.xlu2 %v2944_v4, %s2379_s15 }
 0xce7   :  { %1712 = vrot.lane.b32.xlu2 %v2944_v4, %s2382_s17  ;;  %v2228_v4 = vld [vmem:[%s3181_s0 + $0x14] sm:$0x7] }
 0xce8   :  { %v1784_v56 = vunpack.c.l.bf16 %v2228_v4 }
 0xcea   :  { %v1785_v14 = vmul.f32 %v2811_v3, %v1784_v56 }
 0xd2a   :  { %v1505_v41 = vpop.xlane.xlu2 %1504 }
 0xd2b   :  { %2340 = vrcp.f32 %v1505_v41 }
 0xd31   :  { %v2341_v9 = vpop.eup %2340 }
 0xd32   :  { %v1507_v22 = vmul.f32 %v2341_v9, %v2333_v2 }
 0xd34   :  { %v1508_v43 = vpack.c.bf16 %v1507_v22, %v1507_v22  ;;  %v1570_v45 = vpop.xlane.xlu1 %1569 }
 0xd36   :  { %2215 = vmatmul.msk.bf16.vlgmr.msra.gmra.mxu1 %vm132_vm5, %v1508_v43 }
 0xd3a   :  { %v1639_v44 = vpop.xlane.xlu2 %1638 }
 0xd3b   :  { %2342 = vrcp.f32 %v1639_v44 }
 0xd3c   :  { %2344 = vrcp.f32 %v1570_v45 }
 0xd41   :  { %v2343_v48 = vpop.eup %2342 }
 0xd42   :  { %v1641_v49 = vmul.f32 %v2343_v48, %v2337_v35  ;;  %v1644_v51 = vpop.permute.xlu2 %1643  ;;  %v2345_v57 = vpop.eup %2344 }
 0xd43   :  { %v1649_v54 = vand.u32 %v1644_v51, %v2521_v15  ;;  %v1572_v61 = vmul.f32 %v2345_v57, %v2335_v33 }
 0xd44   :  { %v1642_v42 = vpack.c.bf16 %v1641_v49, %v1641_v49  ;;  %v1708_v1 = vpop.xlane.xlu0 %1707 }
 0xd45   :  { %1658 = vmatpush.bf16.msrb.mxu1 %v1649_v54  ;;  %v1573_v19 = vpack.c.bf16 %v1572_v61, %v1572_v61  ;;  %2346 = vrcp.f32 %v1708_v1 }
 0xd48   :  { %2221 = vmatmul.msk.bf16.vlgmr.msrb.gmra.mxu1 %vm132_vm5, %v1642_v42 }
 0xd49   :  { %1797 = vmatpush.bf16.msra.mxu1 %v2798_v63  ;;  %v3051_v63 = vadd.f32 %v2817_v11, %v1785_v14 }
 0xd4a   :  { %v1713_v7 = vpop.permute.xlu2 %1712 }
 0xd4b   :  { %v1718_v10 = vand.u32 %v1713_v7, %v2521_v15  ;;  %v2347_v3 = vpop.eup %2346 }
 0xd4c   :  { %v1575_v60 = vpop.permute.xlu1 %1574  ;;  %v1710_v5 = vmul.f32 %v2347_v3, %v2339_v40 }
 0xd4d   :  { %1798 = vmatpush.bf16.msra.mxu1 %v2805_v0  ;;  %v1580_v62 = vand.u32 %v1575_v60, %v2521_v15  ;;  %v1787_v0 = vpack.c.bf16 %v3051_v63, %v3051_v63 }
 0xd4e   :  { %v1711_v20 = vpack.c.bf16 %v1710_v5, %v1710_v5  ;;  %v2226_v5 = vld [vmem:[%s3188_s8 + $0x10] sm:$0x7] }
 0xd4f   :  { %1589 = vmatpush.bf16.msrb.mxu2 %v1580_v62 }
 0xd52   :  { %2218 = vmatmul.msk.bf16.vlgmr.msrb.gmra.mxu2 %vm132_vm5, %v1573_v19 }
 0xd53   :  { %1727 = vmatpush.bf16.msra.mxu2 %v1718_v10 }
 0xd58   :  { %2229 = vmatmul.msk.bf16.vlgmr.msra.gmra.mxu1 %vm70_vm0, %v1787_v0 }
 0xd62   :  { %2224 = vmatmul.msk.bf16.vlgmr.msra.gmra.mxu2 %vm132_vm5, %v1711_v20 }
 0xdb3   :  { %v1526_v17 = vpop.f32.mrf.mxu1 }
 0xdb4   :  { %v1530_v8 = vpack.c.bf16 %v1526_v17, %v1526_v17 }
 0xdb6   :  { %v1532_v11 = vsel %vm2550_vm8, %v1530_v8, %v1531_v21 }
 0xdb7   :  { %1533 = vst [vmem:[#allocation2] sm:$0x7] %v1532_v11 }
 0xdbb   :  { %v1528_v13 = vpop.f32.mrf.mxu1 }
 0xdbe   :  { %v1600_v40 = vld [vmem:[#allocation2] sm:$0x7] }
 0xdc5   :  { %v1660_v24 = vpop.f32.mrf.mxu1 }
 0xdc6   :  { %v1664_v2 = vpack.c.bf16 %v1660_v24, %v1660_v24 }
 0xdc8   :  { %1666 = vrot.lane.b32.xlu2 %v1664_v2, %s2385_s29 }
 0xdcd   :  { %v1662_v25 = vpop.f32.mrf.mxu1 }
 0xdd5   :  { %v1591_v27 = vpop.f32.mrf.mxu2  ;;  %v1800_v29 = vpop.f32.mrf.mxu1 }
 0xdd6   :  { %v1595_v30 = vpack.c.bf16 %v1591_v27, %v1591_v27  ;;  %v1801_v31 = vadd.f32 %v2834_v39, %v1800_v29 }
 0xdd8   :  { %v1804_v32 = vpack.c.bf16 %v1801_v31, %v1801_v31  ;;  %1597 = vrot.lane.b32.xlu1 %v1595_v30, %s2384_s28 }
 0xdda   :  { %v1806_v33 = vunpack.c.l.b16 %v1804_v32 }
 0xddc   :  { %v3063_v34 = vpack.c.b16 %v1806_v33, %v1806_v33 }
 0xddd   :  { %v1593_v36 = vpop.f32.mrf.mxu2  ;;  %v1802_v35 = vpop.f32.mrf.mxu1 }
 0xdde   :  { %1871 = vrot.lane.b32.xlu0 %v3063_v34, %s2372_s21  ;;  %v2234_v35 = vld [vmem:[%s3185_s1 + $0x54] sm:$0x7] }
 0xde0   :  { %1808 = vrot.lane.b32.xlu1 %v3063_v34, %s2374_s23 }
 0xde5   :  { %v1729_v37 = vpop.f32.mrf.mxu2 }
 0xde6   :  { %v1733_v38 = vpack.c.bf16 %v1729_v37, %v1729_v37 }
 0xde8   :  { %1942 = vrot.lane.b32.xlu1 %v3063_v34, %s2377_s26  ;;  %1735 = vrot.lane.b32.xlu2 %v1733_v38, %s2386_s30 }
 0xded   :  { %v1731_v39 = vpop.f32.mrf.mxu2 }
 0xdf0   :  { %1940 = vrot.lane.b32.xlu1 %v3063_v34, %s2376_s25  ;;  %1873 = vrot.lane.b32.xlu2 %v3063_v34, %s2373_s22 }
 0xdf8   :  { %2009 = vrot.lane.b32.xlu1 %v3063_v34, %s2378_s27  ;;  %2011 = vrot.lane.b32.xlu2 %v3063_v34, %s2375_s24 }
 0xe22   :  { %v1667_v26 = vpop.permute.xlu2 %1666 }
 0xe42   :  { %v1736_v53 = vpop.permute.xlu2 %1735 }
 0xe4a   :  { %v1598_v47 = vpop.permute.xlu1 %1597  ;;  %v1874_v12 = vpop.permute.xlu2 %1873 }
 0xe4b   :  { %v1601_v41 = vsel %vm2591_vm10, %v1598_v47, %v1600_v40  ;;  %v1879_v9 = vsel %vm93_vm1, %v1874_v12, 0 }
 0xe4c   :  { %1602 = vst [vmem:[#allocation2] sm:$0x7] %v1601_v41  ;;  %1888 = vmatpush.bf16.xpose.msrb.mxu0 %v1879_v9 }
 0xe50   :  { %v1872_v7 = vpop.permute.xlu0 %1871 }
 0xe52   :  { %v1809_v22 = vpop.permute.xlu1 %1808  ;;  %v2012_v4 = vpop.permute.xlu2 %2011 }
 0xe53   :  { %v1669_v43 = vld [vmem:[#allocation2] sm:$0x7]  ;;  %v1814_v44 = vsel %vm93_vm1, %v1809_v22, 0  ;;  %v2017_v56 = vsel %vm93_vm1, %v2012_v4, 0 }
 0xe54   :  { %v1670_v45 = vsel %vm2598_vm12, %v1667_v26, %v1669_v43  ;;  %1823 = vmatpush.bf16.xpose.msra.mxu3 %v1814_v44  ;;  %v1897_v26 = vunpack.c.l.bf16 %v2234_v35 }
 0xe55   :  { %1671 = vst [vmem:[#allocation2] sm:$0x7] %v1670_v45 }
 0xe5a   :  { %v1943_v48 = vpop.permute.xlu1 %1942 }
 0xe5b   :  { %v1948_v49 = vsel %vm93_vm1, %v1943_v48, 0  ;;  %2230 = vmatmul.msk.bf16.vlgmr.msra.gmra.mxu3 %vm93_vm1, %v1804_v32 }
 0xe5c   :  { %v1738_v51 = vld [vmem:[#allocation2] sm:$0x7]  ;;  %1957 = vmatpush.bf16.xpose.msrb.mxu3 %v1948_v49 }
 0xe5d   :  { %v1739_v54 = vsel %vm2605_vm14, %v1736_v53, %v1738_v51  ;;  %v2240_v51 = vld [vmem:[%s3185_s1 + $0x5c] sm:$0x7] }
 0xe5e   :  { %1740 = vst [vmem:[#allocation2] sm:$0x7] %v1739_v54  ;;  %v2035_v54 = vunpack.c.l.bf16 %v2240_v51 }
 0xe62   :  { %v1941_v57 = vpop.permute.xlu1 %1940 }
 0xe64   :  { %2088 = vmatpush.bf16.msra.mxu3 %v2974_v58  ;;  %v2231_v58 = vld [vmem:[%s3185_s1 + $0x50] sm:$0x7] }
 0xe65   :  { %v1741_v42 = vld [vmem:[#allocation2] sm:$0x7] }
 0xe66   :  { %2225 = vmatmul.msk.bf16.vlgmr.msra.gmra.mxu0 %vm70_vm0, %v1741_v42 }
 0xe67   :  { %2026 = vmatpush.bf16.xpose.msra.mxu0 %v2017_v56 }
 0xe68   :  { %2089 = vmatpush.bf16.msra.mxu3 %v2981_v59  ;;  %v1832_v59 = vunpack.c.l.bf16 %v2231_v58 }
 0xe6a   :  { %v2010_v61 = vpop.permute.xlu1 %2009 }
 0xe6b   :  { %2236 = vmatmul.msk.bf16.vlgmr.msrb.gmra.mxu3 %vm93_vm1, %v1941_v57 }
 0xe76   :  { %2233 = vmatmul.msk.bf16.vlgmr.msrb.gmra.mxu0 %vm93_vm1, %v1872_v7 }
 0xe86   :  { %2239 = vmatmul.msk.bf16.vlgmr.msra.gmra.mxu0 %vm93_vm1, %v2010_v61  ;;  %vm2121_vm1 = vcmask 254976  }
 0xede   :  { %v1825_v60 = vpop.f32.mrf.mxu3 }
 0xedf   :  { %v1829_v14 = vmul.f32 0.35355338, %v1825_v60 }
 0xee1   :  { %v1833_v62 = vadd.f32 %v1832_v59, %v1829_v14 }
 0xee3   :  { %v1754_v10 = vpop.f32.mrf.mxu0  ;;  %v1834_v19 = vsel %vm117_vm2, %v1833_v62, -inf }
 0xee4   :  { %v1758_v1 = vadd.f32 %v1754_v10, %v2931_v6  ;;  %1835 = vmax.xlane.f32.xlu2 %v1834_v19  ;;  %v2237_v6 = vld [vmem:[%s3185_s1 + $0x58] sm:$0x7] }
 0xee5   :  { %v1966_v30 = vunpack.c.l.bf16 %v2237_v6 }
 0xee6   :  { %v1759_v0 = vadd.f32 %v2994_v16, %v1758_v1  ;;  %v1827_v3 = vpop.f32.mrf.mxu3 }
 0xee8   :  { %v1760_v20 = vpack.c.bf16 %v1759_v0, %v1759_v0  ;;  %v1765_v17 = vsel %vm416_vm4, %v1759_v0, 0.0  ;;  %v1773_v8 = vmul.f32 %v1759_v0, %v1759_v0 }
 0xee9   :  { %v1766_v21 = vrot.slane %v1765_v17, 4 }
 0xeea   :  { %v1763_v11 = vsel %vm2637_vm3, %v1760_v20, %v2226_v5  ;;  %v1774_v13 = vsel %vm416_vm4, %v1773_v8, 0.0 }
 0xeeb   :  { %2227 = vst [vmem:[%s3188_s8 + $0x10] sm:$0x7] %v1763_v11  ;;  %v1767_v24 = vadd.f32 %v1766_v21, %v1765_v17  ;;  %v1775_v2 = vrot.slane %v1774_v13, 4  ;;  %v1756_v25 = vpop.f32.mrf.mxu0 }
 0xeed   :  { %v1768_v27 = vrot.slane %v1767_v24, 2  ;;  %v1776_v29 = vadd.f32 %v1775_v2, %v1774_v13 }
 0xeee   :  { %v1959_v31 = vpop.f32.mrf.mxu3 }
 0xeef   :  { %v1769_v32 = vadd.f32 %v1768_v27, %v1767_v24  ;;  %v1777_v33 = vrot.slane %v1776_v29, 2  ;;  %v1963_v36 = vmul.f32 0.35355338, %v1959_v31 }
 0xef1   :  { %v1770_v37 = vrot.slane %v1769_v32, 1  ;;  %v1778_v38 = vadd.f32 %v1777_v33, %v1776_v29  ;;  %v1967_v39 = vadd.f32 %v1966_v30, %v1963_v36 }
 0xef3   :  { %v1771_v53 = vadd.f32 %v1770_v37, %v1769_v32  ;;  %v1779_v47 = vrot.slane %v1778_v38, 1  ;;  %v1890_v40 = vpop.f32.mrf.mxu0  ;;  %v1968_v12 = vsel %vm117_vm2, %v1967_v39, -inf }
 0xef4   :  { %v1894_v41 = vmul.f32 0.35355338, %v1890_v40  ;;  %1969 = vmax.xlane.f32.xlu0 %v1968_v12 }
 0xef5   :  { %v3121_v9 = vadd.f32 %v1771_v53, %v3012_v46  ;;  %v1780_v22 = vadd.f32 %v1779_v47, %v1778_v38 }
 0xef6   :  { %v1961_v43 = vpop.f32.mrf.mxu3  ;;  %v1898_v44 = vadd.f32 %v1897_v26, %v1894_v41 }
 0xef7   :  { %v3124_v45 = vadd.f32 %v1780_v22, %v3018_v52 }
 0xef8   :  { %v1899_v48 = vsel %vm117_vm2, %v1898_v44, -inf }
 0xef9   :  { %1900 = vmax.xlane.f32.xlu1 %v1899_v48 }
 0xefb   :  { %v1892_v49 = vpop.f32.mrf.mxu0 }
 0xefc   :  { %v1868_v49 = vld [vmem:[#allocation2] sm:$0x7] }
 0xf03   :  { %v2028_v4 = vpop.f32.mrf.mxu0 }
 0xf04   :  { %v2032_v42 = vmul.f32 0.35355338, %v2028_v4 }
 0xf06   :  { %v2036_v56 = vadd.f32 %v2035_v54, %v2032_v42 }
 0xf08   :  { %1911 = vrot.lane.b32.xlu0 %v3063_v34, %s2383_s18  ;;  %v2037_v46 = vsel %vm117_vm2, %v2036_v56, -inf }
 0xf09   :  { %2038 = vmax.xlane.f32.xlu2 %v2037_v46 }
 0xf0b   :  { %v2030_v52 = vpop.f32.mrf.mxu0 }
 0xf21   :  { %1846 = vrot.lane.b32.xlu2 %v3063_v34, %s2380_s16 }
 0xf57   :  { %v1836_v57 = vpop.xlane.xlu2 %1835 }
 0xf58   :  { %v1837_v7 = vsub.f32 %v1833_v62, %v1836_v57 }
 0xf5a   :  { %v1838_v61 = vmul.f32 1.442695, %v1837_v7 }
 0xf5c   :  { %2348 = vpow2.f32 %v1838_v61 }
 0xf62   :  { %v2349_v58 = vpop.eup %2348 }
 0xf63   :  { %v1840_v59 = vsel %vm117_vm2, %v2349_v58, 0.0 }
 0xf64   :  { %1841 = vadd.xlane.f32.xlu1 %v1840_v59 }
 0xf67   :  { %v1970_v60 = vpop.xlane.xlu0 %1969 }
 0xf68   :  { %v1971_v14 = vsub.f32 %v1967_v39, %v1970_v60 }
 0xf6a   :  { %v1972_v10 = vmul.f32 1.442695, %v1971_v14 }
 0xf6c   :  { %2350 = vpow2.f32 %v1972_v10  ;;  %v1901_v19 = vpop.xlane.xlu1 %1900 }
 0xf6d   :  { %v1902_v1 = vsub.f32 %v1898_v44, %v1901_v19 }
 0xf6f   :  { %v1903_v0 = vmul.f32 1.442695, %v1902_v1 }
 0xf71   :  { %2352 = vpow2.f32 %v1903_v0 }
 0xf72   :  { %v2351_v3 = vpop.eup %2350 }
 0xf73   :  { %v1974_v5 = vsel %vm117_vm2, %v2351_v3, 0.0 }
 0xf74   :  { %1975 = vadd.xlane.f32.xlu1 %v1974_v5 }
 0xf77   :  { %v2353_v20 = vpop.eup %2352 }
 0xf78   :  { %v1905_v62 = vsel %vm117_vm2, %v2353_v20, 0.0 }
 0xf79   :  { %1906 = vadd.xlane.f32.xlu0 %v1905_v62 }
 0xf7a   :  { %v1912_v17 = vpop.permute.xlu0 %1911 }
 0xf7b   :  { %v1917_v8 = vand.u32 %v1912_v17, %v2521_v15 }
 0xf7c   :  { %v2039_v21 = vpop.xlane.xlu2 %2038 }
 0xf7d   :  { %v2040_v11 = vsub.f32 %v2036_v56, %v2039_v21  ;;  %1926 = vmatpush.bf16.msrb.mxu1 %v1917_v8 }
 0xf7f   :  { %v2041_v13 = vmul.f32 1.442695, %v2040_v11 }
 0xf81   :  { %2354 = vpow2.f32 %v2041_v13 }
 0xf84   :  { %v1847_v6 = vpop.permute.xlu2 %1846 }
 0xf85   :  { %v1852_v24 = vand.u32 %v1847_v6, %v2521_v15 }
 0xf87   :  { %v2355_v2 = vpop.eup %2354  ;;  %1861 = vmatpush.bf16.msrb.mxu2 %v1852_v24 }
 0xf88   :  { %v2043_v25 = vsel %vm117_vm2, %v2355_v2, 0.0 }
 0xf89   :  { %2044 = vadd.xlane.f32.xlu2 %v2043_v25 }
 0xf8d   :  { %1980 = vrot.lane.b32.xlu1 %v3063_v34, %s2379_s15  ;;  %2049 = vrot.lane.b32.xlu0 %v3063_v34, %s2382_s17 }
 0xfd7   :  { %v1842_v27 = vpop.xlane.xlu1 %1841 }
 0xfd8   :  { %2356 = vrcp.f32 %v1842_v27 }
 0xfde   :  { %v2357_v29 = vpop.eup %2356 }
 0xfdf   :  { %v1844_v30 = vmul.f32 %v2357_v29, %v2349_v58 }
 0xfe1   :  { %v1845_v31 = vpack.c.bf16 %v1844_v30, %v1844_v30 }
 0xfe3   :  { %2232 = vmatmul.msk.bf16.vlgmr.msrb.gmra.mxu2 %vm132_vm5, %v1845_v31 }
 0xfe7   :  { %v1976_v36 = vpop.xlane.xlu1 %1975 }
 0xfec   :  { %v1907_v32 = vpop.xlane.xlu0 %1906 }
 0xfed   :  { %2358 = vrcp.f32 %v1907_v32 }
 0xfee   :  { %2360 = vrcp.f32 %v1976_v36 }
 0xff3   :  { %v2359_v33 = vpop.eup %2358 }
 0xff4   :  { %v1909_v35 = vmul.f32 %v2359_v33, %v2353_v20  ;;  %v2361_v38 = vpop.eup %2360 }
 0xff5   :  { %v1978_v34 = vmul.f32 %v2361_v38, %v2351_v3 }
 0xff6   :  { %v1910_v37 = vpack.c.bf16 %v1909_v35, %v1909_v35 }
 0xff7   :  { %v1979_v41 = vpack.c.bf16 %v1978_v34, %v1978_v34 }
 0xff8   :  { %2235 = vmatmul.msk.bf16.vlgmr.msrb.gmra.mxu1 %vm132_vm5, %v1910_v37 }
 0xffc   :  { %v2045_v39 = vpop.xlane.xlu2 %2044 }
 0xffd   :  { %2362 = vrcp.f32 %v2045_v39 }
 0xfff   :  { %v2050_v26 = vpop.permute.xlu0 %2049  ;;  %v1981_v53 = vpop.permute.xlu1 %1980 }
0x1000   :  { %v2055_v47 = vand.u32 %v2050_v26, %v2521_v15  ;;  %v1986_v40 = vand.u32 %v1981_v53, %v2521_v15 }
0x1002   :  { %1995 = vmatpush.bf16.msra.mxu2 %v1986_v40  ;;  %2064 = vmatpush.bf16.msra.mxu1 %v2055_v47 }
0x1003   :  { %v2363_v12 = vpop.eup %2362 }
0x1004   :  { %v2047_v22 = vmul.f32 %v2363_v12, %v2355_v2 }
0x1005   :  { %2238 = vmatmul.msk.bf16.vlgmr.msra.gmra.mxu2 %vm132_vm5, %v1979_v41 }
0x1006   :  { %v2048_v43 = vpack.c.bf16 %v2047_v22, %v2047_v22 }
0x1008   :  { %2241 = vmatmul.msk.bf16.vlgmr.msra.gmra.mxu1 %vm132_vm5, %v2048_v43 }
0x1066   :  { %v1863_v44 = vpop.f32.mrf.mxu2 }
0x1067   :  { %v1867_v48 = vpack.c.bf16 %v1863_v44, %v1863_v44 }
0x1069   :  { %v1869_v51 = vsel %vm2550_vm8, %v1867_v48, %v1868_v49 }
0x106a   :  { %1870 = vst [vmem:[#allocation2] sm:$0x7] %v1869_v51 }
0x106e   :  { %v1865_v54 = vpop.f32.mrf.mxu2 }
0x1071   :  { %v1937_v50 = vld [vmem:[#allocation2] sm:$0x7] }
0x1075   :  { %v1928_v4 = vpop.f32.mrf.mxu1 }
0x1076   :  { %v1932_v15 = vpack.c.bf16 %v1928_v4, %v1928_v4 }
0x1078   :  { %1934 = vrot.lane.b32.xlu1 %v1932_v15, %s2384_s28 }
0x107d   :  { %v1930_v42 = vpop.f32.mrf.mxu1 }
0x1085   :  { %v2066_v56 = vpop.f32.mrf.mxu1 }
0x1086   :  { %v2070_v46 = vpack.c.bf16 %v2066_v56, %v2066_v56 }
0x1088   :  { %v1997_v52 = vpop.f32.mrf.mxu2  ;;  %2072 = vrot.lane.b32.xlu1 %v2070_v46, %s2386_s30 }
0x1089   :  { %v2001_v57 = vpack.c.bf16 %v1997_v52, %v1997_v52 }
0x108b   :  { %2003 = vrot.lane.b32.xlu0 %v2001_v57, %s2385_s29 }
0x108d   :  { %v2068_v7 = vpop.f32.mrf.mxu1 }
0x1090   :  { %v1999_v61 = vpop.f32.mrf.mxu2 }
0x10ea   :  { %v1935_v58 = vpop.permute.xlu1 %1934 }
0x10eb   :  { %v1938_v59 = vsel %vm2591_vm10, %v1935_v58, %v1937_v50 }
0x10ec   :  { %1939 = vst [vmem:[#allocation2] sm:$0x7] %v1938_v59 }
0x10f3   :  { %v2006_v60 = vld [vmem:[#allocation2] sm:$0x7] }
0x10fa   :  { %v2073_v19 = vpop.permute.xlu1 %2072 }
0x10fd   :  { %v2004_v14 = vpop.permute.xlu0 %2003 }
0x10fe   :  { %v2007_v10 = vsel %vm2598_vm12, %v2004_v14, %v2006_v60 }
0x10ff   :  { %2008 = vst [vmem:[#allocation2] sm:$0x7] %v2007_v10 }
0x1106   :  { %v2075_v1 = vld [vmem:[#allocation2] sm:$0x7] }
0x1107   :  { %v2076_v0 = vsel %vm2605_vm14, %v2073_v19, %v2075_v1 }
0x1108   :  { %2077 = vst [vmem:[#allocation2] sm:$0x7] %v2076_v0 }
0x110f   :  { %v2078_v3 = vld [vmem:[#allocation2] sm:$0x7] }
0x1110   :  { %2242 = vmatmul.msk.bf16.vlgmr.msra.gmra.mxu3 %vm70_vm0, %v2078_v3  ;;  %vm2119_vm0 = vcmask 1040384  }
0x1193   :  { %v2091_v5 = vpop.f32.mrf.mxu3 }
0x1194   :  { %v2095_v18 = vadd.f32 %v2091_v5, %v3051_v63 }
0x1196   :  { %v2096_v20 = vadd.f32 %v2994_v16, %v2095_v18 }
0x1198   :  { %v2097_v62 = vpack.c.bf16 %v2096_v20, %v2096_v20  ;;  %v2102_v17 = vsel %vm416_vm4, %v2096_v20, 0.0  ;;  %v2110_v8 = vmul.f32 %v2096_v20, %v2096_v20 }
0x1199   :  { %v2103_v21 = vrot.slane %v2102_v17, 4 }
0x119a   :  { %v2100_v28 = vsel %vm2637_vm3, %v2097_v62, %v2243_v23  ;;  %v2111_v11 = vsel %vm416_vm4, %v2110_v8, 0.0 }
0x119b   :  { %2244 = vst [vmem:[%s3188_s8 + $0x14] sm:$0x7] %v2100_v28  ;;  %v2104_v63 = vadd.f32 %v2103_v21, %v2102_v17  ;;  %v2112_v16 = vrot.slane %v2111_v11, 4  ;;  %v2093_v13 = vpop.f32.mrf.mxu3 }
0x119d   :  { %v2105_v6 = vrot.slane %v2104_v63, 2  ;;  %v2113_v24 = vadd.f32 %v2112_v16, %v2111_v11 }
0x119f   :  { %v2106_v2 = vadd.f32 %v2105_v6, %v2104_v63  ;;  %v2114_v25 = vrot.slane %v2113_v24, 2 }
0x11a1   :  { %v2107_v27 = vrot.slane %v2106_v2, 1  ;;  %v2115_v29 = vadd.f32 %v2114_v25, %v2113_v24 }
0x11a3   :  { %v2108_v30 = vadd.f32 %v2107_v27, %v2106_v2  ;;  %v2116_v31 = vrot.slane %v2115_v29, 1 }
0x11a5   :  { %v2117_v32 = vadd.f32 %v2116_v31, %v2115_v29  ;;  %v2109_v55 = vadd.f32 %v2108_v30, %v3121_v9 }
0x11a7   :  { %v2118_v33 = vadd.f32 %v2117_v32, %v3124_v45 }
0x11a9   :  { %v2120_v36 = vsel %vm2119_vm0, %v2109_v55, %v2118_v33 }
0x11aa   :  { %2122 = vst.msk [vmem:[%s3189_s9] sm:$0x3] %vm2121_vm1, %v2120_v36 }

</bundles_post_ra>
